<compile_context>
chip_gen: v7x
topology: tpu7x:2x2x1
jax: 0.10.0
libtpu: 0.0.40
codegen_flags: <defaults>
</compile_context>

<pallas_src>
import functools

import jax
import jax.numpy as jnp
from jax.experimental import pallas as pl
from jax.experimental.pallas import tpu as pltpu

EPS_LN = 1e-5      # F.layer_norm default eps
EPS_L2 = 1e-12     # F.normalize default eps
SQRT_HALF = 0.7071067811865476

ROW_TILES = (512, 256, 128, 64, 32, 16)   # sublane-axis tile preferences (no 8: bf16-safe)


def _vmem_limit_bytes():
    """Generation-aware VMEM budget: ~half of physical, clamped to [32, 64] MiB."""
    try:
        cap = int(pltpu.get_tpu_info().vmem_capacity_bytes)
    except Exception:
        cap = 64 * 1024 * 1024
    return max(32 * 1024 * 1024, min(cap // 2, 64 * 1024 * 1024))


VMEM_LIMIT = _vmem_limit_bytes()


def _pick_rows(n, min_steps=2):
    """Largest preferred row tile dividing n; prefer >=min_steps grid steps (megacore)."""
    for p in ROW_TILES:
        if p <= n and n % p == 0 and n // p >= min_steps:
            return p
    for p in ROW_TILES:
        if p <= n and n % p == 0:
            return p
    return n


# ---------------------------------------------------------------------------
# f32 math helpers (traced inside kernels)
# ---------------------------------------------------------------------------
def _layernorm_f32(x, gamma):
    mean = jnp.mean(x, axis=-1, keepdims=True)
    var = jnp.mean(jnp.square(x - mean), axis=-1, keepdims=True)   # biased, like F.layer_norm
    return (x - mean) * jax.lax.rsqrt(var + EPS_LN) * gamma        # beta == 0


def _l2norm_f32(t):
    norm = jnp.sqrt(jnp.sum(t * t, axis=-1, keepdims=True))
    return t / jnp.maximum(norm, EPS_L2)                           # == F.normalize(dim=-1)


def _gelu_exact(x):
    return 0.5 * x * (1.0 + jax.lax.erf(x * SQRT_HALF))            # F.gelu default (erf)


def _mha_core(q, kv, nk, nv, qs, ks, *, heads, dim_head, scale):
    """Multi-head cosine-sim attention with a learned null key/value column.

    q : (N, H*Dh) f32    kv : (M, 2*H*Dh) f32 ([k | v] along lanes)
    nk, nv : (H, Dh) f32  qs, ks : (1, Dh) f32
    Returns (N, H*Dh) f32 attention output (pre-to_out). All heads in one grid step
    via a static unrolled loop; every slice is 128-lane aligned (whole vregs).
    """
    inner = heads * dim_head
    qsf = qs * scale                                   # fold fixed attention scale into q_scale
    outs = []
    for h in range(heads):
        lo, hi = h * dim_head, (h + 1) * dim_head
        qh = q[:, lo:hi]                               # (N, Dh)
        kh = kv[:, lo:hi]                              # (M, Dh)
        vh = kv[:, inner + lo:inner + hi]              # (M, Dh)
        nkh = nk[h:h + 1, :]                           # (1, Dh) static row
        nvh = nv[h:h + 1, :]                           # (1, Dh)

        qf = _l2norm_f32(qh) * qsf
        kf = _l2norm_f32(kh) * ks
        nkf = _l2norm_f32(nkh) * ks                    # null key l2-normed & scaled (as in ref)

        s = jax.lax.dot_general(qf.astype(jnp.bfloat16), kf.astype(jnp.bfloat16),
                                (((1,), (1,)), ((), ())),
                                preferred_element_type=jnp.float32)        # (N, M)
        s0 = jnp.sum(qf * nkf, axis=-1, keepdims=True)                     # (N, 1) null column

        m = jnp.maximum(jnp.max(s, axis=-1, keepdims=True), s0)
        p = jnp.exp(s - m)
        p0 = jnp.exp(s0 - m)
        inv = pl.reciprocal(jnp.sum(p, axis=-1, keepdims=True) + p0, approx=True)
        ctx = jnp.dot(p.astype(jnp.bfloat16), vh.astype(jnp.bfloat16),
                      preferred_element_type=jnp.float32)                  # (N, Dh)
        outs.append((ctx + p0 * nvh) * inv)
    return jnp.concatenate(outs, axis=-1) if heads > 1 else outs[0]


# ---------------------------------------------------------------------------
# Kernel: fused self-attention sub-layer (LN + QKV + attention + to_out + residual)
# ---------------------------------------------------------------------------
def _self_attn_kernel(x_ref, g_ref, wqkv_ref, nk_ref, nv_ref, qs_ref, ks_ref, wo_ref,
                      o_ref, *, heads, dim_head, scale):
    inner = heads * dim_head
    x = x_ref[0].astype(jnp.float32)                                       # (N, D)
    xn = _layernorm_f32(x, g_ref[...].astype(jnp.float32)).astype(jnp.bfloat16)
    qkv = jnp.dot(xn, wqkv_ref[...], preferred_element_type=jnp.float32)   # (N, 3*inner)
    ctx = _mha_core(qkv[:, :inner], qkv[:, inner:],
                    nk_ref[...].astype(jnp.float32), nv_ref[...].astype(jnp.float32),
                    qs_ref[...].astype(jnp.float32), ks_ref[...].astype(jnp.float32),
                    heads=heads, dim_head=dim_head, scale=scale)
    out = jnp.dot(ctx.astype(jnp.bfloat16), wo_ref[...],
                  preferred_element_type=jnp.float32)                      # to_out
    o_ref[0] = (out + x).astype(o_ref.dtype)                               # fused residual


def pallas_self_attention(x, p, *, heads, dim_head, scale):
    B, N, D = x.shape
    inner = heads * dim_head
    return pl.pallas_call(
        functools.partial(_self_attn_kernel, heads=heads, dim_head=dim_head, scale=scale),
        grid=(B,),
        in_specs=[
            pl.BlockSpec((1, N, D), lambda b: (b, 0, 0)),
            pl.BlockSpec((1, D), lambda b: (0, 0)),
            pl.BlockSpec((D, 3 * inner), lambda b: (0, 0)),
            pl.BlockSpec((heads, dim_head), lambda b: (0, 0)),
            pl.BlockSpec((heads, dim_head), lambda b: (0, 0)),
            pl.BlockSpec((1, dim_head), lambda b: (0, 0)),
            pl.BlockSpec((1, dim_head), lambda b: (0, 0)),
            pl.BlockSpec((inner, D), lambda b: (0, 0)),
        ],
        out_specs=pl.BlockSpec((1, N, D), lambda b: (b, 0, 0)),
        out_shape=jax.ShapeDtypeStruct((B, N, D), x.dtype),
        compiler_params=pltpu.CompilerParams(
            dimension_semantics=("parallel",), vmem_limit_bytes=VMEM_LIMIT),
    )(x, p["norm_gamma"].reshape(1, D), p["w_qkv"], p["null_k"], p["null_v"],
      p["q_scale"], p["k_scale"], p["wout"])


# ---------------------------------------------------------------------------
# Kernel: fused cross-attention sub-layer (LN(x)+Wq, raw-context Wkv, attention,
#         to_out, residual)
# ---------------------------------------------------------------------------
def _cross_attn_kernel(x_ref, c_ref, g_ref, wq_ref, wkv_ref, nk_ref, nv_ref, qs_ref, ks_ref,
                       wo_ref, o_ref, *, heads, dim_head, scale):
    x = x_ref[0].astype(jnp.float32)                                       # (N, D)
    xn = _layernorm_f32(x, g_ref[...].astype(jnp.float32)).astype(jnp.bfloat16)
    q = jnp.dot(xn, wq_ref[...], preferred_element_type=jnp.float32)       # (N, inner)
    kv = jnp.dot(c_ref[0], wkv_ref[...], preferred_element_type=jnp.float32)  # (M, 2*inner)
    ctx = _mha_core(q, kv,
                    nk_ref[...].astype(jnp.float32), nv_ref[...].astype(jnp.float32),
                    qs_ref[...].astype(jnp.float32), ks_ref[...].astype(jnp.float32),
                    heads=heads, dim_head=dim_head, scale=scale)
    out = jnp.dot(ctx.astype(jnp.bfloat16), wo_ref[...],
                  preferred_element_type=jnp.float32)
    o_ref[0] = (out + x).astype(o_ref.dtype)


def pallas_cross_attention(x, context_bf, p, *, heads, dim_head, scale):
    B, N, D = x.shape
    M = context_bf.shape[1]
    inner = heads * dim_head
    return pl.pallas_call(
        functools.partial(_cross_attn_kernel, heads=heads, dim_head=dim_head, scale=scale),
        grid=(B,),
        in_specs=[
            pl.BlockSpec((1, N, D), lambda b: (b, 0, 0)),
            pl.BlockSpec((1, M, D), lambda b: (b, 0, 0)),
            pl.BlockSpec((1, D), lambda b: (0, 0)),
            pl.BlockSpec((D, inner), lambda b: (0, 0)),
            pl.BlockSpec((D, 2 * inner), lambda b: (0, 0)),
            pl.BlockSpec((heads, dim_head), lambda b: (0, 0)),
            pl.BlockSpec((heads, dim_head), lambda b: (0, 0)),
            pl.BlockSpec((1, dim_head), lambda b: (0, 0)),
            pl.BlockSpec((1, dim_head), lambda b: (0, 0)),
            pl.BlockSpec((inner, D), lambda b: (0, 0)),
        ],
        out_specs=pl.BlockSpec((1, N, D), lambda b: (b, 0, 0)),
        out_shape=jax.ShapeDtypeStruct((B, N, D), x.dtype),
        compiler_params=pltpu.CompilerParams(
            dimension_semantics=("parallel",), vmem_limit_bytes=VMEM_LIMIT),
    )(x, context_bf, p["norm_gamma"].reshape(1, D), p["wq"], p["wkv"],
      p["null_k"], p["null_v"], p["q_scale"], p["k_scale"], p["wout"])


# ---------------------------------------------------------------------------
# Kernel: fully-fused feed-forward (LN + w1a/w1g + GEGLU + LN + w2 + residual)
# ---------------------------------------------------------------------------
def _ff_kernel(x_ref, g1_ref, w1a_ref, w1g_ref, g2_ref, w2_ref, o_ref):
    x = x_ref[...].astype(jnp.float32)                                     # (tm, D)
    xn = _layernorm_f32(x, g1_ref[...].astype(jnp.float32)).astype(jnp.bfloat16)
    a = jnp.dot(xn, w1a_ref[...], preferred_element_type=jnp.float32)      # value half (gelu'd)
    g = jnp.dot(xn, w1g_ref[...], preferred_element_type=jnp.float32)      # gate half
    h = g * _gelu_exact(a)                                                 # GEGLU: gate * gelu(x)
    hn = _layernorm_f32(h, g2_ref[...].astype(jnp.float32)).astype(jnp.bfloat16)
    y = jnp.dot(hn, w2_ref[...], preferred_element_type=jnp.float32)
    o_ref[...] = (y + x).astype(o_ref.dtype)                               # fused residual


def pallas_feedforward(x, p):
    B, N, D = x.shape
    R = B * N
    inner = p["w1a"].shape[1]
    x2d = x.reshape(R, D)
    tm = _pick_rows(R)
    out = pl.pallas_call(
        _ff_kernel,
        grid=(R // tm,),
        in_specs=[
            pl.BlockSpec((tm, D), lambda i: (i, 0)),
            pl.BlockSpec((1, D), lambda i: (0, 0)),
            pl.BlockSpec((D, inner), lambda i: (0, 0)),
            pl.BlockSpec((D, inner), lambda i: (0, 0)),
            pl.BlockSpec((1, inner), lambda i: (0, 0)),
            pl.BlockSpec((inner, D), lambda i: (0, 0)),
        ],
        out_specs=pl.BlockSpec((tm, D), lambda i: (i, 0)),
        out_shape=jax.ShapeDtypeStruct((R, D), x.dtype),
        compiler_params=pltpu.CompilerParams(
            dimension_semantics=("parallel",), vmem_limit_bytes=VMEM_LIMIT),
    )(x2d, p["g1"].reshape(1, D), p["w1a"], p["w1g"], p["g2"].reshape(1, inner), p["w2"])
    return out.reshape(B, N, D)


# ---------------------------------------------------------------------------
# Kernel: standalone row-tiled LayerNorm — only for the final norm
# ---------------------------------------------------------------------------
def _ln_kernel(x_ref, g_ref, o_ref):
    x = x_ref[...].astype(jnp.float32)
    o_ref[...] = _layernorm_f32(x, g_ref[...].astype(jnp.float32)).astype(o_ref.dtype)


def pallas_layernorm(x, gamma):
    shp = x.shape
    x2 = x.reshape(-1, shp[-1])
    R, D = x2.shape
    tm = _pick_rows(R)
    out = pl.pallas_call(
        _ln_kernel,
        grid=(R // tm,),
        in_specs=[pl.BlockSpec((tm, D), lambda i: (i, 0)),
                  pl.BlockSpec((1, D), lambda i: (0, 0))],
        out_specs=pl.BlockSpec((tm, D), lambda i: (i, 0)),
        out_shape=jax.ShapeDtypeStruct((R, D), x.dtype),
        compiler_params=pltpu.CompilerParams(
            dimension_semantics=("parallel",), vmem_limit_bytes=VMEM_LIMIT),
    )(x2, gamma.reshape(1, D))
    return out.reshape(shp)


# ---------------------------------------------------------------------------
# Module forward: 3 fused pallas_calls per layer + final LN
# ---------------------------------------------------------------------------
def transformer_blocks_forward(x, context, params, *, heads, dim_head, scale=8.0):
    context_bf = context.astype(jnp.bfloat16)   # cast once; reused by every layer's KV proj
    for layer in params["layers"]:
        x = pallas_self_attention(x, layer["self_attn"],
                                  heads=heads, dim_head=dim_head, scale=scale)
        x = pallas_cross_attention(x, context_bf, layer["cross_attn"],
                                   heads=heads, dim_head=dim_head, scale=scale)
        x = pallas_feedforward(x, layer["ff"])
    return pallas_layernorm(x, params["final_gamma"])


# ---------------------------------------------------------------------------
# Deterministic parameter init (weights stored bf16 for the MXU; norms/scales f32)
# ---------------------------------------------------------------------------
def init_attention_params(key, dim, dim_head, heads, cross_attend):
    inner = dim_head * heads
    ks = jax.random.split(key, 5)
    std = 0.02
    wq = jax.random.normal(ks[0], (dim, inner), jnp.float32) * std
    wkv = jax.random.normal(ks[1], (dim, 2 * inner), jnp.float32) * std
    p = dict(
        norm_gamma=jnp.ones((dim,), jnp.float32),
        null_k=jax.random.normal(ks[2], (heads, dim_head), jnp.float32),
        null_v=jax.random.normal(ks[3], (heads, dim_head), jnp.float32),
        q_scale=jnp.ones((1, dim_head), jnp.float32),
        k_scale=jnp.ones((1, dim_head), jnp.float32),
        wout=(jax.random.normal(ks[4], (inner, dim), jnp.float32) * std).astype(jnp.bfloat16),
    )
    if cross_attend:
        p["wq"] = wq.astype(jnp.bfloat16)
        p["wkv"] = wkv.astype(jnp.bfloat16)
    else:
        # fused [Wq | Wk | Wv] — mathematically identical to separate to_q / to_kv linears
        p["w_qkv"] = jnp.concatenate([wq, wkv], axis=1).astype(jnp.bfloat16)
    return p


def init_ff_params(key, dim, mult):
    inner = int(dim * mult * 2 / 3)
    k1, k2, k3 = jax.random.split(key, 3)
    std = 0.02
    return dict(
        g1=jnp.ones((dim,), jnp.float32),
        # w1 split into the gelu (value) half and the gate half (lane-aligned GEGLU)
        w1a=(jax.random.normal(k1, (dim, inner), jnp.float32) * std).astype(jnp.bfloat16),
        w1g=(jax.random.normal(k2, (dim, inner), jnp.float32) * std).astype(jnp.bfloat16),
        g2=jnp.ones((inner,), jnp.float32),
        w2=(jax.random.normal(k3, (inner, dim), jnp.float32) * std).astype(jnp.bfloat16),
    )


def init_transformer_params(key, *, dim, depth, dim_head, heads, ff_mult):
    layers = []
    for _ in range(depth):
        k1, k2, k3, key = jax.random.split(key, 4)
        layers.append(dict(
            self_attn=init_attention_params(k1, dim, dim_head, heads, cross_attend=False),
            cross_attn=init_attention_params(k2, dim, dim_head, heads, cross_attend=True),
            ff=init_ff_params(k3, dim, ff_mult),
        ))
    return dict(layers=layers, final_gamma=jnp.ones((dim,), jnp.float32))


# ---------------------------------------------------------------------------
# Demo
# ---------------------------------------------------------------------------
if __name__ == "__main__":
    # small but lane-dense config: dim=256, dim_head=128, heads=2, ff inner=512
    B, N, M = 2, 16, 24
    dim, depth, dim_head, heads, ff_mult = 256, 2, 128, 2, 3

    key = jax.random.PRNGKey(0)
    kx, kc, kp = jax.random.split(key, 3)
    x = jax.random.normal(kx, (B, N, dim), jnp.float32)
    context = jax.random.normal(kc, (B, M, dim), jnp.float32)
    params = init_transformer_params(kp, dim=dim, depth=depth, dim_head=dim_head,
                                     heads=heads, ff_mult=ff_mult)

    fwd = jax.jit(functools.partial(transformer_blocks_forward,
                                    heads=heads, dim_head=dim_head))
    out = fwd(x, context, params)
    jax.block_until_ready(out)
    assert out.shape == (B, N, dim)
    assert bool(jnp.all(jnp.isfinite(out)))
    print("KERNEL_OK")
</pallas_src>

<mosaic_0001>
module attributes {stable_mosaic.version = 11 : i64} {
  func.func @_ff_kernel(%arg0: i32, %arg1: memref<16x256xf32, #tpu.memory_space<vmem>>, %arg2: memref<1x256xf32, #tpu.memory_space<vmem>>, %arg3: memref<256x512xbf16, #tpu.memory_space<vmem>>, %arg4: memref<256x512xbf16, #tpu.memory_space<vmem>>, %arg5: memref<1x512xf32, #tpu.memory_space<vmem>>, %arg6: memref<512x256xbf16, #tpu.memory_space<vmem>>, %arg7: memref<16x256xf32, #tpu.memory_space<vmem>>) attributes {dimension_semantics = [#tpu.dimension_semantics<parallel>], iteration_bounds = array<i64: 2>, scalar_prefetch = 0 : i64, scratch_operands = 0 : i64, tpu.core_type = #tpu.core_type<tc>, window_params = [{transform_indices = @transform_0, window_bounds = array<i64: 16, 256>}, {pipeline_mode = #tpu.pipeline_mode<synchronous>, transform_indices = @transform_1, window_bounds = array<i64: 1, 256>}, {pipeline_mode = #tpu.pipeline_mode<synchronous>, transform_indices = @transform_2, window_bounds = array<i64: 256, 512>}, {pipeline_mode = #tpu.pipeline_mode<synchronous>, transform_indices = @transform_3, window_bounds = array<i64: 256, 512>}, {pipeline_mode = #tpu.pipeline_mode<synchronous>, transform_indices = @transform_4, window_bounds = array<i64: 1, 512>}, {pipeline_mode = #tpu.pipeline_mode<synchronous>, transform_indices = @transform_5, window_bounds = array<i64: 512, 256>}, {transform_indices = @transform_6, window_bounds = array<i64: 16, 256>}]} {
    %c0 = arith.constant 0 : index
    %c0_0 = arith.constant 0 : index
    %0 = vector.load %arg1[%c0, %c0_0] : memref<16x256xf32, #tpu.memory_space<vmem>>, vector<16x256xf32>
    %c0_1 = arith.constant 0 : index
    %c0_2 = arith.constant 0 : index
    %1 = vector.load %arg2[%c0_1, %c0_2] : memref<1x256xf32, #tpu.memory_space<vmem>>, vector<1x256xf32>
    %cst = arith.constant dense<0.000000e+00> : vector<16xf32>
    %2 = vector.multi_reduction <add>, %0, %cst [1] : vector<16x256xf32> to vector<16xf32>
    %3 = vector.shape_cast %2 : vector<16xf32> to vector<16x1xf32>
    %cst_3 = arith.constant 2.560000e+02 : f32
    %4 = vector.broadcast %cst_3 : f32 to vector<16x1xf32>
    %5 = arith.divf %3, %4 : vector<16x1xf32>
    %6 = vector.broadcast %5 : vector<16x1xf32> to vector<16x256xf32>
    %7 = arith.subf %0, %6 : vector<16x256xf32>
    %8 = arith.mulf %7, %7 : vector<16x256xf32>
    %cst_4 = arith.constant dense<0.000000e+00> : vector<16xf32>
    %9 = vector.multi_reduction <add>, %8, %cst_4 [1] : vector<16x256xf32> to vector<16xf32>
    %10 = vector.shape_cast %9 : vector<16xf32> to vector<16x1xf32>
    %cst_5 = arith.constant 2.560000e+02 : f32
    %11 = vector.broadcast %cst_5 : f32 to vector<16x1xf32>
    %12 = arith.divf %10, %11 : vector<16x1xf32>
    %13 = vector.broadcast %5 : vector<16x1xf32> to vector<16x256xf32>
    %14 = arith.subf %0, %13 : vector<16x256xf32>
    %cst_6 = arith.constant 9.99999974E-6 : f32
    %15 = vector.broadcast %cst_6 : f32 to vector<16x1xf32>
    %16 = arith.addf %12, %15 : vector<16x1xf32>
    %17 = math.rsqrt %16 : vector<16x1xf32>
    %18 = vector.broadcast %17 : vector<16x1xf32> to vector<16x256xf32>
    %19 = arith.mulf %14, %18 : vector<16x256xf32>
    %20 = vector.broadcast %1 : vector<1x256xf32> to vector<16x256xf32>
    %21 = arith.mulf %19, %20 : vector<16x256xf32>
    %22 = arith.truncf %21 : vector<16x256xf32> to vector<16x256xbf16>
    %c0_7 = arith.constant 0 : index
    %c0_8 = arith.constant 0 : index
    %23 = vector.load %arg3[%c0_7, %c0_8] : memref<256x512xbf16, #tpu.memory_space<vmem>>, vector<256x512xbf16>
    %cst_9 = arith.constant dense<0.000000e+00> : vector<16x512xf32>
    %24 = tpu.matmul %22, %23, %cst_9 {dimension_numbers = #tpu.dot_dimension_numbers<[1], [0], [0], [1], [0, 0, 1, 1], [], []>} : vector<16x256xbf16>, vector<256x512xbf16>, vector<16x512xf32> -> vector<16x512xf32>
    %c0_10 = arith.constant 0 : index
    %c0_11 = arith.constant 0 : index
    %25 = vector.load %arg4[%c0_10, %c0_11] : memref<256x512xbf16, #tpu.memory_space<vmem>>, vector<256x512xbf16>
    %cst_12 = arith.constant dense<0.000000e+00> : vector<16x512xf32>
    %26 = tpu.matmul %22, %25, %cst_12 {dimension_numbers = #tpu.dot_dimension_numbers<[1], [0], [0], [1], [0, 0, 1, 1], [], []>} : vector<16x256xbf16>, vector<256x512xbf16>, vector<16x512xf32> -> vector<16x512xf32>
    %cst_13 = arith.constant 5.000000e-01 : f32
    %27 = vector.broadcast %cst_13 : f32 to vector<16x512xf32>
    %28 = arith.mulf %27, %24 : vector<16x512xf32>
    %cst_14 = arith.constant 0.707106769 : f32
    %29 = vector.broadcast %cst_14 : f32 to vector<16x512xf32>
    %30 = arith.mulf %24, %29 : vector<16x512xf32>
    %31 = math.erf %30 : vector<16x512xf32>
    %cst_15 = arith.constant 1.000000e+00 : f32
    %32 = vector.broadcast %cst_15 : f32 to vector<16x512xf32>
    %33 = arith.addf %32, %31 : vector<16x512xf32>
    %34 = arith.mulf %28, %33 : vector<16x512xf32>
    %35 = arith.mulf %26, %34 : vector<16x512xf32>
    %c0_16 = arith.constant 0 : index
    %c0_17 = arith.constant 0 : index
    %36 = vector.load %arg5[%c0_16, %c0_17] : memref<1x512xf32, #tpu.memory_space<vmem>>, vector<1x512xf32>
    %cst_18 = arith.constant dense<0.000000e+00> : vector<16xf32>
    %37 = vector.multi_reduction <add>, %35, %cst_18 [1] : vector<16x512xf32> to vector<16xf32>
    %38 = vector.shape_cast %37 : vector<16xf32> to vector<16x1xf32>
    %cst_19 = arith.constant 5.120000e+02 : f32
    %39 = vector.broadcast %cst_19 : f32 to vector<16x1xf32>
    %40 = arith.divf %38, %39 : vector<16x1xf32>
    %41 = vector.broadcast %40 : vector<16x1xf32> to vector<16x512xf32>
    %42 = arith.subf %35, %41 : vector<16x512xf32>
    %43 = arith.mulf %42, %42 : vector<16x512xf32>
    %cst_20 = arith.constant dense<0.000000e+00> : vector<16xf32>
    %44 = vector.multi_reduction <add>, %43, %cst_20 [1] : vector<16x512xf32> to vector<16xf32>
    %45 = vector.shape_cast %44 : vector<16xf32> to vector<16x1xf32>
    %cst_21 = arith.constant 5.120000e+02 : f32
    %46 = vector.broadcast %cst_21 : f32 to vector<16x1xf32>
    %47 = arith.divf %45, %46 : vector<16x1xf32>
    %48 = vector.broadcast %40 : vector<16x1xf32> to vector<16x512xf32>
    %49 = arith.subf %35, %48 : vector<16x512xf32>
    %cst_22 = arith.constant 9.99999974E-6 : f32
    %50 = vector.broadcast %cst_22 : f32 to vector<16x1xf32>
    %51 = arith.addf %47, %50 : vector<16x1xf32>
    %52 = math.rsqrt %51 : vector<16x1xf32>
    %53 = vector.broadcast %52 : vector<16x1xf32> to vector<16x512xf32>
    %54 = arith.mulf %49, %53 : vector<16x512xf32>
    %55 = vector.broadcast %36 : vector<1x512xf32> to vector<16x512xf32>
    %56 = arith.mulf %54, %55 : vector<16x512xf32>
    %57 = arith.truncf %56 : vector<16x512xf32> to vector<16x512xbf16>
    %c0_23 = arith.constant 0 : index
    %c0_24 = arith.constant 0 : index
    %58 = vector.load %arg6[%c0_23, %c0_24] : memref<512x256xbf16, #tpu.memory_space<vmem>>, vector<512x256xbf16>
    %cst_25 = arith.constant dense<0.000000e+00> : vector<16x256xf32>
    %59 = tpu.matmul %57, %58, %cst_25 {dimension_numbers = #tpu.dot_dimension_numbers<[1], [0], [0], [1], [0, 0, 1, 1], [], []>} : vector<16x512xbf16>, vector<512x256xbf16>, vector<16x256xf32> -> vector<16x256xf32>
    %60 = arith.addf %59, %0 : vector<16x256xf32>
    %c0_26 = arith.constant 0 : index
    %c0_27 = arith.constant 0 : index
    %61 = vector.load %arg7[%c0_26, %c0_27] : memref<16x256xf32, #tpu.memory_space<vmem>>, vector<16x256xf32>
    tpu.vector_store %arg7[%c0_26, %c0_27], %60 {strides = array<i32>} : memref<16x256xf32, #tpu.memory_space<vmem>>, vector<16x256xf32>,
    return
  }
  func.func @transform_0(%arg0: i32) -> (i32, i32) {
    %c0_i32 = arith.constant 0 : i32
    %c0_i32_0 = arith.constant 0 : i32
    return %arg0, %c0_i32 : i32, i32
  }
  func.func @transform_1(%arg0: i32) -> (i32, i32) {
    %c0_i32 = arith.constant 0 : i32
    %c0_i32_0 = arith.constant 0 : i32
    %c0_i32_1 = arith.constant 0 : i32
    return %c0_i32, %c0_i32_0 : i32, i32
  }
  func.func @transform_2(%arg0: i32) -> (i32, i32) {
    %c0_i32 = arith.constant 0 : i32
    %c0_i32_0 = arith.constant 0 : i32
    %c0_i32_1 = arith.constant 0 : i32
    return %c0_i32, %c0_i32_0 : i32, i32
  }
  func.func @transform_3(%arg0: i32) -> (i32, i32) {
    %c0_i32 = arith.constant 0 : i32
    %c0_i32_0 = arith.constant 0 : i32
    %c0_i32_1 = arith.constant 0 : i32
    return %c0_i32, %c0_i32_0 : i32, i32
  }
  func.func @transform_4(%arg0: i32) -> (i32, i32) {
    %c0_i32 = arith.constant 0 : i32
    %c0_i32_0 = arith.constant 0 : i32
    %c0_i32_1 = arith.constant 0 : i32
    return %c0_i32, %c0_i32_0 : i32, i32
  }
  func.func @transform_5(%arg0: i32) -> (i32, i32) {
    %c0_i32 = arith.constant 0 : i32
    %c0_i32_0 = arith.constant 0 : i32
    %c0_i32_1 = arith.constant 0 : i32
    return %c0_i32, %c0_i32_0 : i32, i32
  }
  func.func @transform_6(%arg0: i32) -> (i32, i32) {
    %c0_i32 = arith.constant 0 : i32
    %c0_i32_0 = arith.constant 0 : i32
    return %arg0, %c0_i32 : i32, i32
  }
}

module attributes {stable_mosaic.version = 11 : i64} {
  func.func @_self_attn_kernel(%arg0: i32, %arg1: memref<1x16x256xf32, #tpu.memory_space<vmem>>, %arg2: memref<1x256xf32, #tpu.memory_space<vmem>>, %arg3: memref<256x768xbf16, #tpu.memory_space<vmem>>, %arg4: memref<2x128xf32, #tpu.memory_space<vmem>>, %arg5: memref<2x128xf32, #tpu.memory_space<vmem>>, %arg6: memref<1x128xf32, #tpu.memory_space<vmem>>, %arg7: memref<1x128xf32, #tpu.memory_space<vmem>>, %arg8: memref<256x256xbf16, #tpu.memory_space<vmem>>, %arg9: memref<1x16x256xf32, #tpu.memory_space<vmem>>) attributes {dimension_semantics = [#tpu.dimension_semantics<parallel>], iteration_bounds = array<i64: 2>, scalar_prefetch = 0 : i64, scratch_operands = 0 : i64, tpu.core_type = #tpu.core_type<tc>, window_params = [{transform_indices = @transform_0, window_bounds = array<i64: 1, 16, 256>}, {pipeline_mode = #tpu.pipeline_mode<synchronous>, transform_indices = @transform_1, window_bounds = array<i64: 1, 256>}, {pipeline_mode = #tpu.pipeline_mode<synchronous>, transform_indices = @transform_2, window_bounds = array<i64: 256, 768>}, {pipeline_mode = #tpu.pipeline_mode<synchronous>, transform_indices = @transform_3, window_bounds = array<i64: 2, 128>}, {pipeline_mode = #tpu.pipeline_mode<synchronous>, transform_indices = @transform_4, window_bounds = array<i64: 2, 128>}, {pipeline_mode = #tpu.pipeline_mode<synchronous>, transform_indices = @transform_5, window_bounds = array<i64: 1, 128>}, {pipeline_mode = #tpu.pipeline_mode<synchronous>, transform_indices = @transform_6, window_bounds = array<i64: 1, 128>}, {pipeline_mode = #tpu.pipeline_mode<synchronous>, transform_indices = @transform_7, window_bounds = array<i64: 256, 256>}, {transform_indices = @transform_8, window_bounds = array<i64: 1, 16, 256>}]} {
    %c0 = arith.constant 0 : index
    %c0_0 = arith.constant 0 : index
    %c0_1 = arith.constant 0 : index
    %0 = vector.load %arg1[%c0, %c0_0, %c0_1] : memref<1x16x256xf32, #tpu.memory_space<vmem>>, vector<1x16x256xf32>
    %1 = vector.shape_cast %0 : vector<1x16x256xf32> to vector<16x256xf32>
    %c0_2 = arith.constant 0 : index
    %c0_3 = arith.constant 0 : index
    %2 = vector.load %arg2[%c0_2, %c0_3] : memref<1x256xf32, #tpu.memory_space<vmem>>, vector<1x256xf32>
    %cst = arith.constant dense<0.000000e+00> : vector<16xf32>
    %3 = vector.multi_reduction <add>, %1, %cst [1] : vector<16x256xf32> to vector<16xf32>
    %4 = vector.shape_cast %3 : vector<16xf32> to vector<16x1xf32>
    %cst_4 = arith.constant 2.560000e+02 : f32
    %5 = vector.broadcast %cst_4 : f32 to vector<16x1xf32>
    %6 = arith.divf %4, %5 : vector<16x1xf32>
    %7 = vector.broadcast %6 : vector<16x1xf32> to vector<16x256xf32>
    %8 = arith.subf %1, %7 : vector<16x256xf32>
    %9 = arith.mulf %8, %8 : vector<16x256xf32>
    %cst_5 = arith.constant dense<0.000000e+00> : vector<16xf32>
    %10 = vector.multi_reduction <add>, %9, %cst_5 [1] : vector<16x256xf32> to vector<16xf32>
    %11 = vector.shape_cast %10 : vector<16xf32> to vector<16x1xf32>
    %cst_6 = arith.constant 2.560000e+02 : f32
    %12 = vector.broadcast %cst_6 : f32 to vector<16x1xf32>
    %13 = arith.divf %11, %12 : vector<16x1xf32>
    %14 = vector.broadcast %6 : vector<16x1xf32> to vector<16x256xf32>
    %15 = arith.subf %1, %14 : vector<16x256xf32>
    %cst_7 = arith.constant 9.99999974E-6 : f32
    %16 = vector.broadcast %cst_7 : f32 to vector<16x1xf32>
    %17 = arith.addf %13, %16 : vector<16x1xf32>
    %18 = math.rsqrt %17 : vector<16x1xf32>
    %19 = vector.broadcast %18 : vector<16x1xf32> to vector<16x256xf32>
    %20 = arith.mulf %15, %19 : vector<16x256xf32>
    %21 = vector.broadcast %2 : vector<1x256xf32> to vector<16x256xf32>
    %22 = arith.mulf %20, %21 : vector<16x256xf32>
    %23 = arith.truncf %22 : vector<16x256xf32> to vector<16x256xbf16>
    %c0_8 = arith.constant 0 : index
    %c0_9 = arith.constant 0 : index
    %24 = vector.load %arg3[%c0_8, %c0_9] : memref<256x768xbf16, #tpu.memory_space<vmem>>, vector<256x768xbf16>
    %cst_10 = arith.constant dense<0.000000e+00> : vector<16x768xf32>
    %25 = tpu.matmul %23, %24, %cst_10 {dimension_numbers = #tpu.dot_dimension_numbers<[1], [0], [0], [1], [0, 0, 1, 1], [], []>} : vector<16x256xbf16>, vector<256x768xbf16>, vector<16x768xf32> -> vector<16x768xf32>
    %26 = vector.extract_strided_slice %25 {offsets = [0, 0], sizes = [16, 256], strides = [1, 1]} : vector<16x768xf32> to vector<16x256xf32>
    %27 = vector.extract_strided_slice %25 {offsets = [0, 256], sizes = [16, 512], strides = [1, 1]} : vector<16x768xf32> to vector<16x512xf32>
    %c0_11 = arith.constant 0 : index
    %c0_12 = arith.constant 0 : index
    %28 = vector.load %arg4[%c0_11, %c0_12] : memref<2x128xf32, #tpu.memory_space<vmem>>, vector<2x128xf32>
    %c0_13 = arith.constant 0 : index
    %c0_14 = arith.constant 0 : index
    %29 = vector.load %arg5[%c0_13, %c0_14] : memref<2x128xf32, #tpu.memory_space<vmem>>, vector<2x128xf32>
    %c0_15 = arith.constant 0 : index
    %c0_16 = arith.constant 0 : index
    %30 = vector.load %arg6[%c0_15, %c0_16] : memref<1x128xf32, #tpu.memory_space<vmem>>, vector<1x128xf32>
    %c0_17 = arith.constant 0 : index
    %c0_18 = arith.constant 0 : index
    %31 = vector.load %arg7[%c0_17, %c0_18] : memref<1x128xf32, #tpu.memory_space<vmem>>, vector<1x128xf32>
    %cst_19 = arith.constant 8.000000e+00 : f32
    %32 = vector.broadcast %cst_19 : f32 to vector<1x128xf32>
    %33 = arith.mulf %30, %32 : vector<1x128xf32>
    %34 = vector.extract_strided_slice %26 {offsets = [0, 0], sizes = [16, 128], strides = [1, 1]} : vector<16x256xf32> to vector<16x128xf32>
    %35 = vector.extract_strided_slice %27 {offsets = [0, 0], sizes = [16, 128], strides = [1, 1]} : vector<16x512xf32> to vector<16x128xf32>
    %36 = vector.extract_strided_slice %27 {offsets = [0, 256], sizes = [16, 128], strides = [1, 1]} : vector<16x512xf32> to vector<16x128xf32>
    %37 = vector.extract_strided_slice %28 {offsets = [0, 0], sizes = [1, 128], strides = [1, 1]} : vector<2x128xf32> to vector<1x128xf32>
    %38 = vector.extract_strided_slice %29 {offsets = [0, 0], sizes = [1, 128], strides = [1, 1]} : vector<2x128xf32> to vector<1x128xf32>
    %39 = arith.mulf %34, %34 : vector<16x128xf32>
    %cst_20 = arith.constant dense<0.000000e+00> : vector<16xf32>
    %40 = vector.multi_reduction <add>, %39, %cst_20 [1] : vector<16x128xf32> to vector<16xf32>
    %41 = vector.shape_cast %40 : vector<16xf32> to vector<16x1xf32>
    %42 = math.sqrt %41 : vector<16x1xf32>
    %cst_21 = arith.constant 9.99999996E-13 : f32
    %43 = vector.broadcast %cst_21 : f32 to vector<16x1xf32>
    %44 = arith.maximumf %42, %43 : vector<16x1xf32>
    %45 = vector.broadcast %44 : vector<16x1xf32> to vector<16x128xf32>
    %46 = arith.divf %34, %45 : vector<16x128xf32>
    %47 = vector.broadcast %33 : vector<1x128xf32> to vector<16x128xf32>
    %48 = arith.mulf %46, %47 : vector<16x128xf32>
    %49 = arith.mulf %35, %35 : vector<16x128xf32>
    %cst_22 = arith.constant dense<0.000000e+00> : vector<16xf32>
    %50 = vector.multi_reduction <add>, %49, %cst_22 [1] : vector<16x128xf32> to vector<16xf32>
    %51 = vector.shape_cast %50 : vector<16xf32> to vector<16x1xf32>
    %52 = math.sqrt %51 : vector<16x1xf32>
    %cst_23 = arith.constant 9.99999996E-13 : f32
    %53 = vector.broadcast %cst_23 : f32 to vector<16x1xf32>
    %54 = arith.maximumf %52, %53 : vector<16x1xf32>
    %55 = vector.broadcast %54 : vector<16x1xf32> to vector<16x128xf32>
    %56 = arith.divf %35, %55 : vector<16x128xf32>
    %57 = vector.broadcast %31 : vector<1x128xf32> to vector<16x128xf32>
    %58 = arith.mulf %56, %57 : vector<16x128xf32>
    %59 = arith.mulf %37, %37 : vector<1x128xf32>
    %cst_24 = arith.constant dense<0.000000e+00> : vector<1xf32>
    %60 = vector.multi_reduction <add>, %59, %cst_24 [1] : vector<1x128xf32> to vector<1xf32>
    %61 = vector.shape_cast %60 : vector<1xf32> to vector<1x1xf32>
    %62 = math.sqrt %61 : vector<1x1xf32>
    %cst_25 = arith.constant 9.99999996E-13 : f32
    %63 = vector.broadcast %cst_25 : f32 to vector<1x1xf32>
    %64 = arith.maximumf %62, %63 : vector<1x1xf32>
    %65 = vector.broadcast %64 : vector<1x1xf32> to vector<1x128xf32>
    %66 = arith.divf %37, %65 : vector<1x128xf32>
    %67 = arith.mulf %66, %31 : vector<1x128xf32>
    %68 = arith.truncf %48 : vector<16x128xf32> to vector<16x128xbf16>
    %69 = arith.truncf %58 : vector<16x128xf32> to vector<16x128xbf16>
    %cst_26 = arith.constant dense<0.000000e+00> : vector<16x16xf32>
    %70 = tpu.matmul %68, %69, %cst_26 {dimension_numbers = #tpu.dot_dimension_numbers<[1], [1], [0], [0], [0, 0, 1, 0], [], []>} : vector<16x128xbf16>, vector<16x128xbf16>, vector<16x16xf32> -> vector<16x16xf32>
    %71 = vector.broadcast %67 : vector<1x128xf32> to vector<16x128xf32>
    %72 = arith.mulf %48, %71 : vector<16x128xf32>
    %cst_27 = arith.constant dense<0.000000e+00> : vector<16xf32>
    %73 = vector.multi_reduction <add>, %72, %cst_27 [1] : vector<16x128xf32> to vector<16xf32>
    %74 = vector.shape_cast %73 : vector<16xf32> to vector<16x1xf32>
    %cst_28 = arith.constant dense<0xFF800000> : vector<16xf32>
    %75 = vector.multi_reduction <maximumf>, %70, %cst_28 [1] : vector<16x16xf32> to vector<16xf32>
    %76 = vector.shape_cast %75 : vector<16xf32> to vector<16x1xf32>
    %77 = arith.maximumf %76, %74 : vector<16x1xf32>
    %78 = vector.broadcast %77 : vector<16x1xf32> to vector<16x16xf32>
    %79 = arith.subf %70, %78 : vector<16x16xf32>
    %80 = math.exp %79 : vector<16x16xf32>
    %81 = arith.subf %74, %77 : vector<16x1xf32>
    %82 = math.exp %81 : vector<16x1xf32>
    %cst_29 = arith.constant dense<0.000000e+00> : vector<16xf32>
    %83 = vector.multi_reduction <add>, %80, %cst_29 [1] : vector<16x16xf32> to vector<16xf32>
    %84 = vector.shape_cast %83 : vector<16xf32> to vector<16x1xf32>
    %85 = arith.addf %84, %82 : vector<16x1xf32>
    %86 = tpu.reciprocal %85 {approx = true} : vector<16x1xf32> -> vector<16x1xf32>
    %87 = arith.truncf %80 : vector<16x16xf32> to vector<16x16xbf16>
    %88 = arith.truncf %36 : vector<16x128xf32> to vector<16x128xbf16>
    %cst_30 = arith.constant dense<0.000000e+00> : vector<16x128xf32>
    %89 = tpu.matmul %87, %88, %cst_30 {dimension_numbers = #tpu.dot_dimension_numbers<[1], [0], [0], [1], [0, 0, 1, 1], [], []>} : vector<16x16xbf16>, vector<16x128xbf16>, vector<16x128xf32> -> vector<16x128xf32>
    %90 = vector.broadcast %82 : vector<16x1xf32> to vector<16x128xf32>
    %91 = vector.broadcast %38 : vector<1x128xf32> to vector<16x128xf32>
    %92 = arith.mulf %90, %91 : vector<16x128xf32>
    %93 = arith.addf %89, %92 : vector<16x128xf32>
    %94 = vector.broadcast %86 : vector<16x1xf32> to vector<16x128xf32>
    %95 = arith.mulf %93, %94 : vector<16x128xf32>
    %96 = vector.extract_strided_slice %26 {offsets = [0, 128], sizes = [16, 128], strides = [1, 1]} : vector<16x256xf32> to vector<16x128xf32>
    %97 = vector.extract_strided_slice %27 {offsets = [0, 128], sizes = [16, 128], strides = [1, 1]} : vector<16x512xf32> to vector<16x128xf32>
    %98 = vector.extract_strided_slice %27 {offsets = [0, 384], sizes = [16, 128], strides = [1, 1]} : vector<16x512xf32> to vector<16x128xf32>
    %99 = vector.extract_strided_slice %28 {offsets = [1, 0], sizes = [1, 128], strides = [1, 1]} : vector<2x128xf32> to vector<1x128xf32>
    %100 = vector.extract_strided_slice %29 {offsets = [1, 0], sizes = [1, 128], strides = [1, 1]} : vector<2x128xf32> to vector<1x128xf32>
    %101 = arith.mulf %96, %96 : vector<16x128xf32>
    %cst_31 = arith.constant dense<0.000000e+00> : vector<16xf32>
    %102 = vector.multi_reduction <add>, %101, %cst_31 [1] : vector<16x128xf32> to vector<16xf32>
    %103 = vector.shape_cast %102 : vector<16xf32> to vector<16x1xf32>
    %104 = math.sqrt %103 : vector<16x1xf32>
    %cst_32 = arith.constant 9.99999996E-13 : f32
    %105 = vector.broadcast %cst_32 : f32 to vector<16x1xf32>
    %106 = arith.maximumf %104, %105 : vector<16x1xf32>
    %107 = vector.broadcast %106 : vector<16x1xf32> to vector<16x128xf32>
    %108 = arith.divf %96, %107 : vector<16x128xf32>
    %109 = vector.broadcast %33 : vector<1x128xf32> to vector<16x128xf32>
    %110 = arith.mulf %108, %109 : vector<16x128xf32>
    %111 = arith.mulf %97, %97 : vector<16x128xf32>
    %cst_33 = arith.constant dense<0.000000e+00> : vector<16xf32>
    %112 = vector.multi_reduction <add>, %111, %cst_33 [1] : vector<16x128xf32> to vector<16xf32>
    %113 = vector.shape_cast %112 : vector<16xf32> to vector<16x1xf32>
    %114 = math.sqrt %113 : vector<16x1xf32>
    %cst_34 = arith.constant 9.99999996E-13 : f32
    %115 = vector.broadcast %cst_34 : f32 to vector<16x1xf32>
    %116 = arith.maximumf %114, %115 : vector<16x1xf32>
    %117 = vector.broadcast %116 : vector<16x1xf32> to vector<16x128xf32>
    %118 = arith.divf %97, %117 : vector<16x128xf32>
    %119 = vector.broadcast %31 : vector<1x128xf32> to vector<16x128xf32>
    %120 = arith.mulf %118, %119 : vector<16x128xf32>
    %121 = arith.mulf %99, %99 : vector<1x128xf32>
    %cst_35 = arith.constant dense<0.000000e+00> : vector<1xf32>
    %122 = vector.multi_reduction <add>, %121, %cst_35 [1] : vector<1x128xf32> to vector<1xf32>
    %123 = vector.shape_cast %122 : vector<1xf32> to vector<1x1xf32>
    %124 = math.sqrt %123 : vector<1x1xf32>
    %cst_36 = arith.constant 9.99999996E-13 : f32
    %125 = vector.broadcast %cst_36 : f32 to vector<1x1xf32>
    %126 = arith.maximumf %124, %125 : vector<1x1xf32>
    %127 = vector.broadcast %126 : vector<1x1xf32> to vector<1x128xf32>
    %128 = arith.divf %99, %127 : vector<1x128xf32>
    %129 = arith.mulf %128, %31 : vector<1x128xf32>
    %130 = arith.truncf %110 : vector<16x128xf32> to vector<16x128xbf16>
    %131 = arith.truncf %120 : vector<16x128xf32> to vector<16x128xbf16>
    %cst_37 = arith.constant dense<0.000000e+00> : vector<16x16xf32>
    %132 = tpu.matmul %130, %131, %cst_37 {dimension_numbers = #tpu.dot_dimension_numbers<[1], [1], [0], [0], [0, 0, 1, 0], [], []>} : vector<16x128xbf16>, vector<16x128xbf16>, vector<16x16xf32> -> vector<16x16xf32>
    %133 = vector.broadcast %129 : vector<1x128xf32> to vector<16x128xf32>
    %134 = arith.mulf %110, %133 : vector<16x128xf32>
    %cst_38 = arith.constant dense<0.000000e+00> : vector<16xf32>
    %135 = vector.multi_reduction <add>, %134, %cst_38 [1] : vector<16x128xf32> to vector<16xf32>
    %136 = vector.shape_cast %135 : vector<16xf32> to vector<16x1xf32>
    %cst_39 = arith.constant dense<0xFF800000> : vector<16xf32>
    %137 = vector.multi_reduction <maximumf>, %132, %cst_39 [1] : vector<16x16xf32> to vector<16xf32>
    %138 = vector.shape_cast %137 : vector<16xf32> to vector<16x1xf32>
    %139 = arith.maximumf %138, %136 : vector<16x1xf32>
    %140 = vector.broadcast %139 : vector<16x1xf32> to vector<16x16xf32>
    %141 = arith.subf %132, %140 : vector<16x16xf32>
    %142 = math.exp %141 : vector<16x16xf32>
    %143 = arith.subf %136, %139 : vector<16x1xf32>
    %144 = math.exp %143 : vector<16x1xf32>
    %cst_40 = arith.constant dense<0.000000e+00> : vector<16xf32>
    %145 = vector.multi_reduction <add>, %142, %cst_40 [1] : vector<16x16xf32> to vector<16xf32>
    %146 = vector.shape_cast %145 : vector<16xf32> to vector<16x1xf32>
    %147 = arith.addf %146, %144 : vector<16x1xf32>
    %148 = tpu.reciprocal %147 {approx = true} : vector<16x1xf32> -> vector<16x1xf32>
    %149 = arith.truncf %142 : vector<16x16xf32> to vector<16x16xbf16>
    %150 = arith.truncf %98 : vector<16x128xf32> to vector<16x128xbf16>
    %cst_41 = arith.constant dense<0.000000e+00> : vector<16x128xf32>
    %151 = tpu.matmul %149, %150, %cst_41 {dimension_numbers = #tpu.dot_dimension_numbers<[1], [0], [0], [1], [0, 0, 1, 1], [], []>} : vector<16x16xbf16>, vector<16x128xbf16>, vector<16x128xf32> -> vector<16x128xf32>
    %152 = vector.broadcast %144 : vector<16x1xf32> to vector<16x128xf32>
    %153 = vector.broadcast %100 : vector<1x128xf32> to vector<16x128xf32>
    %154 = arith.mulf %152, %153 : vector<16x128xf32>
    %155 = arith.addf %151, %154 : vector<16x128xf32>
    %156 = vector.broadcast %148 : vector<16x1xf32> to vector<16x128xf32>
    %157 = arith.mulf %155, %156 : vector<16x128xf32>
    %158 = tpu.concatenate %95, %157 in 1 : vector<16x128xf32>, vector<16x128xf32> -> vector<16x256xf32>
    %159 = arith.truncf %158 : vector<16x256xf32> to vector<16x256xbf16>
    %c0_42 = arith.constant 0 : index
    %c0_43 = arith.constant 0 : index
    %160 = vector.load %arg8[%c0_42, %c0_43] : memref<256x256xbf16, #tpu.memory_space<vmem>>, vector<256x256xbf16>
    %cst_44 = arith.constant dense<0.000000e+00> : vector<16x256xf32>
    %161 = tpu.matmul %159, %160, %cst_44 {dimension_numbers = #tpu.dot_dimension_numbers<[1], [0], [0], [1], [0, 0, 1, 1], [], []>} : vector<16x256xbf16>, vector<256x256xbf16>, vector<16x256xf32> -> vector<16x256xf32>
    %162 = arith.addf %161, %1 : vector<16x256xf32>
    %c0_45 = arith.constant 0 : index
    %c0_46 = arith.constant 0 : index
    %c0_47 = arith.constant 0 : index
    %163 = vector.load %arg9[%c0_45, %c0_46, %c0_47] : memref<1x16x256xf32, #tpu.memory_space<vmem>>, vector<1x16x256xf32>
    %164 = vector.shape_cast %163 : vector<1x16x256xf32> to vector<16x256xf32>
    %165 = vector.shape_cast %162 : vector<16x256xf32> to vector<1x16x256xf32>
    tpu.vector_store %arg9[%c0_45, %c0_46, %c0_47], %165 {strides = array<i32>} : memref<1x16x256xf32, #tpu.memory_space<vmem>>, vector<1x16x256xf32>,
    return
  }
  func.func @transform_0(%arg0: i32) -> (i32, i32, i32) {
    %c0_i32 = arith.constant 0 : i32
    %c0_i32_0 = arith.constant 0 : i32
    %c0_i32_1 = arith.constant 0 : i32
    return %arg0, %c0_i32, %c0_i32_0 : i32, i32, i32
  }
  func.func @transform_1(%arg0: i32) -> (i32, i32) {
    %c0_i32 = arith.constant 0 : i32
    %c0_i32_0 = arith.constant 0 : i32
    %c0_i32_1 = arith.constant 0 : i32
    return %c0_i32, %c0_i32_0 : i32, i32
  }
  func.func @transform_2(%arg0: i32) -> (i32, i32) {
    %c0_i32 = arith.constant 0 : i32
    %c0_i32_0 = arith.constant 0 : i32
    %c0_i32_1 = arith.constant 0 : i32
    return %c0_i32, %c0_i32_0 : i32, i32
  }
  func.func @transform_3(%arg0: i32) -> (i32, i32) {
    %c0_i32 = arith.constant 0 : i32
    %c0_i32_0 = arith.constant 0 : i32
    %c0_i32_1 = arith.constant 0 : i32
    return %c0_i32, %c0_i32_0 : i32, i32
  }
  func.func @transform_4(%arg0: i32) -> (i32, i32) {
    %c0_i32 = arith.constant 0 : i32
    %c0_i32_0 = arith.constant 0 : i32
    %c0_i32_1 = arith.constant 0 : i32
    return %c0_i32, %c0_i32_0 : i32, i32
  }
  func.func @transform_5(%arg0: i32) -> (i32, i32) {
    %c0_i32 = arith.constant 0 : i32
    %c0_i32_0 = arith.constant 0 : i32
    %c0_i32_1 = arith.constant 0 : i32
    return %c0_i32, %c0_i32_0 : i32, i32
  }
  func.func @transform_6(%arg0: i32) -> (i32, i32) {
    %c0_i32 = arith.constant 0 : i32
    %c0_i32_0 = arith.constant 0 : i32
    %c0_i32_1 = arith.constant 0 : i32
    return %c0_i32, %c0_i32_0 : i32, i32
  }
  func.func @transform_7(%arg0: i32) -> (i32, i32) {
    %c0_i32 = arith.constant 0 : i32
    %c0_i32_0 = arith.constant 0 : i32
    %c0_i32_1 = arith.constant 0 : i32
    return %c0_i32, %c0_i32_0 : i32, i32
  }
  func.func @transform_8(%arg0: i32) -> (i32, i32, i32) {
    %c0_i32 = arith.constant 0 : i32
    %c0_i32_0 = arith.constant 0 : i32
    %c0_i32_1 = arith.constant 0 : i32
    return %arg0, %c0_i32, %c0_i32_0 : i32, i32, i32
  }
}

module attributes {stable_mosaic.version = 11 : i64} {
  func.func @_cross_attn_kernel(%arg0: i32, %arg1: memref<1x16x256xf32, #tpu.memory_space<vmem>>, %arg2: memref<1x24x256xbf16, #tpu.memory_space<vmem>>, %arg3: memref<1x256xf32, #tpu.memory_space<vmem>>, %arg4: memref<256x256xbf16, #tpu.memory_space<vmem>>, %arg5: memref<256x512xbf16, #tpu.memory_space<vmem>>, %arg6: memref<2x128xf32, #tpu.memory_space<vmem>>, %arg7: memref<2x128xf32, #tpu.memory_space<vmem>>, %arg8: memref<1x128xf32, #tpu.memory_space<vmem>>, %arg9: memref<1x128xf32, #tpu.memory_space<vmem>>, %arg10: memref<256x256xbf16, #tpu.memory_space<vmem>>, %arg11: memref<1x16x256xf32, #tpu.memory_space<vmem>>) attributes {dimension_semantics = [#tpu.dimension_semantics<parallel>], iteration_bounds = array<i64: 2>, scalar_prefetch = 0 : i64, scratch_operands = 0 : i64, tpu.core_type = #tpu.core_type<tc>, window_params = [{transform_indices = @transform_0, window_bounds = array<i64: 1, 16, 256>}, {transform_indices = @transform_1, window_bounds = array<i64: 1, 24, 256>}, {pipeline_mode = #tpu.pipeline_mode<synchronous>, transform_indices = @transform_2, window_bounds = array<i64: 1, 256>}, {pipeline_mode = #tpu.pipeline_mode<synchronous>, transform_indices = @transform_3, window_bounds = array<i64: 256, 256>}, {pipeline_mode = #tpu.pipeline_mode<synchronous>, transform_indices = @transform_4, window_bounds = array<i64: 256, 512>}, {pipeline_mode = #tpu.pipeline_mode<synchronous>, transform_indices = @transform_5, window_bounds = array<i64: 2, 128>}, {pipeline_mode = #tpu.pipeline_mode<synchronous>, transform_indices = @transform_6, window_bounds = array<i64: 2, 128>}, {pipeline_mode = #tpu.pipeline_mode<synchronous>, transform_indices = @transform_7, window_bounds = array<i64: 1, 128>}, {pipeline_mode = #tpu.pipeline_mode<synchronous>, transform_indices = @transform_8, window_bounds = array<i64: 1, 128>}, {pipeline_mode = #tpu.pipeline_mode<synchronous>, transform_indices = @transform_9, window_bounds = array<i64: 256, 256>}, {transform_indices = @transform_10, window_bounds = array<i64: 1, 16, 256>}]} {
    %c0 = arith.constant 0 : index
    %c0_0 = arith.constant 0 : index
    %c0_1 = arith.constant 0 : index
    %0 = vector.load %arg1[%c0, %c0_0, %c0_1] : memref<1x16x256xf32, #tpu.memory_space<vmem>>, vector<1x16x256xf32>
    %1 = vector.shape_cast %0 : vector<1x16x256xf32> to vector<16x256xf32>
    %c0_2 = arith.constant 0 : index
    %c0_3 = arith.constant 0 : index
    %2 = vector.load %arg3[%c0_2, %c0_3] : memref<1x256xf32, #tpu.memory_space<vmem>>, vector<1x256xf32>
    %cst = arith.constant dense<0.000000e+00> : vector<16xf32>
    %3 = vector.multi_reduction <add>, %1, %cst [1] : vector<16x256xf32> to vector<16xf32>
    %4 = vector.shape_cast %3 : vector<16xf32> to vector<16x1xf32>
    %cst_4 = arith.constant 2.560000e+02 : f32
    %5 = vector.broadcast %cst_4 : f32 to vector<16x1xf32>
    %6 = arith.divf %4, %5 : vector<16x1xf32>
    %7 = vector.broadcast %6 : vector<16x1xf32> to vector<16x256xf32>
    %8 = arith.subf %1, %7 : vector<16x256xf32>
    %9 = arith.mulf %8, %8 : vector<16x256xf32>
    %cst_5 = arith.constant dense<0.000000e+00> : vector<16xf32>
    %10 = vector.multi_reduction <add>, %9, %cst_5 [1] : vector<16x256xf32> to vector<16xf32>
    %11 = vector.shape_cast %10 : vector<16xf32> to vector<16x1xf32>
    %cst_6 = arith.constant 2.560000e+02 : f32
    %12 = vector.broadcast %cst_6 : f32 to vector<16x1xf32>
    %13 = arith.divf %11, %12 : vector<16x1xf32>
    %14 = vector.broadcast %6 : vector<16x1xf32> to vector<16x256xf32>
    %15 = arith.subf %1, %14 : vector<16x256xf32>
    %cst_7 = arith.constant 9.99999974E-6 : f32
    %16 = vector.broadcast %cst_7 : f32 to vector<16x1xf32>
    %17 = arith.addf %13, %16 : vector<16x1xf32>
    %18 = math.rsqrt %17 : vector<16x1xf32>
    %19 = vector.broadcast %18 : vector<16x1xf32> to vector<16x256xf32>
    %20 = arith.mulf %15, %19 : vector<16x256xf32>
    %21 = vector.broadcast %2 : vector<1x256xf32> to vector<16x256xf32>
    %22 = arith.mulf %20, %21 : vector<16x256xf32>
    %23 = arith.truncf %22 : vector<16x256xf32> to vector<16x256xbf16>
    %c0_8 = arith.constant 0 : index
    %c0_9 = arith.constant 0 : index
    %24 = vector.load %arg4[%c0_8, %c0_9] : memref<256x256xbf16, #tpu.memory_space<vmem>>, vector<256x256xbf16>
    %cst_10 = arith.constant dense<0.000000e+00> : vector<16x256xf32>
    %25 = tpu.matmul %23, %24, %cst_10 {dimension_numbers = #tpu.dot_dimension_numbers<[1], [0], [0], [1], [0, 0, 1, 1], [], []>} : vector<16x256xbf16>, vector<256x256xbf16>, vector<16x256xf32> -> vector<16x256xf32>
    %c0_11 = arith.constant 0 : index
    %c0_12 = arith.constant 0 : index
    %c0_13 = arith.constant 0 : index
    %26 = vector.load %arg2[%c0_11, %c0_12, %c0_13] : memref<1x24x256xbf16, #tpu.memory_space<vmem>>, vector<1x24x256xbf16>
    %27 = vector.shape_cast %26 : vector<1x24x256xbf16> to vector<24x256xbf16>
    %c0_14 = arith.constant 0 : index
    %c0_15 = arith.constant 0 : index
    %28 = vector.load %arg5[%c0_14, %c0_15] : memref<256x512xbf16, #tpu.memory_space<vmem>>, vector<256x512xbf16>
    %cst_16 = arith.constant dense<0.000000e+00> : vector<24x512xf32>
    %29 = tpu.matmul %27, %28, %cst_16 {dimension_numbers = #tpu.dot_dimension_numbers<[1], [0], [0], [1], [0, 0, 1, 1], [], []>} : vector<24x256xbf16>, vector<256x512xbf16>, vector<24x512xf32> -> vector<24x512xf32>
    %c0_17 = arith.constant 0 : index
    %c0_18 = arith.constant 0 : index
    %30 = vector.load %arg6[%c0_17, %c0_18] : memref<2x128xf32, #tpu.memory_space<vmem>>, vector<2x128xf32>
    %c0_19 = arith.constant 0 : index
    %c0_20 = arith.constant 0 : index
    %31 = vector.load %arg7[%c0_19, %c0_20] : memref<2x128xf32, #tpu.memory_space<vmem>>, vector<2x128xf32>
    %c0_21 = arith.constant 0 : index
    %c0_22 = arith.constant 0 : index
    %32 = vector.load %arg8[%c0_21, %c0_22] : memref<1x128xf32, #tpu.memory_space<vmem>>, vector<1x128xf32>
    %c0_23 = arith.constant 0 : index
    %c0_24 = arith.constant 0 : index
    %33 = vector.load %arg9[%c0_23, %c0_24] : memref<1x128xf32, #tpu.memory_space<vmem>>, vector<1x128xf32>
    %cst_25 = arith.constant 8.000000e+00 : f32
    %34 = vector.broadcast %cst_25 : f32 to vector<1x128xf32>
    %35 = arith.mulf %32, %34 : vector<1x128xf32>
    %36 = vector.extract_strided_slice %25 {offsets = [0, 0], sizes = [16, 128], strides = [1, 1]} : vector<16x256xf32> to vector<16x128xf32>
    %37 = vector.extract_strided_slice %29 {offsets = [0, 0], sizes = [24, 128], strides = [1, 1]} : vector<24x512xf32> to vector<24x128xf32>
    %38 = vector.extract_strided_slice %29 {offsets = [0, 256], sizes = [24, 128], strides = [1, 1]} : vector<24x512xf32> to vector<24x128xf32>
    %39 = vector.extract_strided_slice %30 {offsets = [0, 0], sizes = [1, 128], strides = [1, 1]} : vector<2x128xf32> to vector<1x128xf32>
    %40 = vector.extract_strided_slice %31 {offsets = [0, 0], sizes = [1, 128], strides = [1, 1]} : vector<2x128xf32> to vector<1x128xf32>
    %41 = arith.mulf %36, %36 : vector<16x128xf32>
    %cst_26 = arith.constant dense<0.000000e+00> : vector<16xf32>
    %42 = vector.multi_reduction <add>, %41, %cst_26 [1] : vector<16x128xf32> to vector<16xf32>
    %43 = vector.shape_cast %42 : vector<16xf32> to vector<16x1xf32>
    %44 = math.sqrt %43 : vector<16x1xf32>
    %cst_27 = arith.constant 9.99999996E-13 : f32
    %45 = vector.broadcast %cst_27 : f32 to vector<16x1xf32>
    %46 = arith.maximumf %44, %45 : vector<16x1xf32>
    %47 = vector.broadcast %46 : vector<16x1xf32> to vector<16x128xf32>
    %48 = arith.divf %36, %47 : vector<16x128xf32>
    %49 = vector.broadcast %35 : vector<1x128xf32> to vector<16x128xf32>
    %50 = arith.mulf %48, %49 : vector<16x128xf32>
    %51 = arith.mulf %37, %37 : vector<24x128xf32>
    %cst_28 = arith.constant dense<0.000000e+00> : vector<24xf32>
    %52 = vector.multi_reduction <add>, %51, %cst_28 [1] : vector<24x128xf32> to vector<24xf32>
    %53 = vector.shape_cast %52 : vector<24xf32> to vector<24x1xf32>
    %54 = math.sqrt %53 : vector<24x1xf32>
    %cst_29 = arith.constant 9.99999996E-13 : f32
    %55 = vector.broadcast %cst_29 : f32 to vector<24x1xf32>
    %56 = arith.maximumf %54, %55 : vector<24x1xf32>
    %57 = vector.broadcast %56 : vector<24x1xf32> to vector<24x128xf32>
    %58 = arith.divf %37, %57 : vector<24x128xf32>
    %59 = vector.broadcast %33 : vector<1x128xf32> to vector<24x128xf32>
    %60 = arith.mulf %58, %59 : vector<24x128xf32>
    %61 = arith.mulf %39, %39 : vector<1x128xf32>
    %cst_30 = arith.constant dense<0.000000e+00> : vector<1xf32>
    %62 = vector.multi_reduction <add>, %61, %cst_30 [1] : vector<1x128xf32> to vector<1xf32>
    %63 = vector.shape_cast %62 : vector<1xf32> to vector<1x1xf32>
    %64 = math.sqrt %63 : vector<1x1xf32>
    %cst_31 = arith.constant 9.99999996E-13 : f32
    %65 = vector.broadcast %cst_31 : f32 to vector<1x1xf32>
    %66 = arith.maximumf %64, %65 : vector<1x1xf32>
    %67 = vector.broadcast %66 : vector<1x1xf32> to vector<1x128xf32>
    %68 = arith.divf %39, %67 : vector<1x128xf32>
    %69 = arith.mulf %68, %33 : vector<1x128xf32>
    %70 = arith.truncf %50 : vector<16x128xf32> to vector<16x128xbf16>
    %71 = arith.truncf %60 : vector<24x128xf32> to vector<24x128xbf16>
    %cst_32 = arith.constant dense<0.000000e+00> : vector<16x24xf32>
    %72 = tpu.matmul %70, %71, %cst_32 {dimension_numbers = #tpu.dot_dimension_numbers<[1], [1], [0], [0], [0, 0, 1, 0], [], []>} : vector<16x128xbf16>, vector<24x128xbf16>, vector<16x24xf32> -> vector<16x24xf32>
    %73 = vector.broadcast %69 : vector<1x128xf32> to vector<16x128xf32>
    %74 = arith.mulf %50, %73 : vector<16x128xf32>
    %cst_33 = arith.constant dense<0.000000e+00> : vector<16xf32>
    %75 = vector.multi_reduction <add>, %74, %cst_33 [1] : vector<16x128xf32> to vector<16xf32>
    %76 = vector.shape_cast %75 : vector<16xf32> to vector<16x1xf32>
    %cst_34 = arith.constant dense<0xFF800000> : vector<16xf32>
    %77 = vector.multi_reduction <maximumf>, %72, %cst_34 [1] : vector<16x24xf32> to vector<16xf32>
    %78 = vector.shape_cast %77 : vector<16xf32> to vector<16x1xf32>
    %79 = arith.maximumf %78, %76 : vector<16x1xf32>
    %80 = vector.broadcast %79 : vector<16x1xf32> to vector<16x24xf32>
    %81 = arith.subf %72, %80 : vector<16x24xf32>
    %82 = math.exp %81 : vector<16x24xf32>
    %83 = arith.subf %76, %79 : vector<16x1xf32>
    %84 = math.exp %83 : vector<16x1xf32>
    %cst_35 = arith.constant dense<0.000000e+00> : vector<16xf32>
    %85 = vector.multi_reduction <add>, %82, %cst_35 [1] : vector<16x24xf32> to vector<16xf32>
    %86 = vector.shape_cast %85 : vector<16xf32> to vector<16x1xf32>
    %87 = arith.addf %86, %84 : vector<16x1xf32>
    %88 = tpu.reciprocal %87 {approx = true} : vector<16x1xf32> -> vector<16x1xf32>
    %89 = arith.truncf %82 : vector<16x24xf32> to vector<16x24xbf16>
    %90 = arith.truncf %38 : vector<24x128xf32> to vector<24x128xbf16>
    %cst_36 = arith.constant dense<0.000000e+00> : vector<16x128xf32>
    %91 = tpu.matmul %89, %90, %cst_36 {dimension_numbers = #tpu.dot_dimension_numbers<[1], [0], [0], [1], [0, 0, 1, 1], [], []>} : vector<16x24xbf16>, vector<24x128xbf16>, vector<16x128xf32> -> vector<16x128xf32>
    %92 = vector.broadcast %84 : vector<16x1xf32> to vector<16x128xf32>
    %93 = vector.broadcast %40 : vector<1x128xf32> to vector<16x128xf32>
    %94 = arith.mulf %92, %93 : vector<16x128xf32>
    %95 = arith.addf %91, %94 : vector<16x128xf32>
    %96 = vector.broadcast %88 : vector<16x1xf32> to vector<16x128xf32>
    %97 = arith.mulf %95, %96 : vector<16x128xf32>
    %98 = vector.extract_strided_slice %25 {offsets = [0, 128], sizes = [16, 128], strides = [1, 1]} : vector<16x256xf32> to vector<16x128xf32>
    %99 = vector.extract_strided_slice %29 {offsets = [0, 128], sizes = [24, 128], strides = [1, 1]} : vector<24x512xf32> to vector<24x128xf32>
    %100 = vector.extract_strided_slice %29 {offsets = [0, 384], sizes = [24, 128], strides = [1, 1]} : vector<24x512xf32> to vector<24x128xf32>
    %101 = vector.extract_strided_slice %30 {offsets = [1, 0], sizes = [1, 128], strides = [1, 1]} : vector<2x128xf32> to vector<1x128xf32>
    %102 = vector.extract_strided_slice %31 {offsets = [1, 0], sizes = [1, 128], strides = [1, 1]} : vector<2x128xf32> to vector<1x128xf32>
    %103 = arith.mulf %98, %98 : vector<16x128xf32>
    %cst_37 = arith.constant dense<0.000000e+00> : vector<16xf32>
    %104 = vector.multi_reduction <add>, %103, %cst_37 [1] : vector<16x128xf32> to vector<16xf32>
    %105 = vector.shape_cast %104 : vector<16xf32> to vector<16x1xf32>
    %106 = math.sqrt %105 : vector<16x1xf32>
    %cst_38 = arith.constant 9.99999996E-13 : f32
    %107 = vector.broadcast %cst_38 : f32 to vector<16x1xf32>
    %108 = arith.maximumf %106, %107 : vector<16x1xf32>
    %109 = vector.broadcast %108 : vector<16x1xf32> to vector<16x128xf32>
    %110 = arith.divf %98, %109 : vector<16x128xf32>
    %111 = vector.broadcast %35 : vector<1x128xf32> to vector<16x128xf32>
    %112 = arith.mulf %110, %111 : vector<16x128xf32>
    %113 = arith.mulf %99, %99 : vector<24x128xf32>
    %cst_39 = arith.constant dense<0.000000e+00> : vector<24xf32>
    %114 = vector.multi_reduction <add>, %113, %cst_39 [1] : vector<24x128xf32> to vector<24xf32>
    %115 = vector.shape_cast %114 : vector<24xf32> to vector<24x1xf32>
    %116 = math.sqrt %115 : vector<24x1xf32>
    %cst_40 = arith.constant 9.99999996E-13 : f32
    %117 = vector.broadcast %cst_40 : f32 to vector<24x1xf32>
    %118 = arith.maximumf %116, %117 : vector<24x1xf32>
    %119 = vector.broadcast %118 : vector<24x1xf32> to vector<24x128xf32>
    %120 = arith.divf %99, %119 : vector<24x128xf32>
    %121 = vector.broadcast %33 : vector<1x128xf32> to vector<24x128xf32>
    %122 = arith.mulf %120, %121 : vector<24x128xf32>
    %123 = arith.mulf %101, %101 : vector<1x128xf32>
    %cst_41 = arith.constant dense<0.000000e+00> : vector<1xf32>
    %124 = vector.multi_reduction <add>, %123, %cst_41 [1] : vector<1x128xf32> to vector<1xf32>
    %125 = vector.shape_cast %124 : vector<1xf32> to vector<1x1xf32>
    %126 = math.sqrt %125 : vector<1x1xf32>
    %cst_42 = arith.constant 9.99999996E-13 : f32
    %127 = vector.broadcast %cst_42 : f32 to vector<1x1xf32>
    %128 = arith.maximumf %126, %127 : vector<1x1xf32>
    %129 = vector.broadcast %128 : vector<1x1xf32> to vector<1x128xf32>
    %130 = arith.divf %101, %129 : vector<1x128xf32>
    %131 = arith.mulf %130, %33 : vector<1x128xf32>
    %132 = arith.truncf %112 : vector<16x128xf32> to vector<16x128xbf16>
    %133 = arith.truncf %122 : vector<24x128xf32> to vector<24x128xbf16>
    %cst_43 = arith.constant dense<0.000000e+00> : vector<16x24xf32>
    %134 = tpu.matmul %132, %133, %cst_43 {dimension_numbers = #tpu.dot_dimension_numbers<[1], [1], [0], [0], [0, 0, 1, 0], [], []>} : vector<16x128xbf16>, vector<24x128xbf16>, vector<16x24xf32> -> vector<16x24xf32>
    %135 = vector.broadcast %131 : vector<1x128xf32> to vector<16x128xf32>
    %136 = arith.mulf %112, %135 : vector<16x128xf32>
    %cst_44 = arith.constant dense<0.000000e+00> : vector<16xf32>
    %137 = vector.multi_reduction <add>, %136, %cst_44 [1] : vector<16x128xf32> to vector<16xf32>
    %138 = vector.shape_cast %137 : vector<16xf32> to vector<16x1xf32>
    %cst_45 = arith.constant dense<0xFF800000> : vector<16xf32>
    %139 = vector.multi_reduction <maximumf>, %134, %cst_45 [1] : vector<16x24xf32> to vector<16xf32>
    %140 = vector.shape_cast %139 : vector<16xf32> to vector<16x1xf32>
    %141 = arith.maximumf %140, %138 : vector<16x1xf32>
    %142 = vector.broadcast %141 : vector<16x1xf32> to vector<16x24xf32>
    %143 = arith.subf %134, %142 : vector<16x24xf32>
    %144 = math.exp %143 : vector<16x24xf32>
    %145 = arith.subf %138, %141 : vector<16x1xf32>
    %146 = math.exp %145 : vector<16x1xf32>
    %cst_46 = arith.constant dense<0.000000e+00> : vector<16xf32>
    %147 = vector.multi_reduction <add>, %144, %cst_46 [1] : vector<16x24xf32> to vector<16xf32>
    %148 = vector.shape_cast %147 : vector<16xf32> to vector<16x1xf32>
    %149 = arith.addf %148, %146 : vector<16x1xf32>
    %150 = tpu.reciprocal %149 {approx = true} : vector<16x1xf32> -> vector<16x1xf32>
    %151 = arith.truncf %144 : vector<16x24xf32> to vector<16x24xbf16>
    %152 = arith.truncf %100 : vector<24x128xf32> to vector<24x128xbf16>
    %cst_47 = arith.constant dense<0.000000e+00> : vector<16x128xf32>
    %153 = tpu.matmul %151, %152, %cst_47 {dimension_numbers = #tpu.dot_dimension_numbers<[1], [0], [0], [1], [0, 0, 1, 1], [], []>} : vector<16x24xbf16>, vector<24x128xbf16>, vector<16x128xf32> -> vector<16x128xf32>
    %154 = vector.broadcast %146 : vector<16x1xf32> to vector<16x128xf32>
    %155 = vector.broadcast %102 : vector<1x128xf32> to vector<16x128xf32>
    %156 = arith.mulf %154, %155 : vector<16x128xf32>
    %157 = arith.addf %153, %156 : vector<16x128xf32>
    %158 = vector.broadcast %150 : vector<16x1xf32> to vector<16x128xf32>
    %159 = arith.mulf %157, %158 : vector<16x128xf32>
    %160 = tpu.concatenate %97, %159 in 1 : vector<16x128xf32>, vector<16x128xf32> -> vector<16x256xf32>
    %161 = arith.truncf %160 : vector<16x256xf32> to vector<16x256xbf16>
    %c0_48 = arith.constant 0 : index
    %c0_49 = arith.constant 0 : index
    %162 = vector.load %arg10[%c0_48, %c0_49] : memref<256x256xbf16, #tpu.memory_space<vmem>>, vector<256x256xbf16>
    %cst_50 = arith.constant dense<0.000000e+00> : vector<16x256xf32>
    %163 = tpu.matmul %161, %162, %cst_50 {dimension_numbers = #tpu.dot_dimension_numbers<[1], [0], [0], [1], [0, 0, 1, 1], [], []>} : vector<16x256xbf16>, vector<256x256xbf16>, vector<16x256xf32> -> vector<16x256xf32>
    %164 = arith.addf %163, %1 : vector<16x256xf32>
    %c0_51 = arith.constant 0 : index
    %c0_52 = arith.constant 0 : index
    %c0_53 = arith.constant 0 : index
    %165 = vector.load %arg11[%c0_51, %c0_52, %c0_53] : memref<1x16x256xf32, #tpu.memory_space<vmem>>, vector<1x16x256xf32>
    %166 = vector.shape_cast %165 : vector<1x16x256xf32> to vector<16x256xf32>
    %167 = vector.shape_cast %164 : vector<16x256xf32> to vector<1x16x256xf32>
    tpu.vector_store %arg11[%c0_51, %c0_52, %c0_53], %167 {strides = array<i32>} : memref<1x16x256xf32, #tpu.memory_space<vmem>>, vector<1x16x256xf32>,
    return
  }
  func.func @transform_0(%arg0: i32) -> (i32, i32, i32) {
    %c0_i32 = arith.constant 0 : i32
    %c0_i32_0 = arith.constant 0 : i32
    %c0_i32_1 = arith.constant 0 : i32
    return %arg0, %c0_i32, %c0_i32_0 : i32, i32, i32
  }
  func.func @transform_1(%arg0: i32) -> (i32, i32, i32) {
    %c0_i32 = arith.constant 0 : i32
    %c0_i32_0 = arith.constant 0 : i32
    %c0_i32_1 = arith.constant 0 : i32
    return %arg0, %c0_i32, %c0_i32_0 : i32, i32, i32
  }
  func.func @transform_2(%arg0: i32) -> (i32, i32) {
    %c0_i32 = arith.constant 0 : i32
    %c0_i32_0 = arith.constant 0 : i32
    %c0_i32_1 = arith.constant 0 : i32
    return %c0_i32, %c0_i32_0 : i32, i32
  }
  func.func @transform_3(%arg0: i32) -> (i32, i32) {
    %c0_i32 = arith.constant 0 : i32
    %c0_i32_0 = arith.constant 0 : i32
    %c0_i32_1 = arith.constant 0 : i32
    return %c0_i32, %c0_i32_0 : i32, i32
  }
  func.func @transform_4(%arg0: i32) -> (i32, i32) {
    %c0_i32 = arith.constant 0 : i32
    %c0_i32_0 = arith.constant 0 : i32
    %c0_i32_1 = arith.constant 0 : i32
    return %c0_i32, %c0_i32_0 : i32, i32
  }
  func.func @transform_5(%arg0: i32) -> (i32, i32) {
    %c0_i32 = arith.constant 0 : i32
    %c0_i32_0 = arith.constant 0 : i32
    %c0_i32_1 = arith.constant 0 : i32
    return %c0_i32, %c0_i32_0 : i32, i32
  }
  func.func @transform_6(%arg0: i32) -> (i32, i32) {
    %c0_i32 = arith.constant 0 : i32
    %c0_i32_0 = arith.constant 0 : i32
    %c0_i32_1 = arith.constant 0 : i32
    return %c0_i32, %c0_i32_0 : i32, i32
  }
  func.func @transform_7(%arg0: i32) -> (i32, i32) {
    %c0_i32 = arith.constant 0 : i32
    %c0_i32_0 = arith.constant 0 : i32
    %c0_i32_1 = arith.constant 0 : i32
    return %c0_i32, %c0_i32_0 : i32, i32
  }
  func.func @transform_8(%arg0: i32) -> (i32, i32) {
    %c0_i32 = arith.constant 0 : i32
    %c0_i32_0 = arith.constant 0 : i32
    %c0_i32_1 = arith.constant 0 : i32
    return %c0_i32, %c0_i32_0 : i32, i32
  }
  func.func @transform_9(%arg0: i32) -> (i32, i32) {
    %c0_i32 = arith.constant 0 : i32
    %c0_i32_0 = arith.constant 0 : i32
    %c0_i32_1 = arith.constant 0 : i32
    return %c0_i32, %c0_i32_0 : i32, i32
  }
  func.func @transform_10(%arg0: i32) -> (i32, i32, i32) {
    %c0_i32 = arith.constant 0 : i32
    %c0_i32_0 = arith.constant 0 : i32
    %c0_i32_1 = arith.constant 0 : i32
    return %arg0, %c0_i32, %c0_i32_0 : i32, i32, i32
  }
}

module attributes {stable_mosaic.version = 11 : i64} {
  func.func @_self_attn_kernel(%arg0: i32, %arg1: memref<1x16x256xf32, #tpu.memory_space<vmem>>, %arg2: memref<1x256xf32, #tpu.memory_space<vmem>>, %arg3: memref<256x768xbf16, #tpu.memory_space<vmem>>, %arg4: memref<2x128xf32, #tpu.memory_space<vmem>>, %arg5: memref<2x128xf32, #tpu.memory_space<vmem>>, %arg6: memref<1x128xf32, #tpu.memory_space<vmem>>, %arg7: memref<1x128xf32, #tpu.memory_space<vmem>>, %arg8: memref<256x256xbf16, #tpu.memory_space<vmem>>, %arg9: memref<1x16x256xf32, #tpu.memory_space<vmem>>) attributes {dimension_semantics = [#tpu.dimension_semantics<parallel>], iteration_bounds = array<i64: 2>, scalar_prefetch = 0 : i64, scratch_operands = 0 : i64, tpu.core_type = #tpu.core_type<tc>, window_params = [{transform_indices = @transform_0, window_bounds = array<i64: 1, 16, 256>}, {pipeline_mode = #tpu.pipeline_mode<synchronous>, transform_indices = @transform_1, window_bounds = array<i64: 1, 256>}, {pipeline_mode = #tpu.pipeline_mode<synchronous>, transform_indices = @transform_2, window_bounds = array<i64: 256, 768>}, {pipeline_mode = #tpu.pipeline_mode<synchronous>, transform_indices = @transform_3, window_bounds = array<i64: 2, 128>}, {pipeline_mode = #tpu.pipeline_mode<synchronous>, transform_indices = @transform_4, window_bounds = array<i64: 2, 128>}, {pipeline_mode = #tpu.pipeline_mode<synchronous>, transform_indices = @transform_5, window_bounds = array<i64: 1, 128>}, {pipeline_mode = #tpu.pipeline_mode<synchronous>, transform_indices = @transform_6, window_bounds = array<i64: 1, 128>}, {pipeline_mode = #tpu.pipeline_mode<synchronous>, transform_indices = @transform_7, window_bounds = array<i64: 256, 256>}, {transform_indices = @transform_8, window_bounds = array<i64: 1, 16, 256>}]} {
    %c0 = arith.constant 0 : index
    %c0_0 = arith.constant 0 : index
    %c0_1 = arith.constant 0 : index
    %0 = vector.load %arg1[%c0, %c0_0, %c0_1] : memref<1x16x256xf32, #tpu.memory_space<vmem>>, vector<1x16x256xf32>
    %1 = vector.shape_cast %0 : vector<1x16x256xf32> to vector<16x256xf32>
    %c0_2 = arith.constant 0 : index
    %c0_3 = arith.constant 0 : index
    %2 = vector.load %arg2[%c0_2, %c0_3] : memref<1x256xf32, #tpu.memory_space<vmem>>, vector<1x256xf32>
    %cst = arith.constant dense<0.000000e+00> : vector<16xf32>
    %3 = vector.multi_reduction <add>, %1, %cst [1] : vector<16x256xf32> to vector<16xf32>
    %4 = vector.shape_cast %3 : vector<16xf32> to vector<16x1xf32>
    %cst_4 = arith.constant 2.560000e+02 : f32
    %5 = vector.broadcast %cst_4 : f32 to vector<16x1xf32>
    %6 = arith.divf %4, %5 : vector<16x1xf32>
    %7 = vector.broadcast %6 : vector<16x1xf32> to vector<16x256xf32>
    %8 = arith.subf %1, %7 : vector<16x256xf32>
    %9 = arith.mulf %8, %8 : vector<16x256xf32>
    %cst_5 = arith.constant dense<0.000000e+00> : vector<16xf32>
    %10 = vector.multi_reduction <add>, %9, %cst_5 [1] : vector<16x256xf32> to vector<16xf32>
    %11 = vector.shape_cast %10 : vector<16xf32> to vector<16x1xf32>
    %cst_6 = arith.constant 2.560000e+02 : f32
    %12 = vector.broadcast %cst_6 : f32 to vector<16x1xf32>
    %13 = arith.divf %11, %12 : vector<16x1xf32>
    %14 = vector.broadcast %6 : vector<16x1xf32> to vector<16x256xf32>
    %15 = arith.subf %1, %14 : vector<16x256xf32>
    %cst_7 = arith.constant 9.99999974E-6 : f32
    %16 = vector.broadcast %cst_7 : f32 to vector<16x1xf32>
    %17 = arith.addf %13, %16 : vector<16x1xf32>
    %18 = math.rsqrt %17 : vector<16x1xf32>
    %19 = vector.broadcast %18 : vector<16x1xf32> to vector<16x256xf32>
    %20 = arith.mulf %15, %19 : vector<16x256xf32>
    %21 = vector.broadcast %2 : vector<1x256xf32> to vector<16x256xf32>
    %22 = arith.mulf %20, %21 : vector<16x256xf32>
    %23 = arith.truncf %22 : vector<16x256xf32> to vector<16x256xbf16>
    %c0_8 = arith.constant 0 : index
    %c0_9 = arith.constant 0 : index
    %24 = vector.load %arg3[%c0_8, %c0_9] : memref<256x768xbf16, #tpu.memory_space<vmem>>, vector<256x768xbf16>
    %cst_10 = arith.constant dense<0.000000e+00> : vector<16x768xf32>
    %25 = tpu.matmul %23, %24, %cst_10 {dimension_numbers = #tpu.dot_dimension_numbers<[1], [0], [0], [1], [0, 0, 1, 1], [], []>} : vector<16x256xbf16>, vector<256x768xbf16>, vector<16x768xf32> -> vector<16x768xf32>
    %26 = vector.extract_strided_slice %25 {offsets = [0, 0], sizes = [16, 256], strides = [1, 1]} : vector<16x768xf32> to vector<16x256xf32>
    %27 = vector.extract_strided_slice %25 {offsets = [0, 256], sizes = [16, 512], strides = [1, 1]} : vector<16x768xf32> to vector<16x512xf32>
    %c0_11 = arith.constant 0 : index
    %c0_12 = arith.constant 0 : index
    %28 = vector.load %arg4[%c0_11, %c0_12] : memref<2x128xf32, #tpu.memory_space<vmem>>, vector<2x128xf32>
    %c0_13 = arith.constant 0 : index
    %c0_14 = arith.constant 0 : index
    %29 = vector.load %arg5[%c0_13, %c0_14] : memref<2x128xf32, #tpu.memory_space<vmem>>, vector<2x128xf32>
    %c0_15 = arith.constant 0 : index
    %c0_16 = arith.constant 0 : index
    %30 = vector.load %arg6[%c0_15, %c0_16] : memref<1x128xf32, #tpu.memory_space<vmem>>, vector<1x128xf32>
    %c0_17 = arith.constant 0 : index
    %c0_18 = arith.constant 0 : index
    %31 = vector.load %arg7[%c0_17, %c0_18] : memref<1x128xf32, #tpu.memory_space<vmem>>, vector<1x128xf32>
    %cst_19 = arith.constant 8.000000e+00 : f32
    %32 = vector.broadcast %cst_19 : f32 to vector<1x128xf32>
    %33 = arith.mulf %30, %32 : vector<1x128xf32>
    %34 = vector.extract_strided_slice %26 {offsets = [0, 0], sizes = [16, 128], strides = [1, 1]} : vector<16x256xf32> to vector<16x128xf32>
    %35 = vector.extract_strided_slice %27 {offsets = [0, 0], sizes = [16, 128], strides = [1, 1]} : vector<16x512xf32> to vector<16x128xf32>
    %36 = vector.extract_strided_slice %27 {offsets = [0, 256], sizes = [16, 128], strides = [1, 1]} : vector<16x512xf32> to vector<16x128xf32>
    %37 = vector.extract_strided_slice %28 {offsets = [0, 0], sizes = [1, 128], strides = [1, 1]} : vector<2x128xf32> to vector<1x128xf32>
    %38 = vector.extract_strided_slice %29 {offsets = [0, 0], sizes = [1, 128], strides = [1, 1]} : vector<2x128xf32> to vector<1x128xf32>
    %39 = arith.mulf %34, %34 : vector<16x128xf32>
    %cst_20 = arith.constant dense<0.000000e+00> : vector<16xf32>
    %40 = vector.multi_reduction <add>, %39, %cst_20 [1] : vector<16x128xf32> to vector<16xf32>
    %41 = vector.shape_cast %40 : vector<16xf32> to vector<16x1xf32>
    %42 = math.sqrt %41 : vector<16x1xf32>
    %cst_21 = arith.constant 9.99999996E-13 : f32
    %43 = vector.broadcast %cst_21 : f32 to vector<16x1xf32>
    %44 = arith.maximumf %42, %43 : vector<16x1xf32>
    %45 = vector.broadcast %44 : vector<16x1xf32> to vector<16x128xf32>
    %46 = arith.divf %34, %45 : vector<16x128xf32>
    %47 = vector.broadcast %33 : vector<1x128xf32> to vector<16x128xf32>
    %48 = arith.mulf %46, %47 : vector<16x128xf32>
    %49 = arith.mulf %35, %35 : vector<16x128xf32>
    %cst_22 = arith.constant dense<0.000000e+00> : vector<16xf32>
    %50 = vector.multi_reduction <add>, %49, %cst_22 [1] : vector<16x128xf32> to vector<16xf32>
    %51 = vector.shape_cast %50 : vector<16xf32> to vector<16x1xf32>
    %52 = math.sqrt %51 : vector<16x1xf32>
    %cst_23 = arith.constant 9.99999996E-13 : f32
    %53 = vector.broadcast %cst_23 : f32 to vector<16x1xf32>
    %54 = arith.maximumf %52, %53 : vector<16x1xf32>
    %55 = vector.broadcast %54 : vector<16x1xf32> to vector<16x128xf32>
    %56 = arith.divf %35, %55 : vector<16x128xf32>
    %57 = vector.broadcast %31 : vector<1x128xf32> to vector<16x128xf32>
    %58 = arith.mulf %56, %57 : vector<16x128xf32>
    %59 = arith.mulf %37, %37 : vector<1x128xf32>
    %cst_24 = arith.constant dense<0.000000e+00> : vector<1xf32>
    %60 = vector.multi_reduction <add>, %59, %cst_24 [1] : vector<1x128xf32> to vector<1xf32>
    %61 = vector.shape_cast %60 : vector<1xf32> to vector<1x1xf32>
    %62 = math.sqrt %61 : vector<1x1xf32>
    %cst_25 = arith.constant 9.99999996E-13 : f32
    %63 = vector.broadcast %cst_25 : f32 to vector<1x1xf32>
    %64 = arith.maximumf %62, %63 : vector<1x1xf32>
    %65 = vector.broadcast %64 : vector<1x1xf32> to vector<1x128xf32>
    %66 = arith.divf %37, %65 : vector<1x128xf32>
    %67 = arith.mulf %66, %31 : vector<1x128xf32>
    %68 = arith.truncf %48 : vector<16x128xf32> to vector<16x128xbf16>
    %69 = arith.truncf %58 : vector<16x128xf32> to vector<16x128xbf16>
    %cst_26 = arith.constant dense<0.000000e+00> : vector<16x16xf32>
    %70 = tpu.matmul %68, %69, %cst_26 {dimension_numbers = #tpu.dot_dimension_numbers<[1], [1], [0], [0], [0, 0, 1, 0], [], []>} : vector<16x128xbf16>, vector<16x128xbf16>, vector<16x16xf32> -> vector<16x16xf32>
    %71 = vector.broadcast %67 : vector<1x128xf32> to vector<16x128xf32>
    %72 = arith.mulf %48, %71 : vector<16x128xf32>
    %cst_27 = arith.constant dense<0.000000e+00> : vector<16xf32>
    %73 = vector.multi_reduction <add>, %72, %cst_27 [1] : vector<16x128xf32> to vector<16xf32>
    %74 = vector.shape_cast %73 : vector<16xf32> to vector<16x1xf32>
    %cst_28 = arith.constant dense<0xFF800000> : vector<16xf32>
    %75 = vector.multi_reduction <maximumf>, %70, %cst_28 [1] : vector<16x16xf32> to vector<16xf32>
    %76 = vector.shape_cast %75 : vector<16xf32> to vector<16x1xf32>
    %77 = arith.maximumf %76, %74 : vector<16x1xf32>
    %78 = vector.broadcast %77 : vector<16x1xf32> to vector<16x16xf32>
    %79 = arith.subf %70, %78 : vector<16x16xf32>
    %80 = math.exp %79 : vector<16x16xf32>
    %81 = arith.subf %74, %77 : vector<16x1xf32>
    %82 = math.exp %81 : vector<16x1xf32>
    %cst_29 = arith.constant dense<0.000000e+00> : vector<16xf32>
    %83 = vector.multi_reduction <add>, %80, %cst_29 [1] : vector<16x16xf32> to vector<16xf32>
    %84 = vector.shape_cast %83 : vector<16xf32> to vector<16x1xf32>
    %85 = arith.addf %84, %82 : vector<16x1xf32>
    %86 = tpu.reciprocal %85 {approx = true} : vector<16x1xf32> -> vector<16x1xf32>
    %87 = arith.truncf %80 : vector<16x16xf32> to vector<16x16xbf16>
    %88 = arith.truncf %36 : vector<16x128xf32> to vector<16x128xbf16>
    %cst_30 = arith.constant dense<0.000000e+00> : vector<16x128xf32>
    %89 = tpu.matmul %87, %88, %cst_30 {dimension_numbers = #tpu.dot_dimension_numbers<[1], [0], [0], [1], [0, 0, 1, 1], [], []>} : vector<16x16xbf16>, vector<16x128xbf16>, vector<16x128xf32> -> vector<16x128xf32>
    %90 = vector.broadcast %82 : vector<16x1xf32> to vector<16x128xf32>
    %91 = vector.broadcast %38 : vector<1x128xf32> to vector<16x128xf32>
    %92 = arith.mulf %90, %91 : vector<16x128xf32>
    %93 = arith.addf %89, %92 : vector<16x128xf32>
    %94 = vector.broadcast %86 : vector<16x1xf32> to vector<16x128xf32>
    %95 = arith.mulf %93, %94 : vector<16x128xf32>
    %96 = vector.extract_strided_slice %26 {offsets = [0, 128], sizes = [16, 128], strides = [1, 1]} : vector<16x256xf32> to vector<16x128xf32>
    %97 = vector.extract_strided_slice %27 {offsets = [0, 128], sizes = [16, 128], strides = [1, 1]} : vector<16x512xf32> to vector<16x128xf32>
    %98 = vector.extract_strided_slice %27 {offsets = [0, 384], sizes = [16, 128], strides = [1, 1]} : vector<16x512xf32> to vector<16x128xf32>
    %99 = vector.extract_strided_slice %28 {offsets = [1, 0], sizes = [1, 128], strides = [1, 1]} : vector<2x128xf32> to vector<1x128xf32>
    %100 = vector.extract_strided_slice %29 {offsets = [1, 0], sizes = [1, 128], strides = [1, 1]} : vector<2x128xf32> to vector<1x128xf32>
    %101 = arith.mulf %96, %96 : vector<16x128xf32>
    %cst_31 = arith.constant dense<0.000000e+00> : vector<16xf32>
    %102 = vector.multi_reduction <add>, %101, %cst_31 [1] : vector<16x128xf32> to vector<16xf32>
    %103 = vector.shape_cast %102 : vector<16xf32> to vector<16x1xf32>
    %104 = math.sqrt %103 : vector<16x1xf32>
    %cst_32 = arith.constant 9.99999996E-13 : f32
    %105 = vector.broadcast %cst_32 : f32 to vector<16x1xf32>
    %106 = arith.maximumf %104, %105 : vector<16x1xf32>
    %107 = vector.broadcast %106 : vector<16x1xf32> to vector<16x128xf32>
    %108 = arith.divf %96, %107 : vector<16x128xf32>
    %109 = vector.broadcast %33 : vector<1x128xf32> to vector<16x128xf32>
    %110 = arith.mulf %108, %109 : vector<16x128xf32>
    %111 = arith.mulf %97, %97 : vector<16x128xf32>
    %cst_33 = arith.constant dense<0.000000e+00> : vector<16xf32>
    %112 = vector.multi_reduction <add>, %111, %cst_33 [1] : vector<16x128xf32> to vector<16xf32>
    %113 = vector.shape_cast %112 : vector<16xf32> to vector<16x1xf32>
    %114 = math.sqrt %113 : vector<16x1xf32>
    %cst_34 = arith.constant 9.99999996E-13 : f32
    %115 = vector.broadcast %cst_34 : f32 to vector<16x1xf32>
    %116 = arith.maximumf %114, %115 : vector<16x1xf32>
    %117 = vector.broadcast %116 : vector<16x1xf32> to vector<16x128xf32>
    %118 = arith.divf %97, %117 : vector<16x128xf32>
    %119 = vector.broadcast %31 : vector<1x128xf32> to vector<16x128xf32>
    %120 = arith.mulf %118, %119 : vector<16x128xf32>
    %121 = arith.mulf %99, %99 : vector<1x128xf32>
    %cst_35 = arith.constant dense<0.000000e+00> : vector<1xf32>
    %122 = vector.multi_reduction <add>, %121, %cst_35 [1] : vector<1x128xf32> to vector<1xf32>
    %123 = vector.shape_cast %122 : vector<1xf32> to vector<1x1xf32>
    %124 = math.sqrt %123 : vector<1x1xf32>
    %cst_36 = arith.constant 9.99999996E-13 : f32
    %125 = vector.broadcast %cst_36 : f32 to vector<1x1xf32>
    %126 = arith.maximumf %124, %125 : vector<1x1xf32>
    %127 = vector.broadcast %126 : vector<1x1xf32> to vector<1x128xf32>
    %128 = arith.divf %99, %127 : vector<1x128xf32>
    %129 = arith.mulf %128, %31 : vector<1x128xf32>
    %130 = arith.truncf %110 : vector<16x128xf32> to vector<16x128xbf16>
    %131 = arith.truncf %120 : vector<16x128xf32> to vector<16x128xbf16>
    %cst_37 = arith.constant dense<0.000000e+00> : vector<16x16xf32>
    %132 = tpu.matmul %130, %131, %cst_37 {dimension_numbers = #tpu.dot_dimension_numbers<[1], [1], [0], [0], [0, 0, 1, 0], [], []>} : vector<16x128xbf16>, vector<16x128xbf16>, vector<16x16xf32> -> vector<16x16xf32>
    %133 = vector.broadcast %129 : vector<1x128xf32> to vector<16x128xf32>
    %134 = arith.mulf %110, %133 : vector<16x128xf32>
    %cst_38 = arith.constant dense<0.000000e+00> : vector<16xf32>
    %135 = vector.multi_reduction <add>, %134, %cst_38 [1] : vector<16x128xf32> to vector<16xf32>
    %136 = vector.shape_cast %135 : vector<16xf32> to vector<16x1xf32>
    %cst_39 = arith.constant dense<0xFF800000> : vector<16xf32>
    %137 = vector.multi_reduction <maximumf>, %132, %cst_39 [1] : vector<16x16xf32> to vector<16xf32>
    %138 = vector.shape_cast %137 : vector<16xf32> to vector<16x1xf32>
    %139 = arith.maximumf %138, %136 : vector<16x1xf32>
    %140 = vector.broadcast %139 : vector<16x1xf32> to vector<16x16xf32>
    %141 = arith.subf %132, %140 : vector<16x16xf32>
    %142 = math.exp %141 : vector<16x16xf32>
    %143 = arith.subf %136, %139 : vector<16x1xf32>
    %144 = math.exp %143 : vector<16x1xf32>
    %cst_40 = arith.constant dense<0.000000e+00> : vector<16xf32>
    %145 = vector.multi_reduction <add>, %142, %cst_40 [1] : vector<16x16xf32> to vector<16xf32>
    %146 = vector.shape_cast %145 : vector<16xf32> to vector<16x1xf32>
    %147 = arith.addf %146, %144 : vector<16x1xf32>
    %148 = tpu.reciprocal %147 {approx = true} : vector<16x1xf32> -> vector<16x1xf32>
    %149 = arith.truncf %142 : vector<16x16xf32> to vector<16x16xbf16>
    %150 = arith.truncf %98 : vector<16x128xf32> to vector<16x128xbf16>
    %cst_41 = arith.constant dense<0.000000e+00> : vector<16x128xf32>
    %151 = tpu.matmul %149, %150, %cst_41 {dimension_numbers = #tpu.dot_dimension_numbers<[1], [0], [0], [1], [0, 0, 1, 1], [], []>} : vector<16x16xbf16>, vector<16x128xbf16>, vector<16x128xf32> -> vector<16x128xf32>
    %152 = vector.broadcast %144 : vector<16x1xf32> to vector<16x128xf32>
    %153 = vector.broadcast %100 : vector<1x128xf32> to vector<16x128xf32>
    %154 = arith.mulf %152, %153 : vector<16x128xf32>
    %155 = arith.addf %151, %154 : vector<16x128xf32>
    %156 = vector.broadcast %148 : vector<16x1xf32> to vector<16x128xf32>
    %157 = arith.mulf %155, %156 : vector<16x128xf32>
    %158 = tpu.concatenate %95, %157 in 1 : vector<16x128xf32>, vector<16x128xf32> -> vector<16x256xf32>
    %159 = arith.truncf %158 : vector<16x256xf32> to vector<16x256xbf16>
    %c0_42 = arith.constant 0 : index
    %c0_43 = arith.constant 0 : index
    %160 = vector.load %arg8[%c0_42, %c0_43] : memref<256x256xbf16, #tpu.memory_space<vmem>>, vector<256x256xbf16>
    %cst_44 = arith.constant dense<0.000000e+00> : vector<16x256xf32>
    %161 = tpu.matmul %159, %160, %cst_44 {dimension_numbers = #tpu.dot_dimension_numbers<[1], [0], [0], [1], [0, 0, 1, 1], [], []>} : vector<16x256xbf16>, vector<256x256xbf16>, vector<16x256xf32> -> vector<16x256xf32>
    %162 = arith.addf %161, %1 : vector<16x256xf32>
    %c0_45 = arith.constant 0 : index
    %c0_46 = arith.constant 0 : index
    %c0_47 = arith.constant 0 : index
    %163 = vector.load %arg9[%c0_45, %c0_46, %c0_47] : memref<1x16x256xf32, #tpu.memory_space<vmem>>, vector<1x16x256xf32>
    %164 = vector.shape_cast %163 : vector<1x16x256xf32> to vector<16x256xf32>
    %165 = vector.shape_cast %162 : vector<16x256xf32> to vector<1x16x256xf32>
    tpu.vector_store %arg9[%c0_45, %c0_46, %c0_47], %165 {strides = array<i32>} : memref<1x16x256xf32, #tpu.memory_space<vmem>>, vector<1x16x256xf32>,
    return
  }
  func.func @transform_0(%arg0: i32) -> (i32, i32, i32) {
    %c0_i32 = arith.constant 0 : i32
    %c0_i32_0 = arith.constant 0 : i32
    %c0_i32_1 = arith.constant 0 : i32
    return %arg0, %c0_i32, %c0_i32_0 : i32, i32, i32
  }
  func.func @transform_1(%arg0: i32) -> (i32, i32) {
    %c0_i32 = arith.constant 0 : i32
    %c0_i32_0 = arith.constant 0 : i32
    %c0_i32_1 = arith.constant 0 : i32
    return %c0_i32, %c0_i32_0 : i32, i32
  }
  func.func @transform_2(%arg0: i32) -> (i32, i32) {
    %c0_i32 = arith.constant 0 : i32
    %c0_i32_0 = arith.constant 0 : i32
    %c0_i32_1 = arith.constant 0 : i32
    return %c0_i32, %c0_i32_0 : i32, i32
  }
  func.func @transform_3(%arg0: i32) -> (i32, i32) {
    %c0_i32 = arith.constant 0 : i32
    %c0_i32_0 = arith.constant 0 : i32
    %c0_i32_1 = arith.constant 0 : i32
    return %c0_i32, %c0_i32_0 : i32, i32
  }
  func.func @transform_4(%arg0: i32) -> (i32, i32) {
    %c0_i32 = arith.constant 0 : i32
    %c0_i32_0 = arith.constant 0 : i32
    %c0_i32_1 = arith.constant 0 : i32
    return %c0_i32, %c0_i32_0 : i32, i32
  }
  func.func @transform_5(%arg0: i32) -> (i32, i32) {
    %c0_i32 = arith.constant 0 : i32
    %c0_i32_0 = arith.constant 0 : i32
    %c0_i32_1 = arith.constant 0 : i32
    return %c0_i32, %c0_i32_0 : i32, i32
  }
  func.func @transform_6(%arg0: i32) -> (i32, i32) {
    %c0_i32 = arith.constant 0 : i32
    %c0_i32_0 = arith.constant 0 : i32
    %c0_i32_1 = arith.constant 0 : i32
    return %c0_i32, %c0_i32_0 : i32, i32
  }
  func.func @transform_7(%arg0: i32) -> (i32, i32) {
    %c0_i32 = arith.constant 0 : i32
    %c0_i32_0 = arith.constant 0 : i32
    %c0_i32_1 = arith.constant 0 : i32
    return %c0_i32, %c0_i32_0 : i32, i32
  }
  func.func @transform_8(%arg0: i32) -> (i32, i32, i32) {
    %c0_i32 = arith.constant 0 : i32
    %c0_i32_0 = arith.constant 0 : i32
    %c0_i32_1 = arith.constant 0 : i32
    return %arg0, %c0_i32, %c0_i32_0 : i32, i32, i32
  }
}

module attributes {stable_mosaic.version = 11 : i64} {
  func.func @_cross_attn_kernel(%arg0: i32, %arg1: memref<1x16x256xf32, #tpu.memory_space<vmem>>, %arg2: memref<1x24x256xbf16, #tpu.memory_space<vmem>>, %arg3: memref<1x256xf32, #tpu.memory_space<vmem>>, %arg4: memref<256x256xbf16, #tpu.memory_space<vmem>>, %arg5: memref<256x512xbf16, #tpu.memory_space<vmem>>, %arg6: memref<2x128xf32, #tpu.memory_space<vmem>>, %arg7: memref<2x128xf32, #tpu.memory_space<vmem>>, %arg8: memref<1x128xf32, #tpu.memory_space<vmem>>, %arg9: memref<1x128xf32, #tpu.memory_space<vmem>>, %arg10: memref<256x256xbf16, #tpu.memory_space<vmem>>, %arg11: memref<1x16x256xf32, #tpu.memory_space<vmem>>) attributes {dimension_semantics = [#tpu.dimension_semantics<parallel>], iteration_bounds = array<i64: 2>, scalar_prefetch = 0 : i64, scratch_operands = 0 : i64, tpu.core_type = #tpu.core_type<tc>, window_params = [{transform_indices = @transform_0, window_bounds = array<i64: 1, 16, 256>}, {transform_indices = @transform_1, window_bounds = array<i64: 1, 24, 256>}, {pipeline_mode = #tpu.pipeline_mode<synchronous>, transform_indices = @transform_2, window_bounds = array<i64: 1, 256>}, {pipeline_mode = #tpu.pipeline_mode<synchronous>, transform_indices = @transform_3, window_bounds = array<i64: 256, 256>}, {pipeline_mode = #tpu.pipeline_mode<synchronous>, transform_indices = @transform_4, window_bounds = array<i64: 256, 512>}, {pipeline_mode = #tpu.pipeline_mode<synchronous>, transform_indices = @transform_5, window_bounds = array<i64: 2, 128>}, {pipeline_mode = #tpu.pipeline_mode<synchronous>, transform_indices = @transform_6, window_bounds = array<i64: 2, 128>}, {pipeline_mode = #tpu.pipeline_mode<synchronous>, transform_indices = @transform_7, window_bounds = array<i64: 1, 128>}, {pipeline_mode = #tpu.pipeline_mode<synchronous>, transform_indices = @transform_8, window_bounds = array<i64: 1, 128>}, {pipeline_mode = #tpu.pipeline_mode<synchronous>, transform_indices = @transform_9, window_bounds = array<i64: 256, 256>}, {transform_indices = @transform_10, window_bounds = array<i64: 1, 16, 256>}]} {
    %c0 = arith.constant 0 : index
    %c0_0 = arith.constant 0 : index
    %c0_1 = arith.constant 0 : index
    %0 = vector.load %arg1[%c0, %c0_0, %c0_1] : memref<1x16x256xf32, #tpu.memory_space<vmem>>, vector<1x16x256xf32>
    %1 = vector.shape_cast %0 : vector<1x16x256xf32> to vector<16x256xf32>
    %c0_2 = arith.constant 0 : index
    %c0_3 = arith.constant 0 : index
    %2 = vector.load %arg3[%c0_2, %c0_3] : memref<1x256xf32, #tpu.memory_space<vmem>>, vector<1x256xf32>
    %cst = arith.constant dense<0.000000e+00> : vector<16xf32>
    %3 = vector.multi_reduction <add>, %1, %cst [1] : vector<16x256xf32> to vector<16xf32>
    %4 = vector.shape_cast %3 : vector<16xf32> to vector<16x1xf32>
    %cst_4 = arith.constant 2.560000e+02 : f32
    %5 = vector.broadcast %cst_4 : f32 to vector<16x1xf32>
    %6 = arith.divf %4, %5 : vector<16x1xf32>
    %7 = vector.broadcast %6 : vector<16x1xf32> to vector<16x256xf32>
    %8 = arith.subf %1, %7 : vector<16x256xf32>
    %9 = arith.mulf %8, %8 : vector<16x256xf32>
    %cst_5 = arith.constant dense<0.000000e+00> : vector<16xf32>
    %10 = vector.multi_reduction <add>, %9, %cst_5 [1] : vector<16x256xf32> to vector<16xf32>
    %11 = vector.shape_cast %10 : vector<16xf32> to vector<16x1xf32>
    %cst_6 = arith.constant 2.560000e+02 : f32
    %12 = vector.broadcast %cst_6 : f32 to vector<16x1xf32>
    %13 = arith.divf %11, %12 : vector<16x1xf32>
    %14 = vector.broadcast %6 : vector<16x1xf32> to vector<16x256xf32>
    %15 = arith.subf %1, %14 : vector<16x256xf32>
    %cst_7 = arith.constant 9.99999974E-6 : f32
    %16 = vector.broadcast %cst_7 : f32 to vector<16x1xf32>
    %17 = arith.addf %13, %16 : vector<16x1xf32>
    %18 = math.rsqrt %17 : vector<16x1xf32>
    %19 = vector.broadcast %18 : vector<16x1xf32> to vector<16x256xf32>
    %20 = arith.mulf %15, %19 : vector<16x256xf32>
    %21 = vector.broadcast %2 : vector<1x256xf32> to vector<16x256xf32>
    %22 = arith.mulf %20, %21 : vector<16x256xf32>
    %23 = arith.truncf %22 : vector<16x256xf32> to vector<16x256xbf16>
    %c0_8 = arith.constant 0 : index
    %c0_9 = arith.constant 0 : index
    %24 = vector.load %arg4[%c0_8, %c0_9] : memref<256x256xbf16, #tpu.memory_space<vmem>>, vector<256x256xbf16>
    %cst_10 = arith.constant dense<0.000000e+00> : vector<16x256xf32>
    %25 = tpu.matmul %23, %24, %cst_10 {dimension_numbers = #tpu.dot_dimension_numbers<[1], [0], [0], [1], [0, 0, 1, 1], [], []>} : vector<16x256xbf16>, vector<256x256xbf16>, vector<16x256xf32> -> vector<16x256xf32>
    %c0_11 = arith.constant 0 : index
    %c0_12 = arith.constant 0 : index
    %c0_13 = arith.constant 0 : index
    %26 = vector.load %arg2[%c0_11, %c0_12, %c0_13] : memref<1x24x256xbf16, #tpu.memory_space<vmem>>, vector<1x24x256xbf16>
    %27 = vector.shape_cast %26 : vector<1x24x256xbf16> to vector<24x256xbf16>
    %c0_14 = arith.constant 0 : index
    %c0_15 = arith.constant 0 : index
    %28 = vector.load %arg5[%c0_14, %c0_15] : memref<256x512xbf16, #tpu.memory_space<vmem>>, vector<256x512xbf16>
    %cst_16 = arith.constant dense<0.000000e+00> : vector<24x512xf32>
    %29 = tpu.matmul %27, %28, %cst_16 {dimension_numbers = #tpu.dot_dimension_numbers<[1], [0], [0], [1], [0, 0, 1, 1], [], []>} : vector<24x256xbf16>, vector<256x512xbf16>, vector<24x512xf32> -> vector<24x512xf32>
    %c0_17 = arith.constant 0 : index
    %c0_18 = arith.constant 0 : index
    %30 = vector.load %arg6[%c0_17, %c0_18] : memref<2x128xf32, #tpu.memory_space<vmem>>, vector<2x128xf32>
    %c0_19 = arith.constant 0 : index
    %c0_20 = arith.constant 0 : index
    %31 = vector.load %arg7[%c0_19, %c0_20] : memref<2x128xf32, #tpu.memory_space<vmem>>, vector<2x128xf32>
    %c0_21 = arith.constant 0 : index
    %c0_22 = arith.constant 0 : index
    %32 = vector.load %arg8[%c0_21, %c0_22] : memref<1x128xf32, #tpu.memory_space<vmem>>, vector<1x128xf32>
    %c0_23 = arith.constant 0 : index
    %c0_24 = arith.constant 0 : index
    %33 = vector.load %arg9[%c0_23, %c0_24] : memref<1x128xf32, #tpu.memory_space<vmem>>, vector<1x128xf32>
    %cst_25 = arith.constant 8.000000e+00 : f32
    %34 = vector.broadcast %cst_25 : f32 to vector<1x128xf32>
    %35 = arith.mulf %32, %34 : vector<1x128xf32>
    %36 = vector.extract_strided_slice %25 {offsets = [0, 0], sizes = [16, 128], strides = [1, 1]} : vector<16x256xf32> to vector<16x128xf32>
    %37 = vector.extract_strided_slice %29 {offsets = [0, 0], sizes = [24, 128], strides = [1, 1]} : vector<24x512xf32> to vector<24x128xf32>
    %38 = vector.extract_strided_slice %29 {offsets = [0, 256], sizes = [24, 128], strides = [1, 1]} : vector<24x512xf32> to vector<24x128xf32>
    %39 = vector.extract_strided_slice %30 {offsets = [0, 0], sizes = [1, 128], strides = [1, 1]} : vector<2x128xf32> to vector<1x128xf32>
    %40 = vector.extract_strided_slice %31 {offsets = [0, 0], sizes = [1, 128], strides = [1, 1]} : vector<2x128xf32> to vector<1x128xf32>
    %41 = arith.mulf %36, %36 : vector<16x128xf32>
    %cst_26 = arith.constant dense<0.000000e+00> : vector<16xf32>
    %42 = vector.multi_reduction <add>, %41, %cst_26 [1] : vector<16x128xf32> to vector<16xf32>
    %43 = vector.shape_cast %42 : vector<16xf32> to vector<16x1xf32>
    %44 = math.sqrt %43 : vector<16x1xf32>
    %cst_27 = arith.constant 9.99999996E-13 : f32
    %45 = vector.broadcast %cst_27 : f32 to vector<16x1xf32>
    %46 = arith.maximumf %44, %45 : vector<16x1xf32>
    %47 = vector.broadcast %46 : vector<16x1xf32> to vector<16x128xf32>
    %48 = arith.divf %36, %47 : vector<16x128xf32>
    %49 = vector.broadcast %35 : vector<1x128xf32> to vector<16x128xf32>
    %50 = arith.mulf %48, %49 : vector<16x128xf32>
    %51 = arith.mulf %37, %37 : vector<24x128xf32>
    %cst_28 = arith.constant dense<0.000000e+00> : vector<24xf32>
    %52 = vector.multi_reduction <add>, %51, %cst_28 [1] : vector<24x128xf32> to vector<24xf32>
    %53 = vector.shape_cast %52 : vector<24xf32> to vector<24x1xf32>
    %54 = math.sqrt %53 : vector<24x1xf32>
    %cst_29 = arith.constant 9.99999996E-13 : f32
    %55 = vector.broadcast %cst_29 : f32 to vector<24x1xf32>
    %56 = arith.maximumf %54, %55 : vector<24x1xf32>
    %57 = vector.broadcast %56 : vector<24x1xf32> to vector<24x128xf32>
    %58 = arith.divf %37, %57 : vector<24x128xf32>
    %59 = vector.broadcast %33 : vector<1x128xf32> to vector<24x128xf32>
    %60 = arith.mulf %58, %59 : vector<24x128xf32>
    %61 = arith.mulf %39, %39 : vector<1x128xf32>
    %cst_30 = arith.constant dense<0.000000e+00> : vector<1xf32>
    %62 = vector.multi_reduction <add>, %61, %cst_30 [1] : vector<1x128xf32> to vector<1xf32>
    %63 = vector.shape_cast %62 : vector<1xf32> to vector<1x1xf32>
    %64 = math.sqrt %63 : vector<1x1xf32>
    %cst_31 = arith.constant 9.99999996E-13 : f32
    %65 = vector.broadcast %cst_31 : f32 to vector<1x1xf32>
    %66 = arith.maximumf %64, %65 : vector<1x1xf32>
    %67 = vector.broadcast %66 : vector<1x1xf32> to vector<1x128xf32>
    %68 = arith.divf %39, %67 : vector<1x128xf32>
    %69 = arith.mulf %68, %33 : vector<1x128xf32>
    %70 = arith.truncf %50 : vector<16x128xf32> to vector<16x128xbf16>
    %71 = arith.truncf %60 : vector<24x128xf32> to vector<24x128xbf16>
    %cst_32 = arith.constant dense<0.000000e+00> : vector<16x24xf32>
    %72 = tpu.matmul %70, %71, %cst_32 {dimension_numbers = #tpu.dot_dimension_numbers<[1], [1], [0], [0], [0, 0, 1, 0], [], []>} : vector<16x128xbf16>, vector<24x128xbf16>, vector<16x24xf32> -> vector<16x24xf32>
    %73 = vector.broadcast %69 : vector<1x128xf32> to vector<16x128xf32>
    %74 = arith.mulf %50, %73 : vector<16x128xf32>
    %cst_33 = arith.constant dense<0.000000e+00> : vector<16xf32>
    %75 = vector.multi_reduction <add>, %74, %cst_33 [1] : vector<16x128xf32> to vector<16xf32>
    %76 = vector.shape_cast %75 : vector<16xf32> to vector<16x1xf32>
    %cst_34 = arith.constant dense<0xFF800000> : vector<16xf32>
    %77 = vector.multi_reduction <maximumf>, %72, %cst_34 [1] : vector<16x24xf32> to vector<16xf32>
    %78 = vector.shape_cast %77 : vector<16xf32> to vector<16x1xf32>
    %79 = arith.maximumf %78, %76 : vector<16x1xf32>
    %80 = vector.broadcast %79 : vector<16x1xf32> to vector<16x24xf32>
    %81 = arith.subf %72, %80 : vector<16x24xf32>
    %82 = math.exp %81 : vector<16x24xf32>
    %83 = arith.subf %76, %79 : vector<16x1xf32>
    %84 = math.exp %83 : vector<16x1xf32>
    %cst_35 = arith.constant dense<0.000000e+00> : vector<16xf32>
    %85 = vector.multi_reduction <add>, %82, %cst_35 [1] : vector<16x24xf32> to vector<16xf32>
    %86 = vector.shape_cast %85 : vector<16xf32> to vector<16x1xf32>
    %87 = arith.addf %86, %84 : vector<16x1xf32>
    %88 = tpu.reciprocal %87 {approx = true} : vector<16x1xf32> -> vector<16x1xf32>
    %89 = arith.truncf %82 : vector<16x24xf32> to vector<16x24xbf16>
    %90 = arith.truncf %38 : vector<24x128xf32> to vector<24x128xbf16>
    %cst_36 = arith.constant dense<0.000000e+00> : vector<16x128xf32>
    %91 = tpu.matmul %89, %90, %cst_36 {dimension_numbers = #tpu.dot_dimension_numbers<[1], [0], [0], [1], [0, 0, 1, 1], [], []>} : vector<16x24xbf16>, vector<24x128xbf16>, vector<16x128xf32> -> vector<16x128xf32>
    %92 = vector.broadcast %84 : vector<16x1xf32> to vector<16x128xf32>
    %93 = vector.broadcast %40 : vector<1x128xf32> to vector<16x128xf32>
    %94 = arith.mulf %92, %93 : vector<16x128xf32>
    %95 = arith.addf %91, %94 : vector<16x128xf32>
    %96 = vector.broadcast %88 : vector<16x1xf32> to vector<16x128xf32>
    %97 = arith.mulf %95, %96 : vector<16x128xf32>
    %98 = vector.extract_strided_slice %25 {offsets = [0, 128], sizes = [16, 128], strides = [1, 1]} : vector<16x256xf32> to vector<16x128xf32>
    %99 = vector.extract_strided_slice %29 {offsets = [0, 128], sizes = [24, 128], strides = [1, 1]} : vector<24x512xf32> to vector<24x128xf32>
    %100 = vector.extract_strided_slice %29 {offsets = [0, 384], sizes = [24, 128], strides = [1, 1]} : vector<24x512xf32> to vector<24x128xf32>
    %101 = vector.extract_strided_slice %30 {offsets = [1, 0], sizes = [1, 128], strides = [1, 1]} : vector<2x128xf32> to vector<1x128xf32>
    %102 = vector.extract_strided_slice %31 {offsets = [1, 0], sizes = [1, 128], strides = [1, 1]} : vector<2x128xf32> to vector<1x128xf32>
    %103 = arith.mulf %98, %98 : vector<16x128xf32>
    %cst_37 = arith.constant dense<0.000000e+00> : vector<16xf32>
    %104 = vector.multi_reduction <add>, %103, %cst_37 [1] : vector<16x128xf32> to vector<16xf32>
    %105 = vector.shape_cast %104 : vector<16xf32> to vector<16x1xf32>
    %106 = math.sqrt %105 : vector<16x1xf32>
    %cst_38 = arith.constant 9.99999996E-13 : f32
    %107 = vector.broadcast %cst_38 : f32 to vector<16x1xf32>
    %108 = arith.maximumf %106, %107 : vector<16x1xf32>
    %109 = vector.broadcast %108 : vector<16x1xf32> to vector<16x128xf32>
    %110 = arith.divf %98, %109 : vector<16x128xf32>
    %111 = vector.broadcast %35 : vector<1x128xf32> to vector<16x128xf32>
    %112 = arith.mulf %110, %111 : vector<16x128xf32>
    %113 = arith.mulf %99, %99 : vector<24x128xf32>
    %cst_39 = arith.constant dense<0.000000e+00> : vector<24xf32>
    %114 = vector.multi_reduction <add>, %113, %cst_39 [1] : vector<24x128xf32> to vector<24xf32>
    %115 = vector.shape_cast %114 : vector<24xf32> to vector<24x1xf32>
    %116 = math.sqrt %115 : vector<24x1xf32>
    %cst_40 = arith.constant 9.99999996E-13 : f32
    %117 = vector.broadcast %cst_40 : f32 to vector<24x1xf32>
    %118 = arith.maximumf %116, %117 : vector<24x1xf32>
    %119 = vector.broadcast %118 : vector<24x1xf32> to vector<24x128xf32>
    %120 = arith.divf %99, %119 : vector<24x128xf32>
    %121 = vector.broadcast %33 : vector<1x128xf32> to vector<24x128xf32>
    %122 = arith.mulf %120, %121 : vector<24x128xf32>
    %123 = arith.mulf %101, %101 : vector<1x128xf32>
    %cst_41 = arith.constant dense<0.000000e+00> : vector<1xf32>
    %124 = vector.multi_reduction <add>, %123, %cst_41 [1] : vector<1x128xf32> to vector<1xf32>
    %125 = vector.shape_cast %124 : vector<1xf32> to vector<1x1xf32>
    %126 = math.sqrt %125 : vector<1x1xf32>
    %cst_42 = arith.constant 9.99999996E-13 : f32
    %127 = vector.broadcast %cst_42 : f32 to vector<1x1xf32>
    %128 = arith.maximumf %126, %127 : vector<1x1xf32>
    %129 = vector.broadcast %128 : vector<1x1xf32> to vector<1x128xf32>
    %130 = arith.divf %101, %129 : vector<1x128xf32>
    %131 = arith.mulf %130, %33 : vector<1x128xf32>
    %132 = arith.truncf %112 : vector<16x128xf32> to vector<16x128xbf16>
    %133 = arith.truncf %122 : vector<24x128xf32> to vector<24x128xbf16>
    %cst_43 = arith.constant dense<0.000000e+00> : vector<16x24xf32>
    %134 = tpu.matmul %132, %133, %cst_43 {dimension_numbers = #tpu.dot_dimension_numbers<[1], [1], [0], [0], [0, 0, 1, 0], [], []>} : vector<16x128xbf16>, vector<24x128xbf16>, vector<16x24xf32> -> vector<16x24xf32>
    %135 = vector.broadcast %131 : vector<1x128xf32> to vector<16x128xf32>
    %136 = arith.mulf %112, %135 : vector<16x128xf32>
    %cst_44 = arith.constant dense<0.000000e+00> : vector<16xf32>
    %137 = vector.multi_reduction <add>, %136, %cst_44 [1] : vector<16x128xf32> to vector<16xf32>
    %138 = vector.shape_cast %137 : vector<16xf32> to vector<16x1xf32>
    %cst_45 = arith.constant dense<0xFF800000> : vector<16xf32>
    %139 = vector.multi_reduction <maximumf>, %134, %cst_45 [1] : vector<16x24xf32> to vector<16xf32>
    %140 = vector.shape_cast %139 : vector<16xf32> to vector<16x1xf32>
    %141 = arith.maximumf %140, %138 : vector<16x1xf32>
    %142 = vector.broadcast %141 : vector<16x1xf32> to vector<16x24xf32>
    %143 = arith.subf %134, %142 : vector<16x24xf32>
    %144 = math.exp %143 : vector<16x24xf32>
    %145 = arith.subf %138, %141 : vector<16x1xf32>
    %146 = math.exp %145 : vector<16x1xf32>
    %cst_46 = arith.constant dense<0.000000e+00> : vector<16xf32>
    %147 = vector.multi_reduction <add>, %144, %cst_46 [1] : vector<16x24xf32> to vector<16xf32>
    %148 = vector.shape_cast %147 : vector<16xf32> to vector<16x1xf32>
    %149 = arith.addf %148, %146 : vector<16x1xf32>
    %150 = tpu.reciprocal %149 {approx = true} : vector<16x1xf32> -> vector<16x1xf32>
    %151 = arith.truncf %144 : vector<16x24xf32> to vector<16x24xbf16>
    %152 = arith.truncf %100 : vector<24x128xf32> to vector<24x128xbf16>
    %cst_47 = arith.constant dense<0.000000e+00> : vector<16x128xf32>
    %153 = tpu.matmul %151, %152, %cst_47 {dimension_numbers = #tpu.dot_dimension_numbers<[1], [0], [0], [1], [0, 0, 1, 1], [], []>} : vector<16x24xbf16>, vector<24x128xbf16>, vector<16x128xf32> -> vector<16x128xf32>
    %154 = vector.broadcast %146 : vector<16x1xf32> to vector<16x128xf32>
    %155 = vector.broadcast %102 : vector<1x128xf32> to vector<16x128xf32>
    %156 = arith.mulf %154, %155 : vector<16x128xf32>
    %157 = arith.addf %153, %156 : vector<16x128xf32>
    %158 = vector.broadcast %150 : vector<16x1xf32> to vector<16x128xf32>
    %159 = arith.mulf %157, %158 : vector<16x128xf32>
    %160 = tpu.concatenate %97, %159 in 1 : vector<16x128xf32>, vector<16x128xf32> -> vector<16x256xf32>
    %161 = arith.truncf %160 : vector<16x256xf32> to vector<16x256xbf16>
    %c0_48 = arith.constant 0 : index
    %c0_49 = arith.constant 0 : index
    %162 = vector.load %arg10[%c0_48, %c0_49] : memref<256x256xbf16, #tpu.memory_space<vmem>>, vector<256x256xbf16>
    %cst_50 = arith.constant dense<0.000000e+00> : vector<16x256xf32>
    %163 = tpu.matmul %161, %162, %cst_50 {dimension_numbers = #tpu.dot_dimension_numbers<[1], [0], [0], [1], [0, 0, 1, 1], [], []>} : vector<16x256xbf16>, vector<256x256xbf16>, vector<16x256xf32> -> vector<16x256xf32>
    %164 = arith.addf %163, %1 : vector<16x256xf32>
    %c0_51 = arith.constant 0 : index
    %c0_52 = arith.constant 0 : index
    %c0_53 = arith.constant 0 : index
    %165 = vector.load %arg11[%c0_51, %c0_52, %c0_53] : memref<1x16x256xf32, #tpu.memory_space<vmem>>, vector<1x16x256xf32>
    %166 = vector.shape_cast %165 : vector<1x16x256xf32> to vector<16x256xf32>
    %167 = vector.shape_cast %164 : vector<16x256xf32> to vector<1x16x256xf32>
    tpu.vector_store %arg11[%c0_51, %c0_52, %c0_53], %167 {strides = array<i32>} : memref<1x16x256xf32, #tpu.memory_space<vmem>>, vector<1x16x256xf32>,
    return
  }
  func.func @transform_0(%arg0: i32) -> (i32, i32, i32) {
    %c0_i32 = arith.constant 0 : i32
    %c0_i32_0 = arith.constant 0 : i32
    %c0_i32_1 = arith.constant 0 : i32
    return %arg0, %c0_i32, %c0_i32_0 : i32, i32, i32
  }
  func.func @transform_1(%arg0: i32) -> (i32, i32, i32) {
    %c0_i32 = arith.constant 0 : i32
    %c0_i32_0 = arith.constant 0 : i32
    %c0_i32_1 = arith.constant 0 : i32
    return %arg0, %c0_i32, %c0_i32_0 : i32, i32, i32
  }
  func.func @transform_2(%arg0: i32) -> (i32, i32) {
    %c0_i32 = arith.constant 0 : i32
    %c0_i32_0 = arith.constant 0 : i32
    %c0_i32_1 = arith.constant 0 : i32
    return %c0_i32, %c0_i32_0 : i32, i32
  }
  func.func @transform_3(%arg0: i32) -> (i32, i32) {
    %c0_i32 = arith.constant 0 : i32
    %c0_i32_0 = arith.constant 0 : i32
    %c0_i32_1 = arith.constant 0 : i32
    return %c0_i32, %c0_i32_0 : i32, i32
  }
  func.func @transform_4(%arg0: i32) -> (i32, i32) {
    %c0_i32 = arith.constant 0 : i32
    %c0_i32_0 = arith.constant 0 : i32
    %c0_i32_1 = arith.constant 0 : i32
    return %c0_i32, %c0_i32_0 : i32, i32
  }
  func.func @transform_5(%arg0: i32) -> (i32, i32) {
    %c0_i32 = arith.constant 0 : i32
    %c0_i32_0 = arith.constant 0 : i32
    %c0_i32_1 = arith.constant 0 : i32
    return %c0_i32, %c0_i32_0 : i32, i32
  }
  func.func @transform_6(%arg0: i32) -> (i32, i32) {
    %c0_i32 = arith.constant 0 : i32
    %c0_i32_0 = arith.constant 0 : i32
    %c0_i32_1 = arith.constant 0 : i32
    return %c0_i32, %c0_i32_0 : i32, i32
  }
  func.func @transform_7(%arg0: i32) -> (i32, i32) {
    %c0_i32 = arith.constant 0 : i32
    %c0_i32_0 = arith.constant 0 : i32
    %c0_i32_1 = arith.constant 0 : i32
    return %c0_i32, %c0_i32_0 : i32, i32
  }
  func.func @transform_8(%arg0: i32) -> (i32, i32) {
    %c0_i32 = arith.constant 0 : i32
    %c0_i32_0 = arith.constant 0 : i32
    %c0_i32_1 = arith.constant 0 : i32
    return %c0_i32, %c0_i32_0 : i32, i32
  }
  func.func @transform_9(%arg0: i32) -> (i32, i32) {
    %c0_i32 = arith.constant 0 : i32
    %c0_i32_0 = arith.constant 0 : i32
    %c0_i32_1 = arith.constant 0 : i32
    return %c0_i32, %c0_i32_0 : i32, i32
  }
  func.func @transform_10(%arg0: i32) -> (i32, i32, i32) {
    %c0_i32 = arith.constant 0 : i32
    %c0_i32_0 = arith.constant 0 : i32
    %c0_i32_1 = arith.constant 0 : i32
    return %arg0, %c0_i32, %c0_i32_0 : i32, i32, i32
  }
}

module attributes {stable_mosaic.version = 11 : i64} {
  func.func @_ff_kernel(%arg0: i32, %arg1: memref<16x256xf32, #tpu.memory_space<vmem>>, %arg2: memref<1x256xf32, #tpu.memory_space<vmem>>, %arg3: memref<256x512xbf16, #tpu.memory_space<vmem>>, %arg4: memref<256x512xbf16, #tpu.memory_space<vmem>>, %arg5: memref<1x512xf32, #tpu.memory_space<vmem>>, %arg6: memref<512x256xbf16, #tpu.memory_space<vmem>>, %arg7: memref<16x256xf32, #tpu.memory_space<vmem>>) attributes {dimension_semantics = [#tpu.dimension_semantics<parallel>], iteration_bounds = array<i64: 2>, scalar_prefetch = 0 : i64, scratch_operands = 0 : i64, tpu.core_type = #tpu.core_type<tc>, window_params = [{transform_indices = @transform_0, window_bounds = array<i64: 16, 256>}, {pipeline_mode = #tpu.pipeline_mode<synchronous>, transform_indices = @transform_1, window_bounds = array<i64: 1, 256>}, {pipeline_mode = #tpu.pipeline_mode<synchronous>, transform_indices = @transform_2, window_bounds = array<i64: 256, 512>}, {pipeline_mode = #tpu.pipeline_mode<synchronous>, transform_indices = @transform_3, window_bounds = array<i64: 256, 512>}, {pipeline_mode = #tpu.pipeline_mode<synchronous>, transform_indices = @transform_4, window_bounds = array<i64: 1, 512>}, {pipeline_mode = #tpu.pipeline_mode<synchronous>, transform_indices = @transform_5, window_bounds = array<i64: 512, 256>}, {transform_indices = @transform_6, window_bounds = array<i64: 16, 256>}]} {
    %c0 = arith.constant 0 : index
    %c0_0 = arith.constant 0 : index
    %0 = vector.load %arg1[%c0, %c0_0] : memref<16x256xf32, #tpu.memory_space<vmem>>, vector<16x256xf32>
    %c0_1 = arith.constant 0 : index
    %c0_2 = arith.constant 0 : index
    %1 = vector.load %arg2[%c0_1, %c0_2] : memref<1x256xf32, #tpu.memory_space<vmem>>, vector<1x256xf32>
    %cst = arith.constant dense<0.000000e+00> : vector<16xf32>
    %2 = vector.multi_reduction <add>, %0, %cst [1] : vector<16x256xf32> to vector<16xf32>
    %3 = vector.shape_cast %2 : vector<16xf32> to vector<16x1xf32>
    %cst_3 = arith.constant 2.560000e+02 : f32
    %4 = vector.broadcast %cst_3 : f32 to vector<16x1xf32>
    %5 = arith.divf %3, %4 : vector<16x1xf32>
    %6 = vector.broadcast %5 : vector<16x1xf32> to vector<16x256xf32>
    %7 = arith.subf %0, %6 : vector<16x256xf32>
    %8 = arith.mulf %7, %7 : vector<16x256xf32>
    %cst_4 = arith.constant dense<0.000000e+00> : vector<16xf32>
    %9 = vector.multi_reduction <add>, %8, %cst_4 [1] : vector<16x256xf32> to vector<16xf32>
    %10 = vector.shape_cast %9 : vector<16xf32> to vector<16x1xf32>
    %cst_5 = arith.constant 2.560000e+02 : f32
    %11 = vector.broadcast %cst_5 : f32 to vector<16x1xf32>
    %12 = arith.divf %10, %11 : vector<16x1xf32>
    %13 = vector.broadcast %5 : vector<16x1xf32> to vector<16x256xf32>
    %14 = arith.subf %0, %13 : vector<16x256xf32>
    %cst_6 = arith.constant 9.99999974E-6 : f32
    %15 = vector.broadcast %cst_6 : f32 to vector<16x1xf32>
    %16 = arith.addf %12, %15 : vector<16x1xf32>
    %17 = math.rsqrt %16 : vector<16x1xf32>
    %18 = vector.broadcast %17 : vector<16x1xf32> to vector<16x256xf32>
    %19 = arith.mulf %14, %18 : vector<16x256xf32>
    %20 = vector.broadcast %1 : vector<1x256xf32> to vector<16x256xf32>
    %21 = arith.mulf %19, %20 : vector<16x256xf32>
    %22 = arith.truncf %21 : vector<16x256xf32> to vector<16x256xbf16>
    %c0_7 = arith.constant 0 : index
    %c0_8 = arith.constant 0 : index
    %23 = vector.load %arg3[%c0_7, %c0_8] : memref<256x512xbf16, #tpu.memory_space<vmem>>, vector<256x512xbf16>
    %cst_9 = arith.constant dense<0.000000e+00> : vector<16x512xf32>
    %24 = tpu.matmul %22, %23, %cst_9 {dimension_numbers = #tpu.dot_dimension_numbers<[1], [0], [0], [1], [0, 0, 1, 1], [], []>} : vector<16x256xbf16>, vector<256x512xbf16>, vector<16x512xf32> -> vector<16x512xf32>
    %c0_10 = arith.constant 0 : index
    %c0_11 = arith.constant 0 : index
    %25 = vector.load %arg4[%c0_10, %c0_11] : memref<256x512xbf16, #tpu.memory_space<vmem>>, vector<256x512xbf16>
    %cst_12 = arith.constant dense<0.000000e+00> : vector<16x512xf32>
    %26 = tpu.matmul %22, %25, %cst_12 {dimension_numbers = #tpu.dot_dimension_numbers<[1], [0], [0], [1], [0, 0, 1, 1], [], []>} : vector<16x256xbf16>, vector<256x512xbf16>, vector<16x512xf32> -> vector<16x512xf32>
    %cst_13 = arith.constant 5.000000e-01 : f32
    %27 = vector.broadcast %cst_13 : f32 to vector<16x512xf32>
    %28 = arith.mulf %27, %24 : vector<16x512xf32>
    %cst_14 = arith.constant 0.707106769 : f32
    %29 = vector.broadcast %cst_14 : f32 to vector<16x512xf32>
    %30 = arith.mulf %24, %29 : vector<16x512xf32>
    %31 = math.erf %30 : vector<16x512xf32>
    %cst_15 = arith.constant 1.000000e+00 : f32
    %32 = vector.broadcast %cst_15 : f32 to vector<16x512xf32>
    %33 = arith.addf %32, %31 : vector<16x512xf32>
    %34 = arith.mulf %28, %33 : vector<16x512xf32>
    %35 = arith.mulf %26, %34 : vector<16x512xf32>
    %c0_16 = arith.constant 0 : index
    %c0_17 = arith.constant 0 : index
    %36 = vector.load %arg5[%c0_16, %c0_17] : memref<1x512xf32, #tpu.memory_space<vmem>>, vector<1x512xf32>
    %cst_18 = arith.constant dense<0.000000e+00> : vector<16xf32>
    %37 = vector.multi_reduction <add>, %35, %cst_18 [1] : vector<16x512xf32> to vector<16xf32>
    %38 = vector.shape_cast %37 : vector<16xf32> to vector<16x1xf32>
    %cst_19 = arith.constant 5.120000e+02 : f32
    %39 = vector.broadcast %cst_19 : f32 to vector<16x1xf32>
    %40 = arith.divf %38, %39 : vector<16x1xf32>
    %41 = vector.broadcast %40 : vector<16x1xf32> to vector<16x512xf32>
    %42 = arith.subf %35, %41 : vector<16x512xf32>
    %43 = arith.mulf %42, %42 : vector<16x512xf32>
    %cst_20 = arith.constant dense<0.000000e+00> : vector<16xf32>
    %44 = vector.multi_reduction <add>, %43, %cst_20 [1] : vector<16x512xf32> to vector<16xf32>
    %45 = vector.shape_cast %44 : vector<16xf32> to vector<16x1xf32>
    %cst_21 = arith.constant 5.120000e+02 : f32
    %46 = vector.broadcast %cst_21 : f32 to vector<16x1xf32>
    %47 = arith.divf %45, %46 : vector<16x1xf32>
    %48 = vector.broadcast %40 : vector<16x1xf32> to vector<16x512xf32>
    %49 = arith.subf %35, %48 : vector<16x512xf32>
    %cst_22 = arith.constant 9.99999974E-6 : f32
    %50 = vector.broadcast %cst_22 : f32 to vector<16x1xf32>
    %51 = arith.addf %47, %50 : vector<16x1xf32>
    %52 = math.rsqrt %51 : vector<16x1xf32>
    %53 = vector.broadcast %52 : vector<16x1xf32> to vector<16x512xf32>
    %54 = arith.mulf %49, %53 : vector<16x512xf32>
    %55 = vector.broadcast %36 : vector<1x512xf32> to vector<16x512xf32>
    %56 = arith.mulf %54, %55 : vector<16x512xf32>
    %57 = arith.truncf %56 : vector<16x512xf32> to vector<16x512xbf16>
    %c0_23 = arith.constant 0 : index
    %c0_24 = arith.constant 0 : index
    %58 = vector.load %arg6[%c0_23, %c0_24] : memref<512x256xbf16, #tpu.memory_space<vmem>>, vector<512x256xbf16>
    %cst_25 = arith.constant dense<0.000000e+00> : vector<16x256xf32>
    %59 = tpu.matmul %57, %58, %cst_25 {dimension_numbers = #tpu.dot_dimension_numbers<[1], [0], [0], [1], [0, 0, 1, 1], [], []>} : vector<16x512xbf16>, vector<512x256xbf16>, vector<16x256xf32> -> vector<16x256xf32>
    %60 = arith.addf %59, %0 : vector<16x256xf32>
    %c0_26 = arith.constant 0 : index
    %c0_27 = arith.constant 0 : index
    %61 = vector.load %arg7[%c0_26, %c0_27] : memref<16x256xf32, #tpu.memory_space<vmem>>, vector<16x256xf32>
    tpu.vector_store %arg7[%c0_26, %c0_27], %60 {strides = array<i32>} : memref<16x256xf32, #tpu.memory_space<vmem>>, vector<16x256xf32>,
    return
  }
  func.func @transform_0(%arg0: i32) -> (i32, i32) {
    %c0_i32 = arith.constant 0 : i32
    %c0_i32_0 = arith.constant 0 : i32
    return %arg0, %c0_i32 : i32, i32
  }
  func.func @transform_1(%arg0: i32) -> (i32, i32) {
    %c0_i32 = arith.constant 0 : i32
    %c0_i32_0 = arith.constant 0 : i32
    %c0_i32_1 = arith.constant 0 : i32
    return %c0_i32, %c0_i32_0 : i32, i32
  }
  func.func @transform_2(%arg0: i32) -> (i32, i32) {
    %c0_i32 = arith.constant 0 : i32
    %c0_i32_0 = arith.constant 0 : i32
    %c0_i32_1 = arith.constant 0 : i32
    return %c0_i32, %c0_i32_0 : i32, i32
  }
  func.func @transform_3(%arg0: i32) -> (i32, i32) {
    %c0_i32 = arith.constant 0 : i32
    %c0_i32_0 = arith.constant 0 : i32
    %c0_i32_1 = arith.constant 0 : i32
    return %c0_i32, %c0_i32_0 : i32, i32
  }
  func.func @transform_4(%arg0: i32) -> (i32, i32) {
    %c0_i32 = arith.constant 0 : i32
    %c0_i32_0 = arith.constant 0 : i32
    %c0_i32_1 = arith.constant 0 : i32
    return %c0_i32, %c0_i32_0 : i32, i32
  }
  func.func @transform_5(%arg0: i32) -> (i32, i32) {
    %c0_i32 = arith.constant 0 : i32
    %c0_i32_0 = arith.constant 0 : i32
    %c0_i32_1 = arith.constant 0 : i32
    return %c0_i32, %c0_i32_0 : i32, i32
  }
  func.func @transform_6(%arg0: i32) -> (i32, i32) {
    %c0_i32 = arith.constant 0 : i32
    %c0_i32_0 = arith.constant 0 : i32
    return %arg0, %c0_i32 : i32, i32
  }
}

module attributes {stable_mosaic.version = 11 : i64} {
  func.func @_ln_kernel(%arg0: i32, %arg1: memref<16x256xf32, #tpu.memory_space<vmem>>, %arg2: memref<1x256xf32, #tpu.memory_space<vmem>>, %arg3: memref<16x256xf32, #tpu.memory_space<vmem>>) attributes {dimension_semantics = [#tpu.dimension_semantics<parallel>], iteration_bounds = array<i64: 2>, scalar_prefetch = 0 : i64, scratch_operands = 0 : i64, tpu.core_type = #tpu.core_type<tc>, window_params = [{transform_indices = @transform_0, window_bounds = array<i64: 16, 256>}, {pipeline_mode = #tpu.pipeline_mode<synchronous>, transform_indices = @transform_1, window_bounds = array<i64: 1, 256>}, {transform_indices = @transform_2, window_bounds = array<i64: 16, 256>}]} {
    %c0 = arith.constant 0 : index
    %c0_0 = arith.constant 0 : index
    %0 = vector.load %arg1[%c0, %c0_0] : memref<16x256xf32, #tpu.memory_space<vmem>>, vector<16x256xf32>
    %c0_1 = arith.constant 0 : index
    %c0_2 = arith.constant 0 : index
    %1 = vector.load %arg2[%c0_1, %c0_2] : memref<1x256xf32, #tpu.memory_space<vmem>>, vector<1x256xf32>
    %cst = arith.constant dense<0.000000e+00> : vector<16xf32>
    %2 = vector.multi_reduction <add>, %0, %cst [1] : vector<16x256xf32> to vector<16xf32>
    %3 = vector.shape_cast %2 : vector<16xf32> to vector<16x1xf32>
    %cst_3 = arith.constant 2.560000e+02 : f32
    %4 = vector.broadcast %cst_3 : f32 to vector<16x1xf32>
    %5 = arith.divf %3, %4 : vector<16x1xf32>
    %6 = vector.broadcast %5 : vector<16x1xf32> to vector<16x256xf32>
    %7 = arith.subf %0, %6 : vector<16x256xf32>
    %8 = arith.mulf %7, %7 : vector<16x256xf32>
    %cst_4 = arith.constant dense<0.000000e+00> : vector<16xf32>
    %9 = vector.multi_reduction <add>, %8, %cst_4 [1] : vector<16x256xf32> to vector<16xf32>
    %10 = vector.shape_cast %9 : vector<16xf32> to vector<16x1xf32>
    %cst_5 = arith.constant 2.560000e+02 : f32
    %11 = vector.broadcast %cst_5 : f32 to vector<16x1xf32>
    %12 = arith.divf %10, %11 : vector<16x1xf32>
    %13 = vector.broadcast %5 : vector<16x1xf32> to vector<16x256xf32>
    %14 = arith.subf %0, %13 : vector<16x256xf32>
    %cst_6 = arith.constant 9.99999974E-6 : f32
    %15 = vector.broadcast %cst_6 : f32 to vector<16x1xf32>
    %16 = arith.addf %12, %15 : vector<16x1xf32>
    %17 = math.rsqrt %16 : vector<16x1xf32>
    %18 = vector.broadcast %17 : vector<16x1xf32> to vector<16x256xf32>
    %19 = arith.mulf %14, %18 : vector<16x256xf32>
    %20 = vector.broadcast %1 : vector<1x256xf32> to vector<16x256xf32>
    %21 = arith.mulf %19, %20 : vector<16x256xf32>
    %c0_7 = arith.constant 0 : index
    %c0_8 = arith.constant 0 : index
    %22 = vector.load %arg3[%c0_7, %c0_8] : memref<16x256xf32, #tpu.memory_space<vmem>>, vector<16x256xf32>
    tpu.vector_store %arg3[%c0_7, %c0_8], %21 {strides = array<i32>} : memref<16x256xf32, #tpu.memory_space<vmem>>, vector<16x256xf32>,
    return
  }
  func.func @transform_0(%arg0: i32) -> (i32, i32) {
    %c0_i32 = arith.constant 0 : i32
    %c0_i32_0 = arith.constant 0 : i32
    return %arg0, %c0_i32 : i32, i32
  }
  func.func @transform_1(%arg0: i32) -> (i32, i32) {
    %c0_i32 = arith.constant 0 : i32
    %c0_i32_0 = arith.constant 0 : i32
    %c0_i32_1 = arith.constant 0 : i32
    return %c0_i32, %c0_i32_0 : i32, i32
  }
  func.func @transform_2(%arg0: i32) -> (i32, i32) {
    %c0_i32 = arith.constant 0 : i32
    %c0_i32_0 = arith.constant 0 : i32
    return %arg0, %c0_i32 : i32, i32
  }
}

</mosaic_0001>

<bundles_post_ra>
// kernel: transformer_blocks_forward.7
= control target key start
LH: loop header
LB: loop body
LE: loop exit
PB: predicated region body
PF: predicated region fallthrough
CT: control target
= control target key end

     0   :  { %13 = vsyncpa [#allocation3], 0  ;;  %s3038_s0 = inlined_call_operand.hbm [shape: f32[2,16,256], index: 0, kind: input, shape index: {}]   ;;  %s3039_s1 = inlined_call_operand.vmem [shape: f32[1,256], index: 1, kind: input, shape index: {}]   ;;  %s3040_s2 = inlined_call_operand.hbm [shape: bf16[256,768], index: 2, kind: input, shape index: {}]   ;;  %s3041_s3 = inlined_call_operand.vmem [shape: f32[2,128], index: 3, kind: input, shape index: {}]   ;;  %s3042_s4 = inlined_call_operand.vmem [shape: f32[2,128], index: 4, kind: input, shape index: {}]   ;;  %s3043_s5 = inlined_call_operand.vmem [shape: f32[1,128], index: 5, kind: input, shape index: {}]   ;;  %s3044_s6 = inlined_call_operand.vmem [shape: f32[1,128], index: 6, kind: input, shape index: {}]   ;;  %s3045_s7 = inlined_call_operand.hbm [shape: bf16[256,256], index: 7, kind: input, shape index: {}]   ;;  %s3046_s8 = inlined_call_operand.vmem [shape: f32[2,16,256], index: 8, kind: output, shape index: {}]  }
   0x1   :  { %15 = vsyncpa [#allocation3 + $0x1], 0 }
   0x2   :  { %16 = vsyncpa [#allocation5], 0  ;;  %s2572_s27 = smov 0   ;;  %s2574_s28 = smov 0  }
   0x3   :  { %s2576_s29 = smov 0   ;;  %s2578_s30 = smov 0  }
   0x4 LB: > { %s2591_s9 = sadd.s32 4294967295, %s2514_s30   ;;  %p42_p0 = scmp.ne.s32.totalorder %s2506_s28, %s2502_s27  ;;  %s2514_s30 = sphi %s2578_s30, %s3062_s30   ;;  %s2510_s29 = sphi %s2576_s29, %s3061_s29   ;;  %s2506_s28 = sphi %s2574_s28, %s3060_s28   ;;  %s2502_s27 = sphi %s2572_s27, %s3059_s27  }
   0x5   : > { %p3047_p1 = scmp.eq.s32.totalorder %s2591_s9, 0  ;;  %p1879_p2 = scmp.ge.s32.totalorder %s2514_s30, 1 }
   0x6   : > { %p226_p3 = scmp.lt.s32.totalorder %s2514_s30, 3  ;;  %s2516_s12 = smov [#allocation4]  }
   0x7   : > { %p2599_p4 = por %p3047_p1, %p42_p0  ;;  %s241_s13 = sshll.u32 %s2516_s12, 4  ;;  %s242_s13 = int_to_ptr.vmem [resolvable:$true] %s241_s13 }
   0x8   : > { %p2603_p5 = pnand %p1879_p2, %p226_p3  ;;  %s2517_s15 = smov [#allocation6]  }
   0x9   : > { %s3050_s10 = scalar_select %p2599_p4, 1, 0 }
   0xa   : > { %s3051_s11 = scalar_select %p2603_p5, 1, 0 }
   0xb   : > { %p2068_p6 = pneg %p2603_p5  ;;  %s266_s16 = sshll.u32 %s2517_s15, 4  ;;  %s2615_s16 = int_to_ptr.vmem [resolvable:$true] %s266_s16 }
   0xc   : > { %s2390_s19 = scalar_lea.hbm %s3040_s2, 12288 }
   0xd   : > { %p2611_p7 = pnand %p2068_p6, %p3047_p1  ;;  %p2391_p8 = scmp.ne.s32.totalorder %s3040_s2, %s2390_s19 }
   0xe   : > { %p2397_p12 = scmp.lt.u32.totalorder %s2390_s19, %s3040_s2 }
   0xf   : > { %p2392_p9 = pneg %p2611_p7 }
  0x11   : > { %p2393_p10 = pnand %p2392_p9, %p2391_p8 }
  0x13   : > { %p2394_p11 = pneg %p2393_p10 }
  0x15   : > { %p2399_p13 = pnand %p2397_p12, %p2394_p11 }
  0x17   : > { %2402 = shalt.err (!%p2399_p13)
}
  0x18   : > { %s2403_s24 = scalar_lea.vmem %s242_s13, 12288  ;;  %p2411_p6 = scmp.lt.s32.totalorder %s242_s13, %s242_s13 }
  0x19   : > { %p2404_p0 = scmp.ne.s32.totalorder %s242_s13, %s2403_s24  ;;  %p2412_p1 = scmp.lt.s32.totalorder %s2403_s24, %s2403_s24 }
  0x1b   : > { %p2406_p2 = pnand %p2404_p0, %p2392_p9  ;;  %p2413_p4 = por %p2412_p1, %p2411_p6 }
  0x1d   : > { %p2407_p3 = pneg %p2406_p2 }
  0x1f   : > { %p2414_p5 = pnand %p2413_p4, %p2407_p3 }
  0x21   : > { %2417 = shalt.err (!%p2414_p5)
}
  0x22   : > { %s2518_s25 = smov 384   ;;  %s2519_s26 = smov 24  }
  0x23   : > { %2071 = dma.hbm_to_vmem [thread:$0]  (!%p2611_p7), %s3040_s2, 12288, %s242_s13, [#allocation5], %s2518_s25, %s2518_s25, %s2519_s26  }
  0x24   : > { %s2418_s18 = scalar_lea.hbm %s3045_s7, 4096 }
  0x25   : > { %p2419_p8 = scmp.ne.s32.totalorder %s3045_s7, %s2418_s18  ;;  %p2425_p5 = scmp.lt.u32.totalorder %s2418_s18, %s3045_s7 }
  0x27   : > { %p2421_p1 = pnand %p2419_p8, %p2392_p9 }
  0x29   : > { %p2422_p4 = pneg %p2421_p1 }
  0x2b   : > { %p2427_p10 = pnand %p2425_p5, %p2422_p4 }
  0x2d   : > { %2430 = shalt.err (!%p2427_p10)
}
  0x2e   : > { %s2431_s13 = scalar_lea.vmem %s2615_s16, 4096  ;;  %p2439_p0 = scmp.lt.s32.totalorder %s2615_s16, %s2615_s16 }
  0x2f   : > { %p2432_p11 = scmp.ne.s32.totalorder %s2615_s16, %s2431_s13  ;;  %p2440_p2 = scmp.lt.s32.totalorder %s2431_s13, %s2431_s13 }
  0x31   : > { %p2434_p12 = pnand %p2432_p11, %p2392_p9  ;;  %p2441_p3 = por %p2440_p2, %p2439_p0 }
  0x33   : > { %p2435_p13 = pneg %p2434_p12 }
  0x35   : > { %p2442_p6 = pnand %p2441_p3, %p2435_p13 }
  0x37   : > { %2445 = shalt.err (!%p2442_p6)
}
  0x38   : > { %s2520_s23 = smov 128   ;;  %s2521_s24 = smov 8  }
  0x39   : > { %2074 = dma.hbm_to_vmem [thread:$0]  (!%p2611_p7), %s3045_s7, 4096, %s2615_s16, [#allocation5], %s2520_s23, %s2520_s23, %s2521_s24  }
  0x3a   : > { %s2665_s27 = sadd.s32 1, %s2514_s30   ;;  %s29_s15 = sadd.s32 1, %s2510_s29 }
  0x3b   : > { %s26_s12 = ssub.s32 %s2514_s30, %s2665_s27  ;;  %p36_p8 = scmp.ne.s32.totalorder %s2510_s29, %s2506_s28 }
  0x3c   : > { %p27_p9 = scmp.eq.s32.totalorder %s26_s12, 0  ;;  %p37_p1 = scmp.eq.s32.totalorder %s2514_s30, 0 }
  0x3d   : > { %p2081_p5 = scmp.lt.s32.totalorder %s2514_s30, 2  ;;  %s280_s18 = sand.u32 1, %s2510_s29  }
  0x3e   : > { %s2674_s17 = scalar_select %p27_p9, %s2510_s29, %s29_s15  }
  0x3f   : > { %p38_p4 = por %p37_p1, %p36_p8  ;;  %s2024_s19 = sshll.u32 %s2514_s30, 9 }
  0x40   : > { %s1883_s20 = sshll.u32 %s280_s18, 5  ;;  %s2682_s22 = scalar_lea.hbm %s3038_s0, %s2024_s19 }
  0x41   : > { %s284_s16 = scalar_lea.vmem [#allocation2], %s1883_s20  ;;  %p2684_p7 = pnand %p2081_p5, %p38_p4 }
  0x42   : > { %s291_s13 = sshll.u32 %s284_s16, 4  ;;  %s2690_s30 = scalar_lea.sflag [#allocation3], %s280_s18  ;;  %s2688_s13 = int_to_ptr.vmem [resolvable:$true] %s291_s13 }
  0x43   : > { %s2446_s24 = scalar_lea.hbm %s2682_s22, 512  ;;  %p2448_p11 = pneg %p2684_p7 }
  0x44   : > { %p2447_p10 = scmp.ne.s32.totalorder %s2682_s22, %s2446_s24  ;;  %s2451_s12 = scalar_lea.hbm %s3038_s0, 1024 }
  0x45   : > { %p2452_p0 = scmp.lt.u32.totalorder %s2682_s22, %s3038_s0  ;;  %p2453_p2 = scmp.lt.u32.totalorder %s2451_s12, %s2446_s24 }
  0x46   : > { %p2449_p12 = pnand %p2448_p11, %p2447_p10  ;;  %p2455_p6 = scmp.lt.u32.totalorder %s2446_s24, %s2682_s22 }
  0x47   : > { %p2454_p3 = por %p2453_p2, %p2452_p0 }
  0x48   : > { %p2450_p13 = pneg %p2449_p12 }
  0x49   : > { %p2456_p9 = por %p2455_p6, %p2454_p3 }
  0x4b   : > { %p2457_p8 = pnand %p2456_p9, %p2450_p13 }
  0x4d   : > { %2460 = shalt.err (!%p2457_p8)
}
  0x4e   : > { %s2461_s18 = scalar_lea.vmem %s2688_s13, 512  ;;  %s2522_s20 = smov [#allocation2]  }
  0x4f   : > { %p2462_p1 = scmp.ne.s32.totalorder %s2688_s13, %s2461_s18  ;;  %s2466_s14 = sshll.u32 %s2522_s20, 4  ;;  %s2467_s14 = int_to_ptr.vmem [resolvable:$false] %s2466_s14 }
  0x50   : > { %s2468_s21 = scalar_lea.vmem %s2467_s14, 1024  ;;  %p2469_p10 = scmp.lt.s32.totalorder %s2688_s13, %s2467_s14 }
  0x51   : > { %p2464_p4 = pnand %p2462_p1, %p2448_p11  ;;  %p2470_p12 = scmp.lt.s32.totalorder %s2468_s21, %s2461_s18 }
  0x53   : > { %p2465_p5 = pneg %p2464_p4  ;;  %p2471_p0 = por %p2470_p12, %p2469_p10 }
  0x55   : > { %p2472_p2 = pnand %p2471_p0, %p2465_p5 }
  0x57   : > { %2475 = shalt.err (!%p2472_p2)
}
  0x58   : > { %s2523_s16 = smov 256   ;;  %s2524_s24 = smov 16  }
  0x59   : > { %2078 = dma.hbm_to_vmem [thread:$0]  (!%p2684_p7), %s2682_s22, 512, %s2688_s13, %s2690_s30, %s2523_s16, %s2523_s16, %s2524_s24  }
  0x5a   : > { %p3054_p11 = scmp.ne.s32.totalorder %s3051_s11, 0 }
  0x5b   : > { %s305_s25 = sand.u32 (!%p3054_p11), 1, %s2506_s28   ;;  %p3055_p13 = scmp.ne.s32.totalorder (!%p3054_p11), %s3050_s10, 0 }
  0x5c   : > { %303 = sbr.rel (%p3054_p11) target bundleno = 1645 (0x66d), region = 52  ;;  %s1887_s26 = sshll.u32 (!%p3054_p11), %s305_s25, 5 }
  0x5d   : > { %s306_s12 = scalar_lea.sflag (!%p3054_p11), [#allocation3], %s305_s25  ;;  %s2721_s15 = scalar_lea.vmem (!%p3054_p11), [#allocation2], %s1887_s26 }
  0x63   : > { %2493 = dma.done.wait (%p3055_p13), %s306_s12, 512  }
  0x64   : > { %2495 = vsyncadd (%p3055_p13), %s306_s12, 4294966784  ;;  %p3056_p3 = scmp.eq.s32.totalorder %s2591_s9, 0 }
  0x66   : > { %2497 = dma.done.wait (%p3056_p3), [#allocation5], 16384   ;;  %p3057_p7 = pmov %p3056_p3 }
  0x67   : > { %v2732_v0 = vld [vmem:[%s2721_s15] sm:$0xff]  ;;  %v2735_v1 = vld [vmem:[%s2721_s15 + $0x8] sm:$0xff]  ;;  %v2738_v2 = vld [vmem:[%s2721_s15 + $0x10] sm:$0xff]  ;;  %vm1399_vm0 = vcmask 1041409   ;;  %vm1190_vm1 = vcmask 1040384   ;;  %vm2526_vm2 = vmmov 0  }
  0x68   : > { %2499 = vsyncadd (%p3057_p7), [#allocation5], 4294950912  ;;  %v361_v3 = vadd.f32 %v2735_v1, %v2732_v0  ;;  %v2743_v4 = vld [vmem:[%s2721_s15 + $0x18] sm:$0xff]  ;;  %v2129_v8 = vld [vmem:[#allocation4 + $0xc] ss:$24 sps:$4 sm:$0xff]   ;;  %p350_p6 = scmp.lt.s32.totalorder %s2591_s9, 1 }
  0x69   : > { %v364_v5 = vadd.f32 %v2743_v4, %v2738_v2  ;;  %v2126_v6 = vld [vmem:[#allocation4 + $0x4] ss:$24 sps:$4 sm:$0xff]   ;;  %v2128_v7 = vld [vmem:[#allocation4] ss:$24 sps:$4 sm:$0xff]   ;;  %v2132_v10 = vld [vmem:[#allocation4 + $0x34] ss:$24 sps:$4 sm:$0xff]   ;;  %1030 = vmatprep.subr.bf16.mxu1 %v2129_v8 }
  0x6a   : > { %362 = vadd.xlane.f32.xlu0 %v361_v3  ;;  %v2131_v9 = vld [vmem:[#allocation4 + $0x8] ss:$24 sps:$4 sm:$0xff]   ;;  %987 = vmatprep.subr.bf16.mxu0 %v2126_v6  ;;  %v2135_v11 = vld [vmem:[#allocation4 + $0x3c] ss:$24 sps:$4 sm:$0xff]   ;;  %v2137_v13 = vld [vmem:[#allocation4 + $0x38] ss:$24 sps:$4 sm:$0xff]  }
  0x6b   : > { %988 = vmatpush1.bf16.msra.mxu0 %v2128_v7  ;;  %1031 = vmatpush1.bf16.msra.mxu1 %v2131_v9  ;;  %v2134_v12 = vld [vmem:[#allocation4 + $0x30] ss:$24 sps:$4 sm:$0xff]   ;;  %v2138_v14 = vld [vmem:[#allocation4 + $0x64] ss:$24 sps:$4 sm:$0xff]   ;;  %v2140_v16 = vld [vmem:[#allocation4 + $0x60] ss:$24 sps:$4 sm:$0xff]  }
  0x6c   : > { %989 = vmatprep.subr.bf16.mxu0 %v2132_v10  ;;  %1032 = vmatprep.subr.bf16.mxu1 %v2135_v11  ;;  %v2141_v15 = vld [vmem:[#allocation4 + $0x6c] ss:$24 sps:$4 sm:$0xff]   ;;  %v2143_v17 = vld [vmem:[#allocation4 + $0x68] ss:$24 sps:$4 sm:$0xff]   ;;  %v2147_v19 = vld [vmem:[#allocation4 + $0x9c] ss:$24 sps:$4 sm:$0xff]  }
  0x6d   : > { %v2144_v18 = vld [vmem:[#allocation4 + $0x94] ss:$24 sps:$4 sm:$0xff]   ;;  %v2146_v20 = vld [vmem:[#allocation4 + $0x90] ss:$24 sps:$4 sm:$0xff]   ;;  %v2150_v22 = vld [vmem:[#allocation4 + $0xc4] ss:$24 sps:$4 sm:$0xff]  }
  0x6e   : > { %365 = vadd.xlane.f32.xlu0 %v364_v5  ;;  %v2149_v21 = vld [vmem:[#allocation4 + $0x98] ss:$24 sps:$4 sm:$0xff]   ;;  %v2153_v23 = vld [vmem:[#allocation4 + $0xcc] ss:$24 sps:$4 sm:$0xff]   ;;  %v2155_v25 = vld [vmem:[#allocation4 + $0xc8] ss:$24 sps:$4 sm:$0xff]  }
  0x6f   : > { %990 = vmatpush1.bf16.msra.mxu0 %v2134_v12  ;;  %1033 = vmatpush1.bf16.msra.mxu1 %v2137_v13  ;;  %v2152_v24 = vld [vmem:[#allocation4 + $0xc0] ss:$24 sps:$4 sm:$0xff]   ;;  %v2156_v26 = vld [vmem:[#allocation4 + $0xf4] ss:$24 sps:$4 sm:$0xff]   ;;  %v2158_v28 = vld [vmem:[#allocation4 + $0xf0] ss:$24 sps:$4 sm:$0xff]  }
  0x70   : > { %991 = vmatprep.subr.bf16.mxu0 %v2138_v14  ;;  %1034 = vmatprep.subr.bf16.mxu1 %v2141_v15  ;;  %v2159_v27 = vld [vmem:[#allocation4 + $0xfc] ss:$24 sps:$4 sm:$0xff]   ;;  %v2161_v29 = vld [vmem:[#allocation4 + $0xf8] ss:$24 sps:$4 sm:$0xff]   ;;  %v2165_v31 = vld [vmem:[#allocation4 + $0x12c] ss:$24 sps:$4 sm:$0xff]  }
  0x71   : > { %v2162_v30 = vld [vmem:[#allocation4 + $0x124] ss:$24 sps:$4 sm:$0xff]   ;;  %v2164_v32 = vld [vmem:[#allocation4 + $0x120] ss:$24 sps:$4 sm:$0xff]   ;;  %v2168_v34 = vld [vmem:[#allocation4 + $0x154] ss:$24 sps:$4 sm:$0xff]  }
  0x72   : > { %v2167_v33 = vld [vmem:[#allocation4 + $0x128] ss:$24 sps:$4 sm:$0xff]   ;;  %v2171_v35 = vld [vmem:[#allocation4 + $0x15c] ss:$24 sps:$4 sm:$0xff]   ;;  %v2173_v37 = vld [vmem:[#allocation4 + $0x158] ss:$24 sps:$4 sm:$0xff]  }
  0x73   : > { %992 = vmatpush1.bf16.msra.mxu0 %v2140_v16  ;;  %1035 = vmatpush1.bf16.msra.mxu1 %v2143_v17  ;;  %v2170_v36 = vld [vmem:[#allocation4 + $0x150] ss:$24 sps:$4 sm:$0xff]   ;;  %v2174_v38 = vld [vmem:[#allocation4 + $0x184] ss:$24 sps:$4 sm:$0xff]   ;;  %v2176_v40 = vld [vmem:[#allocation4 + $0x180] ss:$24 sps:$4 sm:$0xff]  }
  0x74   : > { %993 = vmatprep.subr.bf16.mxu0 %v2144_v18  ;;  %1036 = vmatprep.subr.bf16.mxu1 %v2147_v19  ;;  %v2177_v39 = vld [vmem:[#allocation4 + $0x18c] ss:$24 sps:$4 sm:$0xff]   ;;  %v2179_v41 = vld [vmem:[#allocation4 + $0x188] ss:$24 sps:$4 sm:$0xff]   ;;  %v2183_v43 = vld [vmem:[#allocation4 + $0x1bc] ss:$24 sps:$4 sm:$0xff]  }
  0x75   : > { %v2180_v42 = vld [vmem:[#allocation4 + $0x1b4] ss:$24 sps:$4 sm:$0xff]   ;;  %v2182_v44 = vld [vmem:[#allocation4 + $0x1b0] ss:$24 sps:$4 sm:$0xff]   ;;  %v2186_v60 = vld [vmem:[#allocation4 + $0x1e4] ss:$24 sps:$4 sm:$0xff]  }
  0x76   : > { %v2185_v45 = vld [vmem:[#allocation4 + $0x1b8] ss:$24 sps:$4 sm:$0xff]   ;;  %v2189_v62 = vld [vmem:[#allocation4 + $0x1ec] ss:$24 sps:$4 sm:$0xff]   ;;  %v2191_v63 = vld [vmem:[#allocation4 + $0x1e8] ss:$24 sps:$4 sm:$0xff]  }
  0x77   : > { %994 = vmatpush1.bf16.msra.mxu0 %v2146_v20  ;;  %1037 = vmatpush1.bf16.msra.mxu1 %v2149_v21  ;;  %v2188_v61 = vld [vmem:[#allocation4 + $0x1e0] ss:$24 sps:$4 sm:$0xff]   ;;  %v2201_v6 = vld [vmem:[#allocation4 + $0x24c] ss:$24 sps:$4 sm:$0xff]   ;;  %v2207_v9 = vld [vmem:[#allocation4 + $0x27c] ss:$24 sps:$4 sm:$0xff]  }
  0x78   : > { %995 = vmatprep.subr.bf16.mxu0 %v2150_v22  ;;  %1038 = vmatprep.subr.bf16.mxu1 %v2153_v23  ;;  %v2197_v3 = vld [vmem:[#allocation4 + $0x218] ss:$24 sps:$4 sm:$0xff]   ;;  %v2203_v7 = vld [vmem:[#allocation4 + $0x248] ss:$24 sps:$4 sm:$0xff]   ;;  %v2204_v8 = vld [vmem:[#allocation4 + $0x274] ss:$24 sps:$4 sm:$0xff]  }
  0x79   : > { %v2200_v5 = vld [vmem:[#allocation4 + $0x240] ss:$24 sps:$4 sm:$0xff]   ;;  %v2206_v10 = vld [vmem:[#allocation4 + $0x270] ss:$24 sps:$4 sm:$0xff]   ;;  %v2210_v12 = vld [vmem:[#allocation4 + $0x2a4] ss:$24 sps:$4 sm:$0xff]  }
  0x7a   : > { %v2209_v11 = vld [vmem:[#allocation4 + $0x278] ss:$24 sps:$4 sm:$0xff]   ;;  %v2213_v13 = vld [vmem:[#allocation4 + $0x2ac] ss:$24 sps:$4 sm:$0xff]   ;;  %v2215_v15 = vld [vmem:[#allocation4 + $0x2a8] ss:$24 sps:$4 sm:$0xff]  }
  0x7b   : > { %996 = vmatpush1.bf16.msra.mxu0 %v2152_v24  ;;  %1039 = vmatpush1.bf16.msra.mxu1 %v2155_v25  ;;  %v2212_v14 = vld [vmem:[#allocation4 + $0x2a0] ss:$24 sps:$4 sm:$0xff]   ;;  %v2216_v16 = vld [vmem:[#allocation4 + $0x2d4] ss:$24 sps:$4 sm:$0xff]   ;;  %v2218_v18 = vld [vmem:[#allocation4 + $0x2d0] ss:$24 sps:$4 sm:$0xff]  }
  0x7c   : > { %997 = vmatprep.subr.bf16.mxu0 %v2156_v26  ;;  %1040 = vmatprep.subr.bf16.mxu1 %v2159_v27  ;;  %v2219_v17 = vld [vmem:[#allocation4 + $0x2dc] ss:$24 sps:$4 sm:$0xff]   ;;  %v2221_v19 = vld [vmem:[#allocation4 + $0x2d8] ss:$24 sps:$4 sm:$0xff]   ;;  %v395_v26 = vlaneseq  ;;  %s3064_s9 = smov (!%p350_p6, %s2591_s9), 1 }
  0x7d   : > { %v2224_v20 = vld [vmem:[#allocation4 + $0x14] ss:$24 sps:$4 sm:$0xff]   ;;  %s2025_s21 = sshll.u32 %s3064_s9, 5 }
  0x7e   : > { %s354_s25 = scalar_lea.vmem %s3046_s8, %s2025_s21 }
  0x7f   : > { %998 = vmatpush1.bf16.msra.mxu0 %v2158_v28  ;;  %1041 = vmatpush1.bf16.msra.mxu1 %v2161_v29  ;;  %v396_v28 = vshrl.u32 %v395_v26, 7  ;;  %v2814_v26 = vld [vmem:[%s3041_s3] sm:$0x3] }
  0x80   : > { %999 = vmatprep.subr.bf16.mxu0 %v2162_v30  ;;  %1042 = vmatprep.subr.bf16.mxu1 %v2165_v31 }
  0x81   : > { %v2767_v29 = vsub.s32 0, %v396_v28  ;;  %v2769_v30 = vsub.s32 1, %v396_v28  ;;  %v1189_v28 = vmul.f32 %v2814_v26, %v2814_v26 }
  0x83   : > { %1000 = vmatpush1.bf16.msra.mxu0 %v2164_v32  ;;  %1043 = vmatpush1.bf16.msra.mxu1 %v2167_v33  ;;  %v360_v32 = vld [vmem:[%s3039_s1] sm:$0x3] }
  0x84   : > { %1001 = vmatprep.subr.bf16.mxu0 %v2168_v34  ;;  %1044 = vmatprep.subr.bf16.mxu1 %v2171_v35  ;;  %v402_v34 = vrot.slane %v360_v32, %v2769_v30 }
  0x87   : > { %1002 = vmatpush1.bf16.msra.mxu0 %v2170_v36  ;;  %1045 = vmatpush1.bf16.msra.mxu1 %v2173_v37  ;;  %v398_v36 = vrot.slane %v360_v32, %v2767_v29 }
  0x88   : > { %1003 = vmatprep.subr.bf16.mxu0 %v2174_v38  ;;  %1046 = vmatprep.subr.bf16.mxu1 %v2177_v39 }
  0x8b   : > { %1004 = vmatpush1.bf16.msra.mxu0 %v2176_v40  ;;  %1047 = vmatpush1.bf16.msra.mxu1 %v2179_v41 }
  0x8c   : > { %1005 = vmatprep.subr.bf16.mxu0 %v2180_v42  ;;  %1048 = vmatprep.subr.bf16.mxu1 %v2183_v43 }
  0x8f   : > { %1006 = vmatpush1.bf16.msra.mxu0 %v2182_v44  ;;  %1049 = vmatpush1.bf16.msra.mxu1 %v2185_v45  ;;  %v2222_v45 = vld [vmem:[#allocation4 + $0x10] ss:$24 sps:$4 sm:$0xff]  }
  0x90   : > { %1007 = vmatprep.subr.bf16.mxu0 %v2186_v60  ;;  %1050 = vmatprep.subr.bf16.mxu1 %v2189_v62  ;;  %v2243_v60 = vld [vmem:[#allocation4 + $0x160] ss:$24 sps:$4 sm:$0xff]   ;;  %v2246_v62 = vld [vmem:[#allocation4 + $0x190] ss:$24 sps:$4 sm:$0xff]  }
  0x93   : > { %1008 = vmatpush1.bf16.msra.mxu0 %v2188_v61  ;;  %1051 = vmatpush1.bf16.msra.mxu1 %v2191_v63  ;;  %v2248_v61 = vld [vmem:[#allocation4 + $0x194] ss:$24 sps:$4 sm:$0xff]   ;;  %v2251_v63 = vld [vmem:[#allocation4 + $0x1c4] ss:$24 sps:$4 sm:$0xff]  }
  0xf7   : > { %v363_v46 = vpop.xlane.xlu0 %362 }
  0xf8   : > { %v368_v47 = vmul.f32 0.00390625, %v363_v46 }
  0xfa   : > { %v2748_v48 = vsub.f32 %v2732_v0, %v368_v47  ;;  %v2751_v49 = vsub.f32 %v2735_v1, %v368_v47  ;;  %v2192_v0 = vld [vmem:[#allocation4 + $0x214] ss:$24 sps:$4 sm:$0xff]   ;;  %v2194_v1 = vld [vmem:[#allocation4 + $0x210] ss:$24 sps:$4 sm:$0xff]   ;;  %v2227_v47 = vld [vmem:[#allocation4 + $0x44] ss:$24 sps:$4 sm:$0xff]  }
  0xfb   : > { %v366_v50 = vpop.xlane.xlu0 %365  ;;  %1009 = vmatprep.subr.bf16.mxu0 %v2192_v0  ;;  %v2249_v0 = vld [vmem:[#allocation4 + $0x1c0] ss:$24 sps:$4 sm:$0xff]  }
  0xfc   : > { %v369_v51 = vmul.f32 0.00390625, %v366_v50  ;;  %v374_v52 = vmul.f32 %v2748_v48, %v2748_v48  ;;  %v375_v53 = vmul.f32 %v2751_v49, %v2751_v49  ;;  %1010 = vmatpush1.bf16.msra.mxu0 %v2194_v1  ;;  %v2228_v50 = vld [vmem:[#allocation4 + $0x70] ss:$24 sps:$4 sm:$0xff]   ;;  %v2254_v1 = vld [vmem:[#allocation4 + $0x1f4] ss:$24 sps:$4 sm:$0xff]  }
  0xfe   : > { %v2758_v54 = vsub.f32 %v2738_v2, %v369_v51  ;;  %v2761_v55 = vsub.f32 %v2743_v4, %v369_v51  ;;  %v378_v56 = vadd.f32 %v375_v53, %v374_v52  ;;  %v2195_v2 = vld [vmem:[#allocation4 + $0x21c] ss:$24 sps:$4 sm:$0xff]   ;;  %v2231_v52 = vld [vmem:[#allocation4 + $0xa0] ss:$24 sps:$4 sm:$0xff]  }
  0xff   : > { %1052 = vmatprep.subr.bf16.mxu1 %v2195_v2  ;;  %v2198_v4 = vld [vmem:[#allocation4 + $0x244] ss:$24 sps:$4 sm:$0xff]   ;;  %v2236_v53 = vld [vmem:[#allocation4 + $0xd4] ss:$24 sps:$4 sm:$0xff]   ;;  %v2252_v2 = vld [vmem:[#allocation4 + $0x1f0] ss:$24 sps:$4 sm:$0xff]  }
 0x100   : > { %379 = vadd.xlane.f32.xlu1 %v378_v56  ;;  %v376_v57 = vmul.f32 %v2758_v54, %v2758_v54  ;;  %v377_v58 = vmul.f32 %v2761_v55, %v2761_v55  ;;  %1053 = vmatpush1.bf16.msra.mxu1 %v2197_v3  ;;  %v2233_v51 = vld [vmem:[#allocation4 + $0xa4] ss:$24 sps:$4 sm:$0xff]   ;;  %v2237_v56 = vld [vmem:[#allocation4 + $0x100] ss:$24 sps:$4 sm:$0xff]  }
 0x101   : > { %1011 = vmatprep.subr.bf16.mxu0 %v2198_v4  ;;  %1054 = vmatprep.subr.bf16.mxu1 %v2201_v6  ;;  %v2257_v3 = vld [vmem:[#allocation4 + $0x224] ss:$24 sps:$4 sm:$0xff]   ;;  %v2255_v4 = vld [vmem:[#allocation4 + $0x220] ss:$24 sps:$4 sm:$0xff]   ;;  %v2258_v6 = vld [vmem:[#allocation4 + $0x250] ss:$24 sps:$4 sm:$0xff]  }
 0x102   : > { %v381_v59 = vadd.f32 %v377_v58, %v376_v57  ;;  %1012 = vmatpush1.bf16.msra.mxu0 %v2200_v5  ;;  %v2242_v57 = vld [vmem:[#allocation4 + $0x134] ss:$24 sps:$4 sm:$0xff]   ;;  %v2240_v58 = vld [vmem:[#allocation4 + $0x130] ss:$24 sps:$4 sm:$0xff]  }
 0x103   : > { %1013 = vmatprep.subr.bf16.mxu0 %v2204_v8  ;;  %v2260_v5 = vld [vmem:[#allocation4 + $0x254] ss:$24 sps:$4 sm:$0xff]   ;;  %v2261_v8 = vld [vmem:[#allocation4 + $0x280] ss:$24 sps:$4 sm:$0xff]  }
 0x104   : > { %382 = vadd.xlane.f32.xlu1 %v381_v59  ;;  %1055 = vmatpush1.bf16.msra.mxu1 %v2203_v7  ;;  %v2245_v59 = vld [vmem:[#allocation4 + $0x164] ss:$24 sps:$4 sm:$0xff]  }
 0x105   : > { %1056 = vmatprep.subr.bf16.mxu1 %v2207_v9  ;;  %v2263_v7 = vld [vmem:[#allocation4 + $0x284] ss:$24 sps:$4 sm:$0xff]   ;;  %v2266_v9 = vld [vmem:[#allocation4 + $0x2b4] ss:$24 sps:$4 sm:$0xff]  }
 0x106   : > { %1014 = vmatpush1.bf16.msra.mxu0 %v2206_v10  ;;  %v2264_v10 = vld [vmem:[#allocation4 + $0x2b0] ss:$24 sps:$4 sm:$0xff]  }
 0x107   : > { %1015 = vmatprep.subr.bf16.mxu0 %v2210_v12  ;;  %v2267_v12 = vld [vmem:[#allocation4 + $0x2e0] ss:$24 sps:$4 sm:$0xff]  }
 0x108   : > { %1057 = vmatpush1.bf16.msra.mxu1 %v2209_v11  ;;  %v2269_v11 = vld [vmem:[#allocation4 + $0x2e4] ss:$24 sps:$4 sm:$0xff]  }
 0x109   : > { %1058 = vmatprep.subr.bf16.mxu1 %v2213_v13 }
 0x10a   : > { %1016 = vmatpush1.bf16.msra.mxu0 %v2212_v14 }
 0x10b   : > { %1017 = vmatprep.subr.bf16.mxu0 %v2216_v16 }
 0x10c   : > { %1059 = vmatpush1.bf16.msra.mxu1 %v2215_v15 }
 0x10d   : > { %1060 = vmatprep.subr.bf16.mxu1 %v2219_v17 }
 0x10e   : > { %1018 = vmatpush1.bf16.msra.mxu0 %v2218_v18 }
 0x10f   : > { %1073 = vmatprep.subr.bf16.mxu0 %v2224_v20 }
 0x110   : > { %1061 = vmatpush1.bf16.msra.mxu1 %v2221_v19 }
 0x18d   : > { %v380_v21 = vpop.xlane.xlu1 %379 }
 0x18e   : > { %v384_v22 = vmul.f32 0.00390625, %v380_v21 }
 0x190   : > { %v386_v23 = vadd.f32 1e-05, %v384_v22 }
 0x191   : > { %v383_v24 = vpop.xlane.xlu1 %382 }
 0x192   : > { %2318 = vrsqrt.f32 %v386_v23  ;;  %v385_v25 = vmul.f32 0.00390625, %v383_v24 }
 0x194   : > { %v387_v27 = vadd.f32 1e-05, %v385_v25 }
 0x196   : > { %2320 = vrsqrt.f32 %v387_v27 }
 0x19c   : > { %v2319_v31 = vpop.eup %2318 }
 0x19d   : > { %v391_v33 = vmul.f32 %v2319_v31, %v2751_v49  ;;  %v390_v35 = vmul.f32 %v2319_v31, %v2748_v48  ;;  %v2225_v48 = vld [vmem:[#allocation4 + $0x40] ss:$24 sps:$4 sm:$0xff]   ;;  %v2230_v49 = vld [vmem:[#allocation4 + $0x74] ss:$24 sps:$4 sm:$0xff]  }
 0x19f   : > { %v406_v40 = vmul.f32 %v402_v34, %v391_v33  ;;  %v405_v42 = vmul.f32 %v398_v36, %v390_v35  ;;  %v1400_v33 = vsel %vm1399_vm0, %v1189_v28, 0.0  ;;  %v2525_v35 = vmov 0.0  }
 0x1a0   : > { %v2321_v37 = vpop.eup %2320  ;;  %2046 = vmatprep.subr.bf16.mxu1 %v2525_v35 }
 0x1a1   : > { %v393_v38 = vmul.f32 %v2321_v37, %v2761_v55  ;;  %v392_v39 = vmul.f32 %v2321_v37, %v2758_v54  ;;  %v2234_v54 = vld [vmem:[#allocation4 + $0xd0] ss:$24 sps:$4 sm:$0xff]   ;;  %v2239_v55 = vld [vmem:[#allocation4 + $0x104] ss:$24 sps:$4 sm:$0xff]  }
 0x1a3   : > { %v408_v41 = vmul.f32 %v402_v34, %v393_v38  ;;  %v407_v43 = vmul.f32 %v398_v36, %v392_v39  ;;  %v1191_v34 = vsel %vm1190_vm1, %v1189_v28, 0.0 }
 0x1a5   : > { %v410_v44 = vpack.c.bf16 %v408_v41, %v406_v40  ;;  %v2780_v46 = vpack.c.bf16 %v407_v43, %v405_v42 }
 0x1a7   : > { %1019 = vmatprep.mubr.bf16.mxu0 %v410_v44  ;;  %1062 = vmatprep.mubr.bf16.mxu1 %v410_v44 }
 0x1a8   : > { %1020 = vmatmul.mubr.bf16.vlgmr.msra.gmra.mrb[0].mxu0 %v2780_v46  ;;  %1063 = vmatmul.mubr.bf16.vlgmr.msra.gmra.mrb[0].mxu1 %v2780_v46 }
 0x1a9   : > { %1074 = vmatpush1.bf16.msra.mxu0 %v2222_v45  ;;  %1105 = vmatprep.mubr.bf16.mxu0 %v410_v44 }
 0x1aa   : > { %1075 = vmatprep.subr.bf16.mxu0 %v2227_v47  ;;  %2048 = vmatprep.mubr.msk.bf16.mxu1 %vm2526_vm2, %v2525_v35  ;;  %v2847_v47 = vld [vmem:[%s3044_s6] sm:$0x1] }
 0x1ad   : > { %1076 = vmatpush1.bf16.msra.mxu0 %v2225_v48 }
 0x1ae   : > { %1077 = vmatprep.subr.bf16.mxu0 %v2230_v49 }
 0x1b1   : > { %1078 = vmatpush1.bf16.msra.mxu0 %v2228_v50  ;;  %v2855_v50 = vrot.slane %v2847_v47, %v2767_v29 }
 0x1b2   : > { %1079 = vmatprep.subr.bf16.mxu0 %v2233_v51 }
 0x1b5   : > { %1080 = vmatpush1.bf16.msra.mxu0 %v2231_v52 }
 0x1b6   : > { %1081 = vmatprep.subr.bf16.mxu0 %v2236_v53 }
 0x1b9   : > { %1082 = vmatpush1.bf16.msra.mxu0 %v2234_v54 }
 0x1ba   : > { %1083 = vmatprep.subr.bf16.mxu0 %v2239_v55 }
 0x1bd   : > { %1084 = vmatpush1.bf16.msra.mxu0 %v2237_v56 }
 0x1be   : > { %1085 = vmatprep.subr.bf16.mxu0 %v2242_v57 }
 0x1c1   : > { %1086 = vmatpush1.bf16.msra.mxu0 %v2240_v58 }
 0x1c2   : > { %1087 = vmatprep.subr.bf16.mxu0 %v2245_v59 }
 0x1c5   : > { %1088 = vmatpush1.bf16.msra.mxu0 %v2243_v60 }
 0x1c6   : > { %1089 = vmatprep.subr.bf16.mxu0 %v2248_v61 }
 0x1c9   : > { %1090 = vmatpush1.bf16.msra.mxu0 %v2246_v62 }
 0x1ca   : > { %1091 = vmatprep.subr.bf16.mxu0 %v2251_v63 }
 0x1cd   : > { %1092 = vmatpush1.bf16.msra.mxu0 %v2249_v0 }
 0x1ce   : > { %1093 = vmatprep.subr.bf16.mxu0 %v2254_v1 }
 0x1d1   : > { %1094 = vmatpush1.bf16.msra.mxu0 %v2252_v2 }
 0x1d2   : > { %1095 = vmatprep.subr.bf16.mxu0 %v2257_v3 }
 0x1d5   : > { %1096 = vmatpush1.bf16.msra.mxu0 %v2255_v4 }
 0x1d6   : > { %1097 = vmatprep.subr.bf16.mxu0 %v2260_v5 }
 0x1d9   : > { %1098 = vmatpush1.bf16.msra.mxu0 %v2258_v6 }
 0x1da   : > { %1099 = vmatprep.subr.bf16.mxu0 %v2263_v7 }
 0x1dd   : > { %1100 = vmatpush1.bf16.msra.mxu0 %v2261_v8 }
 0x1de   : > { %1101 = vmatprep.subr.bf16.mxu0 %v2266_v9 }
 0x1e1   : > { %1102 = vmatpush1.bf16.msra.mxu0 %v2264_v10 }
 0x1e2   : > { %1103 = vmatprep.subr.bf16.mxu0 %v2269_v11 }
 0x1e5   : > { %1104 = vmatpush1.bf16.msra.mxu0 %v2267_v12 }
 0x1e6   : > { %2034 = vmatprep.subr.bf16.mxu0 %v2525_v35 }
 0x1e8   : > { %1106 = vmatmul.mubr.bf16.vlgmr.msra.gmra.mrb[4].mxu0 %v2780_v46 }
 0x1e9   : > { %2036 = vmatprep.mubr.msk.bf16.mxu0 %vm2526_vm2, %v2525_v35 }
 0x27b   : > { %v2785_v13 = vpop.f32.mrb[0].mxu0  ;;  %v2787_v14 = vpop.f32.mrb[0].mxu1 }
 0x27c   : > { %v2789_v15 = vpop.f32.mrb[1].mxu0  ;;  %v2791_v16 = vpop.f32.mrb[1].mxu1  ;;  %v1155_v17 = vmul.f32 %v2787_v14, %v2787_v14  ;;  %v1121_v31 = vmul.f32 %v2785_v13, %v2785_v13 }
 0x27d   : > { %v2795_v18 = vpop.f32.mrb[2].mxu0  ;;  %v2797_v19 = vpop.f32.mrb[2].mxu1  ;;  %v1371_v23 = vmul.f32 %v2791_v16, %v2791_v16  ;;  %v1343_v25 = vmul.f32 %v2789_v15, %v2789_v15 }
 0x27e   : > { %1157 = vadd.xlane.f32.xlu0 %v1155_v17  ;;  %v2799_v20 = vpop.f32.mrb[3].mxu0  ;;  %v2801_v21 = vpop.f32.mrb[3].mxu1  ;;  %v1156_v22 = vmul.f32 %v2797_v19, %v2797_v19  ;;  %v1122_v32 = vmul.f32 %v2795_v18, %v2795_v18 }
 0x27f   : > { %v1372_v24 = vmul.f32 %v2801_v21, %v2801_v21  ;;  %v1344_v27 = vmul.f32 %v2799_v20, %v2799_v20 }
 0x280   : > { %1159 = vadd.xlane.f32.xlu1 %v1156_v22 }
 0x282   : > { %1373 = vadd.xlane.f32.xlu0 %v1371_v23 }
 0x284   : > { %1375 = vadd.xlane.f32.xlu1 %v1372_v24 }
 0x286   : > { %1345 = vadd.xlane.f32.xlu0 %v1343_v25 }
 0x288   : > { %1347 = vadd.xlane.f32.xlu1 %v1344_v27 }
 0x28a   : > { %1123 = vadd.xlane.f32.xlu0 %v1121_v31 }
 0x28c   : > { %1125 = vadd.xlane.f32.xlu1 %v1122_v32 }
 0x28e   : > { %1401 = vadd.xlane.f32.xlu0 %v1400_v33 }
 0x290   : > { %1192 = vadd.xlane.f32.xlu1 %v1191_v34 }
 0x2bb   : > { %v2830_v36 = vpop.f32.mrb[4].mxu0 }
 0x2bc   : > { %v2832_v37 = vpop.f32.mrb[5].mxu0 }
 0x2bd   : > { %v2834_v38 = vpop.f32.mrb[6].mxu0 }
 0x2be   : > { %v1290_v39 = vpack.c.bf16 %v2834_v38, %v2830_v36  ;;  %v2838_v40 = vpop.f32.mrb[7].mxu0 }
 0x2bf   : > { %v1498_v41 = vpack.c.bf16 %v2838_v40, %v2832_v37 }
 0x30b   : > { %v1158_v42 = vpop.xlane.xlu0 %1157 }
 0x30c   : > { %2322 = vrsqrt.f32 %v1158_v42  ;;  %vm1163_vm3 = vcmp.eq.f32.partialorder %v1158_v42, inf  ;;  %vm1165_vm4 = vcmp.eq.f32.partialorder %v1158_v42, 0.0  ;;  %v1166_v52 = vand.u32 2147483648, %v1158_v42 }
 0x30d   : > { %v1160_v43 = vpop.xlane.xlu1 %1159 }
 0x30e   : > { %2324 = vrsqrt.f32 %v1160_v43  ;;  %vm1170_vm5 = vcmp.eq.f32.partialorder %v1160_v43, inf  ;;  %vm1172_vm6 = vcmp.eq.f32.partialorder %v1160_v43, 0.0  ;;  %v1173_v55 = vand.u32 2147483648, %v1160_v43 }
 0x30f   : > { %v1374_v44 = vpop.xlane.xlu0 %1373 }
 0x310   : > { %2326 = vrsqrt.f32 %v1374_v44  ;;  %vm1379_vm7 = vcmp.eq.f32.partialorder %v1374_v44, inf  ;;  %vm1381_vm8 = vcmp.eq.f32.partialorder %v1374_v44, 0.0  ;;  %v1382_v58 = vand.u32 2147483648, %v1374_v44 }
 0x311   : > { %v1376_v45 = vpop.xlane.xlu1 %1375 }
 0x312   : > { %2328 = vrsqrt.f32 %v1376_v45  ;;  %vm1386_vm9 = vcmp.eq.f32.partialorder %v1376_v45, inf  ;;  %vm1388_vm10 = vcmp.eq.f32.partialorder %v1376_v45, 0.0  ;;  %v1389_v1 = vand.u32 2147483648, %v1376_v45 }
 0x313   : > { %v2842_v46 = vpop.xlane.xlu0 %1345 }
 0x314   : > { %2330 = vrsqrt.f32 %v2842_v46  ;;  %vm1351_vm11 = vcmp.eq.f32.partialorder %v2842_v46, inf  ;;  %vm1353_vm12 = vcmp.eq.f32.partialorder %v2842_v46, 0.0  ;;  %v1354_v11 = vand.u32 2147483648, %v2842_v46 }
 0x315   : > { %v2850_v48 = vpop.xlane.xlu1 %1347 }
 0x316   : > { %v2323_v49 = vpop.eup %2322  ;;  %2332 = vrsqrt.f32 %v2850_v48  ;;  %vm1358_vm13 = vcmp.eq.f32.partialorder %v2850_v48, inf  ;;  %vm1360_vm14 = vcmp.eq.f32.partialorder %v2850_v48, 0.0  ;;  %v1361_v25 = vand.u32 2147483648, %v2850_v48 }
 0x317   : > { %v1162_v51 = vmul.f32 %v2323_v49, %v1158_v42  ;;  %v2857_v53 = vpop.xlane.xlu0 %1123 }
 0x318   : > { %v2325_v54 = vpop.eup %2324  ;;  %2334 = vrsqrt.f32 %v2857_v53  ;;  %vm1129_vm15 = vcmp.eq.f32.partialorder %v2857_v53, inf  ;;  %vm1131_vm0 = vcmp.eq.f32.partialorder %v2857_v53, 0.0  ;;  %v1132_v34 = vand.u32 2147483648, %v2857_v53 }
 0x319   : > { %v1164_v56 = vsel %vm1163_vm3, %v1158_v42, %v1162_v51  ;;  %v1169_v57 = vmul.f32 %v2325_v54, %v1160_v43  ;;  %v2860_v59 = vpop.xlane.xlu1 %1125 }
 0x31a   : > { %v2327_v60 = vpop.eup %2326  ;;  %v1167_v61 = vsel %vm1165_vm4, %v1166_v52, %v1164_v56  ;;  %2336 = vrsqrt.f32 %v2860_v59  ;;  %vm1136_vm1 = vcmp.eq.f32.partialorder %v2860_v59, inf  ;;  %vm1138_vm3 = vcmp.eq.f32.partialorder %v2860_v59, 0.0 }
 0x31b   : > { %v1175_v62 = vmax.f32 %v1167_v61, 1e-12  ;;  %v1171_v63 = vsel %vm1170_vm5, %v1160_v43, %v1169_v57  ;;  %v1378_v0 = vmul.f32 %v2327_v60, %v1374_v44  ;;  %v2864_v2 = vpop.xlane.xlu0 %1401 }
 0x31c   : > { %v2329_v3 = vpop.eup %2328  ;;  %v1174_v4 = vsel %vm1172_vm6, %v1173_v55, %v1171_v63  ;;  %2338 = vrsqrt.f32 %v2864_v2  ;;  %vm1405_vm4 = vcmp.eq.f32.partialorder %v2864_v2, inf  ;;  %vm1407_vm5 = vcmp.eq.f32.partialorder %v2864_v2, 0.0 }
 0x31d   : > { %2340 = vrcp.f32 %v1175_v62  ;;  %v1176_v5 = vmax.f32 %v1174_v4, 1e-12  ;;  %v1380_v6 = vsel %vm1379_vm7, %v1374_v44, %v1378_v0  ;;  %v1385_v7 = vmul.f32 %v2329_v3, %v1376_v45  ;;  %v2871_v8 = vpop.xlane.xlu1 %1192 }
 0x31e   : > { %v2331_v9 = vpop.eup %2330  ;;  %v1383_v10 = vsel %vm1381_vm8, %v1382_v58, %v1380_v6  ;;  %2342 = vrsqrt.f32 %v2871_v8  ;;  %vm1196_vm6 = vcmp.eq.f32.partialorder %v2871_v8, inf  ;;  %vm1198_vm7 = vcmp.eq.f32.partialorder %v2871_v8, 0.0 }
 0x31f   : > { %2344 = vrcp.f32 %v1176_v5  ;;  %v1391_v12 = vmax.f32 %v1383_v10, 1e-12  ;;  %v1387_v17 = vsel %vm1386_vm9, %v1376_v45, %v1385_v7  ;;  %v1350_v22 = vmul.f32 %v2331_v9, %v2842_v46 }
 0x320   : > { %v2333_v23 = vpop.eup %2332  ;;  %v1390_v24 = vsel %vm1388_vm10, %v1389_v1, %v1387_v17  ;;  %v1199_v63 = vand.u32 2147483648, %v2871_v8  ;;  %v1118_v1 = vld [vmem:[%s3043_s5] sm:$0x1]  ;;  %vm1258_vm8 = vcmask 130048  }
 0x321   : > { %2346 = vrcp.f32 %v1391_v12  ;;  %v1392_v27 = vmax.f32 %v1390_v24, 1e-12  ;;  %v1352_v28 = vsel %vm1351_vm11, %v2842_v46, %v1350_v22  ;;  %v1357_v31 = vmul.f32 %v2333_v23, %v2850_v48 }
 0x322   : > { %v2335_v32 = vpop.eup %2334  ;;  %v1355_v33 = vsel %vm1353_vm12, %v1354_v11, %v1352_v28  ;;  %v1139_v46 = vand.u32 2147483648, %v2860_v59  ;;  %v1120_v11 = vmul.f32 8.0, %v1118_v1 }
 0x323   : > { %2348 = vrcp.f32 %v1392_v27  ;;  %v1363_v42 = vmax.f32 %v1355_v33, 1e-12  ;;  %v1359_v43 = vsel %vm1358_vm13, %v2850_v48, %v1357_v31  ;;  %v1128_v44 = vmul.f32 %v2335_v32, %v2857_v53 }
 0x324   : > { %v2337_v45 = vpop.eup %2336  ;;  %v1362_v49 = vsel %vm1360_vm14, %v1361_v25, %v1359_v43  ;;  %v1408_v48 = vand.u32 2147483648, %v2864_v2  ;;  %v1151_v31 = vrot.slane %v1120_v11, %v2767_v29 }
 0x325   : > { %2350 = vrcp.f32 %v1363_v42  ;;  %v1364_v51 = vmax.f32 %v1362_v49, 1e-12  ;;  %v1130_v52 = vsel %vm1129_vm15, %v2857_v53, %v1128_v44  ;;  %v1135_v54 = vmul.f32 %v2337_v45, %v2860_v59 }
 0x326   : > { %v2339_v55 = vpop.eup %2338  ;;  %v1133_v56 = vsel %vm1131_vm0, %v1132_v34, %v1130_v52 }
 0x327   : > { %v2341_v57 = vpop.eup %2340  ;;  %2352 = vrcp.f32 %v1364_v51  ;;  %v1141_v58 = vmax.f32 %v1133_v56, 1e-12  ;;  %v1137_v60 = vsel %vm1136_vm1, %v2860_v59, %v1135_v54  ;;  %v1404_v61 = vmul.f32 %v2339_v55, %v2864_v2 }
 0x328   : > { %v2343_v62 = vpop.eup %2342  ;;  %v1140_v53 = vsel %vm1138_vm3, %v1139_v46, %v1137_v60  ;;  %v1178_v0 = vmul.f32 %v2341_v57, %v2787_v14 }
 0x329   : > { %v2345_v3 = vpop.eup %2344  ;;  %2354 = vrcp.f32 %v1141_v58  ;;  %v1142_v4 = vmax.f32 %v1140_v53, 1e-12  ;;  %v1406_v5 = vsel %vm1405_vm4, %v2864_v2, %v1404_v61  ;;  %v1195_v59 = vmul.f32 %v2343_v62, %v2871_v8 }
 0x32a   : > { %v1409_v6 = vsel %vm1407_vm5, %v1408_v48, %v1406_v5  ;;  %v1180_v7 = vmul.f32 %v2345_v3, %v2797_v19  ;;  %v1187_v17 = vmul.f32 %v2855_v50, %v1178_v0 }
 0x32b   : > { %v2347_v9 = vpop.eup %2346  ;;  %2356 = vrcp.f32 %v1142_v4  ;;  %v1410_v14 = vmax.f32 %v1409_v6, 1e-12  ;;  %v1197_v10 = vsel %vm1196_vm6, %v2871_v8, %v1195_v59 }
 0x32c   : > { %v1200_v12 = vsel %vm1198_vm7, %v1199_v63, %v1197_v10  ;;  %v1188_v22 = vmul.f32 %v2855_v50, %v1180_v7  ;;  %v1394_v2 = vmul.f32 %v2347_v9, %v2791_v16 }
 0x32d   : > { %v2349_v23 = vpop.eup %2348  ;;  %2358 = vrcp.f32 %v1410_v14  ;;  %v1201_v19 = vmax.f32 %v1200_v12, 1e-12 }
 0x32e   : > { %v1206_v24 = vpack.c.bf16 %v1188_v22, %v1187_v17  ;;  %v1396_v25 = vmul.f32 %v2349_v23, %v2801_v21  ;;  %v1397_v28 = vmul.f32 %v1394_v2, %v2855_v50 }
 0x32f   : > { %v2351_v27 = vpop.eup %2350  ;;  %2360 = vrcp.f32 %v1201_v19 }
 0x330   : > { %2035 = vmatpush3.bf16.xpose.msra.mxu0 %v1206_v24  ;;  %v1398_v8 = vmul.f32 %v1396_v25, %v2855_v50  ;;  %v1366_v32 = vmul.f32 %v2351_v27, %v2789_v15 }
 0x331   : > { %v2353_v33 = vpop.eup %2352  ;;  %2040 = vmatprep.subr.bf16.mxu0 %v2525_v35 }
 0x332   : > { %v1415_v16 = vpack.c.bf16 %v1398_v8, %v1397_v28  ;;  %v1368_v34 = vmul.f32 %v2353_v33, %v2799_v20  ;;  %v1369_v21 = vmul.f32 %v1366_v32, %v1151_v31 }
 0x333   : > { %v2355_v42 = vpop.eup %2354 }
 0x334   : > { %2047 = vmatpush3.bf16.xpose.msra.mxu1 %v1415_v16  ;;  %v1370_v43 = vmul.f32 %v1368_v34, %v1151_v31  ;;  %v1144_v44 = vmul.f32 %v2355_v42, %v2785_v13 }
 0x335   : > { %v2357_v45 = vpop.eup %2356  ;;  %2052 = vmatprep.subr.bf16.mxu1 %v2525_v35 }
 0x336   : > { %v1414_v49 = vpack.c.bf16 %v1370_v43, %v1369_v21  ;;  %v1146_v46 = vmul.f32 %v2357_v45, %v2795_v18  ;;  %v1153_v15 = vmul.f32 %v1151_v31, %v1144_v44  ;;  %v2270_v45 = vld [vmem:[#allocation6] ss:$8 sps:$4 sm:$0xff]  }
 0x337   : > { %v2359_v51 = vpop.eup %2358 }
 0x338   : > { %v1154_v52 = vmul.f32 %v1151_v31, %v1146_v46  ;;  %v1412_v54 = vmul.f32 %v2359_v51, %v2814_v26  ;;  %v2275_v46 = vld [vmem:[#allocation6 + $0x14] ss:$8 sps:$4 sm:$0xff]   ;;  %v2273_v51 = vld [vmem:[#allocation6 + $0x10] ss:$8 sps:$4 sm:$0xff]  }
 0x339   : > { %v2361_v55 = vpop.eup %2360 }
 0x33a   : > { %v1205_v56 = vpack.c.bf16 %v1154_v52, %v1153_v15  ;;  %v1203_v20 = vmul.f32 %v2361_v55, %v2814_v26  ;;  %v1413_v48 = vmul.f32 %v1412_v54, %v2855_v50  ;;  %v2281_v54 = vld [vmem:[#allocation6 + $0x34] ss:$8 sps:$4 sm:$0xff]   ;;  %v2279_v55 = vld [vmem:[#allocation6 + $0x30] ss:$8 sps:$4 sm:$0xff]  }
 0x33b   : > { %2049 = vmatmul.mubr.bf16.vlgmr.msra.gmra.mrb[4].mxu1 %v1414_v49  ;;  %v2272_v49 = vld [vmem:[#allocation6 + $0x4] ss:$8 sps:$4 sm:$0xff]  }
 0x33c   : > { %2037 = vmatmul.mubr.bf16.vlgmr.msra.gmra.mrb[8].mxu0 %v1205_v56  ;;  %2053 = vmatpush3.bf16.msra.mxu1 %v1498_v41  ;;  %v1204_v13 = vmul.f32 %v1203_v20, %v2847_v47  ;;  %v1460_v37 = vrot.slane %v1413_v48, %v2769_v30  ;;  %v2284_v56 = vld [vmem:[#allocation6 + $0x44] ss:$8 sps:$4 sm:$0xff]   ;;  %v2282_v20 = vld [vmem:[#allocation6 + $0x40] ss:$8 sps:$4 sm:$0xff]   ;;  %v2285_v48 = vld [vmem:[#allocation6 + $0x50] ss:$8 sps:$4 sm:$0xff]  }
 0x33d   : > { %2041 = vmatpush3.bf16.msra.mxu0 %v1290_v39  ;;  %2054 = vmatprep.mubr.msk.bf16.mxu1 %vm2526_vm2, %v2525_v35 }
 0x33e   : > { %v1251_v18 = vrot.slane %v1204_v13, %v2767_v29  ;;  %2042 = vmatprep.mubr.msk.bf16.mxu0 %vm2526_vm2, %v2525_v35  ;;  %v1462_v40 = vmul.f32 %v1460_v37, %v1370_v43  ;;  %v1461_v41 = vmul.f32 %v1460_v37, %v1369_v21  ;;  %1745 = vmatprep.subr.bf16.mxu1 %v2272_v49  ;;  %v2287_v13 = vld [vmem:[#allocation6 + $0x54] ss:$8 sps:$4 sm:$0xff]   ;;  %v2291_v37 = vld [vmem:[#allocation6 + $0x70] ss:$8 sps:$4 sm:$0xff]  }
 0x340   : > { %v1253_v26 = vmul.f32 %v1251_v18, %v1154_v52  ;;  %v1252_v57 = vmul.f32 %v1251_v18, %v1153_v15  ;;  %v2278_v15 = vld [vmem:[#allocation6 + $0x24] ss:$8 sps:$4 sm:$0xff]   ;;  %v2276_v52 = vld [vmem:[#allocation6 + $0x20] ss:$8 sps:$4 sm:$0xff]  }
 0x341   : > { %v2290_v18 = vld [vmem:[#allocation6 + $0x64] ss:$8 sps:$4 sm:$0xff]  }
 0x342   : > { %1256 = vadd.xlane.f32.xlu1 %v1253_v26  ;;  %1254 = vadd.xlane.f32.xlu0 %v1252_v57  ;;  %v2288_v26 = vld [vmem:[#allocation6 + $0x60] ss:$8 sps:$4 sm:$0xff]   ;;  %v2293_v57 = vld [vmem:[#allocation6 + $0x74] ss:$8 sps:$4 sm:$0xff]  }
 0x346   : > { %1465 = vadd.xlane.f32.xlu1 %v1462_v40  ;;  %1463 = vadd.xlane.f32.xlu0 %v1461_v41  ;;  %v2296_v40 = vld [vmem:[#allocation6 + $0x84] ss:$8 sps:$4 sm:$0xff]   ;;  %v2294_v41 = vld [vmem:[#allocation6 + $0x80] ss:$8 sps:$4 sm:$0xff]  }
 0x3cf   : > { %v2967_v0 = vpop.xlane.xlu0 %1254  ;;  %v2969_v1 = vpop.xlane.xlu1 %1256 }
 0x3d3   : > { %v2971_v3 = vpop.xlane.xlu0 %1463  ;;  %v2973_v4 = vpop.xlane.xlu1 %1465 }
 0x40e   : > { %v1450_v36 = vpop.f32.mrb[4].mxu1 }
 0x40f   : > { %v1241_v38 = vpop.f32.mrb[8].mxu0  ;;  %v2050_v39 = vpop.f32.mrb[5].mxu1  ;;  %v1467_v47 = vsel %vm1258_vm8, %v1450_v36, -inf }
 0x410   : > { %v1453_v50 = vpop.f32.mrb[6].mxu1  ;;  %1468 = vmax.xlane.f32.xlu0 %v1467_v47  ;;  %v2038_v58 = vpop.f32.mrb[9].mxu0  ;;  %v1259_v53 = vsel %vm1258_vm8, %v1241_v38, -inf  ;;  %v2302_v39 = vld [vmem:[#allocation6 + $0xa4] ss:$8 sps:$4 sm:$0xff]  }
 0x411   : > { %v1244_v35 = vpop.f32.mrb[10].mxu0  ;;  %v2051_v60 = vpop.f32.mrb[7].mxu1  ;;  %v1470_v61 = vsel %vm1258_vm8, %v1453_v50, -inf  ;;  %v2300_v47 = vld [vmem:[#allocation6 + $0xa0] ss:$8 sps:$4 sm:$0xff]  }
 0x412   : > { %1471 = vmax.xlane.f32.xlu1 %v1470_v61  ;;  %v2039_v62 = vpop.f32.mrb[11].mxu0  ;;  %v1262_v63 = vsel %vm1258_vm8, %v1244_v35, -inf  ;;  %v2303_v58 = vld [vmem:[#allocation6 + $0xb0] ss:$8 sps:$4 sm:$0xff]   ;;  %v2306_v60 = vld [vmem:[#allocation6 + $0xc0] ss:$8 sps:$4 sm:$0xff]  }
 0x413   : > { %v2311_v61 = vld [vmem:[#allocation6 + $0xd4] ss:$8 sps:$4 sm:$0xff]   ;;  %v2309_v62 = vld [vmem:[#allocation6 + $0xd0] ss:$8 sps:$4 sm:$0xff]  }
 0x414   : > { %1260 = vmax.xlane.f32.xlu0 %v1259_v53  ;;  %v2314_v53 = vld [vmem:[#allocation6 + $0xe4] ss:$8 sps:$4 sm:$0xff]  }
 0x416   : > { %1263 = vmax.xlane.f32.xlu1 %v1262_v63  ;;  %v2312_v63 = vld [vmem:[#allocation6 + $0xe0] ss:$8 sps:$4 sm:$0xff]  }
 0x49d   : > { %v1469_v5 = vpop.xlane.xlu0 %1468 }
 0x49e   : > { %v2976_v59 = vmax.f32 %v1469_v5, %v2971_v3  ;;  %v2317_v5 = vld [vmem:[#allocation6 + $0xf4] ss:$8 sps:$4 sm:$0xff]  }
 0x49f   : > { %v1472_v6 = vpop.xlane.xlu1 %1471 }
 0x4a0   : > { %v1475_v7 = vsub.f32 %v1450_v36, %v2976_v59  ;;  %v1481_v9 = vsub.f32 %v2971_v3, %v2976_v59  ;;  %v2982_v14 = vmax.f32 %v1472_v6, %v2973_v4  ;;  %v2299_v36 = vld [vmem:[#allocation6 + $0x94] ss:$8 sps:$4 sm:$0xff]   ;;  %v2315_v6 = vld [vmem:[#allocation6 + $0xf0] ss:$8 sps:$4 sm:$0xff]  }
 0x4a1   : > { %v1261_v10 = vpop.xlane.xlu0 %1260 }
 0x4a2   : > { %v1477_v11 = vmul.f32 1.442695, %v1475_v7  ;;  %v1476_v12 = vsub.f32 %v1453_v50, %v2982_v14  ;;  %v1482_v17 = vsub.f32 %v2973_v4, %v2982_v14  ;;  %v2988_v22 = vmax.f32 %v1261_v10, %v2967_v0  ;;  %v2305_v50 = vld [vmem:[#allocation6 + $0xb4] ss:$8 sps:$4 sm:$0xff]  }
 0x4a3   : > { %v1264_v2 = vpop.xlane.xlu1 %1263  ;;  %v1483_v7 = vmul.f32 1.442695, %v1481_v9 }
 0x4a4   : > { %2362 = vpow2.f32 %v1477_v11  ;;  %v1479_v23 = vmul.f32 1.442695, %v1476_v12  ;;  %v2991_v19 = vmax.f32 %v1264_v2, %v2969_v1  ;;  %v1267_v24 = vsub.f32 %v1241_v38, %v2988_v22  ;;  %v2297_v38 = vld [vmem:[#allocation6 + $0x90] ss:$8 sps:$4 sm:$0xff]  }
 0x4a5   : > { %v1273_v10 = vsub.f32 %v2967_v0, %v2988_v22  ;;  %v1485_v11 = vmul.f32 1.442695, %v1482_v17 }
 0x4a6   : > { %2364 = vpow2.f32 %v1479_v23  ;;  %v1268_v25 = vsub.f32 %v1244_v35, %v2991_v19  ;;  %v1269_v27 = vmul.f32 1.442695, %v1267_v24  ;;  %v2308_v35 = vld [vmem:[#allocation6 + $0xc4] ss:$8 sps:$4 sm:$0xff]   ;;  %v1274_v12 = vsub.f32 %v2969_v1, %v2991_v19  ;;  %v1117_v1 = vld [vmem:[%s3042_s4] sm:$0x3] }
 0x4a7   : > { %v1275_v2 = vmul.f32 1.442695, %v1273_v10 }
 0x4a8   : > { %v1271_v28 = vmul.f32 1.442695, %v1268_v25  ;;  %2366 = vpow2.f32 %v1269_v27  ;;  %v1277_v23 = vmul.f32 1.442695, %v1274_v12 }
 0x4aa   : > { %2368 = vpow2.f32 %v1271_v28  ;;  %v1502_v28 = vrot.slane %v1117_v1, %v2769_v30 }
 0x4ab   : > { %2370 = vpow2.f32 %v1483_v7 }
 0x4ac   : > { %2372 = vpow2.f32 %v1485_v11 }
 0x4ad   : > { %2374 = vpow2.f32 %v1275_v2 }
 0x4ae   : > { %v2363_v8 = vpop.eup %2362  ;;  %2376 = vpow2.f32 %v1277_v23 }
 0x4af   : > { %v1487_v31 = vsel %vm1258_vm8, %v2363_v8, 0.0 }
 0x4b0   : > { %v2365_v32 = vpop.eup %2364  ;;  %1488 = vadd.xlane.f32.xlu0 %v1487_v31 }
 0x4b1   : > { %v1490_v33 = vsel %vm1258_vm8, %v2365_v32, 0.0  ;;  %v1497_v16 = vpack.c.bf16 %v2365_v32, %v2363_v8  ;;  %v1294_v32 = vrot.slane %v1117_v1, %v2767_v29 }
 0x4b2   : > { %1491 = vadd.xlane.f32.xlu1 %v1490_v33  ;;  %v2367_v34 = vpop.eup %2366 }
 0x4b3   : > { %2055 = vmatmul.mubr.msk.bf16.vlgmr.msra.gmra.mrb[8].mxu1 %vm1258_vm8, %v1497_v16  ;;  %v1279_v42 = vsel %vm1258_vm8, %v2367_v34, 0.0 }
 0x4b4   : > { %v2369_v21 = vpop.eup %2368  ;;  %1280 = vadd.xlane.f32.xlu0 %v1279_v42  ;;  %1746 = vmatpush1.bf16.msra.mxu1 %v2270_v45 }
 0x4b5   : > { %v1282_v43 = vsel %vm1258_vm8, %v2369_v21, 0.0  ;;  %v1289_v44 = vpack.c.bf16 %v2369_v21, %v2367_v34  ;;  %1747 = vmatprep.subr.bf16.mxu1 %v2275_v46  ;;  %v2371_v3 = vpop.eup %2370 }
 0x4b6   : > { %1283 = vadd.xlane.f32.xlu1 %v1282_v43  ;;  %v2373_v9 = vpop.eup %2372  ;;  %v1503_v8 = vmul.f32 %v2371_v3, %v1502_v28 }
 0x4b7   : > { %2043 = vmatmul.mubr.msk.bf16.vlgmr.msra.gmra.mrb[12].mxu0 %vm1258_vm8, %v1289_v44  ;;  %v2375_v22 = vpop.eup %2374  ;;  %v1504_v34 = vmul.f32 %v2373_v9, %v1502_v28 }
 0x4b8   : > { %1748 = vmatpush1.bf16.msra.mxu1 %v2273_v51  ;;  %v2377_v17 = vpop.eup %2376  ;;  %v1295_v46 = vmul.f32 %v2375_v22, %v1294_v32 }
 0x4b9   : > { %1749 = vmatprep.subr.bf16.mxu1 %v2278_v15 }
 0x4bc   : > { %1750 = vmatpush1.bf16.msra.mxu1 %v2276_v52 }
 0x4bd   : > { %1751 = vmatprep.subr.bf16.mxu1 %v2281_v54  ;;  %v1296_v54 = vmul.f32 %v2377_v17, %v1294_v32 }
 0x4c0   : > { %1752 = vmatpush1.bf16.msra.mxu1 %v2279_v55 }
 0x4c1   : > { %1753 = vmatprep.subr.bf16.mxu1 %v2284_v56 }
 0x4c4   : > { %1754 = vmatpush1.bf16.msra.mxu1 %v2282_v20 }
 0x4c5   : > { %1755 = vmatprep.subr.bf16.mxu1 %v2287_v13 }
 0x4c8   : > { %1756 = vmatpush1.bf16.msra.mxu1 %v2285_v48 }
 0x4c9   : > { %1757 = vmatprep.subr.bf16.mxu1 %v2290_v18 }
 0x4cc   : > { %1758 = vmatpush1.bf16.msra.mxu1 %v2288_v26 }
 0x4cd   : > { %1759 = vmatprep.subr.bf16.mxu1 %v2293_v57 }
 0x4d0   : > { %1760 = vmatpush1.bf16.msra.mxu1 %v2291_v37 }
 0x4d1   : > { %1761 = vmatprep.subr.bf16.mxu1 %v2296_v40  ;;  %v2386_v40 = vld [vmem:[%s2721_s15] sm:$0xff] }
 0x4d4   : > { %1762 = vmatpush1.bf16.msra.mxu1 %v2294_v41 }
 0x4d5   : > { %1763 = vmatprep.subr.bf16.mxu1 %v2299_v36 }
 0x4d8   : > { %1764 = vmatpush1.bf16.msra.mxu1 %v2297_v38  ;;  %v2387_v38 = vld [vmem:[%s2721_s15 + $0x8] sm:$0xff] }
 0x4d9   : > { %1765 = vmatprep.subr.bf16.mxu1 %v2302_v39 }
 0x4dc   : > { %1766 = vmatpush1.bf16.msra.mxu1 %v2300_v47 }
 0x4dd   : > { %1767 = vmatprep.subr.bf16.mxu1 %v2305_v50  ;;  %v2388_v50 = vld [vmem:[%s2721_s15 + $0x10] sm:$0xff] }
 0x4e0   : > { %1768 = vmatpush1.bf16.msra.mxu1 %v2303_v58 }
 0x4e1   : > { %1769 = vmatprep.subr.bf16.mxu1 %v2308_v35 }
 0x4e4   : > { %1770 = vmatpush1.bf16.msra.mxu1 %v2306_v60  ;;  %v2389_v60 = vld [vmem:[%s2721_s15 + $0x18] sm:$0xff] }
 0x4e5   : > { %1771 = vmatprep.subr.bf16.mxu1 %v2311_v61 }
 0x4e8   : > { %1772 = vmatpush1.bf16.msra.mxu1 %v2309_v62 }
 0x4e9   : > { %1773 = vmatprep.subr.bf16.mxu1 %v2314_v53 }
 0x4ec   : > { %1774 = vmatpush1.bf16.msra.mxu1 %v2312_v63 }
 0x4ed   : > { %1775 = vmatprep.subr.bf16.mxu1 %v2317_v5 }
 0x4f0   : > { %1776 = vmatpush1.bf16.msra.mxu1 %v2315_v6 }
 0x53d   : > { %v1489_v24 = vpop.xlane.xlu0 %1488 }
 0x53e   : > { %v1493_v59 = vadd.f32 %v2371_v3, %v1489_v24 }
 0x53f   : > { %v1492_v25 = vpop.xlane.xlu1 %1491 }
 0x540   : > { %v1494_v27 = vadd.f32 %v2373_v9, %v1492_v25  ;;  %2378 = vrcp.f32 %v1493_v59 }
 0x541   : > { %v1281_v0 = vpop.xlane.xlu0 %1280 }
 0x542   : > { %v1285_v14 = vadd.f32 %v2375_v22, %v1281_v0  ;;  %2380 = vrcp.f32 %v1494_v27 }
 0x543   : > { %v1284_v4 = vpop.xlane.xlu1 %1283 }
 0x544   : > { %v1286_v19 = vadd.f32 %v2377_v17, %v1284_v4  ;;  %2382 = vrcp.f32 %v1285_v14 }
 0x546   : > { %2384 = vrcp.f32 %v1286_v19 }
 0x54a   : > { %v2379_v42 = vpop.eup %2378 }
 0x54c   : > { %v2381_v49 = vpop.eup %2380 }
 0x54e   : > { %v2383_v55 = vpop.eup %2382 }
 0x550   : > { %v2385_v18 = vpop.eup %2384 }
 0x586   : > { %v1542_v31 = vpop.f32.mrb[8].mxu1 }
 0x587   : > { %v1543_v33 = vadd.f32 %v1542_v31, %v1503_v8  ;;  %v2056_v16 = vpop.f32.mrb[9].mxu1 }
 0x588   : > { %v1545_v21 = vpop.f32.mrb[10].mxu1 }
 0x589   : > { %v1549_v43 = vmul.f32 %v2379_v42, %v1543_v33  ;;  %v1546_v44 = vadd.f32 %v1545_v21, %v1504_v34  ;;  %v2057_v45 = vpop.f32.mrb[11].mxu1 }
 0x58a   : > { %v1334_v15 = vpop.f32.mrb[12].mxu0 }
 0x58b   : > { %v1550_v51 = vmul.f32 %v2381_v49, %v1546_v44  ;;  %v1335_v30 = vadd.f32 %v1334_v15, %v1295_v46  ;;  %v2044_v52 = vpop.f32.mrb[13].mxu0 }
 0x58c   : > { %v1337_v29 = vpop.f32.mrb[14].mxu0 }
 0x58d   : > { %v1552_v56 = vpack.c.bf16 %v1550_v51, %v1549_v43  ;;  %v1341_v20 = vmul.f32 %v2383_v55, %v1335_v30  ;;  %v1338_v13 = vadd.f32 %v1337_v29, %v1296_v54  ;;  %v2045_v48 = vpop.f32.mrb[15].mxu0 }
 0x58f   : > { %1777 = vmatprep.mubr.bf16.mxu1 %v1552_v56  ;;  %v1342_v26 = vmul.f32 %v2385_v18, %v1338_v13 }
 0x591   : > { %v1551_v57 = vpack.c.bf16 %v1342_v26, %v1341_v20 }
 0x593   : > { %1778 = vmatmul.mubr.bf16.vlgmr.msra.gmra.mrb[12].mxu1 %v1551_v57 }
 0x666   : > { %v1779_v37 = vpop.f32.mrb[12].mxu1 }
 0x667   : > { %v1780_v41 = vadd.f32 %v2386_v40, %v1779_v37  ;;  %v1781_v36 = vpop.f32.mrb[13].mxu1 }
 0x668   : > { %v1782_v39 = vadd.f32 %v2387_v38, %v1781_v36  ;;  %v1783_v47 = vpop.f32.mrb[14].mxu1 }
 0x669   : > { %1788 = vst [vmem:[%s354_s25] sm:$0xff] %v1780_v41  ;;  %v1784_v58 = vadd.f32 %v2388_v50, %v1783_v47  ;;  %v1785_v35 = vpop.f32.mrb[15].mxu1 }
 0x66a   : > { %1789 = vst [vmem:[%s354_s25 + $0x8] sm:$0xff] %v1782_v39  ;;  %v1786_v61 = vadd.f32 %v2389_v60, %v1785_v35 }
 0x66b   : > { %1790 = vst [vmem:[%s354_s25 + $0x10] sm:$0xff] %v1784_v58 }
 0x66c   : > { %1791 = vst [vmem:[%s354_s25 + $0x18] sm:$0xff] %v1786_v61 }
 0x66d PF: > { %s3058_s9 = smov %s2665_s27  ;;  %p19_p9 = scmp.ge.s32.totalorder %s2665_s27, 4  }
 0x66e   : > { %s3059_s27 = smov %s2506_s28  ;;  %s3060_s28 = smov %s2510_s29 }
 0x66f   : > { %s3061_s29 = smov %s2674_s17  ;;  %s3062_s30 = smov %s3058_s9 }
 0x670   :  { %21 = sbr.rel (!%p19_p9) target bundleno = 4 (0x4), region = 100 }
 0x677   :  { %1813 = vsyncpa [#allocation3], 1 }
 0x678   :  { %1815 = vsyncpa [#allocation3 + $0x1], 1 }
 0x679   :  { %1816 = vsyncpa [#allocation5], 1 }

// kernel: transformer_blocks_forward.9
= control target key start
LH: loop header
LB: loop body
LE: loop exit
PB: predicated region body
PF: predicated region fallthrough
CT: control target
= control target key end

     0   :  { %11 = vsyncpa [#allocation3], 0  ;;  %s2575_s21 = smov 0   ;;  %s3338_s0 = inlined_call_operand.vmem [shape: f32[32,256], index: 0, kind: input, shape index: {}]   ;;  %s3339_s1 = inlined_call_operand.hbm [shape: f32[1,256], index: 1, kind: input, shape index: {}]   ;;  %s3340_s2 = inlined_call_operand.vmem [shape: bf16[256,512], index: 2, kind: input, shape index: {}]   ;;  %s3341_s3 = inlined_call_operand.vmem [shape: bf16[256,512], index: 3, kind: input, shape index: {}]   ;;  %s3342_s4 = inlined_call_operand.vmem [shape: f32[1,512], index: 4, kind: input, shape index: {}]   ;;  %s3343_s5 = inlined_call_operand.vmem [shape: bf16[512,256], index: 5, kind: input, shape index: {}]   ;;  %s3344_s6 = inlined_call_operand.vmem [shape: f32[32,256], index: 6, kind: output, shape index: {}]  }
   0x1 LB: > { %s1947_s22 = sadd.s32 4294967295, %s2537_s21   ;;  %p1949_p0 = scmp.ge.s32.totalorder %s2537_s21, 1  ;;  %s2537_s21 = sphi %s2575_s21, %s17_s21  }
   0x2   : > { %p179_p1 = scmp.lt.s32.totalorder %s2537_s21, 3  ;;  %p2589_p3 = scmp.eq.s32.totalorder %s1947_s22, 0 }
   0x3   : > { %s2539_s25 = smov [#allocation2]   ;;  %s2499_s30 = scalar_lea.hbm %s3339_s1, 32 }
   0x4   : > { %p2583_p2 = pnand %p1949_p0, %p179_p1  ;;  %s192_s26 = sshll.u32 %s2539_s25, 4  ;;  %s193_s26 = int_to_ptr.vmem [resolvable:$true] %s192_s26 }
   0x5   : > { %s3349_s24 = scalar_select %p2589_p3, 1, 0 }
   0x6   : > { %s3348_s23 = scalar_select %p2583_p2, 1, 0 }
   0x7   : > { %p2168_p4 = pneg %p2583_p2  ;;  %p2500_p6 = scmp.ne.s32.totalorder %s3339_s1, %s2499_s30 }
   0x8   : > { %p2506_p10 = scmp.lt.u32.totalorder %s2499_s30, %s3339_s1 }
   0x9   : > { %p2597_p5 = pnand %p2589_p3, %p2168_p4 }
   0xb   : > { %p2501_p7 = pneg %p2597_p5 }
   0xd   : > { %p2502_p8 = pnand %p2501_p7, %p2500_p6 }
   0xf   : > { %p2503_p9 = pneg %p2502_p8 }
  0x11   : > { %p2508_p11 = pnand %p2506_p10, %p2503_p9 }
  0x13   : > { %2511 = shalt.err (!%p2508_p11)
}
  0x14   : > { %s2512_s11 = scalar_lea.vmem %s193_s26, 32  ;;  %p2520_p1 = scmp.lt.s32.totalorder %s193_s26, %s193_s26 }
  0x15   : > { %p2513_p12 = scmp.ne.s32.totalorder %s193_s26, %s2512_s11  ;;  %p2521_p4 = scmp.lt.s32.totalorder %s2512_s11, %s2512_s11 }
  0x17   : > { %p2515_p13 = pnand %p2513_p12, %p2501_p7  ;;  %p2522_p3 = por %p2521_p4, %p2520_p1 }
  0x19   : > { %p2516_p0 = pneg %p2515_p13 }
  0x1b   : > { %p2523_p2 = pnand %p2522_p3, %p2516_p0 }
  0x1d   : > { %2526 = shalt.err (!%p2523_p2)
}
  0x1e   : > { %2171 = dma.hbm_to_vmem [thread:$0]  (!%p2597_p5), %s3339_s1, 32, %s193_s26, [#allocation3]  }
  0x1f   : > { %p3351_p6 = scmp.ne.s32.totalorder %s3348_s23, 0 }
  0x20   : > { %p3352_p8 = scmp.ne.s32.totalorder (!%p3351_p6), %s3349_s24, 0 }
  0x21   : > { %227 = sbr.rel (%p3351_p6) target bundleno = 1316 (0x524), region = 44 }
  0x28   : > { %2532 = dma.done.wait (%p3352_p8), [#allocation3], 32  }
  0x29   : > { %2534 = vsyncadd (%p3352_p8), [#allocation3], 4294967264  ;;  %s1954_s14 = sshll.u32 %s1947_s22, 1  ;;  %v2183_v6 = vld [vmem:[%s3340_s2 + $0x4] ss:$16 sps:$4 sm:$0xff]  }
  0x2a   : > { %p260_p3 = scmp.lt.s32.totalorder %s1954_s14, 3  ;;  %v2185_v7 = vld [vmem:[%s3340_s2] ss:$16 sps:$4 sm:$0xff]   ;;  %v2186_v8 = vld [vmem:[%s3341_s3 + $0x4] ss:$16 sps:$4 sm:$0xff]   ;;  %712 = vmatprep.subr.bf16.mxu1 %v2183_v6 }
  0x2b   : > { %v2188_v9 = vld [vmem:[%s3341_s3] ss:$16 sps:$4 sm:$0xff]   ;;  %v2189_v10 = vld [vmem:[%s3340_s2 + $0x24] ss:$16 sps:$4 sm:$0xff]   ;;  %1182 = vmatprep.subr.bf16.mxu0 %v2186_v8  ;;  %713 = vmatpush1.bf16.msra.mxu1 %v2185_v7 }
  0x2c   : > { %s3354_s14 = smov (!%p260_p3, %s1954_s14), 3  ;;  %v2192_v11 = vld [vmem:[%s3341_s3 + $0x24] ss:$16 sps:$4 sm:$0xff]   ;;  %1183 = vmatpush1.bf16.msra.mxu0 %v2188_v9  ;;  %v2191_v12 = vld [vmem:[%s3340_s2 + $0x20] ss:$16 sps:$4 sm:$0xff]   ;;  %714 = vmatprep.subr.bf16.mxu1 %v2189_v10 }
  0x2d   : > { %s2154_s15 = sshll.u32 %s3354_s14, 4  ;;  %v2194_v13 = vld [vmem:[%s3341_s3 + $0x20] ss:$16 sps:$4 sm:$0xff]   ;;  %1184 = vmatprep.subr.bf16.mxu0 %v2192_v11  ;;  %v2195_v14 = vld [vmem:[%s3340_s2 + $0x44] ss:$16 sps:$4 sm:$0xff]  }
  0x2e   : > { %s2633_s18 = scalar_lea.vmem %s3338_s0, %s2154_s15  ;;  %v2198_v15 = vld [vmem:[%s3341_s3 + $0x44] ss:$16 sps:$4 sm:$0xff]   ;;  %v2197_v16 = vld [vmem:[%s3340_s2 + $0x40] ss:$16 sps:$4 sm:$0xff]   ;;  %s271_s28 = scalar_lea.vmem %s3344_s6, %s2154_s15 }
  0x2f   : > { %v2636_v0 = vld [vmem:[%s2633_s18] sm:$0xff]  ;;  %v2639_v1 = vld [vmem:[%s2633_s18 + $0x8] sm:$0xff]  ;;  %v2642_v2 = vld [vmem:[%s2633_s18 + $0x10] sm:$0xff]  ;;  %715 = vmatpush1.bf16.msra.mxu1 %v2191_v12 }
  0x30   : > { %v278_v3 = vadd.f32 %v2639_v1, %v2636_v0  ;;  %v2647_v4 = vld [vmem:[%s2633_s18 + $0x18] sm:$0xff]  ;;  %1185 = vmatpush1.bf16.msra.mxu0 %v2194_v13  ;;  %v2200_v17 = vld [vmem:[%s3341_s3 + $0x40] ss:$16 sps:$4 sm:$0xff]   ;;  %716 = vmatprep.subr.bf16.mxu1 %v2195_v14  ;;  %v2201_v18 = vld [vmem:[%s3340_s2 + $0x64] ss:$16 sps:$4 sm:$0xff]  }
  0x31   : > { %v281_v5 = vadd.f32 %v2647_v4, %v2642_v2  ;;  %1186 = vmatprep.subr.bf16.mxu0 %v2198_v15  ;;  %v2204_v19 = vld [vmem:[%s3341_s3 + $0x64] ss:$16 sps:$4 sm:$0xff]   ;;  %v2203_v20 = vld [vmem:[%s3340_s2 + $0x60] ss:$16 sps:$4 sm:$0xff]  }
  0x32   : > { %279 = vadd.xlane.f32.xlu0 %v278_v3  ;;  %v2206_v21 = vld [vmem:[%s3341_s3 + $0x60] ss:$16 sps:$4 sm:$0xff]   ;;  %v2207_v22 = vld [vmem:[%s3340_s2 + $0x84] ss:$16 sps:$4 sm:$0xff]  }
  0x33   : > { %717 = vmatpush1.bf16.msra.mxu1 %v2197_v16  ;;  %v2210_v23 = vld [vmem:[%s3341_s3 + $0x84] ss:$16 sps:$4 sm:$0xff]   ;;  %v2209_v24 = vld [vmem:[%s3340_s2 + $0x80] ss:$16 sps:$4 sm:$0xff]  }
  0x34   : > { %1187 = vmatpush1.bf16.msra.mxu0 %v2200_v17  ;;  %718 = vmatprep.subr.bf16.mxu1 %v2201_v18  ;;  %v2212_v25 = vld [vmem:[%s3341_s3 + $0x80] ss:$16 sps:$4 sm:$0xff]   ;;  %v2213_v26 = vld [vmem:[%s3340_s2 + $0xa4] ss:$16 sps:$4 sm:$0xff]  }
  0x35   : > { %1188 = vmatprep.subr.bf16.mxu0 %v2204_v19  ;;  %v2216_v27 = vld [vmem:[%s3341_s3 + $0xa4] ss:$16 sps:$4 sm:$0xff]   ;;  %v2215_v28 = vld [vmem:[%s3340_s2 + $0xa0] ss:$16 sps:$4 sm:$0xff]  }
  0x36   : > { %282 = vadd.xlane.f32.xlu0 %v281_v5  ;;  %v2218_v29 = vld [vmem:[%s3341_s3 + $0xa0] ss:$16 sps:$4 sm:$0xff]   ;;  %v2219_v30 = vld [vmem:[%s3340_s2 + $0xc4] ss:$16 sps:$4 sm:$0xff]  }
  0x37   : > { %719 = vmatpush1.bf16.msra.mxu1 %v2203_v20  ;;  %v2222_v31 = vld [vmem:[%s3341_s3 + $0xc4] ss:$16 sps:$4 sm:$0xff]   ;;  %v2221_v32 = vld [vmem:[%s3340_s2 + $0xc0] ss:$16 sps:$4 sm:$0xff]   ;;  %v2281_v20 = vld [vmem:[%s3340_s2 + $0xc] ss:$16 sps:$4 sm:$0xff]  }
  0x38   : > { %1189 = vmatpush1.bf16.msra.mxu0 %v2206_v21  ;;  %720 = vmatprep.subr.bf16.mxu1 %v2207_v22  ;;  %v2224_v33 = vld [vmem:[%s3341_s3 + $0xc0] ss:$16 sps:$4 sm:$0xff]   ;;  %v2225_v34 = vld [vmem:[%s3340_s2 + $0xe4] ss:$16 sps:$4 sm:$0xff]  }
  0x39   : > { %1190 = vmatprep.subr.bf16.mxu0 %v2210_v23  ;;  %v2228_v35 = vld [vmem:[%s3341_s3 + $0xe4] ss:$16 sps:$4 sm:$0xff]   ;;  %v2227_v36 = vld [vmem:[%s3340_s2 + $0xe0] ss:$16 sps:$4 sm:$0xff]  }
  0x3a   : > { %v2230_v37 = vld [vmem:[%s3341_s3 + $0xe0] ss:$16 sps:$4 sm:$0xff]   ;;  %v2231_v38 = vld [vmem:[%s3340_s2 + $0x104] ss:$16 sps:$4 sm:$0xff]  }
  0x3b   : > { %721 = vmatpush1.bf16.msra.mxu1 %v2209_v24  ;;  %v2234_v39 = vld [vmem:[%s3341_s3 + $0x104] ss:$16 sps:$4 sm:$0xff]   ;;  %v2233_v40 = vld [vmem:[%s3340_s2 + $0x100] ss:$16 sps:$4 sm:$0xff]  }
  0x3c   : > { %1191 = vmatpush1.bf16.msra.mxu0 %v2212_v25  ;;  %722 = vmatprep.subr.bf16.mxu1 %v2213_v26  ;;  %v2236_v41 = vld [vmem:[%s3341_s3 + $0x100] ss:$16 sps:$4 sm:$0xff]   ;;  %v2237_v42 = vld [vmem:[%s3340_s2 + $0x124] ss:$16 sps:$4 sm:$0xff]   ;;  %v312_v26 = vlaneseq }
  0x3d   : > { %1192 = vmatprep.subr.bf16.mxu0 %v2216_v27  ;;  %v2240_v43 = vld [vmem:[%s3341_s3 + $0x124] ss:$16 sps:$4 sm:$0xff]   ;;  %v2239_v44 = vld [vmem:[%s3340_s2 + $0x120] ss:$16 sps:$4 sm:$0xff]  }
  0x3e   : > { %v2242_v45 = vld [vmem:[%s3341_s3 + $0x120] ss:$16 sps:$4 sm:$0xff]   ;;  %v2243_v60 = vld [vmem:[%s3340_s2 + $0x144] ss:$16 sps:$4 sm:$0xff]  }
  0x3f   : > { %723 = vmatpush1.bf16.msra.mxu1 %v2215_v28  ;;  %v2245_v61 = vld [vmem:[%s3340_s2 + $0x140] ss:$16 sps:$4 sm:$0xff]   ;;  %v2246_v62 = vld [vmem:[%s3341_s3 + $0x144] ss:$16 sps:$4 sm:$0xff]   ;;  %v2866_v28 = vshrl.u32 %v312_v26, 7 }
  0x40   : > { %1193 = vmatpush1.bf16.msra.mxu0 %v2218_v29  ;;  %724 = vmatprep.subr.bf16.mxu1 %v2219_v30  ;;  %v2248_v63 = vld [vmem:[%s3341_s3 + $0x140] ss:$16 sps:$4 sm:$0xff]   ;;  %v2258_v6 = vld [vmem:[%s3341_s3 + $0x184] ss:$16 sps:$4 sm:$0xff]   ;;  %v2345_v26 = vld [vmem:[%s3341_s3 + $0xc8] ss:$16 sps:$4 sm:$0xff]  }
  0x41   : > { %1194 = vmatprep.subr.bf16.mxu0 %v2222_v31  ;;  %v2254_v3 = vld [vmem:[%s3341_s3 + $0x160] ss:$16 sps:$4 sm:$0xff]   ;;  %v2261_v8 = vld [vmem:[%s3340_s2 + $0x1a4] ss:$16 sps:$4 sm:$0xff]   ;;  %v318_v29 = vsub.s32 1, %v2866_v28  ;;  %v314_v30 = vsub.s32 0, %v2866_v28 }
  0x42   : > { %v2257_v5 = vld [vmem:[%s3340_s2 + $0x180] ss:$16 sps:$4 sm:$0xff]   ;;  %v2264_v9 = vld [vmem:[%s3341_s3 + $0x1a4] ss:$16 sps:$4 sm:$0xff]  }
  0x43   : > { %725 = vmatpush1.bf16.msra.mxu1 %v2221_v32  ;;  %v2260_v7 = vld [vmem:[%s3341_s3 + $0x180] ss:$16 sps:$4 sm:$0xff]   ;;  %v2267_v12 = vld [vmem:[%s3340_s2 + $0x1c4] ss:$16 sps:$4 sm:$0xff]  }
  0x44   : > { %1195 = vmatpush1.bf16.msra.mxu0 %v2224_v33  ;;  %726 = vmatprep.subr.bf16.mxu1 %v2225_v34  ;;  %v2263_v10 = vld [vmem:[%s3340_s2 + $0x1a0] ss:$16 sps:$4 sm:$0xff]   ;;  %v2270_v13 = vld [vmem:[%s3341_s3 + $0x1c4] ss:$16 sps:$4 sm:$0xff]  }
  0x45   : > { %1196 = vmatprep.subr.bf16.mxu0 %v2228_v35  ;;  %v2266_v11 = vld [vmem:[%s3341_s3 + $0x1a0] ss:$16 sps:$4 sm:$0xff]   ;;  %v2273_v16 = vld [vmem:[%s3340_s2 + $0x1e4] ss:$16 sps:$4 sm:$0xff]  }
  0x46   : > { %v2269_v14 = vld [vmem:[%s3340_s2 + $0x1c0] ss:$16 sps:$4 sm:$0xff]   ;;  %v2276_v17 = vld [vmem:[%s3341_s3 + $0x1e4] ss:$16 sps:$4 sm:$0xff]  }
  0x47   : > { %727 = vmatpush1.bf16.msra.mxu1 %v2227_v36  ;;  %v2272_v15 = vld [vmem:[%s3341_s3 + $0x1c0] ss:$16 sps:$4 sm:$0xff]  }
  0x48   : > { %1197 = vmatpush1.bf16.msra.mxu0 %v2230_v37  ;;  %728 = vmatprep.subr.bf16.mxu1 %v2231_v38  ;;  %v2275_v18 = vld [vmem:[%s3340_s2 + $0x1e0] ss:$16 sps:$4 sm:$0xff]  }
  0x49   : > { %1198 = vmatprep.subr.bf16.mxu0 %v2234_v39  ;;  %v2278_v19 = vld [vmem:[%s3341_s3 + $0x1e0] ss:$16 sps:$4 sm:$0xff]  }
  0x4a   : > { %v277_v32 = vld [vmem:[#allocation2] sm:$0x3] }
  0x4b   : > { %729 = vmatpush1.bf16.msra.mxu1 %v2233_v40  ;;  %v319_v34 = vrot.slane %v277_v32, %v318_v29  ;;  %v315_v36 = vrot.slane %v277_v32, %v314_v30  ;;  %v2353_v32 = vld [vmem:[%s3341_s3 + $0x10c] ss:$16 sps:$4 sm:$0xff]  }
  0x4c   : > { %1199 = vmatpush1.bf16.msra.mxu0 %v2236_v41  ;;  %730 = vmatprep.subr.bf16.mxu1 %v2237_v42 }
  0x4d   : > { %1200 = vmatprep.subr.bf16.mxu0 %v2240_v43 }
  0x4f   : > { %731 = vmatpush1.bf16.msra.mxu1 %v2239_v44 }
  0x50   : > { %1201 = vmatpush1.bf16.msra.mxu0 %v2242_v45  ;;  %732 = vmatprep.subr.bf16.mxu1 %v2243_v60  ;;  %v2279_v45 = vld [vmem:[%s3340_s2 + $0x8] ss:$16 sps:$4 sm:$0xff]  }
  0x51   : > { %1202 = vmatprep.subr.bf16.mxu0 %v2246_v62  ;;  %v2300_v60 = vld [vmem:[%s3340_s2 + $0xe8] ss:$16 sps:$4 sm:$0xff]  }
  0x52   : > { %v2303_v62 = vld [vmem:[%s3340_s2 + $0x108] ss:$16 sps:$4 sm:$0xff]  }
  0x53   : > { %733 = vmatpush1.bf16.msra.mxu1 %v2245_v61  ;;  %v2305_v61 = vld [vmem:[%s3340_s2 + $0x10c] ss:$16 sps:$4 sm:$0xff]  }
  0x54   : > { %1203 = vmatpush1.bf16.msra.mxu0 %v2248_v63  ;;  %v2308_v63 = vld [vmem:[%s3340_s2 + $0x12c] ss:$16 sps:$4 sm:$0xff]  }
  0xbf   : > { %v280_v46 = vpop.xlane.xlu0 %279 }
  0xc0   : > { %v285_v47 = vmul.f32 0.00390625, %v280_v46 }
  0xc2   : > { %v2772_v48 = vsub.f32 %v2636_v0, %v285_v47  ;;  %v2775_v49 = vsub.f32 %v2639_v1, %v285_v47  ;;  %v2249_v0 = vld [vmem:[%s3340_s2 + $0x164] ss:$16 sps:$4 sm:$0xff]   ;;  %v2251_v1 = vld [vmem:[%s3340_s2 + $0x160] ss:$16 sps:$4 sm:$0xff]   ;;  %v2284_v47 = vld [vmem:[%s3340_s2 + $0x2c] ss:$16 sps:$4 sm:$0xff]  }
  0xc3   : > { %v283_v50 = vpop.xlane.xlu0 %282  ;;  %734 = vmatprep.subr.bf16.mxu1 %v2249_v0  ;;  %v2306_v0 = vld [vmem:[%s3340_s2 + $0x128] ss:$16 sps:$4 sm:$0xff]  }
  0xc4   : > { %v286_v51 = vmul.f32 0.00390625, %v283_v50  ;;  %v291_v52 = vmul.f32 %v2772_v48, %v2772_v48  ;;  %v292_v53 = vmul.f32 %v2775_v49, %v2775_v49  ;;  %735 = vmatpush1.bf16.msra.mxu1 %v2251_v1  ;;  %v2285_v50 = vld [vmem:[%s3340_s2 + $0x48] ss:$16 sps:$4 sm:$0xff]   ;;  %v2311_v1 = vld [vmem:[%s3340_s2 + $0x14c] ss:$16 sps:$4 sm:$0xff]  }
  0xc6   : > { %v2782_v54 = vsub.f32 %v2642_v2, %v286_v51  ;;  %v2785_v55 = vsub.f32 %v2647_v4, %v286_v51  ;;  %v295_v56 = vadd.f32 %v292_v53, %v291_v52  ;;  %v2252_v2 = vld [vmem:[%s3341_s3 + $0x164] ss:$16 sps:$4 sm:$0xff]   ;;  %v2290_v51 = vld [vmem:[%s3340_s2 + $0x6c] ss:$16 sps:$4 sm:$0xff]   ;;  %v2288_v52 = vld [vmem:[%s3340_s2 + $0x68] ss:$16 sps:$4 sm:$0xff]  }
  0xc7   : > { %1204 = vmatprep.subr.bf16.mxu0 %v2252_v2  ;;  %v2255_v4 = vld [vmem:[%s3340_s2 + $0x184] ss:$16 sps:$4 sm:$0xff]   ;;  %v2293_v53 = vld [vmem:[%s3340_s2 + $0x8c] ss:$16 sps:$4 sm:$0xff]   ;;  %v2309_v2 = vld [vmem:[%s3340_s2 + $0x148] ss:$16 sps:$4 sm:$0xff]  }
  0xc8   : > { %296 = vadd.xlane.f32.xlu1 %v295_v56  ;;  %v293_v57 = vmul.f32 %v2782_v54, %v2782_v54  ;;  %v294_v58 = vmul.f32 %v2785_v55, %v2785_v55  ;;  %1205 = vmatpush1.bf16.msra.mxu0 %v2254_v3  ;;  %v2294_v56 = vld [vmem:[%s3340_s2 + $0xa8] ss:$16 sps:$4 sm:$0xff]   ;;  %v2314_v3 = vld [vmem:[%s3340_s2 + $0x16c] ss:$16 sps:$4 sm:$0xff]  }
  0xc9   : > { %736 = vmatprep.subr.bf16.mxu1 %v2255_v4  ;;  %1206 = vmatprep.subr.bf16.mxu0 %v2258_v6  ;;  %v2312_v4 = vld [vmem:[%s3340_s2 + $0x168] ss:$16 sps:$4 sm:$0xff]  }
  0xca   : > { %v298_v59 = vadd.f32 %v294_v58, %v293_v57  ;;  %737 = vmatpush1.bf16.msra.mxu1 %v2257_v5  ;;  %v2299_v57 = vld [vmem:[%s3340_s2 + $0xcc] ss:$16 sps:$4 sm:$0xff]   ;;  %v2297_v58 = vld [vmem:[%s3340_s2 + $0xc8] ss:$16 sps:$4 sm:$0xff]  }
  0xcb   : > { %738 = vmatprep.subr.bf16.mxu1 %v2261_v8  ;;  %v2317_v5 = vld [vmem:[%s3340_s2 + $0x18c] ss:$16 sps:$4 sm:$0xff]   ;;  %v2315_v6 = vld [vmem:[%s3340_s2 + $0x188] ss:$16 sps:$4 sm:$0xff]  }
  0xcc   : > { %299 = vadd.xlane.f32.xlu1 %v298_v59  ;;  %1207 = vmatpush1.bf16.msra.mxu0 %v2260_v7  ;;  %v2302_v59 = vld [vmem:[%s3340_s2 + $0xec] ss:$16 sps:$4 sm:$0xff]   ;;  %v2318_v8 = vld [vmem:[%s3340_s2 + $0x1a8] ss:$16 sps:$4 sm:$0xff]  }
  0xcd   : > { %1208 = vmatprep.subr.bf16.mxu0 %v2264_v9  ;;  %v2320_v7 = vld [vmem:[%s3340_s2 + $0x1ac] ss:$16 sps:$4 sm:$0xff]  }
  0xce   : > { %739 = vmatpush1.bf16.msra.mxu1 %v2263_v10  ;;  %v2323_v9 = vld [vmem:[%s3340_s2 + $0x1cc] ss:$16 sps:$4 sm:$0xff]   ;;  %v2321_v10 = vld [vmem:[%s3340_s2 + $0x1c8] ss:$16 sps:$4 sm:$0xff]  }
  0xcf   : > { %740 = vmatprep.subr.bf16.mxu1 %v2267_v12  ;;  %v2324_v12 = vld [vmem:[%s3340_s2 + $0x1e8] ss:$16 sps:$4 sm:$0xff]  }
  0xd0   : > { %1209 = vmatpush1.bf16.msra.mxu0 %v2266_v11  ;;  %v2326_v11 = vld [vmem:[%s3340_s2 + $0x1ec] ss:$16 sps:$4 sm:$0xff]  }
  0xd1   : > { %1210 = vmatprep.subr.bf16.mxu0 %v2270_v13  ;;  %v2329_v13 = vld [vmem:[%s3341_s3 + $0xc] ss:$16 sps:$4 sm:$0xff]  }
  0xd2   : > { %741 = vmatpush1.bf16.msra.mxu1 %v2269_v14  ;;  %v2327_v14 = vld [vmem:[%s3341_s3 + $0x8] ss:$16 sps:$4 sm:$0xff]  }
  0xd3   : > { %742 = vmatprep.subr.bf16.mxu1 %v2273_v16  ;;  %v2330_v16 = vld [vmem:[%s3341_s3 + $0x28] ss:$16 sps:$4 sm:$0xff]  }
  0xd4   : > { %1211 = vmatpush1.bf16.msra.mxu0 %v2272_v15  ;;  %v2332_v15 = vld [vmem:[%s3341_s3 + $0x2c] ss:$16 sps:$4 sm:$0xff]  }
  0xd5   : > { %1212 = vmatprep.subr.bf16.mxu0 %v2276_v17  ;;  %v2335_v17 = vld [vmem:[%s3341_s3 + $0x4c] ss:$16 sps:$4 sm:$0xff]  }
  0xd6   : > { %743 = vmatpush1.bf16.msra.mxu1 %v2275_v18  ;;  %v2333_v18 = vld [vmem:[%s3341_s3 + $0x48] ss:$16 sps:$4 sm:$0xff]  }
  0xd7   : > { %755 = vmatprep.subr.bf16.mxu1 %v2281_v20  ;;  %v2336_v20 = vld [vmem:[%s3341_s3 + $0x68] ss:$16 sps:$4 sm:$0xff]  }
  0xd8   : > { %1213 = vmatpush1.bf16.msra.mxu0 %v2278_v19  ;;  %v2338_v19 = vld [vmem:[%s3341_s3 + $0x6c] ss:$16 sps:$4 sm:$0xff]  }
 0x155   : > { %v297_v21 = vpop.xlane.xlu1 %296 }
 0x156   : > { %v301_v22 = vmul.f32 0.00390625, %v297_v21  ;;  %v2341_v21 = vld [vmem:[%s3341_s3 + $0x8c] ss:$16 sps:$4 sm:$0xff]  }
 0x158   : > { %v303_v23 = vadd.f32 1e-05, %v301_v22  ;;  %v2339_v22 = vld [vmem:[%s3341_s3 + $0x88] ss:$16 sps:$4 sm:$0xff]  }
 0x159   : > { %v300_v24 = vpop.xlane.xlu1 %299 }
 0x15a   : > { %2471 = vrsqrt.f32 %v303_v23  ;;  %v302_v25 = vmul.f32 0.00390625, %v300_v24  ;;  %v2344_v23 = vld [vmem:[%s3341_s3 + $0xac] ss:$16 sps:$4 sm:$0xff]   ;;  %v2342_v24 = vld [vmem:[%s3341_s3 + $0xa8] ss:$16 sps:$4 sm:$0xff]  }
 0x15c   : > { %v304_v27 = vadd.f32 1e-05, %v302_v25  ;;  %v2347_v25 = vld [vmem:[%s3341_s3 + $0xcc] ss:$16 sps:$4 sm:$0xff]  }
 0x15e   : > { %2473 = vrsqrt.f32 %v304_v27  ;;  %v2350_v27 = vld [vmem:[%s3341_s3 + $0xec] ss:$16 sps:$4 sm:$0xff]  }
 0x164   : > { %v2472_v31 = vpop.eup %2471 }
 0x165   : > { %v308_v33 = vmul.f32 %v2472_v31, %v2775_v49  ;;  %v307_v35 = vmul.f32 %v2472_v31, %v2772_v48  ;;  %v2282_v48 = vld [vmem:[%s3340_s2 + $0x28] ss:$16 sps:$4 sm:$0xff]   ;;  %v2287_v49 = vld [vmem:[%s3340_s2 + $0x4c] ss:$16 sps:$4 sm:$0xff]  }
 0x166   : > { %v2348_v31 = vld [vmem:[%s3341_s3 + $0xe8] ss:$16 sps:$4 sm:$0xff]  }
 0x167   : > { %v323_v40 = vmul.f32 %v319_v34, %v308_v33  ;;  %v322_v42 = vmul.f32 %v315_v36, %v307_v35  ;;  %v2351_v33 = vld [vmem:[%s3341_s3 + $0x108] ss:$16 sps:$4 sm:$0xff]  }
 0x168   : > { %v2474_v37 = vpop.eup %2473  ;;  %v2354_v35 = vld [vmem:[%s3341_s3 + $0x128] ss:$16 sps:$4 sm:$0xff]  }
 0x169   : > { %v310_v38 = vmul.f32 %v2474_v37, %v2785_v55  ;;  %v309_v39 = vmul.f32 %v2474_v37, %v2782_v54  ;;  %v2291_v54 = vld [vmem:[%s3340_s2 + $0x88] ss:$16 sps:$4 sm:$0xff]   ;;  %v2296_v55 = vld [vmem:[%s3340_s2 + $0xac] ss:$16 sps:$4 sm:$0xff]  }
 0x16a   : > { %v2357_v37 = vld [vmem:[%s3341_s3 + $0x148] ss:$16 sps:$4 sm:$0xff]  }
 0x16b   : > { %v325_v41 = vmul.f32 %v319_v34, %v310_v38  ;;  %v324_v43 = vmul.f32 %v315_v36, %v309_v39  ;;  %v2356_v34 = vld [vmem:[%s3341_s3 + $0x12c] ss:$16 sps:$4 sm:$0xff]   ;;  %v2360_v39 = vld [vmem:[%s3341_s3 + $0x168] ss:$16 sps:$4 sm:$0xff]  }
 0x16c   : > { %v2359_v36 = vld [vmem:[%s3341_s3 + $0x14c] ss:$16 sps:$4 sm:$0xff]  }
 0x16d   : > { %v2878_v44 = vpack.c.bf16 %v325_v41, %v323_v40  ;;  %v2883_v46 = vpack.c.bf16 %v324_v43, %v322_v42  ;;  %v2362_v38 = vld [vmem:[%s3341_s3 + $0x16c] ss:$16 sps:$4 sm:$0xff]   ;;  %v2363_v41 = vld [vmem:[%s3341_s3 + $0x188] ss:$16 sps:$4 sm:$0xff]  }
 0x16e   : > { %v2365_v40 = vld [vmem:[%s3341_s3 + $0x18c] ss:$16 sps:$4 sm:$0xff]   ;;  %v2366_v43 = vld [vmem:[%s3341_s3 + $0x1a8] ss:$16 sps:$4 sm:$0xff]  }
 0x16f   : > { %744 = vmatprep.mubr.bf16.mxu1 %v2878_v44  ;;  %1214 = vmatprep.mubr.bf16.mxu0 %v2878_v44  ;;  %v2368_v42 = vld [vmem:[%s3341_s3 + $0x1ac] ss:$16 sps:$4 sm:$0xff]  }
 0x170   : > { %745 = vmatmul.mubr.bf16.vlgmr.msra.gmra.mrb[0].mxu1 %v2883_v46  ;;  %1215 = vmatmul.mubr.bf16.vlgmr.msra.gmra.mrb[0].mxu0 %v2883_v46 }
 0x171   : > { %756 = vmatpush1.bf16.msra.mxu1 %v2279_v45  ;;  %787 = vmatprep.mubr.bf16.mxu1 %v2878_v44  ;;  %v2369_v45 = vld [vmem:[%s3341_s3 + $0x1c8] ss:$16 sps:$4 sm:$0xff]  }
 0x172   : > { %757 = vmatprep.subr.bf16.mxu1 %v2284_v47  ;;  %v2374_v47 = vld [vmem:[%s3341_s3 + $0x1ec] ss:$16 sps:$4 sm:$0xff]  }
 0x175   : > { %758 = vmatpush1.bf16.msra.mxu1 %v2282_v48  ;;  %v2372_v48 = vld [vmem:[%s3341_s3 + $0x1e8] ss:$16 sps:$4 sm:$0xff]  }
 0x176   : > { %759 = vmatprep.subr.bf16.mxu1 %v2287_v49 }
 0x179   : > { %760 = vmatpush1.bf16.msra.mxu1 %v2285_v50 }
 0x17a   : > { %761 = vmatprep.subr.bf16.mxu1 %v2290_v51 }
 0x17d   : > { %762 = vmatpush1.bf16.msra.mxu1 %v2288_v52 }
 0x17e   : > { %763 = vmatprep.subr.bf16.mxu1 %v2293_v53 }
 0x181   : > { %764 = vmatpush1.bf16.msra.mxu1 %v2291_v54 }
 0x182   : > { %765 = vmatprep.subr.bf16.mxu1 %v2296_v55 }
 0x185   : > { %766 = vmatpush1.bf16.msra.mxu1 %v2294_v56 }
 0x186   : > { %767 = vmatprep.subr.bf16.mxu1 %v2299_v57 }
 0x189   : > { %768 = vmatpush1.bf16.msra.mxu1 %v2297_v58 }
 0x18a   : > { %769 = vmatprep.subr.bf16.mxu1 %v2302_v59 }
 0x18d   : > { %770 = vmatpush1.bf16.msra.mxu1 %v2300_v60 }
 0x18e   : > { %771 = vmatprep.subr.bf16.mxu1 %v2305_v61 }
 0x191   : > { %772 = vmatpush1.bf16.msra.mxu1 %v2303_v62 }
 0x192   : > { %773 = vmatprep.subr.bf16.mxu1 %v2308_v63 }
 0x195   : > { %774 = vmatpush1.bf16.msra.mxu1 %v2306_v0 }
 0x196   : > { %775 = vmatprep.subr.bf16.mxu1 %v2311_v1 }
 0x199   : > { %776 = vmatpush1.bf16.msra.mxu1 %v2309_v2 }
 0x19a   : > { %777 = vmatprep.subr.bf16.mxu1 %v2314_v3 }
 0x19d   : > { %778 = vmatpush1.bf16.msra.mxu1 %v2312_v4 }
 0x19e   : > { %779 = vmatprep.subr.bf16.mxu1 %v2317_v5 }
 0x1a1   : > { %780 = vmatpush1.bf16.msra.mxu1 %v2315_v6 }
 0x1a2   : > { %781 = vmatprep.subr.bf16.mxu1 %v2320_v7 }
 0x1a5   : > { %782 = vmatpush1.bf16.msra.mxu1 %v2318_v8 }
 0x1a6   : > { %783 = vmatprep.subr.bf16.mxu1 %v2323_v9 }
 0x1a9   : > { %784 = vmatpush1.bf16.msra.mxu1 %v2321_v10 }
 0x1aa   : > { %785 = vmatprep.subr.bf16.mxu1 %v2326_v11 }
 0x1ad   : > { %786 = vmatpush1.bf16.msra.mxu1 %v2324_v12 }
 0x1ae   : > { %1225 = vmatprep.subr.bf16.mxu1 %v2329_v13 }
 0x1b0   : > { %788 = vmatmul.mubr.bf16.vlgmr.msra.gmra.mrb[4].mxu1 %v2883_v46 }
 0x1b1   : > { %1226 = vmatpush1.bf16.msra.mxu1 %v2327_v14  ;;  %1257 = vmatprep.mubr.bf16.mxu1 %v2878_v44  ;;  %v2371_v44 = vld [vmem:[%s3341_s3 + $0x1cc] ss:$16 sps:$4 sm:$0xff]  }
 0x1b2   : > { %1227 = vmatprep.subr.bf16.mxu1 %v2332_v15 }
 0x1b5   : > { %1228 = vmatpush1.bf16.msra.mxu1 %v2330_v16 }
 0x1b6   : > { %1229 = vmatprep.subr.bf16.mxu1 %v2335_v17 }
 0x1b9   : > { %1230 = vmatpush1.bf16.msra.mxu1 %v2333_v18 }
 0x1ba   : > { %1231 = vmatprep.subr.bf16.mxu1 %v2338_v19 }
 0x1bd   : > { %1232 = vmatpush1.bf16.msra.mxu1 %v2336_v20 }
 0x1be   : > { %1233 = vmatprep.subr.bf16.mxu1 %v2341_v21 }
 0x1c1   : > { %1234 = vmatpush1.bf16.msra.mxu1 %v2339_v22 }
 0x1c2   : > { %1235 = vmatprep.subr.bf16.mxu1 %v2344_v23 }
 0x1c5   : > { %1236 = vmatpush1.bf16.msra.mxu1 %v2342_v24 }
 0x1c6   : > { %1237 = vmatprep.subr.bf16.mxu1 %v2347_v25 }
 0x1c9   : > { %1238 = vmatpush1.bf16.msra.mxu1 %v2345_v26 }
 0x1ca   : > { %1239 = vmatprep.subr.bf16.mxu1 %v2350_v27 }
 0x1cd   : > { %1240 = vmatpush1.bf16.msra.mxu1 %v2348_v31 }
 0x1ce   : > { %1241 = vmatprep.subr.bf16.mxu1 %v2353_v32 }
 0x1d1   : > { %1242 = vmatpush1.bf16.msra.mxu1 %v2351_v33 }
 0x1d2   : > { %1243 = vmatprep.subr.bf16.mxu1 %v2356_v34 }
 0x1d5   : > { %1244 = vmatpush1.bf16.msra.mxu1 %v2354_v35 }
 0x1d6   : > { %1245 = vmatprep.subr.bf16.mxu1 %v2359_v36 }
 0x1d9   : > { %1246 = vmatpush1.bf16.msra.mxu1 %v2357_v37 }
 0x1da   : > { %1247 = vmatprep.subr.bf16.mxu1 %v2362_v38 }
 0x1dd   : > { %1248 = vmatpush1.bf16.msra.mxu1 %v2360_v39 }
 0x1de   : > { %1249 = vmatprep.subr.bf16.mxu1 %v2365_v40 }
 0x1e1   : > { %1250 = vmatpush1.bf16.msra.mxu1 %v2363_v41 }
 0x1e2   : > { %1251 = vmatprep.subr.bf16.mxu1 %v2368_v42 }
 0x1e5   : > { %1252 = vmatpush1.bf16.msra.mxu1 %v2366_v43 }
 0x1e6   : > { %1253 = vmatprep.subr.bf16.mxu1 %v2371_v44 }
 0x1e9   : > { %1254 = vmatpush1.bf16.msra.mxu1 %v2369_v45 }
 0x1ea   : > { %1255 = vmatprep.subr.bf16.mxu1 %v2374_v47 }
 0x1ed   : > { %1256 = vmatpush1.bf16.msra.mxu1 %v2372_v48 }
 0x1f0   : > { %1258 = vmatmul.mubr.bf16.vlgmr.msra.gmra.mrb[8].mxu1 %v2883_v46 }
 0x243   : > { %v746_v49 = vpop.f32.mrb[0].mxu1  ;;  %v1216_v50 = vpop.f32.mrb[0].mxu0 }
 0x244   : > { %v1276_v51 = vmul.f32 0.70710677, %v746_v49  ;;  %v748_v52 = vpop.f32.mrb[1].mxu1  ;;  %v1218_v53 = vpop.f32.mrb[1].mxu0  ;;  %v1268_v63 = vmul.f32 0.5, %v746_v49 }
 0x245   : > { %v1277_v54 = vmul.f32 0.70710677, %v748_v52  ;;  %v750_v55 = vpop.f32.mrb[2].mxu1  ;;  %v1220_v56 = vpop.f32.mrb[2].mxu0  ;;  %v1269_v1 = vmul.f32 0.5, %v748_v52 }
 0x246   : > { %2475 = verf.f32 %v1276_v51  ;;  %v1280_v57 = vmul.f32 0.70710677, %v750_v55  ;;  %v752_v58 = vpop.f32.mrb[3].mxu1  ;;  %v1222_v59 = vpop.f32.mrb[3].mxu0  ;;  %v1272_v5 = vmul.f32 0.5, %v750_v55 }
 0x247   : > { %2477 = verf.f32 %v1277_v54  ;;  %v1281_v60 = vmul.f32 0.70710677, %v752_v58  ;;  %v1273_v8 = vmul.f32 0.5, %v752_v58  ;;  %v2375_v58 = vld [vmem:[%s3343_s5] ss:$8 sps:$4 sm:$0xff]  }
 0x248   : > { %2479 = verf.f32 %v1280_v57 }
 0x249   : > { %2481 = verf.f32 %v1281_v60  ;;  %v2380_v60 = vld [vmem:[%s3343_s5 + $0x14] ss:$8 sps:$4 sm:$0xff]  }
 0x250   : > { %v2476_v61 = vpop.eup %2475 }
 0x251   : > { %v2478_v62 = vpop.eup %2477  ;;  %v1292_v46 = vadd.f32 1.0, %v2476_v61  ;;  %v2378_v61 = vld [vmem:[%s3343_s5 + $0x10] ss:$8 sps:$4 sm:$0xff]  }
 0x252   : > { %v2480_v0 = vpop.eup %2479  ;;  %v1293_v2 = vadd.f32 1.0, %v2478_v62  ;;  %v2383_v62 = vld [vmem:[%s3343_s5 + $0x24] ss:$8 sps:$4 sm:$0xff]  }
 0x253   : > { %v2482_v3 = vpop.eup %2481  ;;  %v1300_v4 = vmul.f32 %v1292_v46, %v1268_v63  ;;  %v1296_v6 = vadd.f32 1.0, %v2480_v0  ;;  %v2381_v63 = vld [vmem:[%s3343_s5 + $0x20] ss:$8 sps:$4 sm:$0xff]   ;;  %v2386_v46 = vld [vmem:[%s3343_s5 + $0x34] ss:$8 sps:$4 sm:$0xff]  }
 0x254   : > { %v1301_v7 = vmul.f32 %v1293_v2, %v1269_v1  ;;  %v1297_v9 = vadd.f32 1.0, %v2482_v3  ;;  %v2384_v0 = vld [vmem:[%s3343_s5 + $0x30] ss:$8 sps:$4 sm:$0xff]   ;;  %v2389_v1 = vld [vmem:[%s3343_s5 + $0x44] ss:$8 sps:$4 sm:$0xff]  }
 0x255   : > { %v3079_v10 = vmul.f32 %v1300_v4, %v1216_v50  ;;  %v1304_v11 = vmul.f32 %v1296_v6, %v1272_v5  ;;  %v2387_v2 = vld [vmem:[%s3343_s5 + $0x40] ss:$8 sps:$4 sm:$0xff]   ;;  %v2392_v3 = vld [vmem:[%s3343_s5 + $0x54] ss:$8 sps:$4 sm:$0xff]   ;;  %v2390_v4 = vld [vmem:[%s3343_s5 + $0x50] ss:$8 sps:$4 sm:$0xff]  }
 0x256   : > { %v3081_v12 = vmul.f32 %v1301_v7, %v1218_v53  ;;  %v1305_v13 = vmul.f32 %v1297_v9, %v1273_v8  ;;  %v2395_v5 = vld [vmem:[%s3343_s5 + $0x64] ss:$8 sps:$4 sm:$0xff]   ;;  %v2393_v6 = vld [vmem:[%s3343_s5 + $0x60] ss:$8 sps:$4 sm:$0xff]   ;;  %v2398_v7 = vld [vmem:[%s3343_s5 + $0x74] ss:$8 sps:$4 sm:$0xff]  }
 0x257   : > { %v3083_v14 = vmul.f32 %v1304_v11, %v1220_v56  ;;  %v2396_v8 = vld [vmem:[%s3343_s5 + $0x70] ss:$8 sps:$4 sm:$0xff]   ;;  %v2401_v9 = vld [vmem:[%s3343_s5 + $0x84] ss:$8 sps:$4 sm:$0xff]   ;;  %v2399_v11 = vld [vmem:[%s3343_s5 + $0x80] ss:$8 sps:$4 sm:$0xff]  }
 0x258   : > { %v3085_v15 = vmul.f32 %v1305_v13, %v1222_v59  ;;  %v1317_v42 = vadd.f32 %v3081_v12, %v3079_v10  ;;  %v2377_v59 = vld [vmem:[%s3343_s5 + $0x4] ss:$8 sps:$4 sm:$0xff]   ;;  %v2404_v13 = vld [vmem:[%s3343_s5 + $0x94] ss:$8 sps:$4 sm:$0xff]  }
 0x259   : > { %1787 = vmatprep.subr.bf16.mxu0 %v2377_v59 }
 0x25a   : > { %v1322_v50 = vadd.f32 %v3085_v15, %v3083_v14  ;;  %1788 = vmatpush1.bf16.msra.mxu0 %v2375_v58 }
 0x25b   : > { %1789 = vmatprep.subr.bf16.mxu0 %v2380_v60 }
 0x25e   : > { %1790 = vmatpush1.bf16.msra.mxu0 %v2378_v61 }
 0x25f   : > { %1791 = vmatprep.subr.bf16.mxu0 %v2383_v62  ;;  %v1381_v62 = vsub.s32 2, %v2866_v28 }
 0x262   : > { %1792 = vmatpush1.bf16.msra.mxu0 %v2381_v63  ;;  %v1316_v63 = vld [vmem:[%s3342_s4] sm:$0xf] }
 0x263   : > { %1793 = vmatprep.subr.bf16.mxu0 %v2386_v46  ;;  %v1385_v46 = vsub.s32 3, %v2866_v28 }
 0x266   : > { %1794 = vmatpush1.bf16.msra.mxu0 %v2384_v0 }
 0x267   : > { %1795 = vmatprep.subr.bf16.mxu0 %v2389_v1  ;;  %v1378_v1 = vrot.slane %v1316_v63, %v318_v29 }
 0x26a   : > { %1796 = vmatpush1.bf16.msra.mxu0 %v2387_v2  ;;  %v1382_v2 = vrot.slane %v1316_v63, %v1381_v62  ;;  %v2496_v62 = vld [vmem:[%s2633_s18 + $0x8] sm:$0xff] }
 0x26b   : > { %1797 = vmatprep.subr.bf16.mxu0 %v2392_v3 }
 0x26e   : > { %1798 = vmatpush1.bf16.msra.mxu0 %v2390_v4 }
 0x26f   : > { %1799 = vmatprep.subr.bf16.mxu0 %v2395_v5  ;;  %v1374_v5 = vrot.slane %v1316_v63, %v314_v30  ;;  %v2423_v30 = vld [vmem:[%s3343_s5 + $0x100] ss:$8 sps:$4 sm:$0xff]  }
 0x272   : > { %1800 = vmatpush1.bf16.msra.mxu0 %v2393_v6 }
 0x273   : > { %1801 = vmatprep.subr.bf16.mxu0 %v2398_v7 }
 0x276   : > { %1802 = vmatpush1.bf16.msra.mxu0 %v2396_v8 }
 0x277   : > { %1803 = vmatprep.subr.bf16.mxu0 %v2401_v9 }
 0x27a   : > { %1804 = vmatpush1.bf16.msra.mxu0 %v2399_v11 }
 0x27b   : > { %1805 = vmatprep.subr.bf16.mxu0 %v2404_v13  ;;  %v1386_v13 = vrot.slane %v1316_v63, %v1385_v46 }
 0x283   : > { %v789_v16 = vpop.f32.mrb[4].mxu1 }
 0x284   : > { %v791_v17 = vpop.f32.mrb[5].mxu1  ;;  %v1278_v20 = vmul.f32 0.70710677, %v789_v16  ;;  %v1270_v33 = vmul.f32 0.5, %v789_v16  ;;  %v2402_v16 = vld [vmem:[%s3343_s5 + $0x90] ss:$8 sps:$4 sm:$0xff]  }
 0x285   : > { %v793_v18 = vpop.f32.mrb[6].mxu1  ;;  %v1279_v21 = vmul.f32 0.70710677, %v791_v17  ;;  %v1271_v35 = vmul.f32 0.5, %v791_v17  ;;  %v2407_v17 = vld [vmem:[%s3343_s5 + $0xa4] ss:$8 sps:$4 sm:$0xff]   ;;  %1806 = vmatpush1.bf16.msra.mxu0 %v2402_v16 }
 0x286   : > { %v795_v19 = vpop.f32.mrb[7].mxu1  ;;  %v1282_v22 = vmul.f32 0.70710677, %v793_v18  ;;  %2483 = verf.f32 %v1278_v20  ;;  %v1274_v37 = vmul.f32 0.5, %v793_v18  ;;  %v2405_v18 = vld [vmem:[%s3343_s5 + $0xa0] ss:$8 sps:$4 sm:$0xff]   ;;  %1807 = vmatprep.subr.bf16.mxu0 %v2407_v17 }
 0x287   : > { %v1283_v23 = vmul.f32 0.70710677, %v795_v19  ;;  %2485 = verf.f32 %v1279_v21  ;;  %v1275_v39 = vmul.f32 0.5, %v795_v19 }
 0x288   : > { %2487 = verf.f32 %v1282_v22 }
 0x289   : > { %2489 = verf.f32 %v1283_v23  ;;  %1808 = vmatpush1.bf16.msra.mxu0 %v2405_v18 }
 0x290   : > { %v2484_v24 = vpop.eup %2483 }
 0x291   : > { %v2486_v25 = vpop.eup %2485  ;;  %v1294_v31 = vadd.f32 1.0, %v2484_v24 }
 0x292   : > { %v2488_v26 = vpop.eup %2487  ;;  %v1295_v32 = vadd.f32 1.0, %v2486_v25 }
 0x293   : > { %v2490_v27 = vpop.eup %2489  ;;  %v1298_v34 = vadd.f32 1.0, %v2488_v26  ;;  %v1302_v38 = vmul.f32 %v1294_v31, %v1270_v33 }
 0x294   : > { %v1299_v36 = vadd.f32 1.0, %v2490_v27  ;;  %v1303_v41 = vmul.f32 %v1295_v32, %v1271_v35 }
 0x295   : > { %v1306_v45 = vmul.f32 %v1298_v34, %v1274_v37 }
 0x296   : > { %v1307_v49 = vmul.f32 %v1299_v36, %v1275_v39 }
 0x2c3   : > { %v1259_v40 = vpop.f32.mrb[8].mxu1 }
 0x2c4   : > { %v3089_v43 = vmul.f32 %v1302_v38, %v1259_v40  ;;  %v1261_v44 = vpop.f32.mrb[9].mxu1 }
 0x2c5   : > { %v3091_v47 = vmul.f32 %v1303_v41, %v1261_v44  ;;  %v1263_v48 = vpop.f32.mrb[10].mxu1  ;;  %v2410_v44 = vld [vmem:[%s3343_s5 + $0xb4] ss:$8 sps:$4 sm:$0xff]  }
 0x2c6   : > { %v1318_v51 = vadd.f32 %v1317_v42, %v3089_v43  ;;  %v3096_v52 = vmul.f32 %v1306_v45, %v1263_v48  ;;  %v1265_v53 = vpop.f32.mrb[11].mxu1  ;;  %v2408_v45 = vld [vmem:[%s3343_s5 + $0xb0] ss:$8 sps:$4 sm:$0xff]   ;;  %1809 = vmatprep.subr.bf16.mxu0 %v2410_v44  ;;  %v2413_v48 = vld [vmem:[%s3343_s5 + $0xc4] ss:$8 sps:$4 sm:$0xff]  }
 0x2c7   : > { %v3098_v54 = vmul.f32 %v1307_v49, %v1265_v53  ;;  %1810 = vmatpush1.bf16.msra.mxu0 %v2408_v45  ;;  %v2416_v49 = vld [vmem:[%s3343_s5 + $0xd4] ss:$8 sps:$4 sm:$0xff]   ;;  %v2450_v44 = vld [vmem:[%s3343_s5 + $0x190] ss:$8 sps:$4 sm:$0xff]   ;;  %v2455_v45 = vld [vmem:[%s3343_s5 + $0x1a4] ss:$8 sps:$4 sm:$0xff]  }
 0x2c8   : > { %v1323_v55 = vadd.f32 %v1322_v50, %v3096_v52  ;;  %v1319_v56 = vadd.f32 %v1318_v51, %v3091_v47  ;;  %1811 = vmatprep.subr.bf16.mxu0 %v2413_v48  ;;  %v2414_v50 = vld [vmem:[%s3343_s5 + $0xd0] ss:$8 sps:$4 sm:$0xff]   ;;  %v2419_v51 = vld [vmem:[%s3343_s5 + $0xe4] ss:$8 sps:$4 sm:$0xff]   ;;  %v2422_v53 = vld [vmem:[%s3343_s5 + $0xf4] ss:$8 sps:$4 sm:$0xff]  }
 0x2c9   : > { %v2458_v48 = vld [vmem:[%s3343_s5 + $0x1b4] ss:$8 sps:$4 sm:$0xff]  }
 0x2ca   : > { %1320 = vadd.xlane.f32.xlu0 %v1319_v56  ;;  %v1324_v57 = vadd.f32 %v1323_v55, %v3098_v54  ;;  %v2425_v55 = vld [vmem:[%s3343_s5 + $0x104] ss:$8 sps:$4 sm:$0xff]  }
 0x2cc   : > { %1325 = vadd.xlane.f32.xlu1 %v1324_v57 }
 0x357   : > { %v1321_v19 = vpop.xlane.xlu0 %1320 }
 0x358   : > { %v1328_v20 = vmul.f32 0.001953125, %v1321_v19 }
 0x359   : > { %v1326_v21 = vpop.xlane.xlu1 %1325 }
 0x35a   : > { %v1330_v22 = vsub.f32 %v3079_v10, %v1328_v20  ;;  %v1331_v23 = vsub.f32 %v3081_v12, %v1328_v20  ;;  %v1329_v24 = vmul.f32 0.001953125, %v1326_v21  ;;  %v1332_v25 = vsub.f32 %v3089_v43, %v1328_v20 }
 0x35b   : > { %v3173_v26 = vsub.f32 %v3091_v47, %v1328_v20  ;;  %v2411_v47 = vld [vmem:[%s3343_s5 + $0xc0] ss:$8 sps:$4 sm:$0xff]  }
 0x35c   : > { %v1334_v27 = vsub.f32 %v3083_v14, %v1329_v24  ;;  %v1335_v31 = vsub.f32 %v3085_v15, %v1329_v24  ;;  %v1338_v32 = vmul.f32 %v1330_v22, %v1330_v22  ;;  %v1339_v33 = vmul.f32 %v1331_v23, %v1331_v23  ;;  %1812 = vmatpush1.bf16.msra.mxu0 %v2411_v47  ;;  %v2453_v47 = vld [vmem:[%s3343_s5 + $0x1a0] ss:$8 sps:$4 sm:$0xff]  }
 0x35d   : > { %v1340_v34 = vmul.f32 %v1332_v25, %v1332_v25  ;;  %v1336_v35 = vsub.f32 %v3096_v52, %v1329_v24  ;;  %v1337_v10 = vsub.f32 %v3098_v54, %v1329_v24  ;;  %v1341_v38 = vmul.f32 %v3173_v26, %v3173_v26  ;;  %1813 = vmatprep.subr.bf16.mxu0 %v2416_v49  ;;  %v2417_v52 = vld [vmem:[%s3343_s5 + $0xe0] ss:$8 sps:$4 sm:$0xff]   ;;  %v2420_v54 = vld [vmem:[%s3343_s5 + $0xf0] ss:$8 sps:$4 sm:$0xff]  }
 0x35e   : > { %v1346_v36 = vadd.f32 %v1339_v33, %v1338_v32  ;;  %v1342_v37 = vmul.f32 %v1334_v27, %v1334_v27  ;;  %v1343_v12 = vmul.f32 %v1335_v31, %v1335_v31  ;;  %v2426_v32 = vld [vmem:[%s3343_s5 + $0x110] ss:$8 sps:$4 sm:$0xff]   ;;  %v2431_v33 = vld [vmem:[%s3343_s5 + $0x124] ss:$8 sps:$4 sm:$0xff]  }
 0x35f   : > { %v1344_v40 = vmul.f32 %v1336_v35, %v1336_v35  ;;  %v1345_v14 = vmul.f32 %v1337_v10, %v1337_v10  ;;  %v2456_v49 = vld [vmem:[%s3343_s5 + $0x1b0] ss:$8 sps:$4 sm:$0xff]  }
 0x360   : > { %v1347_v39 = vadd.f32 %v1346_v36, %v1340_v34  ;;  %v1351_v41 = vadd.f32 %v1343_v12, %v1342_v37  ;;  %1814 = vmatpush1.bf16.msra.mxu0 %v2414_v50  ;;  %v2429_v34 = vld [vmem:[%s3343_s5 + $0x120] ss:$8 sps:$4 sm:$0xff]   ;;  %v2432_v36 = vld [vmem:[%s3343_s5 + $0x130] ss:$8 sps:$4 sm:$0xff]   ;;  %v2440_v12 = vld [vmem:[%s3343_s5 + $0x154] ss:$8 sps:$4 sm:$0xff]  }
 0x361   : > { %1815 = vmatprep.subr.bf16.mxu0 %v2419_v51  ;;  %v2435_v37 = vld [vmem:[%s3343_s5 + $0x140] ss:$8 sps:$4 sm:$0xff]   ;;  %v2461_v50 = vld [vmem:[%s3343_s5 + $0x1c4] ss:$8 sps:$4 sm:$0xff]  }
 0x362   : > { %v1348_v42 = vadd.f32 %v1347_v39, %v1341_v38  ;;  %v1352_v43 = vadd.f32 %v1351_v41, %v1344_v40  ;;  %v2438_v38 = vld [vmem:[%s3343_s5 + $0x150] ss:$8 sps:$4 sm:$0xff]   ;;  %v2443_v39 = vld [vmem:[%s3343_s5 + $0x164] ss:$8 sps:$4 sm:$0xff]   ;;  %v2441_v40 = vld [vmem:[%s3343_s5 + $0x160] ss:$8 sps:$4 sm:$0xff]  }
 0x363   : > { %v2446_v41 = vld [vmem:[%s3343_s5 + $0x174] ss:$8 sps:$4 sm:$0xff]   ;;  %v2459_v51 = vld [vmem:[%s3343_s5 + $0x1c0] ss:$8 sps:$4 sm:$0xff]  }
 0x364   : > { %1349 = vadd.xlane.f32.xlu0 %v1348_v42  ;;  %v1353_v15 = vadd.f32 %v1352_v43, %v1345_v14  ;;  %1816 = vmatpush1.bf16.msra.mxu0 %v2417_v52  ;;  %v2444_v42 = vld [vmem:[%s3343_s5 + $0x170] ss:$8 sps:$4 sm:$0xff]   ;;  %v2449_v14 = vld [vmem:[%s3343_s5 + $0x184] ss:$8 sps:$4 sm:$0xff]   ;;  %v2447_v43 = vld [vmem:[%s3343_s5 + $0x180] ss:$8 sps:$4 sm:$0xff]  }
 0x365   : > { %1817 = vmatprep.subr.bf16.mxu0 %v2422_v53  ;;  %v2464_v52 = vld [vmem:[%s3343_s5 + $0x1d4] ss:$8 sps:$4 sm:$0xff]   ;;  %v2462_v53 = vld [vmem:[%s3343_s5 + $0x1d0] ss:$8 sps:$4 sm:$0xff]  }
 0x366   : > { %1354 = vadd.xlane.f32.xlu1 %v1353_v15  ;;  %v2452_v15 = vld [vmem:[%s3343_s5 + $0x194] ss:$8 sps:$4 sm:$0xff]  }
 0x368   : > { %1818 = vmatpush1.bf16.msra.mxu0 %v2420_v54  ;;  %v2467_v54 = vld [vmem:[%s3343_s5 + $0x1e4] ss:$8 sps:$4 sm:$0xff]  }
 0x369   : > { %1830 = vmatprep.subr.bf16.mxu0 %v2425_v55  ;;  %v2465_v55 = vld [vmem:[%s3343_s5 + $0x1e0] ss:$8 sps:$4 sm:$0xff]  }
 0x3f1   : > { %v1350_v56 = vpop.xlane.xlu0 %1349 }
 0x3f2   : > { %v1356_v57 = vmul.f32 0.001953125, %v1350_v56  ;;  %v2470_v56 = vld [vmem:[%s3343_s5 + $0x1f4] ss:$8 sps:$4 sm:$0xff]  }
 0x3f3   : > { %v1355_v58 = vpop.xlane.xlu1 %1354 }
 0x3f4   : > { %v1358_v59 = vadd.f32 1e-05, %v1356_v57  ;;  %v1357_v60 = vmul.f32 0.001953125, %v1355_v58  ;;  %v2468_v57 = vld [vmem:[%s3343_s5 + $0x1f0] ss:$8 sps:$4 sm:$0xff]  }
 0x3f6   : > { %2491 = vrsqrt.f32 %v1358_v59  ;;  %v1359_v61 = vadd.f32 1e-05, %v1357_v60  ;;  %v2495_v59 = vld [vmem:[%s2633_s18] sm:$0xff] }
 0x3f8   : > { %2493 = vrsqrt.f32 %v1359_v61 }
 0x400   : > { %v2492_v0 = vpop.eup %2491 }
 0x401   : > { %v1363_v3 = vmul.f32 %v2492_v0, %v1331_v23  ;;  %v1362_v4 = vmul.f32 %v2492_v0, %v1330_v22  ;;  %v1364_v6 = vmul.f32 %v2492_v0, %v1332_v25  ;;  %v1365_v11 = vmul.f32 %v2492_v0, %v3173_v26  ;;  %v2428_v26 = vld [vmem:[%s3343_s5 + $0x114] ss:$8 sps:$4 sm:$0xff]  }
 0x402   : > { %v2494_v7 = vpop.eup %2493  ;;  %v2497_v0 = vld [vmem:[%s2633_s18 + $0x10] sm:$0xff] }
 0x403   : > { %v1367_v8 = vmul.f32 %v2494_v7, %v1335_v31  ;;  %v1366_v9 = vmul.f32 %v2494_v7, %v1334_v27  ;;  %v1369_v16 = vmul.f32 %v2494_v7, %v1337_v10  ;;  %v1368_v17 = vmul.f32 %v2494_v7, %v1336_v35  ;;  %v2434_v35 = vld [vmem:[%s3343_s5 + $0x134] ss:$8 sps:$4 sm:$0xff]   ;;  %v2437_v10 = vld [vmem:[%s3343_s5 + $0x144] ss:$8 sps:$4 sm:$0xff]  }
 0x404   : > { %v3224_v18 = vmul.f32 %v1382_v2, %v1364_v6  ;;  %v1392_v19 = vmul.f32 %v1378_v1, %v1363_v3  ;;  %v1391_v29 = vmul.f32 %v1374_v5, %v1362_v4  ;;  %v1394_v25 = vmul.f32 %v1386_v13, %v1365_v11  ;;  %v2498_v3 = vld [vmem:[%s2633_s18 + $0x18] sm:$0xff] }
 0x405   : > { %v1396_v20 = vmul.f32 %v1378_v1, %v1367_v8  ;;  %v1395_v21 = vmul.f32 %v1374_v5, %v1366_v9  ;;  %v1398_v23 = vmul.f32 %v1386_v13, %v1369_v16  ;;  %v3226_v22 = vmul.f32 %v1382_v2, %v1368_v17 }
 0x407   : > { %v1400_v28 = vpack.c.bf16 %v1396_v20, %v1392_v19  ;;  %v1399_v24 = vpack.c.bf16 %v1395_v21, %v1391_v29  ;;  %v1401_v27 = vpack.c.bf16 %v3226_v22, %v3224_v18  ;;  %v1402_v31 = vpack.c.bf16 %v1398_v23, %v1394_v25 }
 0x409   : > { %1819 = vmatprep.mubr.bf16.mxu0 %v1400_v28 }
 0x40a   : > { %1820 = vmatmul.mubr.bf16.vlgmr.msra.gmra.mrb[4].mxu0 %v1399_v24 }
 0x40b   : > { %1831 = vmatpush1.bf16.msra.mxu0 %v2423_v30  ;;  %1862 = vmatprep.mubr.bf16.mxu0 %v1402_v31 }
 0x40c   : > { %1832 = vmatprep.subr.bf16.mxu0 %v2428_v26 }
 0x40f   : > { %1833 = vmatpush1.bf16.msra.mxu0 %v2426_v32 }
 0x410   : > { %1834 = vmatprep.subr.bf16.mxu0 %v2431_v33 }
 0x413   : > { %1835 = vmatpush1.bf16.msra.mxu0 %v2429_v34 }
 0x414   : > { %1836 = vmatprep.subr.bf16.mxu0 %v2434_v35 }
 0x417   : > { %1837 = vmatpush1.bf16.msra.mxu0 %v2432_v36 }
 0x418   : > { %1838 = vmatprep.subr.bf16.mxu0 %v2437_v10 }
 0x41b   : > { %1839 = vmatpush1.bf16.msra.mxu0 %v2435_v37 }
 0x41c   : > { %1840 = vmatprep.subr.bf16.mxu0 %v2440_v12 }
 0x41f   : > { %1841 = vmatpush1.bf16.msra.mxu0 %v2438_v38 }
 0x420   : > { %1842 = vmatprep.subr.bf16.mxu0 %v2443_v39 }
 0x423   : > { %1843 = vmatpush1.bf16.msra.mxu0 %v2441_v40 }
 0x424   : > { %1844 = vmatprep.subr.bf16.mxu0 %v2446_v41 }
 0x427   : > { %1845 = vmatpush1.bf16.msra.mxu0 %v2444_v42 }
 0x428   : > { %1846 = vmatprep.subr.bf16.mxu0 %v2449_v14 }
 0x42b   : > { %1847 = vmatpush1.bf16.msra.mxu0 %v2447_v43 }
 0x42c   : > { %1848 = vmatprep.subr.bf16.mxu0 %v2452_v15 }
 0x42f   : > { %1849 = vmatpush1.bf16.msra.mxu0 %v2450_v44 }
 0x430   : > { %1850 = vmatprep.subr.bf16.mxu0 %v2455_v45 }
 0x433   : > { %1851 = vmatpush1.bf16.msra.mxu0 %v2453_v47 }
 0x434   : > { %1852 = vmatprep.subr.bf16.mxu0 %v2458_v48 }
 0x437   : > { %1853 = vmatpush1.bf16.msra.mxu0 %v2456_v49 }
 0x438   : > { %1854 = vmatprep.subr.bf16.mxu0 %v2461_v50 }
 0x43b   : > { %1855 = vmatpush1.bf16.msra.mxu0 %v2459_v51 }
 0x43c   : > { %1856 = vmatprep.subr.bf16.mxu0 %v2464_v52 }
 0x43f   : > { %1857 = vmatpush1.bf16.msra.mxu0 %v2462_v53 }
 0x440   : > { %1858 = vmatprep.subr.bf16.mxu0 %v2467_v54 }
 0x443   : > { %1859 = vmatpush1.bf16.msra.mxu0 %v2465_v55 }
 0x444   : > { %1860 = vmatprep.subr.bf16.mxu0 %v2470_v56 }
 0x447   : > { %1861 = vmatpush1.bf16.msra.mxu0 %v2468_v57 }
 0x44a   : > { %1863 = vmatmul.mubr.bf16.vlgmr.msra.gmra.mrb[4].mxu0 %v1401_v27 }
 0x51d   : > { %v1864_v58 = vpop.f32.mrb[4].mxu0 }
 0x51e   : > { %v2156_v60 = vadd.f32 %v2495_v59, %v1864_v58  ;;  %v1866_v61 = vpop.f32.mrb[5].mxu0 }
 0x51f   : > { %v2157_v63 = vadd.f32 %v2496_v62, %v1866_v61  ;;  %v1868_v46 = vpop.f32.mrb[6].mxu0 }
 0x520   : > { %1873 = vst [vmem:[%s271_s28] sm:$0xff] %v2156_v60  ;;  %v2158_v1 = vadd.f32 %v2497_v0, %v1868_v46  ;;  %v1870_v2 = vpop.f32.mrb[7].mxu0 }
 0x521   : > { %1874 = vst [vmem:[%s271_s28 + $0x8] sm:$0xff] %v2157_v63  ;;  %v2159_v4 = vadd.f32 %v2498_v3, %v1870_v2 }
 0x522   : > { %1875 = vst [vmem:[%s271_s28 + $0x10] sm:$0xff] %v2158_v1 }
 0x523   : > { %1876 = vst [vmem:[%s271_s28 + $0x18] sm:$0xff] %v2159_v4 }
 0x524 PF: > { %s17_s21 = sadd.s32 1, %s2537_s21  }
 0x525   : > { %p14_p2 = scmp.ge.s32.totalorder %s17_s21, 4  }
 0x527   :  { %16 = sbr.rel (!%p14_p2) target bundleno = 1 (0x1), region = 79 }
 0x52e   :  { %1901 = vsyncpa [#allocation3], 1 }
 0x52f   :  { %1903 = vsyncpa [#allocation3 + $0x1], 1 }

// kernel: transformer_blocks_forward.8
= control target key start
LH: loop header
LB: loop body
LE: loop exit
PB: predicated region body
PF: predicated region fallthrough
CT: control target
= control target key end

     0   :  { %15 = vsyncpa [#allocation3], 0  ;;  %s3534_s0 = inlined_call_operand.vmem [shape: f32[2,16,256], index: 0, kind: input, shape index: {}]   ;;  %s3535_s1 = inlined_call_operand.vmem [shape: bf16[2,24,256], index: 1, kind: input, shape index: {}]   ;;  %s3536_s2 = inlined_call_operand.hbm [shape: f32[1,256], index: 2, kind: input, shape index: {}]   ;;  %s3537_s3 = inlined_call_operand.vmem [shape: bf16[256,256], index: 3, kind: input, shape index: {}]   ;;  %s3538_s4 = inlined_call_operand.vmem [shape: bf16[256,512], index: 4, kind: input, shape index: {}]   ;;  %s3539_s5 = inlined_call_operand.hbm [shape: f32[2,128], index: 5, kind: input, shape index: {}]   ;;  %s3540_s6 = inlined_call_operand.hbm [shape: f32[2,128], index: 6, kind: input, shape index: {}]   ;;  %s3541_s7 = inlined_call_operand.vmem [shape: f32[1,128], index: 7, kind: input, shape index: {}]   ;;  %s3542_s8 = inlined_call_operand.hbm [shape: f32[1,128], index: 8, kind: input, shape index: {}]   ;;  %s3543_s9 = inlined_call_operand.vmem [shape: bf16[256,256], index: 9, kind: input, shape index: {}]   ;;  %s3544_s10 = inlined_call_operand.vmem [shape: f32[2,16,256], index: 10, kind: output, shape index: {}]  }
   0x1   :  { %16 = vsyncpa [#allocation5], 0 }
   0x2   :  { %17 = vsyncpa [#allocation8], 0  ;;  %s2773_s13 = smov 0  }
   0x3 LB: > { %s2779_s14 = sadd.s32 4294967295, %s2710_s13   ;;  %p2053_p0 = scmp.ge.s32.totalorder %s2710_s13, 1  ;;  %s2710_s13 = sphi %s2773_s13, %s23_s13  }
   0x4   : > { %p274_p1 = scmp.lt.s32.totalorder %s2710_s13, 3  ;;  %p3545_p2 = scmp.eq.s32.totalorder %s2779_s14, 0 }
   0x5   : > { %s2712_s15 = smov [#allocation4]   ;;  %s2713_s18 = smov [#allocation2]  }
   0x6   : > { %s304_s16 = sshll.u32 %s2712_s15, 4  ;;  %p2784_p3 = pnand %p2053_p0, %p274_p1  ;;  %s305_s16 = int_to_ptr.vmem [resolvable:$true] %s304_s16 }
   0x7   : > { %s287_s19 = sshll.u32 %s2713_s18, 4  ;;  %s2714_s20 = smov [#allocation6]   ;;  %s2796_s19 = int_to_ptr.vmem [resolvable:$true] %s287_s19 }
   0x8   : > { %s3547_s17 = scalar_select %p2784_p3, 1, 0 }
   0x9   : > { %p2268_p4 = pneg %p2784_p3  ;;  %s315_s21 = sshll.u32 %s2714_s20, 4  ;;  %s2798_s21 = int_to_ptr.vmem [resolvable:$true] %s315_s21 }
   0xa   : > { %s2715_s23 = smov [#allocation7]   ;;  %s2580_s27 = scalar_lea.hbm %s3539_s5, 32 }
   0xb   : > { %p2792_p5 = pnand %p3545_p2, %p2268_p4  ;;  %s329_s24 = sshll.u32 %s2715_s23, 4  ;;  %s2800_s24 = int_to_ptr.vmem [resolvable:$true] %s329_s24 }
   0xc   : > { %p2581_p6 = scmp.ne.s32.totalorder %s3539_s5, %s2580_s27  ;;  %p2587_p10 = scmp.lt.u32.totalorder %s2580_s27, %s3539_s5 }
   0xd   : > { %p2810_p7 = pneg %p2792_p5 }
   0xf   : > { %p2583_p8 = pnand %p2810_p7, %p2581_p6 }
  0x11   : > { %p2584_p9 = pneg %p2583_p8 }
  0x13   : > { %p2589_p11 = pnand %p2587_p10, %p2584_p9 }
  0x15   : > { %2592 = shalt.err (!%p2589_p11)
}
  0x16   : > { %s2593_s15 = scalar_lea.vmem %s305_s16, 32  ;;  %p2601_p1 = scmp.lt.s32.totalorder %s305_s16, %s305_s16 }
  0x17   : > { %p2594_p12 = scmp.ne.s32.totalorder %s305_s16, %s2593_s15  ;;  %p2602_p4 = scmp.lt.s32.totalorder %s2593_s15, %s2593_s15 }
  0x19   : > { %p2596_p13 = pnand %p2594_p12, %p2810_p7  ;;  %p2603_p2 = por %p2602_p4, %p2601_p1 }
  0x1b   : > { %p2597_p0 = pneg %p2596_p13 }
  0x1d   : > { %p2604_p3 = pnand %p2603_p2, %p2597_p0 }
  0x1f   : > { %2607 = shalt.err (!%p2604_p3)
}
  0x20   : > { %2274 = dma.hbm_to_vmem [thread:$0]  (!%p2792_p5), %s3539_s5, 32, %s305_s16, [#allocation5]  }
  0x21   : > { %s2608_s26 = scalar_lea.hbm %s3536_s2, 32 }
  0x22   : > { %p2609_p6 = scmp.ne.s32.totalorder %s3536_s2, %s2608_s26  ;;  %p2615_p2 = scmp.lt.u32.totalorder %s2608_s26, %s3536_s2 }
  0x24   : > { %p2611_p8 = pnand %p2609_p6, %p2810_p7 }
  0x26   : > { %p2612_p9 = pneg %p2611_p8 }
  0x28   : > { %p2617_p3 = pnand %p2615_p2, %p2612_p9 }
  0x2a   : > { %2620 = shalt.err (!%p2617_p3)
}
  0x2b   : > { %s2621_s16 = scalar_lea.vmem %s2796_s19, 32  ;;  %p2629_p13 = scmp.lt.s32.totalorder %s2796_s19, %s2796_s19 }
  0x2c   : > { %p2622_p10 = scmp.ne.s32.totalorder %s2796_s19, %s2621_s16  ;;  %p2630_p0 = scmp.lt.s32.totalorder %s2621_s16, %s2621_s16 }
  0x2e   : > { %p2624_p11 = pnand %p2622_p10, %p2810_p7  ;;  %p2631_p1 = por %p2630_p0, %p2629_p13 }
  0x30   : > { %p2625_p12 = pneg %p2624_p11 }
  0x32   : > { %p2632_p4 = pnand %p2631_p1, %p2625_p12 }
  0x34   : > { %2635 = shalt.err (!%p2632_p4)
}
  0x35   : > { %2271 = dma.hbm_to_vmem [thread:$0]  (!%p2792_p5), %s3536_s2, 32, %s2796_s19, [#allocation3]  }
  0x36   : > { %s2636_s23 = scalar_lea.hbm %s3540_s6, 32 }
  0x37   : > { %p2637_p6 = scmp.ne.s32.totalorder %s3540_s6, %s2636_s23  ;;  %p2643_p2 = scmp.lt.u32.totalorder %s2636_s23, %s3540_s6 }
  0x39   : > { %p2639_p8 = pnand %p2637_p6, %p2810_p7 }
  0x3b   : > { %p2640_p9 = pneg %p2639_p8 }
  0x3d   : > { %p2645_p3 = pnand %p2643_p2, %p2640_p9 }
  0x3f   : > { %2648 = shalt.err (!%p2645_p3)
}
  0x40   : > { %s2649_s19 = scalar_lea.vmem %s2798_s21, 32  ;;  %p2657_p13 = scmp.lt.s32.totalorder %s2798_s21, %s2798_s21 }
  0x41   : > { %p2650_p10 = scmp.ne.s32.totalorder %s2798_s21, %s2649_s19  ;;  %p2658_p0 = scmp.lt.s32.totalorder %s2649_s19, %s2649_s19 }
  0x43   : > { %p2652_p11 = pnand %p2650_p10, %p2810_p7  ;;  %p2659_p1 = por %p2658_p0, %p2657_p13 }
  0x45   : > { %p2653_p12 = pneg %p2652_p11 }
  0x47   : > { %p2660_p4 = pnand %p2659_p1, %p2653_p12 }
  0x49   : > { %2663 = shalt.err (!%p2660_p4)
}
  0x4a   : > { %2277 = dma.hbm_to_vmem [thread:$0]  (!%p2792_p5), %s3540_s6, 32, %s2798_s21, [#allocation5]  }
  0x4b   : > { %s2664_s15 = scalar_lea.hbm %s3542_s8, 16 }
  0x4c   : > { %p2665_p6 = scmp.ne.s32.totalorder %s3542_s8, %s2664_s15  ;;  %p2671_p2 = scmp.lt.u32.totalorder %s2664_s15, %s3542_s8 }
  0x4e   : > { %p2667_p8 = pnand %p2665_p6, %p2810_p7 }
  0x50   : > { %p2668_p9 = pneg %p2667_p8 }
  0x52   : > { %p2673_p3 = pnand %p2671_p2, %p2668_p9 }
  0x54   : > { %2676 = shalt.err (!%p2673_p3)
}
  0x55   : > { %s2677_s21 = scalar_lea.vmem %s2800_s24, 16  ;;  %s2684_s26 = scalar_lea.vmem %s2800_s24, 32 }
  0x56   : > { %p2678_p10 = scmp.ne.s32.totalorder %s2800_s24, %s2677_s21  ;;  %p2685_p13 = scmp.lt.s32.totalorder %s2800_s24, %s2800_s24 }
  0x57   : > { %p2686_p0 = scmp.lt.s32.totalorder %s2684_s26, %s2677_s21 }
  0x58   : > { %p2680_p11 = pnand %p2678_p10, %p2810_p7 }
  0x59   : > { %p2687_p1 = por %p2686_p0, %p2685_p13 }
  0x5a   : > { %p2681_p12 = pneg %p2680_p11 }
  0x5c   : > { %p2688_p4 = pnand %p2687_p1, %p2681_p12 }
  0x5e   : > { %2691 = shalt.err (!%p2688_p4)
}
  0x5f   : > { %2280 = dma.hbm_to_vmem [thread:$0]  (!%p2792_p5), %s3542_s8, 16, %s2800_s24, [#allocation8]  }
  0x60   : > { %p3550_p6 = scmp.ne.s32.totalorder %s3547_s17, 0 }
  0x61   : > { %p3551_p7 = scmp.eq.s32.totalorder (!%p3550_p6), %s2779_s14, 0 }
  0x62   : > { %361 = sbr.rel (%p3550_p6) target bundleno = 1650 (0x672), region = 60 }
  0x69   : > { %2697 = dma.done.wait (%p3551_p7), [#allocation3], 32   ;;  %p3552_p8 = pmov %p3551_p7 }
  0x6a   : > { %p3553_p9 = pmov %p3551_p7 }
  0x6b   : > { %2699 = vsyncadd (%p3552_p8), [#allocation3], 4294967264 }
  0x6c   : > { %2701 = dma.done.wait (%p3553_p9), [#allocation5], 64   ;;  %p3554_p2 = pmov %p3551_p7 }
  0x6e   : > { %2703 = vsyncadd (%p3554_p2), [#allocation5], 4294967232  ;;  %p3555_p3 = pmov %p3554_p2 }
  0x6f   : > { %p3556_p5 = pmov %p3554_p2 }
  0x70   : > { %2705 = dma.done.wait (%p3555_p3), [#allocation8], 16  }
  0x71   : > { %2707 = vsyncadd (%p3556_p5), [#allocation8], 4294967280  ;;  %p416_p10 = scmp.lt.s32.totalorder %s2779_s14, 1  ;;  %v2303_v5 = vld [vmem:[%s3538_s4 + $0x4] ss:$16 sps:$4 sm:$0xff]   ;;  %vm1545_vm12 = vcmask 1041409  }
  0x72   : > { %v2305_v6 = vld [vmem:[%s3538_s4] ss:$16 sps:$4 sm:$0xff]   ;;  %v2306_v8 = vld [vmem:[%s3538_s4 + $0x24] ss:$16 sps:$4 sm:$0xff]   ;;  %1126 = vmatprep.subr.bf16.mxu1 %v2303_v5  ;;  %vm1316_vm13 = vcmask 1040384   ;;  %vm2717_vm14 = vmmov 0  }
  0x73   : > { %s3558_s14 = smov (!%p416_p10, %s2779_s14), 1  ;;  %1127 = vmatpush1.bf16.msra.mxu1 %v2305_v6  ;;  %v2308_v9 = vld [vmem:[%s3538_s4 + $0x20] ss:$16 sps:$4 sm:$0xff]   ;;  %v2309_v10 = vld [vmem:[%s3538_s4 + $0x44] ss:$16 sps:$4 sm:$0xff]  }
  0x74   : > { %s2205_s17 = sshll.u32 %s3558_s14, 5  ;;  %1128 = vmatprep.subr.bf16.mxu1 %v2306_v8  ;;  %v2311_v11 = vld [vmem:[%s3538_s4 + $0x40] ss:$16 sps:$4 sm:$0xff]   ;;  %v2312_v12 = vld [vmem:[%s3538_s4 + $0x64] ss:$16 sps:$4 sm:$0xff]   ;;  %s2251_s11 = smul.u32 24, %s3558_s14 }
  0x75   : > { %s2920_s30 = scalar_lea.vmem %s3534_s0, %s2205_s17  ;;  %v2314_v13 = vld [vmem:[%s3538_s4 + $0x60] ss:$16 sps:$4 sm:$0xff]   ;;  %v2315_v14 = vld [vmem:[%s3538_s4 + $0x84] ss:$16 sps:$4 sm:$0xff]   ;;  %s430_s28 = scalar_lea.vmem %s3544_s10, %s2205_s17 }
  0x76   : > { %v2923_v0 = vld [vmem:[%s2920_s30] sm:$0xff]  ;;  %v2926_v1 = vld [vmem:[%s2920_s30 + $0x8] sm:$0xff]  ;;  %v2929_v2 = vld [vmem:[%s2920_s30 + $0x10] sm:$0xff]  ;;  %s2975_s25 = scalar_lea.vmem %s3535_s1, %s2251_s11 }
  0x77   : > { %v437_v3 = vadd.f32 %v2926_v1, %v2923_v0  ;;  %v2934_v4 = vld [vmem:[%s2920_s30 + $0x18] sm:$0xff]  ;;  %1129 = vmatpush1.bf16.msra.mxu1 %v2308_v9  ;;  %v2317_v15 = vld [vmem:[%s3538_s4 + $0x80] ss:$16 sps:$4 sm:$0xff]   ;;  %v2318_v16 = vld [vmem:[%s3538_s4 + $0xa4] ss:$16 sps:$4 sm:$0xff]  }
  0x78   : > { %v440_v7 = vadd.f32 %v2934_v4, %v2929_v2  ;;  %1130 = vmatprep.subr.bf16.mxu1 %v2309_v10  ;;  %v2320_v17 = vld [vmem:[%s3538_s4 + $0xa0] ss:$16 sps:$4 sm:$0xff]   ;;  %v2321_v18 = vld [vmem:[%s3538_s4 + $0xc4] ss:$16 sps:$4 sm:$0xff]  }
  0x79   : > { %438 = vadd.xlane.f32.xlu0 %v437_v3  ;;  %v2323_v19 = vld [vmem:[%s3538_s4 + $0xc0] ss:$16 sps:$4 sm:$0xff]   ;;  %v2987_v20 = vld [vmem:[%s2975_s25 + $0x4] ss:$8 sps:$4 sm:$0xff]   ;;  %v2359_v25 = vld [vmem:[%s3537_s3 + $0x14] ss:$8 sps:$4 sm:$0xff]  }
  0x7a   : > { %v2324_v21 = vld [vmem:[%s3538_s4 + $0xe4] ss:$16 sps:$4 sm:$0xff]   ;;  %1158 = vmatprep.mubr.bf16.mxu1 %v2987_v20  ;;  %v2326_v22 = vld [vmem:[%s3538_s4 + $0xe0] ss:$16 sps:$4 sm:$0xff]  }
  0x7b   : > { %1131 = vmatpush1.bf16.msra.mxu1 %v2311_v11  ;;  %v2356_v23 = vld [vmem:[%s3537_s3 + $0x4] ss:$8 sps:$4 sm:$0xff]   ;;  %v2358_v24 = vld [vmem:[%s3537_s3] ss:$8 sps:$4 sm:$0xff]   ;;  %v2361_v27 = vld [vmem:[%s3537_s3 + $0x10] ss:$8 sps:$4 sm:$0xff]  }
  0x7c   : > { %1132 = vmatprep.subr.bf16.mxu1 %v2312_v12  ;;  %v2327_v26 = vld [vmem:[%s3538_s4 + $0x104] ss:$16 sps:$4 sm:$0xff]   ;;  %679 = vmatprep.subr.bf16.mxu0 %v2356_v23  ;;  %v2329_v28 = vld [vmem:[%s3538_s4 + $0x100] ss:$16 sps:$4 sm:$0xff]  }
  0x7d   : > { %441 = vadd.xlane.f32.xlu0 %v440_v7  ;;  %680 = vmatpush1.bf16.msra.mxu0 %v2358_v24  ;;  %v2362_v29 = vld [vmem:[%s3537_s3 + $0x24] ss:$8 sps:$4 sm:$0xff]   ;;  %v2332_v31 = vld [vmem:[%s3538_s4 + $0x120] ss:$16 sps:$4 sm:$0xff]   ;;  %v2365_v34 = vld [vmem:[%s3537_s3 + $0x34] ss:$8 sps:$4 sm:$0xff]  }
  0x7e   : > { %681 = vmatprep.subr.bf16.mxu0 %v2359_v25  ;;  %v2330_v30 = vld [vmem:[%s3538_s4 + $0x124] ss:$16 sps:$4 sm:$0xff]   ;;  %v2364_v32 = vld [vmem:[%s3537_s3 + $0x20] ss:$8 sps:$4 sm:$0xff]   ;;  %v2367_v35 = vld [vmem:[%s3537_s3 + $0x30] ss:$8 sps:$4 sm:$0xff]  }
  0x7f   : > { %1133 = vmatpush1.bf16.msra.mxu1 %v2314_v13  ;;  %v2333_v33 = vld [vmem:[%s3538_s4 + $0x144] ss:$16 sps:$4 sm:$0xff]   ;;  %v2335_v36 = vld [vmem:[%s3538_s4 + $0x140] ss:$16 sps:$4 sm:$0xff]  }
  0x80   : > { %1134 = vmatprep.subr.bf16.mxu1 %v2315_v14  ;;  %v2368_v37 = vld [vmem:[%s3537_s3 + $0x44] ss:$8 sps:$4 sm:$0xff]   ;;  %v2370_v39 = vld [vmem:[%s3537_s3 + $0x40] ss:$8 sps:$4 sm:$0xff]   ;;  %v2371_v41 = vld [vmem:[%s3537_s3 + $0x54] ss:$8 sps:$4 sm:$0xff]  }
  0x81   : > { %682 = vmatpush1.bf16.msra.mxu0 %v2361_v27  ;;  %v2336_v38 = vld [vmem:[%s3538_s4 + $0x164] ss:$16 sps:$4 sm:$0xff]   ;;  %v2338_v40 = vld [vmem:[%s3538_s4 + $0x160] ss:$16 sps:$4 sm:$0xff]  }
  0x82   : > { %683 = vmatprep.subr.bf16.mxu0 %v2362_v29  ;;  %v2339_v42 = vld [vmem:[%s3538_s4 + $0x184] ss:$16 sps:$4 sm:$0xff]   ;;  %v2373_v43 = vld [vmem:[%s3537_s3 + $0x50] ss:$8 sps:$4 sm:$0xff]   ;;  %v2376_v47 = vld [vmem:[%s3537_s3 + $0x60] ss:$8 sps:$4 sm:$0xff]  }
  0x83   : > { %1135 = vmatpush1.bf16.msra.mxu1 %v2317_v15  ;;  %v2341_v44 = vld [vmem:[%s3538_s4 + $0x180] ss:$16 sps:$4 sm:$0xff]   ;;  %v2374_v45 = vld [vmem:[%s3537_s3 + $0x64] ss:$8 sps:$4 sm:$0xff]   ;;  %v2377_v49 = vld [vmem:[%s3537_s3 + $0x74] ss:$8 sps:$4 sm:$0xff]  }
  0x84   : > { %1136 = vmatprep.subr.bf16.mxu1 %v2318_v16  ;;  %v2342_v46 = vld [vmem:[%s3538_s4 + $0x1a4] ss:$16 sps:$4 sm:$0xff]   ;;  %v2344_v48 = vld [vmem:[%s3538_s4 + $0x1a0] ss:$16 sps:$4 sm:$0xff]  }
  0x85   : > { %684 = vmatpush1.bf16.msra.mxu0 %v2364_v32  ;;  %v2345_v50 = vld [vmem:[%s3538_s4 + $0x1c4] ss:$16 sps:$4 sm:$0xff]   ;;  %v2379_v51 = vld [vmem:[%s3537_s3 + $0x70] ss:$8 sps:$4 sm:$0xff]   ;;  %v2382_v55 = vld [vmem:[%s3537_s3 + $0x80] ss:$8 sps:$4 sm:$0xff]  }
  0x86   : > { %685 = vmatprep.subr.bf16.mxu0 %v2365_v34  ;;  %v2347_v52 = vld [vmem:[%s3538_s4 + $0x1c0] ss:$16 sps:$4 sm:$0xff]   ;;  %v2380_v53 = vld [vmem:[%s3537_s3 + $0x84] ss:$8 sps:$4 sm:$0xff]   ;;  %v2383_v57 = vld [vmem:[%s3537_s3 + $0x94] ss:$8 sps:$4 sm:$0xff]  }
  0x87   : > { %1137 = vmatpush1.bf16.msra.mxu1 %v2320_v17  ;;  %v2348_v54 = vld [vmem:[%s3538_s4 + $0x1e4] ss:$16 sps:$4 sm:$0xff]   ;;  %v2350_v56 = vld [vmem:[%s3538_s4 + $0x1e0] ss:$16 sps:$4 sm:$0xff]  }
  0x88   : > { %1138 = vmatprep.subr.bf16.mxu1 %v2321_v18  ;;  %v724_v58 = vld [vmem:[%s2975_s25 + $0x10] sm:$0xff]  ;;  %v3103_v59 = vld [vmem:[%s2975_s25] ss:$8 sps:$4 sm:$0xff]   ;;  %v2386_v15 = vld [vmem:[%s3537_s3 + $0xa4] ss:$8 sps:$4 sm:$0xff]  }
  0x89   : > { %686 = vmatpush1.bf16.msra.mxu0 %v2367_v35  ;;  %v2385_v60 = vld [vmem:[%s3537_s3 + $0x90] ss:$8 sps:$4 sm:$0xff]   ;;  %v3108_v61 = vcombine.high %v724_v58, %v724_v58  ;;  %v3112_v62 = vcombine.low %v724_v58, %v724_v58  ;;  %v2392_v17 = vld [vmem:[%s3537_s3 + $0xc4] ss:$8 sps:$4 sm:$0xff]   ;;  %v2394_v18 = vld [vmem:[%s3537_s3 + $0xc0] ss:$8 sps:$4 sm:$0xff]  }
  0x8a   : > { %687 = vmatprep.subr.bf16.mxu0 %v2368_v37  ;;  %v2391_v16 = vld [vmem:[%s3537_s3 + $0xb0] ss:$8 sps:$4 sm:$0xff]   ;;  %v2400_v23 = vld [vmem:[%s3537_s3 + $0xe0] ss:$8 sps:$4 sm:$0xff]   ;;  %v2401_v24 = vld [vmem:[%s3537_s3 + $0xf4] ss:$8 sps:$4 sm:$0xff]  }
  0x8b   : > { %1139 = vmatpush1.bf16.msra.mxu1 %v2323_v19  ;;  %v2395_v19 = vld [vmem:[%s3537_s3 + $0xd4] ss:$8 sps:$4 sm:$0xff]   ;;  %v2403_v25 = vld [vmem:[%s3537_s3 + $0xf0] ss:$8 sps:$4 sm:$0xff]  }
  0x8c   : > { %1140 = vmatprep.subr.bf16.mxu1 %v2324_v21  ;;  %v2397_v21 = vld [vmem:[%s3537_s3 + $0xd0] ss:$8 sps:$4 sm:$0xff]  }
  0x8d   : > { %688 = vmatpush1.bf16.msra.mxu0 %v2370_v39 }
  0x8e   : > { %689 = vmatprep.subr.bf16.mxu0 %v2371_v41 }
  0x8f   : > { %1141 = vmatpush1.bf16.msra.mxu1 %v2326_v22  ;;  %v2398_v22 = vld [vmem:[%s3537_s3 + $0xe4] ss:$8 sps:$4 sm:$0xff]  }
  0x90   : > { %1142 = vmatprep.subr.bf16.mxu1 %v2327_v26  ;;  %v2406_v26 = vld [vmem:[%s3538_s4 + $0xc] ss:$16 sps:$4 sm:$0xff]  }
  0x91   : > { %690 = vmatpush1.bf16.msra.mxu0 %v2373_v43 }
  0x92   : > { %691 = vmatprep.subr.bf16.mxu0 %v2374_v45 }
  0x93   : > { %1143 = vmatpush1.bf16.msra.mxu1 %v2329_v28 }
  0x94   : > { %1144 = vmatprep.subr.bf16.mxu1 %v2330_v30 }
  0x95   : > { %692 = vmatpush1.bf16.msra.mxu0 %v2376_v47 }
  0x96   : > { %693 = vmatprep.subr.bf16.mxu0 %v2377_v49 }
  0x97   : > { %1145 = vmatpush1.bf16.msra.mxu1 %v2332_v31 }
  0x98   : > { %1146 = vmatprep.subr.bf16.mxu1 %v2333_v33 }
  0x99   : > { %694 = vmatpush1.bf16.msra.mxu0 %v2379_v51 }
  0x9a   : > { %695 = vmatprep.subr.bf16.mxu0 %v2380_v53 }
  0x9b   : > { %1147 = vmatpush1.bf16.msra.mxu1 %v2335_v36 }
  0x9c   : > { %1148 = vmatprep.subr.bf16.mxu1 %v2336_v38 }
  0x9d   : > { %696 = vmatpush1.bf16.msra.mxu0 %v2382_v55 }
  0x9e   : > { %697 = vmatprep.subr.bf16.mxu0 %v2383_v57 }
  0x9f   : > { %1149 = vmatpush1.bf16.msra.mxu1 %v2338_v40 }
  0xa0   : > { %1150 = vmatprep.subr.bf16.mxu1 %v2339_v42 }
  0xa1   : > { %698 = vmatpush1.bf16.msra.mxu0 %v2385_v60 }
  0xa2   : > { %699 = vmatprep.subr.bf16.mxu0 %v2386_v15  ;;  %v2416_v15 = vld [vmem:[%s3538_s4 + $0x88] ss:$16 sps:$4 sm:$0xff]  }
  0xa3   : > { %1151 = vmatpush1.bf16.msra.mxu1 %v2341_v44 }
  0xa4   : > { %1152 = vmatprep.subr.bf16.mxu1 %v2342_v46  ;;  %v471_v46 = vlaneseq }
  0xa7   : > { %1153 = vmatpush1.bf16.msra.mxu1 %v2344_v48  ;;  %v472_v48 = vshrl.u32 %v471_v46, 7 }
  0xa8   : > { %1154 = vmatprep.subr.bf16.mxu1 %v2345_v50 }
  0xa9   : > { %v3198_v49 = vsub.s32 0, %v472_v48  ;;  %v3200_v50 = vsub.s32 1, %v472_v48 }
  0xab   : > { %1155 = vmatpush1.bf16.msra.mxu1 %v2347_v52  ;;  %v436_v52 = vld [vmem:[#allocation2] sm:$0x3] }
  0xac   : > { %1156 = vmatprep.subr.bf16.mxu1 %v2348_v54  ;;  %v474_v54 = vrot.slane %v436_v52, %v3198_v49  ;;  %v478_v55 = vrot.slane %v436_v52, %v3200_v50 }
  0xaf   : > { %1157 = vmatpush1.bf16.msra.mxu1 %v2350_v56 }
  0xb2   : > { %1159 = vmatmul.mubr.bf16.vlgmr.msra.gmra.mrb[0].mxu1 %v3103_v59 }
  0xb3   : > { %1168 = vmatprep.mubr.bf16.mxu1 %v3108_v61 }
  0xba   : > { %1169 = vmatmul.mubr.bf16.gmra.mrb[4].mxu1 %v3112_v62 }
 0x106   : > { %v439_v63 = vpop.xlane.xlu0 %438 }
 0x107   : > { %v444_v3 = vmul.f32 0.00390625, %v439_v63 }
 0x109   : > { %v3116_v5 = vsub.f32 %v2923_v0, %v444_v3  ;;  %v3119_v6 = vsub.f32 %v2926_v1, %v444_v3 }
 0x10a   : > { %v442_v7 = vpop.xlane.xlu0 %441 }
 0x10b   : > { %v445_v8 = vmul.f32 0.00390625, %v442_v7  ;;  %v450_v9 = vmul.f32 %v3116_v5, %v3116_v5  ;;  %v451_v10 = vmul.f32 %v3119_v6, %v3119_v6 }
 0x10d   : > { %v3126_v11 = vsub.f32 %v2929_v2, %v445_v8  ;;  %v3129_v12 = vsub.f32 %v2934_v4, %v445_v8  ;;  %v454_v13 = vadd.f32 %v451_v10, %v450_v9  ;;  %v2388_v2 = vld [vmem:[%s3537_s3 + $0xa0] ss:$8 sps:$4 sm:$0xff]   ;;  %v2389_v4 = vld [vmem:[%s3537_s3 + $0xb4] ss:$8 sps:$4 sm:$0xff]  }
 0x10e   : > { %700 = vmatpush1.bf16.msra.mxu0 %v2388_v2  ;;  %v2421_v2 = vld [vmem:[%s3538_s4 + $0xac] ss:$16 sps:$4 sm:$0xff]  }
 0x10f   : > { %455 = vadd.xlane.f32.xlu1 %v454_v13  ;;  %v452_v0 = vmul.f32 %v3126_v11, %v3126_v11  ;;  %v453_v1 = vmul.f32 %v3129_v12, %v3129_v12  ;;  %701 = vmatprep.subr.bf16.mxu0 %v2389_v4  ;;  %v2409_v13 = vld [vmem:[%s3538_s4 + $0x2c] ss:$16 sps:$4 sm:$0xff]   ;;  %v2419_v4 = vld [vmem:[%s3538_s4 + $0xa8] ss:$16 sps:$4 sm:$0xff]  }
 0x111   : > { %v457_v14 = vadd.f32 %v453_v1, %v452_v0  ;;  %v2415_v0 = vld [vmem:[%s3538_s4 + $0x6c] ss:$16 sps:$4 sm:$0xff]   ;;  %v2716_v1 = vmov 0.0  }
 0x112   : > { %702 = vmatpush1.bf16.msra.mxu0 %v2391_v16  ;;  %2219 = vmatprep.subr.bf16.mxu1 %v2716_v1  ;;  %v2424_v16 = vld [vmem:[%s3538_s4 + $0xcc] ss:$16 sps:$4 sm:$0xff]  }
 0x113   : > { %458 = vadd.xlane.f32.xlu1 %v457_v14  ;;  %703 = vmatprep.subr.bf16.mxu0 %v2392_v17  ;;  %v2418_v14 = vld [vmem:[%s3538_s4 + $0x8c] ss:$16 sps:$4 sm:$0xff]   ;;  %v2422_v17 = vld [vmem:[%s3538_s4 + $0xc8] ss:$16 sps:$4 sm:$0xff]  }
 0x114   : > { %2223 = vmatprep.mubr.msk.bf16.mxu1 %vm2717_vm14, %v2716_v1 }
 0x116   : > { %704 = vmatpush1.bf16.msra.mxu0 %v2394_v18  ;;  %v2427_v18 = vld [vmem:[%s3538_s4 + $0xec] ss:$16 sps:$4 sm:$0xff]  }
 0x117   : > { %705 = vmatprep.subr.bf16.mxu0 %v2395_v19  ;;  %v2425_v19 = vld [vmem:[%s3538_s4 + $0xe8] ss:$16 sps:$4 sm:$0xff]  }
 0x11a   : > { %706 = vmatpush1.bf16.msra.mxu0 %v2397_v21  ;;  %v2430_v21 = vld [vmem:[%s3538_s4 + $0x10c] ss:$16 sps:$4 sm:$0xff]  }
 0x11b   : > { %707 = vmatprep.subr.bf16.mxu0 %v2398_v22  ;;  %v2428_v22 = vld [vmem:[%s3538_s4 + $0x108] ss:$16 sps:$4 sm:$0xff]  }
 0x11e   : > { %708 = vmatpush1.bf16.msra.mxu0 %v2400_v23  ;;  %v2433_v23 = vld [vmem:[%s3538_s4 + $0x12c] ss:$16 sps:$4 sm:$0xff]  }
 0x11f   : > { %709 = vmatprep.subr.bf16.mxu0 %v2401_v24  ;;  %v2431_v24 = vld [vmem:[%s3538_s4 + $0x128] ss:$16 sps:$4 sm:$0xff]  }
 0x122   : > { %710 = vmatpush1.bf16.msra.mxu0 %v2403_v25  ;;  %v2436_v25 = vld [vmem:[%s3538_s4 + $0x14c] ss:$16 sps:$4 sm:$0xff]  }
 0x123   : > { %1177 = vmatprep.subr.bf16.mxu0 %v2406_v26  ;;  %v2434_v26 = vld [vmem:[%s3538_s4 + $0x148] ss:$16 sps:$4 sm:$0xff]  }
 0x185   : > { %v3174_v27 = vpop.f32.mrb[0].mxu1 }
 0x186   : > { %v3176_v28 = vpop.f32.mrb[1].mxu1  ;;  %v1267_v33 = vmul.f32 %v3174_v27, %v3174_v27 }
 0x187   : > { %v3178_v29 = vpop.f32.mrb[2].mxu1  ;;  %v1503_v30 = vmul.f32 %v3176_v28, %v3176_v28 }
 0x188   : > { %v3182_v31 = vpop.f32.mrb[3].mxu1  ;;  %v1268_v34 = vmul.f32 %v3178_v29, %v3178_v29 }
 0x189   : > { %1506 = vadd.xlane.f32.xlu0 %v1503_v30  ;;  %v1504_v32 = vmul.f32 %v3182_v31, %v3182_v31  ;;  %v2439_v30 = vld [vmem:[%s3538_s4 + $0x16c] ss:$16 sps:$4 sm:$0xff]  }
 0x18b   : > { %1508 = vadd.xlane.f32.xlu1 %v1504_v32  ;;  %v2437_v32 = vld [vmem:[%s3538_s4 + $0x168] ss:$16 sps:$4 sm:$0xff]  }
 0x18d   : > { %1270 = vadd.xlane.f32.xlu0 %v1267_v33  ;;  %v3190_v35 = vpop.f32.mrb[4].mxu1  ;;  %v2442_v33 = vld [vmem:[%s3538_s4 + $0x18c] ss:$16 sps:$4 sm:$0xff]  }
 0x18e   : > { %v3192_v36 = vpop.f32.mrb[5].mxu1  ;;  %v1269_v38 = vmul.f32 %v3190_v35, %v3190_v35 }
 0x18f   : > { %1272 = vadd.xlane.f32.xlu1 %v1268_v34  ;;  %v1505_v37 = vmul.f32 %v3192_v36, %v3192_v36  ;;  %v1174_v39 = vpop.f32.mrb[6].mxu1  ;;  %v2440_v34 = vld [vmem:[%s3538_s4 + $0x188] ss:$16 sps:$4 sm:$0xff]  }
 0x190   : > { %v1175_v40 = vpop.f32.mrb[7].mxu1  ;;  %v2448_v39 = vld [vmem:[%s3538_s4 + $0x1cc] ss:$16 sps:$4 sm:$0xff]  }
 0x191   : > { %1510 = vadd.xlane.f32.xlu0 %v1505_v37  ;;  %v2445_v37 = vld [vmem:[%s3538_s4 + $0x1ac] ss:$16 sps:$4 sm:$0xff]   ;;  %v2446_v40 = vld [vmem:[%s3538_s4 + $0x1c8] ss:$16 sps:$4 sm:$0xff]  }
 0x193   : > { %1274 = vadd.xlane.f32.xlu1 %v1269_v38  ;;  %v2443_v38 = vld [vmem:[%s3538_s4 + $0x1a8] ss:$16 sps:$4 sm:$0xff]  }
 0x19c   : > { %v456_v41 = vpop.xlane.xlu1 %455 }
 0x19d   : > { %v460_v42 = vmul.f32 0.00390625, %v456_v41  ;;  %v2451_v41 = vld [vmem:[%s3538_s4 + $0x1ec] ss:$16 sps:$4 sm:$0xff]  }
 0x19f   : > { %v462_v43 = vadd.f32 1e-05, %v460_v42  ;;  %v2449_v42 = vld [vmem:[%s3538_s4 + $0x1e8] ss:$16 sps:$4 sm:$0xff]  }
 0x1a0   : > { %v459_v44 = vpop.xlane.xlu1 %458 }
 0x1a1   : > { %2500 = vrsqrt.f32 %v462_v43  ;;  %v461_v45 = vmul.f32 0.00390625, %v459_v44 }
 0x1a3   : > { %v463_v47 = vadd.f32 1e-05, %v461_v45 }
 0x1a5   : > { %2502 = vrsqrt.f32 %v463_v47 }
 0x1ab   : > { %v2501_v51 = vpop.eup %2500 }
 0x1ac   : > { %v467_v53 = vmul.f32 %v2501_v51, %v3119_v6  ;;  %v466_v56 = vmul.f32 %v2501_v51, %v3116_v5  ;;  %v2404_v6 = vld [vmem:[%s3538_s4 + $0x8] ss:$16 sps:$4 sm:$0xff]  }
 0x1ad   : > { %v2407_v5 = vld [vmem:[%s3538_s4 + $0x28] ss:$16 sps:$4 sm:$0xff]  }
 0x1ae   : > { %v482_v63 = vmul.f32 %v478_v55, %v467_v53  ;;  %v481_v7 = vmul.f32 %v474_v54, %v466_v56 }
 0x1af   : > { %v2503_v57 = vpop.eup %2502 }
 0x1b0   : > { %v469_v58 = vmul.f32 %v2503_v57, %v3129_v12  ;;  %v468_v60 = vmul.f32 %v2503_v57, %v3126_v11  ;;  %v2412_v11 = vld [vmem:[%s3538_s4 + $0x4c] ss:$16 sps:$4 sm:$0xff]   ;;  %v2410_v12 = vld [vmem:[%s3538_s4 + $0x48] ss:$16 sps:$4 sm:$0xff]  }
 0x1b2   : > { %v484_v3 = vmul.f32 %v478_v55, %v469_v58  ;;  %v483_v8 = vmul.f32 %v474_v54, %v468_v60 }
 0x1b4   : > { %v486_v9 = vpack.c.bf16 %v484_v3, %v482_v63  ;;  %v485_v10 = vpack.c.bf16 %v483_v8, %v481_v7 }
 0x1b6   : > { %711 = vmatprep.mubr.bf16.mxu0 %v486_v9 }
 0x1b7   : > { %712 = vmatmul.mubr.bf16.vlgmr.msra.gmra.mrb[0].mxu0 %v485_v10 }
 0x1b8   : > { %1178 = vmatpush1.bf16.msra.mxu0 %v2404_v6  ;;  %1209 = vmatprep.mubr.bf16.mxu0 %v2987_v20  ;;  %v2413_v20 = vld [vmem:[%s3538_s4 + $0x68] ss:$16 sps:$4 sm:$0xff]  }
 0x1b9   : > { %1179 = vmatprep.subr.bf16.mxu0 %v2409_v13 }
 0x1bc   : > { %1180 = vmatpush1.bf16.msra.mxu0 %v2407_v5 }
 0x1bd   : > { %1181 = vmatprep.subr.bf16.mxu0 %v2412_v11 }
 0x1c0   : > { %1182 = vmatpush1.bf16.msra.mxu0 %v2410_v12 }
 0x1c1   : > { %1183 = vmatprep.subr.bf16.mxu0 %v2415_v0 }
 0x1c4   : > { %1184 = vmatpush1.bf16.msra.mxu0 %v2413_v20 }
 0x1c5   : > { %1185 = vmatprep.subr.bf16.mxu0 %v2418_v14 }
 0x1c8   : > { %1186 = vmatpush1.bf16.msra.mxu0 %v2416_v15 }
 0x1c9   : > { %1187 = vmatprep.subr.bf16.mxu0 %v2421_v2 }
 0x1cc   : > { %1188 = vmatpush1.bf16.msra.mxu0 %v2419_v4 }
 0x1cd   : > { %1189 = vmatprep.subr.bf16.mxu0 %v2424_v16 }
 0x1d0   : > { %1190 = vmatpush1.bf16.msra.mxu0 %v2422_v17 }
 0x1d1   : > { %1191 = vmatprep.subr.bf16.mxu0 %v2427_v18 }
 0x1d4   : > { %1192 = vmatpush1.bf16.msra.mxu0 %v2425_v19  ;;  %v3308_v19 = vld [vmem:[#allocation7] sm:$0x1] }
 0x1d5   : > { %1193 = vmatprep.subr.bf16.mxu0 %v2430_v21 }
 0x1d8   : > { %1194 = vmatpush1.bf16.msra.mxu0 %v2428_v22 }
 0x1d9   : > { %1195 = vmatprep.subr.bf16.mxu0 %v2433_v23 }
 0x1dc   : > { %1196 = vmatpush1.bf16.msra.mxu0 %v2431_v24 }
 0x1dd   : > { %1197 = vmatprep.subr.bf16.mxu0 %v2436_v25  ;;  %v3312_v25 = vrot.slane %v3308_v19, %v3198_v49 }
 0x1e0   : > { %1198 = vmatpush1.bf16.msra.mxu0 %v2434_v26 }
 0x1e1   : > { %1199 = vmatprep.subr.bf16.mxu0 %v2439_v30 }
 0x1e4   : > { %1200 = vmatpush1.bf16.msra.mxu0 %v2437_v32 }
 0x1e5   : > { %1201 = vmatprep.subr.bf16.mxu0 %v2442_v33 }
 0x1e8   : > { %1202 = vmatpush1.bf16.msra.mxu0 %v2440_v34 }
 0x1e9   : > { %1203 = vmatprep.subr.bf16.mxu0 %v2445_v37 }
 0x1ec   : > { %1204 = vmatpush1.bf16.msra.mxu0 %v2443_v38 }
 0x1ed   : > { %1205 = vmatprep.subr.bf16.mxu0 %v2448_v39 }
 0x1f0   : > { %1206 = vmatpush1.bf16.msra.mxu0 %v2446_v40 }
 0x1f1   : > { %1207 = vmatprep.subr.bf16.mxu0 %v2451_v41 }
 0x1f4   : > { %1208 = vmatpush1.bf16.msra.mxu0 %v2449_v42 }
 0x1f5   : > { %2235 = vmatprep.subr.bf16.mxu0 %v2716_v1 }
 0x1f7   : > { %1210 = vmatmul.mubr.bf16.vlgmr.msra.gmra.mrb[4].mxu0 %v3103_v59 }
 0x1f8   : > { %1219 = vmatprep.mubr.bf16.mxu0 %v3108_v61 }
 0x1ff   : > { %1220 = vmatmul.mubr.bf16.gmra.mrb[8].mxu0 %v3112_v62 }
 0x200   : > { %2239 = vmatprep.mubr.msk.bf16.mxu0 %vm2717_vm14, %v2716_v1 }
 0x216   : > { %v1507_v43 = vpop.xlane.xlu0 %1506 }
 0x217   : > { %2504 = vrsqrt.f32 %v1507_v43  ;;  %vm1514_vm0 = vcmp.eq.f32.partialorder %v1507_v43, inf  ;;  %v1517_v52 = vand.u32 2147483648, %v1507_v43  ;;  %vm1516_vm1 = vcmp.eq.f32.partialorder %v1507_v43, 0.0 }
 0x218   : > { %v1509_v44 = vpop.xlane.xlu1 %1508 }
 0x219   : > { %2506 = vrsqrt.f32 %v1509_v44  ;;  %vm1521_vm2 = vcmp.eq.f32.partialorder %v1509_v44, inf  ;;  %v1524_v62 = vand.u32 2147483648, %v1509_v44  ;;  %vm1523_vm3 = vcmp.eq.f32.partialorder %v1509_v44, 0.0 }
 0x21a   : > { %v1271_v45 = vpop.xlane.xlu0 %1270 }
 0x21b   : > { %2508 = vrsqrt.f32 %v1271_v45  ;;  %vm1278_vm4 = vcmp.eq.f32.partialorder %v1271_v45, inf  ;;  %v1281_v57 = vand.u32 2147483648, %v1271_v45  ;;  %vm1280_vm5 = vcmp.eq.f32.partialorder %v1271_v45, 0.0 }
 0x21c   : > { %v1273_v46 = vpop.xlane.xlu1 %1272 }
 0x21d   : > { %2510 = vrsqrt.f32 %v1273_v46  ;;  %vm1285_vm6 = vcmp.eq.f32.partialorder %v1273_v46, inf  ;;  %vm1287_vm7 = vcmp.eq.f32.partialorder %v1273_v46, 0.0  ;;  %v1288_v8 = vand.u32 2147483648, %v1273_v46 }
 0x21e   : > { %v1511_v47 = vpop.xlane.xlu0 %1510 }
 0x21f   : > { %2512 = vrsqrt.f32 %v1511_v47  ;;  %vm1528_vm8 = vcmp.eq.f32.partialorder %v1511_v47, inf  ;;  %vm1530_vm9 = vcmp.eq.f32.partialorder %v1511_v47, 0.0  ;;  %v1531_v11 = vand.u32 2147483648, %v1511_v47 }
 0x220   : > { %v1275_v48 = vpop.xlane.xlu1 %1274 }
 0x221   : > { %v2505_v51 = vpop.eup %2504  ;;  %2514 = vrsqrt.f32 %v1275_v48  ;;  %vm1292_vm10 = vcmp.eq.f32.partialorder %v1275_v48, inf  ;;  %vm1294_vm11 = vcmp.eq.f32.partialorder %v1275_v48, 0.0  ;;  %v1295_v2 = vand.u32 2147483648, %v1275_v48 }
 0x222   : > { %v1513_v59 = vmul.f32 %v2505_v51, %v1507_v43 }
 0x223   : > { %v2507_v61 = vpop.eup %2506 }
 0x224   : > { %v1520_v53 = vmul.f32 %v2507_v61, %v1509_v44  ;;  %v1515_v54 = vsel %vm1514_vm0, %v1507_v43, %v1513_v59  ;;  %v3338_v61 = vld [vmem:[#allocation4] sm:$0x3] }
 0x225   : > { %v2509_v55 = vpop.eup %2508  ;;  %v1518_v56 = vsel %vm1516_vm1, %v1517_v52, %v1515_v54  ;;  %v1315_v54 = vmul.f32 %v3338_v61, %v3338_v61 }
 0x226   : > { %v1522_v58 = vsel %vm1521_vm2, %v1509_v44, %v1520_v53  ;;  %v1533_v60 = vmax.f32 %v1518_v56, 1e-12  ;;  %v1277_v63 = vmul.f32 %v2509_v55, %v1271_v45 }
 0x227   : > { %v2511_v3 = vpop.eup %2510  ;;  %v1525_v7 = vsel %vm1523_vm3, %v1524_v62, %v1522_v58  ;;  %v1317_v58 = vsel %vm1316_vm13, %v1315_v54, 0.0 }
 0x228   : > { %v1534_v9 = vmax.f32 %v1525_v7, 1e-12  ;;  %2516 = vrcp.f32 %v1533_v60  ;;  %v1284_v10 = vmul.f32 %v2511_v3, %v1273_v46  ;;  %v1279_v6 = vsel %vm1278_vm4, %v1271_v45, %v1277_v63 }
 0x229   : > { %v2513_v13 = vpop.eup %2512  ;;  %v1282_v5 = vsel %vm1280_vm5, %v1281_v57, %v1279_v6  ;;  %v1546_v57 = vsel %vm1545_vm12, %v1315_v54, 0.0  ;;  %vm1385_vm12 = vcmask 195584  }
 0x22a   : > { %2518 = vrcp.f32 %v1534_v9  ;;  %v1286_v12 = vsel %vm1285_vm6, %v1273_v46, %v1284_v10  ;;  %v1297_v0 = vmax.f32 %v1282_v5, 1e-12  ;;  %v1527_v20 = vmul.f32 %v2513_v13, %v1511_v47 }
 0x22b   : > { %v2515_v14 = vpop.eup %2514  ;;  %v1289_v15 = vsel %vm1287_vm7, %v1288_v8, %v1286_v12 }
 0x22c   : > { %v1298_v4 = vmax.f32 %v1289_v15, 1e-12  ;;  %2520 = vrcp.f32 %v1297_v0  ;;  %v1291_v16 = vmul.f32 %v2515_v14, %v1275_v48  ;;  %v1529_v17 = vsel %vm1528_vm8, %v1511_v47, %v1527_v20 }
 0x22d   : > { %v1532_v18 = vsel %vm1530_vm9, %v1531_v11, %v1529_v17 }
 0x22e   : > { %2522 = vrcp.f32 %v1298_v4  ;;  %v1293_v21 = vsel %vm1292_vm10, %v1275_v48, %v1291_v16  ;;  %v1535_v22 = vmax.f32 %v1532_v18, 1e-12 }
 0x22f   : > { %v1296_v23 = vsel %vm1294_vm11, %v1295_v2, %v1293_v21  ;;  %vm1428_vm11 = vcmask 1043456  }
 0x230   : > { %v1299_v24 = vmax.f32 %v1296_v23, 1e-12  ;;  %2524 = vrcp.f32 %v1535_v22 }
 0x232   : > { %v2517_v26 = vpop.eup %2516  ;;  %2526 = vrcp.f32 %v1299_v24 }
 0x233   : > { %v1537_v30 = vmul.f32 %v2517_v26, %v3176_v28 }
 0x234   : > { %v2519_v32 = vpop.eup %2518 }
 0x235   : > { %v1539_v33 = vmul.f32 %v2519_v32, %v3182_v31  ;;  %v1542_v34 = vmul.f32 %v1537_v30, %v3312_v25 }
 0x236   : > { %v2521_v37 = vpop.eup %2520 }
 0x237   : > { %v1301_v38 = vmul.f32 %v2521_v37, %v3174_v27  ;;  %v1543_v39 = vmul.f32 %v1539_v33, %v3312_v25 }
 0x238   : > { %v2523_v40 = vpop.eup %2522 }
 0x239   : > { %v1303_v41 = vmul.f32 %v2523_v40, %v3178_v29  ;;  %v1312_v42 = vmul.f32 %v3312_v25, %v1301_v38  ;;  %v1561_v43 = vpack.c.bf16 %v1543_v39, %v1542_v34 }
 0x23a   : > { %v2525_v44 = vpop.eup %2524 }
 0x23b   : > { %v1313_v45 = vmul.f32 %v3312_v25, %v1303_v41  ;;  %2236 = vmatpush3.bf16.xpose.msra.mxu0 %v1561_v43  ;;  %v1541_v28 = vmul.f32 %v2525_v44, %v3192_v36  ;;  %v1230_v44 = vld [vmem:[%s3541_s7] sm:$0x1] }
 0x23c   : > { %v2527_v31 = vpop.eup %2526  ;;  %2237 = vmatprep.subr.bf16.mxu0 %v2716_v1 }
 0x23d   : > { %v1332_v46 = vpack.c.bf16 %v1313_v45, %v1312_v42  ;;  %v1305_v27 = vmul.f32 %v2527_v31, %v3190_v35  ;;  %v1544_v47 = vmul.f32 %v1541_v28, %v3312_v25 }
 0x23f   : > { %2220 = vmatpush3.bf16.xpose.msra.mxu1 %v1332_v46  ;;  %v1314_v29 = vmul.f32 %v3312_v25, %v1305_v27  ;;  %v1562_v48 = vpack.c.bf16 %v1544_v47, %v1544_v47  ;;  %v1232_v27 = vmul.f32 8.0, %v1230_v44 }
 0x240   : > { %2221 = vmatprep.subr.bf16.mxu1 %v2716_v1 }
 0x241   : > { %v1333_v51 = vpack.c.bf16 %v1314_v29, %v1314_v29 }
 0x243   : > { %2238 = vmatpush3.bf16.xpose.msra.mxu0 %v1562_v48  ;;  %v1263_v48 = vrot.slane %v1232_v27, %v3198_v49 }
 0x244   : > { %2243 = vmatprep.subr.bf16.mxu0 %v2716_v1 }
 0x247   : > { %2222 = vmatpush3.bf16.xpose.msra.mxu1 %v1333_v51 }
 0x248   : > { %2227 = vmatprep.subr.bf16.mxu1 %v2716_v1 }
 0x28a   : > { %v3330_v36 = vpop.f32.mrb[0].mxu0 }
 0x28b   : > { %v3332_v52 = vpop.f32.mrb[1].mxu0  ;;  %v1233_v55 = vmul.f32 %v3330_v36, %v3330_v36 }
 0x28c   : > { %v3334_v35 = vpop.f32.mrb[2].mxu0  ;;  %v1475_v59 = vmul.f32 %v3332_v52, %v3332_v52 }
 0x28d   : > { %v3340_v62 = vpop.f32.mrb[3].mxu0  ;;  %v1234_v56 = vmul.f32 %v3334_v35, %v3334_v35 }
 0x28e   : > { %1477 = vadd.xlane.f32.xlu0 %v1475_v59  ;;  %v1476_v53 = vmul.f32 %v3340_v62, %v3340_v62 }
 0x290   : > { %1479 = vadd.xlane.f32.xlu1 %v1476_v53 }
 0x292   : > { %1235 = vadd.xlane.f32.xlu0 %v1233_v55 }
 0x294   : > { %1237 = vadd.xlane.f32.xlu1 %v1234_v56 }
 0x296   : > { %1547 = vadd.xlane.f32.xlu0 %v1546_v57 }
 0x298   : > { %1318 = vadd.xlane.f32.xlu1 %v1317_v58 }
 0x31b   : > { %v1478_v60 = vpop.xlane.xlu0 %1477 }
 0x31c   : > { %2528 = vrsqrt.f32 %v1478_v60  ;;  %vm1483_vm15 = vcmp.eq.f32.partialorder %v1478_v60, inf  ;;  %vm1485_vm0 = vcmp.eq.f32.partialorder %v1478_v60, 0.0  ;;  %v1486_v5 = vand.u32 2147483648, %v1478_v60 }
 0x31d   : > { %v1480_v63 = vpop.xlane.xlu1 %1479 }
 0x31e   : > { %2530 = vrsqrt.f32 %v1480_v63  ;;  %vm1490_vm1 = vcmp.eq.f32.partialorder %v1480_v63, inf  ;;  %vm1492_vm2 = vcmp.eq.f32.partialorder %v1480_v63, 0.0  ;;  %v1493_v14 = vand.u32 2147483648, %v1480_v63 }
 0x31f   : > { %v1236_v3 = vpop.xlane.xlu0 %1235 }
 0x320   : > { %2532 = vrsqrt.f32 %v1236_v3  ;;  %vm1241_vm3 = vcmp.eq.f32.partialorder %v1236_v3, inf  ;;  %vm1243_vm4 = vcmp.eq.f32.partialorder %v1236_v3, 0.0  ;;  %v1244_v16 = vand.u32 2147483648, %v1236_v3 }
 0x321   : > { %v1238_v7 = vpop.xlane.xlu1 %1237 }
 0x322   : > { %2534 = vrsqrt.f32 %v1238_v7  ;;  %vm1248_vm5 = vcmp.eq.f32.partialorder %v1238_v7, inf  ;;  %vm1250_vm6 = vcmp.eq.f32.partialorder %v1238_v7, 0.0  ;;  %v1251_v21 = vand.u32 2147483648, %v1238_v7 }
 0x323   : > { %v1548_v8 = vpop.xlane.xlu0 %1547 }
 0x324   : > { %2536 = vrsqrt.f32 %v1548_v8  ;;  %vm1551_vm7 = vcmp.eq.f32.partialorder %v1548_v8, inf  ;;  %vm1553_vm8 = vcmp.eq.f32.partialorder %v1548_v8, 0.0  ;;  %v1554_v32 = vand.u32 2147483648, %v1548_v8 }
 0x325   : > { %v1319_v9 = vpop.xlane.xlu1 %1318 }
 0x326   : > { %v2529_v10 = vpop.eup %2528  ;;  %2538 = vrsqrt.f32 %v1319_v9  ;;  %vm1322_vm9 = vcmp.eq.f32.partialorder %v1319_v9, inf  ;;  %vm1324_vm10 = vcmp.eq.f32.partialorder %v1319_v9, 0.0  ;;  %v1325_v40 = vand.u32 2147483648, %v1319_v9 }
 0x327   : > { %v1482_v6 = vmul.f32 %v2529_v10, %v1478_v60 }
 0x328   : > { %v2531_v13 = vpop.eup %2530 }
 0x329   : > { %v1484_v11 = vsel %vm1483_vm15, %v1478_v60, %v1482_v6  ;;  %v1489_v12 = vmul.f32 %v2531_v13, %v1480_v63 }
 0x32a   : > { %v2533_v0 = vpop.eup %2532  ;;  %v1487_v20 = vsel %vm1485_vm0, %v1486_v5, %v1484_v11 }
 0x32b   : > { %v1495_v15 = vmax.f32 %v1487_v20, 1e-12  ;;  %v1491_v2 = vsel %vm1490_vm1, %v1480_v63, %v1489_v12  ;;  %v1240_v4 = vmul.f32 %v2533_v0, %v1236_v3 }
 0x32c   : > { %v2535_v17 = vpop.eup %2534  ;;  %v1494_v18 = vsel %vm1492_vm2, %v1493_v14, %v1491_v2 }
 0x32d   : > { %2540 = vrcp.f32 %v1495_v15  ;;  %v1496_v22 = vmax.f32 %v1494_v18, 1e-12  ;;  %v1242_v23 = vsel %vm1241_vm3, %v1236_v3, %v1240_v4  ;;  %v1247_v24 = vmul.f32 %v2535_v17, %v1238_v7 }
 0x32e   : > { %v2537_v26 = vpop.eup %2536  ;;  %v1245_v30 = vsel %vm1243_vm4, %v1244_v16, %v1242_v23 }
 0x32f   : > { %2542 = vrcp.f32 %v1496_v22  ;;  %v1253_v33 = vmax.f32 %v1245_v30, 1e-12  ;;  %v1249_v34 = vsel %vm1248_vm5, %v1238_v7, %v1247_v24  ;;  %v1550_v37 = vmul.f32 %v2537_v26, %v1548_v8 }
 0x330   : > { %v2539_v38 = vpop.eup %2538  ;;  %v1252_v39 = vsel %vm1250_vm6, %v1251_v21, %v1249_v34 }
 0x331   : > { %2544 = vrcp.f32 %v1253_v33  ;;  %v1254_v41 = vmax.f32 %v1252_v39, 1e-12  ;;  %v1552_v42 = vsel %vm1551_vm7, %v1548_v8, %v1550_v37  ;;  %v1321_v43 = vmul.f32 %v2539_v38, %v1319_v9 }
 0x332   : > { %v1555_v45 = vsel %vm1553_vm8, %v1554_v32, %v1552_v42 }
 0x333   : > { %2546 = vrcp.f32 %v1254_v41  ;;  %v1556_v28 = vmax.f32 %v1555_v45, 1e-12  ;;  %v1323_v31 = vsel %vm1322_vm9, %v1319_v9, %v1321_v43 }
 0x334   : > { %v1326_v46 = vsel %vm1324_vm10, %v1325_v40, %v1323_v31 }
 0x335   : > { %2548 = vrcp.f32 %v1556_v28  ;;  %v1327_v47 = vmax.f32 %v1326_v46, 1e-12 }
 0x337   : > { %v2541_v29 = vpop.eup %2540  ;;  %2550 = vrcp.f32 %v1327_v47 }
 0x338   : > { %v1498_v51 = vmul.f32 %v2541_v29, %v3332_v52 }
 0x339   : > { %v2543_v59 = vpop.eup %2542 }
 0x33a   : > { %v1500_v53 = vmul.f32 %v2543_v59, %v3340_v62  ;;  %v1501_v55 = vmul.f32 %v1498_v51, %v1263_v48 }
 0x33b   : > { %v2545_v54 = vpop.eup %2544 }
 0x33c   : > { %v1502_v56 = vmul.f32 %v1500_v53, %v1263_v48  ;;  %v1256_v57 = vmul.f32 %v2545_v54, %v3330_v36 }
 0x33d   : > { %v2547_v58 = vpop.eup %2546 }
 0x33e   : > { %v1560_v60 = vpack.c.bf16 %v1502_v56, %v1501_v55  ;;  %v1258_v63 = vmul.f32 %v2547_v58, %v3334_v35  ;;  %v1265_v7 = vmul.f32 %v1263_v48, %v1256_v57 }
 0x33f   : > { %v2549_v3 = vpop.eup %2548 }
 0x340   : > { %2240 = vmatmul.mubr.bf16.vlgmr.msra.gmra.mrb[12].mxu0 %v1560_v60  ;;  %v1266_v8 = vmul.f32 %v1263_v48, %v1258_v63  ;;  %v1558_v9 = vmul.f32 %v2549_v3, %v3338_v61 }
 0x341   : > { %v2551_v10 = vpop.eup %2550  ;;  %2247 = vmatprep.mubr.msk.bf16.mxu0 %vm2717_vm14, %v2716_v1 }
 0x342   : > { %v1331_v52 = vpack.c.bf16 %v1266_v8, %v1265_v7  ;;  %v1329_v62 = vmul.f32 %v2551_v10, %v3338_v61  ;;  %v1559_v6 = vmul.f32 %v1558_v9, %v3312_v25  ;;  %v1211_v61 = vpop.f32.mrb[4].mxu0 }
 0x343   : > { %v1213_v20 = vpop.f32.mrb[5].mxu0 }
 0x344   : > { %2224 = vmatmul.mubr.bf16.vlgmr.msra.gmra.mrb[8].mxu1 %v1331_v52  ;;  %v1330_v36 = vmul.f32 %v1329_v62, %v3308_v19  ;;  %v1607_v11 = vrot.slane %v1559_v6, %v3200_v50  ;;  %v1215_v19 = vpop.f32.mrb[6].mxu0 }
 0x345   : > { %2231 = vmatprep.mubr.msk.bf16.mxu1 %vm2717_vm14, %v2716_v1  ;;  %v1417_v14 = vpack.c.bf16 %v1215_v19, %v1211_v61  ;;  %v1217_v25 = vpop.f32.mrb[7].mxu0  ;;  %v2460_v61 = vld [vmem:[%s3543_s9 + $0x24] ss:$8 sps:$4 sm:$0xff]   ;;  %v2463_v19 = vld [vmem:[%s3543_s9 + $0x34] ss:$8 sps:$4 sm:$0xff]  }
 0x346   : > { %v1378_v35 = vrot.slane %v1330_v36, %v3198_v49  ;;  %v1609_v12 = vmul.f32 %v1607_v11, %v1502_v56  ;;  %v1608_v0 = vmul.f32 %v1607_v11, %v1501_v55  ;;  %v1645_v15 = vpack.c.bf16 %v1217_v25, %v1213_v20  ;;  %v1221_v2 = vpop.f32.mrb[8].mxu0  ;;  %v2454_v11 = vld [vmem:[%s3543_s9 + $0x4] ss:$8 sps:$4 sm:$0xff]   ;;  %v2458_v20 = vld [vmem:[%s3543_s9 + $0x20] ss:$8 sps:$4 sm:$0xff]  }
 0x347   : > { %2228 = vmatpush3.bf16.msra.mxu1 %v1417_v14  ;;  %v1418_v4 = vpack.c.bf16 %v1221_v2, %v1221_v2  ;;  %v1223_v16 = vpop.f32.mrb[9].mxu0  ;;  %v2461_v14 = vld [vmem:[%s3543_s9 + $0x30] ss:$8 sps:$4 sm:$0xff]   ;;  %v2466_v25 = vld [vmem:[%s3543_s9 + $0x44] ss:$8 sps:$4 sm:$0xff]  }
 0x348   : > { %v1380_v13 = vmul.f32 %v1378_v35, %v1266_v8  ;;  %v1379_v5 = vmul.f32 %v1378_v35, %v1265_v7  ;;  %2244 = vmatpush3.bf16.msra.mxu0 %v1645_v15  ;;  %v1646_v17 = vpack.c.bf16 %v1223_v16, %v1223_v16  ;;  %v1225_v18 = vpop.f32.mrb[10].mxu0  ;;  %2229 = vmatprep.subr.bf16.mxu1 %v2716_v1  ;;  %v2464_v15 = vld [vmem:[%s3543_s9 + $0x40] ss:$8 sps:$4 sm:$0xff]   ;;  %v2469_v2 = vld [vmem:[%s3543_s9 + $0x54] ss:$8 sps:$4 sm:$0xff]  }
 0x349   : > { %v1430_v21 = vsel %vm1428_vm11, %v1418_v4, 0  ;;  %v1226_v22 = vpop.f32.mrb[11].mxu0  ;;  %2245 = vmatprep.subr.bf16.mxu0 %v2716_v1  ;;  %v2467_v4 = vld [vmem:[%s3543_s9 + $0x50] ss:$8 sps:$4 sm:$0xff]   ;;  %v2472_v16 = vld [vmem:[%s3543_s9 + $0x64] ss:$8 sps:$4 sm:$0xff]  }
 0x34a   : > { %1383 = vadd.xlane.f32.xlu1 %v1380_v13  ;;  %1381 = vadd.xlane.f32.xlu0 %v1379_v5  ;;  %v1657_v23 = vsel %vm1428_vm11, %v1646_v17, 0  ;;  %v2452_v5 = vld [vmem:[%s3543_s9] ss:$8 sps:$4 sm:$0xff]   ;;  %v2475_v18 = vld [vmem:[%s3543_s9 + $0x74] ss:$8 sps:$4 sm:$0xff]  }
 0x34b   : > { %2230 = vmatpush3.bf16.msra.mxu1 %v1430_v21  ;;  %v2470_v17 = vld [vmem:[%s3543_s9 + $0x60] ss:$8 sps:$4 sm:$0xff]   ;;  %v2473_v21 = vld [vmem:[%s3543_s9 + $0x70] ss:$8 sps:$4 sm:$0xff]   ;;  %v2478_v22 = vld [vmem:[%s3543_s9 + $0x84] ss:$8 sps:$4 sm:$0xff]  }
 0x34c   : > { %2246 = vmatpush3.bf16.msra.mxu0 %v1657_v23  ;;  %1896 = vmatprep.subr.bf16.mxu1 %v2454_v11  ;;  %v2476_v23 = vld [vmem:[%s3543_s9 + $0x80] ss:$8 sps:$4 sm:$0xff]  }
 0x34e   : > { %1612 = vadd.xlane.f32.xlu1 %v1609_v12  ;;  %1610 = vadd.xlane.f32.xlu0 %v1608_v0  ;;  %v2457_v12 = vld [vmem:[%s3543_s9 + $0x14] ss:$8 sps:$4 sm:$0xff]   ;;  %v2455_v0 = vld [vmem:[%s3543_s9 + $0x10] ss:$8 sps:$4 sm:$0xff]  }
 0x3d7   : > { %v3380_v42 = vpop.xlane.xlu0 %1381  ;;  %v3382_v43 = vpop.xlane.xlu1 %1383 }
 0x3db   : > { %v3384_v44 = vpop.xlane.xlu0 %1610  ;;  %v3386_v45 = vpop.xlane.xlu1 %1612 }
 0x413   : > { %v1597_v24 = vpop.f32.mrb[12].mxu0 }
 0x414   : > { %v2241_v26 = vpop.f32.mrb[13].mxu0  ;;  %v1614_v30 = vsel %vm1385_vm12, %v1597_v24, -inf }
 0x415   : > { %v1600_v32 = vpop.f32.mrb[14].mxu0  ;;  %1615 = vmax.xlane.f32.xlu0 %v1614_v30  ;;  %v2479_v26 = vld [vmem:[%s3543_s9 + $0x90] ss:$8 sps:$4 sm:$0xff]   ;;  %v2484_v30 = vld [vmem:[%s3543_s9 + $0xa4] ss:$8 sps:$4 sm:$0xff]  }
 0x416   : > { %v2242_v33 = vpop.f32.mrb[15].mxu0  ;;  %v1617_v34 = vsel %vm1385_vm12, %v1600_v32, -inf }
 0x417   : > { %v1368_v37 = vpop.f32.mrb[8].mxu1  ;;  %1618 = vmax.xlane.f32.xlu1 %v1617_v34  ;;  %v2487_v33 = vld [vmem:[%s3543_s9 + $0xb4] ss:$8 sps:$4 sm:$0xff]   ;;  %v2485_v34 = vld [vmem:[%s3543_s9 + $0xb0] ss:$8 sps:$4 sm:$0xff]  }
 0x418   : > { %v2225_v38 = vpop.f32.mrb[9].mxu1  ;;  %v1386_v39 = vsel %vm1385_vm12, %v1368_v37, -inf }
 0x419   : > { %v1371_v40 = vpop.f32.mrb[10].mxu1  ;;  %1387 = vmax.xlane.f32.xlu0 %v1386_v39  ;;  %v2488_v38 = vld [vmem:[%s3543_s9 + $0xc0] ss:$8 sps:$4 sm:$0xff]   ;;  %v2493_v39 = vld [vmem:[%s3543_s9 + $0xd4] ss:$8 sps:$4 sm:$0xff]  }
 0x41a   : > { %v2226_v1 = vpop.f32.mrb[11].mxu1  ;;  %v1389_v41 = vsel %vm1385_vm12, %v1371_v40, -inf }
 0x41b   : > { %1390 = vmax.xlane.f32.xlu1 %v1389_v41  ;;  %v2496_v1 = vld [vmem:[%s3543_s9 + $0xe4] ss:$8 sps:$4 sm:$0xff]   ;;  %v2494_v41 = vld [vmem:[%s3543_s9 + $0xe0] ss:$8 sps:$4 sm:$0xff]  }
 0x4a2   : > { %v1616_v28 = vpop.xlane.xlu0 %1615 }
 0x4a3   : > { %v3389_v31 = vmax.f32 %v1616_v28, %v3384_v44  ;;  %v2499_v28 = vld [vmem:[%s3543_s9 + $0xf4] ss:$8 sps:$4 sm:$0xff]  }
 0x4a4   : > { %v1619_v46 = vpop.xlane.xlu1 %1618 }
 0x4a5   : > { %v1622_v27 = vsub.f32 %v1597_v24, %v3389_v31  ;;  %v1628_v47 = vsub.f32 %v3384_v44, %v3389_v31  ;;  %v3395_v29 = vmax.f32 %v1619_v46, %v3386_v45  ;;  %v2481_v24 = vld [vmem:[%s3543_s9 + $0x94] ss:$8 sps:$4 sm:$0xff]   ;;  %v2497_v46 = vld [vmem:[%s3543_s9 + $0xf0] ss:$8 sps:$4 sm:$0xff]  }
 0x4a6   : > { %v1388_v48 = vpop.xlane.xlu0 %1387 }
 0x4a7   : > { %v1624_v51 = vmul.f32 1.442695, %v1622_v27  ;;  %v1623_v59 = vsub.f32 %v1600_v32, %v3395_v29  ;;  %v1629_v53 = vsub.f32 %v3386_v45, %v3395_v29  ;;  %v3401_v54 = vmax.f32 %v1388_v48, %v3380_v42  ;;  %v2482_v32 = vld [vmem:[%s3543_s9 + $0xa0] ss:$8 sps:$4 sm:$0xff]   ;;  %v1229_v29 = vld [vmem:[#allocation6] sm:$0x3] }
 0x4a8   : > { %v1391_v55 = vpop.xlane.xlu1 %1390  ;;  %v1630_v27 = vmul.f32 1.442695, %v1628_v47 }
 0x4a9   : > { %2552 = vpow2.f32 %v1624_v51  ;;  %v1626_v56 = vmul.f32 1.442695, %v1623_v59  ;;  %v3404_v57 = vmax.f32 %v1391_v55, %v3382_v43  ;;  %v1394_v58 = vsub.f32 %v1368_v37, %v3401_v54  ;;  %v2490_v37 = vld [vmem:[%s3543_s9 + $0xc4] ss:$8 sps:$4 sm:$0xff]  }
 0x4aa   : > { %v1400_v48 = vsub.f32 %v3380_v42, %v3401_v54  ;;  %v1632_v51 = vmul.f32 1.442695, %v1629_v53 }
 0x4ab   : > { %2554 = vpow2.f32 %v1626_v56  ;;  %v1395_v60 = vsub.f32 %v1371_v40, %v3404_v57  ;;  %v1396_v63 = vmul.f32 1.442695, %v1394_v58  ;;  %v2491_v40 = vld [vmem:[%s3543_s9 + $0xd0] ss:$8 sps:$4 sm:$0xff]   ;;  %v1401_v59 = vsub.f32 %v3382_v43, %v3404_v57 }
 0x4ac   : > { %v1402_v55 = vmul.f32 1.442695, %v1400_v48  ;;  %v1650_v57 = vrot.slane %v1229_v29, %v3200_v50 }
 0x4ad   : > { %v1398_v3 = vmul.f32 1.442695, %v1395_v60  ;;  %2556 = vpow2.f32 %v1396_v63  ;;  %v1404_v56 = vmul.f32 1.442695, %v1401_v59 }
 0x4af   : > { %2558 = vpow2.f32 %v1398_v3 }
 0x4b0   : > { %2560 = vpow2.f32 %v1630_v27 }
 0x4b1   : > { %2562 = vpow2.f32 %v1632_v51 }
 0x4b2   : > { %2564 = vpow2.f32 %v1402_v55 }
 0x4b3   : > { %v2553_v7 = vpop.eup %2552  ;;  %2566 = vpow2.f32 %v1404_v56 }
 0x4b4   : > { %v1634_v8 = vsel %vm1385_vm12, %v2553_v7, 0.0 }
 0x4b5   : > { %v2555_v9 = vpop.eup %2554  ;;  %1635 = vadd.xlane.f32.xlu0 %v1634_v8 }
 0x4b6   : > { %v1637_v10 = vsel %vm1385_vm12, %v2555_v9, 0.0  ;;  %v1644_v52 = vpack.c.bf16 %v2555_v9, %v2553_v7  ;;  %v1422_v9 = vrot.slane %v1229_v29, %v3198_v49 }
 0x4b7   : > { %1638 = vadd.xlane.f32.xlu1 %v1637_v10  ;;  %v2557_v62 = vpop.eup %2556 }
 0x4b8   : > { %2248 = vmatmul.mubr.msk.bf16.vlgmr.msra.gmra.mrb[16].mxu0 %vm1385_vm12, %v1644_v52  ;;  %v1406_v36 = vsel %vm1385_vm12, %v2557_v62, 0.0 }
 0x4b9   : > { %v2559_v6 = vpop.eup %2558  ;;  %1407 = vadd.xlane.f32.xlu0 %v1406_v36 }
 0x4ba   : > { %v1409_v35 = vsel %vm1385_vm12, %v2559_v6, 0.0  ;;  %v1416_v13 = vpack.c.bf16 %v2559_v6, %v2557_v62  ;;  %v2561_v44 = vpop.eup %2560 }
 0x4bb   : > { %1410 = vadd.xlane.f32.xlu1 %v1409_v35  ;;  %v2563_v47 = vpop.eup %2562  ;;  %v1651_v7 = vmul.f32 %v2561_v44, %v1650_v57 }
 0x4bc   : > { %2232 = vmatmul.mubr.msk.bf16.vlgmr.msra.gmra.mrb[12].mxu1 %vm1385_vm12, %v1416_v13  ;;  %v2565_v54 = vpop.eup %2564  ;;  %v1652_v62 = vmul.f32 %v2563_v47, %v1650_v57 }
 0x4bd   : > { %1897 = vmatpush1.bf16.msra.mxu1 %v2452_v5  ;;  %v2567_v3 = vpop.eup %2566 }
 0x4be   : > { %1898 = vmatprep.subr.bf16.mxu1 %v2457_v12  ;;  %v1423_v12 = vmul.f32 %v2565_v54, %v1422_v9 }
 0x4c1   : > { %1899 = vmatpush1.bf16.msra.mxu1 %v2455_v0 }
 0x4c2   : > { %1900 = vmatprep.subr.bf16.mxu1 %v2460_v61 }
 0x4c5   : > { %1901 = vmatpush1.bf16.msra.mxu1 %v2458_v20 }
 0x4c6   : > { %1902 = vmatprep.subr.bf16.mxu1 %v2463_v19  ;;  %v1424_v19 = vmul.f32 %v2567_v3, %v1422_v9 }
 0x4c9   : > { %1903 = vmatpush1.bf16.msra.mxu1 %v2461_v14 }
 0x4ca   : > { %1904 = vmatprep.subr.bf16.mxu1 %v2466_v25 }
 0x4cd   : > { %1905 = vmatpush1.bf16.msra.mxu1 %v2464_v15 }
 0x4ce   : > { %1906 = vmatprep.subr.bf16.mxu1 %v2469_v2 }
 0x4d1   : > { %1907 = vmatpush1.bf16.msra.mxu1 %v2467_v4 }
 0x4d2   : > { %1908 = vmatprep.subr.bf16.mxu1 %v2472_v16 }
 0x4d5   : > { %1909 = vmatpush1.bf16.msra.mxu1 %v2470_v17 }
 0x4d6   : > { %1910 = vmatprep.subr.bf16.mxu1 %v2475_v18 }
 0x4d9   : > { %1911 = vmatpush1.bf16.msra.mxu1 %v2473_v21 }
 0x4da   : > { %1912 = vmatprep.subr.bf16.mxu1 %v2478_v22  ;;  %v2576_v22 = vld [vmem:[%s2920_s30] sm:$0xff] }
 0x4dd   : > { %1913 = vmatpush1.bf16.msra.mxu1 %v2476_v23 }
 0x4de   : > { %1914 = vmatprep.subr.bf16.mxu1 %v2481_v24 }
 0x4e1   : > { %1915 = vmatpush1.bf16.msra.mxu1 %v2479_v26  ;;  %v2577_v26 = vld [vmem:[%s2920_s30 + $0x8] sm:$0xff] }
 0x4e2   : > { %1916 = vmatprep.subr.bf16.mxu1 %v2484_v30 }
 0x4e5   : > { %1917 = vmatpush1.bf16.msra.mxu1 %v2482_v32 }
 0x4e6   : > { %1918 = vmatprep.subr.bf16.mxu1 %v2487_v33  ;;  %v2578_v33 = vld [vmem:[%s2920_s30 + $0x10] sm:$0xff] }
 0x4e9   : > { %1919 = vmatpush1.bf16.msra.mxu1 %v2485_v34 }
 0x4ea   : > { %1920 = vmatprep.subr.bf16.mxu1 %v2490_v37 }
 0x4ed   : > { %1921 = vmatpush1.bf16.msra.mxu1 %v2488_v38  ;;  %v2579_v38 = vld [vmem:[%s2920_s30 + $0x18] sm:$0xff] }
 0x4ee   : > { %1922 = vmatprep.subr.bf16.mxu1 %v2493_v39 }
 0x4f1   : > { %1923 = vmatpush1.bf16.msra.mxu1 %v2491_v40 }
 0x4f2   : > { %1924 = vmatprep.subr.bf16.mxu1 %v2496_v1 }
 0x4f5   : > { %1925 = vmatpush1.bf16.msra.mxu1 %v2494_v41 }
 0x4f6   : > { %1926 = vmatprep.subr.bf16.mxu1 %v2499_v28 }
 0x4f9   : > { %1927 = vmatpush1.bf16.msra.mxu1 %v2497_v46 }
 0x542   : > { %v1636_v58 = vpop.xlane.xlu0 %1635 }
 0x543   : > { %v1640_v31 = vadd.f32 %v2561_v44, %v1636_v58 }
 0x544   : > { %v1639_v60 = vpop.xlane.xlu1 %1638 }
 0x545   : > { %v1641_v63 = vadd.f32 %v2563_v47, %v1639_v60  ;;  %2568 = vrcp.f32 %v1640_v31 }
 0x546   : > { %v1408_v42 = vpop.xlane.xlu0 %1407 }
 0x547   : > { %v1412_v53 = vadd.f32 %v2565_v54, %v1408_v42  ;;  %2570 = vrcp.f32 %v1641_v63 }
 0x548   : > { %v1411_v45 = vpop.xlane.xlu1 %1410 }
 0x549   : > { %v1413_v43 = vadd.f32 %v2567_v3, %v1411_v45  ;;  %2572 = vrcp.f32 %v1412_v53 }
 0x54b   : > { %2574 = vrcp.f32 %v1413_v43 }
 0x54f   : > { %v2569_v36 = vpop.eup %2568 }
 0x551   : > { %v2571_v11 = vpop.eup %2570 }
 0x553   : > { %v2573_v14 = vpop.eup %2572 }
 0x555   : > { %v2575_v16 = vpop.eup %2574 }
 0x58b   : > { %v1693_v8 = vpop.f32.mrb[16].mxu0 }
 0x58c   : > { %v1694_v10 = vadd.f32 %v1693_v8, %v1651_v7  ;;  %v2249_v52 = vpop.f32.mrb[17].mxu0 }
 0x58d   : > { %v1696_v6 = vpop.f32.mrb[18].mxu0 }
 0x58e   : > { %v1700_v35 = vmul.f32 %v2569_v36, %v1694_v10  ;;  %v1697_v13 = vadd.f32 %v1696_v6, %v1652_v62  ;;  %v2250_v5 = vpop.f32.mrb[19].mxu0 }
 0x58f   : > { %v1466_v61 = vpop.f32.mrb[12].mxu1 }
 0x590   : > { %v1701_v0 = vmul.f32 %v2571_v11, %v1697_v13  ;;  %v1467_v50 = vadd.f32 %v1466_v61, %v1423_v12  ;;  %v2233_v20 = vpop.f32.mrb[13].mxu1 }
 0x591   : > { %v1469_v49 = vpop.f32.mrb[14].mxu1 }
 0x592   : > { %v1703_v25 = vpack.c.bf16 %v1701_v0, %v1700_v35  ;;  %v1473_v15 = vmul.f32 %v2573_v14, %v1467_v50  ;;  %v1470_v2 = vadd.f32 %v1469_v49, %v1424_v19  ;;  %v2234_v4 = vpop.f32.mrb[15].mxu1 }
 0x594   : > { %1928 = vmatprep.mubr.bf16.mxu1 %v1703_v25  ;;  %v1474_v17 = vmul.f32 %v2575_v16, %v1470_v2 }
 0x596   : > { %v1702_v18 = vpack.c.bf16 %v1474_v17, %v1473_v15 }
 0x598   : > { %1929 = vmatmul.mubr.bf16.vlgmr.msra.gmra.mrb[16].mxu1 %v1702_v18 }
 0x66b   : > { %v1930_v21 = vpop.f32.mrb[16].mxu1 }
 0x66c   : > { %v1931_v23 = vadd.f32 %v2576_v22, %v1930_v21  ;;  %v1932_v24 = vpop.f32.mrb[17].mxu1 }
 0x66d   : > { %v1933_v30 = vadd.f32 %v2577_v26, %v1932_v24  ;;  %v1934_v32 = vpop.f32.mrb[18].mxu1 }
 0x66e   : > { %1939 = vst [vmem:[%s430_s28] sm:$0xff] %v1931_v23  ;;  %v1935_v34 = vadd.f32 %v2578_v33, %v1934_v32  ;;  %v1936_v37 = vpop.f32.mrb[19].mxu1 }
 0x66f   : > { %1940 = vst [vmem:[%s430_s28 + $0x8] sm:$0xff] %v1933_v30  ;;  %v1937_v39 = vadd.f32 %v2579_v38, %v1936_v37 }
 0x670   : > { %1941 = vst [vmem:[%s430_s28 + $0x10] sm:$0xff] %v1935_v34 }
 0x671   : > { %1942 = vst [vmem:[%s430_s28 + $0x18] sm:$0xff] %v1937_v39 }
 0x672 PF: > { %s23_s13 = sadd.s32 1, %s2710_s13  }
 0x673   : > { %p20_p11 = scmp.ge.s32.totalorder %s23_s13, 4  }
 0x675   :  { %22 = sbr.rel (!%p20_p11) target bundleno = 3 (0x3), region = 110 }
 0x67c   :  { %1964 = vsyncpa [#allocation3], 1 }
 0x67d   :  { %1966 = vsyncpa [#allocation3 + $0x1], 1 }
 0x67e   :  { %1967 = vsyncpa [#allocation5], 1 }
 0x67f   :  { %1968 = vsyncpa [#allocation8], 1 }

// kernel: transformer_blocks_forward.10
= control target key start
LH: loop header
LB: loop body
LE: loop exit
PB: predicated region body
PF: predicated region fallthrough
CT: control target
= control target key end

     0   :  { %s2302_s27 = smov 0   ;;  %s3001_s0 = inlined_call_operand.vmem [shape: f32[2,16,256], index: 0, kind: input, shape index: {}]   ;;  %s3002_s1 = inlined_call_operand.vmem [shape: f32[1,256], index: 1, kind: input, shape index: {}]   ;;  %s3003_s2 = inlined_call_operand.vmem [shape: bf16[256,768], index: 2, kind: input, shape index: {}]   ;;  %s3004_s3 = inlined_call_operand.vmem [shape: f32[2,128], index: 3, kind: input, shape index: {}]   ;;  %s3005_s4 = inlined_call_operand.vmem [shape: f32[2,128], index: 4, kind: input, shape index: {}]   ;;  %s3006_s5 = inlined_call_operand.vmem [shape: f32[1,128], index: 5, kind: input, shape index: {}]   ;;  %s3007_s6 = inlined_call_operand.vmem [shape: f32[1,128], index: 6, kind: input, shape index: {}]   ;;  %s3008_s7 = inlined_call_operand.vmem [shape: bf16[256,256], index: 7, kind: input, shape index: {}]   ;;  %s3009_s8 = inlined_call_operand.vmem [shape: f32[2,16,256], index: 8, kind: output, shape index: {}]  }
   0x1 LB: > { %s1798_s28 = sadd.s32 4294967295, %s2253_s27   ;;  %p1802_p0 = scmp.ge.s32.totalorder %s2253_s27, 1  ;;  %s2253_s27 = sphi %s2302_s27, %s18_s27  }
   0x2   : > { %p262_p1 = scmp.lt.s32.totalorder %s2253_s27, 3 }
   0x4   : > { %p263_p2 = pnand %p1802_p0, %p262_p1 }
   0x5   : > { %p296_p3 = scmp.lt.s32.totalorder (!%p263_p2), %s1798_s28, 1  ;;  %v1983_v6 = vld [vmem:[%s3003_s2 + $0x4] ss:$24 sps:$4 sm:$0xff] (!%p263_p2)   ;;  %v1985_v7 = vld [vmem:[%s3003_s2] ss:$24 sps:$4 sm:$0xff] (!%p263_p2)   ;;  %vm1350_vm0 = vcmask (!%p263_p2), 1041409  }
   0x6   : > { %266 = sbr.rel (%p263_p2) target bundleno = 1558 (0x616), region = 52  ;;  %v1986_v8 = vld [vmem:[%s3003_s2 + $0xc] ss:$24 sps:$4 sm:$0xff] (!%p263_p2)   ;;  %v1988_v9 = vld [vmem:[%s3003_s2 + $0x8] ss:$24 sps:$4 sm:$0xff] (!%p263_p2)   ;;  %938 = vmatprep.subr.bf16.mxu0 (!%p263_p2), %v1983_v6  ;;  %vm1141_vm1 = vcmask (!%p263_p2), 1040384  }
   0x7   : > { %v1989_v10 = vld [vmem:[%s3003_s2 + $0x34] ss:$24 sps:$4 sm:$0xff] (!%p263_p2)   ;;  %981 = vmatprep.subr.bf16.mxu1 (!%p263_p2), %v1986_v8  ;;  %939 = vmatpush1.bf16.msra.mxu0 (!%p263_p2), %v1985_v7  ;;  %v1991_v12 = vld [vmem:[%s3003_s2 + $0x30] ss:$24 sps:$4 sm:$0xff] (!%p263_p2)   ;;  %v1995_v14 = vld [vmem:[%s3003_s2 + $0x64] ss:$24 sps:$4 sm:$0xff] (!%p263_p2)  }
   0x8   : > { %v1992_v11 = vld [vmem:[%s3003_s2 + $0x3c] ss:$24 sps:$4 sm:$0xff] (!%p263_p2)   ;;  %982 = vmatpush1.bf16.msra.mxu1 (!%p263_p2), %v1988_v9  ;;  %v1994_v13 = vld [vmem:[%s3003_s2 + $0x38] ss:$24 sps:$4 sm:$0xff] (!%p263_p2)   ;;  %940 = vmatprep.subr.bf16.mxu0 (!%p263_p2), %v1989_v10  ;;  %v1998_v15 = vld [vmem:[%s3003_s2 + $0x6c] ss:$24 sps:$4 sm:$0xff] (!%p263_p2)  }
   0x9   : > { %983 = vmatprep.subr.bf16.mxu1 (!%p263_p2), %v1992_v11  ;;  %v1997_v16 = vld [vmem:[%s3003_s2 + $0x60] ss:$24 sps:$4 sm:$0xff] (!%p263_p2)   ;;  %v2001_v18 = vld [vmem:[%s3003_s2 + $0x94] ss:$24 sps:$4 sm:$0xff] (!%p263_p2)   ;;  %v2003_v20 = vld [vmem:[%s3003_s2 + $0x90] ss:$24 sps:$4 sm:$0xff] (!%p263_p2)  }
   0xa   : > { %v2000_v17 = vld [vmem:[%s3003_s2 + $0x68] ss:$24 sps:$4 sm:$0xff] (!%p263_p2)   ;;  %v2004_v19 = vld [vmem:[%s3003_s2 + $0x9c] ss:$24 sps:$4 sm:$0xff] (!%p263_p2)   ;;  %v2006_v21 = vld [vmem:[%s3003_s2 + $0x98] ss:$24 sps:$4 sm:$0xff] (!%p263_p2)  }
   0xb   : > { %941 = vmatpush1.bf16.msra.mxu0 (!%p263_p2), %v1991_v12  ;;  %v2007_v22 = vld [vmem:[%s3003_s2 + $0xc4] ss:$24 sps:$4 sm:$0xff] (!%p263_p2)   ;;  %v2009_v24 = vld [vmem:[%s3003_s2 + $0xc0] ss:$24 sps:$4 sm:$0xff] (!%p263_p2)   ;;  %v2013_v26 = vld [vmem:[%s3003_s2 + $0xf4] ss:$24 sps:$4 sm:$0xff] (!%p263_p2)  }
   0xc   : > { %984 = vmatpush1.bf16.msra.mxu1 (!%p263_p2), %v1994_v13  ;;  %942 = vmatprep.subr.bf16.mxu0 (!%p263_p2), %v1995_v14  ;;  %v2010_v23 = vld [vmem:[%s3003_s2 + $0xcc] ss:$24 sps:$4 sm:$0xff] (!%p263_p2)   ;;  %v2012_v25 = vld [vmem:[%s3003_s2 + $0xc8] ss:$24 sps:$4 sm:$0xff] (!%p263_p2)   ;;  %v2016_v27 = vld [vmem:[%s3003_s2 + $0xfc] ss:$24 sps:$4 sm:$0xff] (!%p263_p2)  }
   0xd   : > { %s3011_s28 = smov (!%p296_p3, %s1798_s28), 1  ;;  %985 = vmatprep.subr.bf16.mxu1 %v1998_v15  ;;  %v2015_v28 = vld [vmem:[%s3003_s2 + $0xf0] ss:$24 sps:$4 sm:$0xff]   ;;  %v2019_v30 = vld [vmem:[%s3003_s2 + $0x124] ss:$24 sps:$4 sm:$0xff]   ;;  %vm2256_vm2 = vmmov 0  }
   0xe   : > { %s1939_s29 = sshll.u32 %s3011_s28, 5  ;;  %v2018_v29 = vld [vmem:[%s3003_s2 + $0xf8] ss:$24 sps:$4 sm:$0xff]   ;;  %v2022_v31 = vld [vmem:[%s3003_s2 + $0x12c] ss:$24 sps:$4 sm:$0xff]  }
   0xf   : > { %s2318_s10 = scalar_lea.vmem %s3001_s0, %s1939_s29  ;;  %943 = vmatpush1.bf16.msra.mxu0 %v1997_v16  ;;  %v2021_v32 = vld [vmem:[%s3003_s2 + $0x120] ss:$24 sps:$4 sm:$0xff]   ;;  %v2025_v34 = vld [vmem:[%s3003_s2 + $0x154] ss:$24 sps:$4 sm:$0xff]   ;;  %v2027_v36 = vld [vmem:[%s3003_s2 + $0x150] ss:$24 sps:$4 sm:$0xff]   ;;  %s305_s30 = scalar_lea.vmem %s3009_s8, %s1939_s29 }
  0x10   : > { %v2321_v0 = vld [vmem:[%s2318_s10] sm:$0xff]  ;;  %v2324_v1 = vld [vmem:[%s2318_s10 + $0x8] sm:$0xff]  ;;  %v2327_v2 = vld [vmem:[%s2318_s10 + $0x10] sm:$0xff]  ;;  %986 = vmatpush1.bf16.msra.mxu1 %v2000_v17  ;;  %944 = vmatprep.subr.bf16.mxu0 %v2001_v18 }
  0x11   : > { %v312_v3 = vadd.f32 %v2324_v1, %v2321_v0  ;;  %v2332_v4 = vld [vmem:[%s2318_s10 + $0x18] sm:$0xff]  ;;  %987 = vmatprep.subr.bf16.mxu1 %v2004_v19  ;;  %v2024_v33 = vld [vmem:[%s3003_s2 + $0x128] ss:$24 sps:$4 sm:$0xff]   ;;  %v2034_v39 = vld [vmem:[%s3003_s2 + $0x18c] ss:$24 sps:$4 sm:$0xff]  }
  0x12   : > { %v315_v5 = vadd.f32 %v2332_v4, %v2327_v2  ;;  %v2028_v35 = vld [vmem:[%s3003_s2 + $0x15c] ss:$24 sps:$4 sm:$0xff]   ;;  %v2030_v37 = vld [vmem:[%s3003_s2 + $0x158] ss:$24 sps:$4 sm:$0xff]   ;;  %v2036_v41 = vld [vmem:[%s3003_s2 + $0x188] ss:$24 sps:$4 sm:$0xff]  }
  0x13   : > { %313 = vadd.xlane.f32.xlu0 %v312_v3  ;;  %945 = vmatpush1.bf16.msra.mxu0 %v2003_v20  ;;  %v2031_v38 = vld [vmem:[%s3003_s2 + $0x184] ss:$24 sps:$4 sm:$0xff]   ;;  %v2033_v40 = vld [vmem:[%s3003_s2 + $0x180] ss:$24 sps:$4 sm:$0xff]   ;;  %v2037_v42 = vld [vmem:[%s3003_s2 + $0x1b4] ss:$24 sps:$4 sm:$0xff]  }
  0x14   : > { %988 = vmatpush1.bf16.msra.mxu1 %v2006_v21  ;;  %946 = vmatprep.subr.bf16.mxu0 %v2007_v22  ;;  %v2040_v43 = vld [vmem:[%s3003_s2 + $0x1bc] ss:$24 sps:$4 sm:$0xff]   ;;  %v2039_v44 = vld [vmem:[%s3003_s2 + $0x1b0] ss:$24 sps:$4 sm:$0xff]   ;;  %v2045_v61 = vld [vmem:[%s3003_s2 + $0x1e0] ss:$24 sps:$4 sm:$0xff]  }
  0x15   : > { %989 = vmatprep.subr.bf16.mxu1 %v2010_v23  ;;  %v2042_v45 = vld [vmem:[%s3003_s2 + $0x1b8] ss:$24 sps:$4 sm:$0xff]   ;;  %v2043_v60 = vld [vmem:[%s3003_s2 + $0x1e4] ss:$24 sps:$4 sm:$0xff]   ;;  %v2048_v63 = vld [vmem:[%s3003_s2 + $0x1e8] ss:$24 sps:$4 sm:$0xff]  }
  0x16   : > { %v2046_v62 = vld [vmem:[%s3003_s2 + $0x1ec] ss:$24 sps:$4 sm:$0xff]   ;;  %v2054_v3 = vld [vmem:[%s3003_s2 + $0x218] ss:$24 sps:$4 sm:$0xff]   ;;  %v2060_v7 = vld [vmem:[%s3003_s2 + $0x248] ss:$24 sps:$4 sm:$0xff]  }
  0x17   : > { %316 = vadd.xlane.f32.xlu0 %v315_v5  ;;  %947 = vmatpush1.bf16.msra.mxu0 %v2009_v24  ;;  %v2057_v5 = vld [vmem:[%s3003_s2 + $0x240] ss:$24 sps:$4 sm:$0xff]   ;;  %v2058_v6 = vld [vmem:[%s3003_s2 + $0x24c] ss:$24 sps:$4 sm:$0xff]   ;;  %v2064_v9 = vld [vmem:[%s3003_s2 + $0x27c] ss:$24 sps:$4 sm:$0xff]  }
  0x18   : > { %990 = vmatpush1.bf16.msra.mxu1 %v2012_v25  ;;  %948 = vmatprep.subr.bf16.mxu0 %v2013_v26  ;;  %v2061_v8 = vld [vmem:[%s3003_s2 + $0x274] ss:$24 sps:$4 sm:$0xff]   ;;  %v2063_v10 = vld [vmem:[%s3003_s2 + $0x270] ss:$24 sps:$4 sm:$0xff]   ;;  %v2067_v12 = vld [vmem:[%s3003_s2 + $0x2a4] ss:$24 sps:$4 sm:$0xff]   ;;  %v346_v26 = vlaneseq }
  0x19   : > { %991 = vmatprep.subr.bf16.mxu1 %v2016_v27  ;;  %v2066_v11 = vld [vmem:[%s3003_s2 + $0x278] ss:$24 sps:$4 sm:$0xff]   ;;  %v2070_v13 = vld [vmem:[%s3003_s2 + $0x2ac] ss:$24 sps:$4 sm:$0xff]   ;;  %v2072_v15 = vld [vmem:[%s3003_s2 + $0x2a8] ss:$24 sps:$4 sm:$0xff]  }
  0x1a   : > { %v2069_v14 = vld [vmem:[%s3003_s2 + $0x2a0] ss:$24 sps:$4 sm:$0xff]   ;;  %v2073_v16 = vld [vmem:[%s3003_s2 + $0x2d4] ss:$24 sps:$4 sm:$0xff]   ;;  %v2075_v18 = vld [vmem:[%s3003_s2 + $0x2d0] ss:$24 sps:$4 sm:$0xff]  }
  0x1b   : > { %949 = vmatpush1.bf16.msra.mxu0 %v2015_v28  ;;  %v2076_v17 = vld [vmem:[%s3003_s2 + $0x2dc] ss:$24 sps:$4 sm:$0xff]   ;;  %v2078_v19 = vld [vmem:[%s3003_s2 + $0x2d8] ss:$24 sps:$4 sm:$0xff]   ;;  %v347_v28 = vshrl.u32 %v346_v26, 7 }
  0x1c   : > { %992 = vmatpush1.bf16.msra.mxu1 %v2018_v29  ;;  %950 = vmatprep.subr.bf16.mxu0 %v2019_v30  ;;  %v2081_v20 = vld [vmem:[%s3003_s2 + $0x14] ss:$24 sps:$4 sm:$0xff]   ;;  %v2691_v26 = vld [vmem:[%s3004_s3] sm:$0x3] }
  0x1d   : > { %993 = vmatprep.subr.bf16.mxu1 %v2022_v31  ;;  %v2551_v29 = vsub.s32 0, %v347_v28  ;;  %v2553_v30 = vsub.s32 1, %v347_v28  ;;  %v1140_v28 = vmul.f32 %v2691_v26, %v2691_v26 }
  0x1f   : > { %951 = vmatpush1.bf16.msra.mxu0 %v2021_v32  ;;  %v311_v32 = vld [vmem:[%s3002_s1] sm:$0x3] }
  0x20   : > { %994 = vmatpush1.bf16.msra.mxu1 %v2024_v33  ;;  %952 = vmatprep.subr.bf16.mxu0 %v2025_v34  ;;  %v353_v34 = vrot.slane %v311_v32, %v2553_v30 }
  0x21   : > { %995 = vmatprep.subr.bf16.mxu1 %v2028_v35 }
  0x23   : > { %953 = vmatpush1.bf16.msra.mxu0 %v2027_v36  ;;  %v349_v36 = vrot.slane %v311_v32, %v2551_v29 }
  0x24   : > { %996 = vmatpush1.bf16.msra.mxu1 %v2030_v37  ;;  %954 = vmatprep.subr.bf16.mxu0 %v2031_v38 }
  0x25   : > { %997 = vmatprep.subr.bf16.mxu1 %v2034_v39 }
  0x27   : > { %955 = vmatpush1.bf16.msra.mxu0 %v2033_v40 }
  0x28   : > { %998 = vmatpush1.bf16.msra.mxu1 %v2036_v41  ;;  %956 = vmatprep.subr.bf16.mxu0 %v2037_v42 }
  0x29   : > { %999 = vmatprep.subr.bf16.mxu1 %v2040_v43 }
  0x2b   : > { %957 = vmatpush1.bf16.msra.mxu0 %v2039_v44 }
  0x2c   : > { %1000 = vmatpush1.bf16.msra.mxu1 %v2042_v45  ;;  %958 = vmatprep.subr.bf16.mxu0 %v2043_v60  ;;  %v2079_v45 = vld [vmem:[%s3003_s2 + $0x10] ss:$24 sps:$4 sm:$0xff]   ;;  %v2100_v60 = vld [vmem:[%s3003_s2 + $0x160] ss:$24 sps:$4 sm:$0xff]  }
  0x2d   : > { %1001 = vmatprep.subr.bf16.mxu1 %v2046_v62  ;;  %v2103_v62 = vld [vmem:[%s3003_s2 + $0x190] ss:$24 sps:$4 sm:$0xff]  }
  0x2f   : > { %959 = vmatpush1.bf16.msra.mxu0 %v2045_v61  ;;  %v2105_v61 = vld [vmem:[%s3003_s2 + $0x194] ss:$24 sps:$4 sm:$0xff]  }
  0x30   : > { %1002 = vmatpush1.bf16.msra.mxu1 %v2048_v63  ;;  %v2108_v63 = vld [vmem:[%s3003_s2 + $0x1c4] ss:$24 sps:$4 sm:$0xff]  }
  0xa0   : > { %v314_v46 = vpop.xlane.xlu0 %313 }
  0xa1   : > { %v319_v47 = vmul.f32 0.00390625, %v314_v46 }
  0xa3   : > { %v2457_v48 = vsub.f32 %v2321_v0, %v319_v47  ;;  %v2460_v49 = vsub.f32 %v2324_v1, %v319_v47  ;;  %v2049_v0 = vld [vmem:[%s3003_s2 + $0x214] ss:$24 sps:$4 sm:$0xff]   ;;  %v2051_v1 = vld [vmem:[%s3003_s2 + $0x210] ss:$24 sps:$4 sm:$0xff]   ;;  %v2084_v47 = vld [vmem:[%s3003_s2 + $0x44] ss:$24 sps:$4 sm:$0xff]  }
  0xa4   : > { %v317_v50 = vpop.xlane.xlu0 %316  ;;  %960 = vmatprep.subr.bf16.mxu0 %v2049_v0  ;;  %v2106_v0 = vld [vmem:[%s3003_s2 + $0x1c0] ss:$24 sps:$4 sm:$0xff]  }
  0xa5   : > { %v320_v51 = vmul.f32 0.00390625, %v317_v50  ;;  %v325_v52 = vmul.f32 %v2457_v48, %v2457_v48  ;;  %v326_v53 = vmul.f32 %v2460_v49, %v2460_v49  ;;  %961 = vmatpush1.bf16.msra.mxu0 %v2051_v1  ;;  %v2085_v50 = vld [vmem:[%s3003_s2 + $0x70] ss:$24 sps:$4 sm:$0xff]   ;;  %v2111_v1 = vld [vmem:[%s3003_s2 + $0x1f4] ss:$24 sps:$4 sm:$0xff]  }
  0xa7   : > { %v2467_v54 = vsub.f32 %v2327_v2, %v320_v51  ;;  %v2470_v55 = vsub.f32 %v2332_v4, %v320_v51  ;;  %v329_v56 = vadd.f32 %v326_v53, %v325_v52  ;;  %v2052_v2 = vld [vmem:[%s3003_s2 + $0x21c] ss:$24 sps:$4 sm:$0xff]   ;;  %v2088_v52 = vld [vmem:[%s3003_s2 + $0xa0] ss:$24 sps:$4 sm:$0xff]  }
  0xa8   : > { %1003 = vmatprep.subr.bf16.mxu1 %v2052_v2  ;;  %v2055_v4 = vld [vmem:[%s3003_s2 + $0x244] ss:$24 sps:$4 sm:$0xff]   ;;  %v2093_v53 = vld [vmem:[%s3003_s2 + $0xd4] ss:$24 sps:$4 sm:$0xff]   ;;  %v2109_v2 = vld [vmem:[%s3003_s2 + $0x1f0] ss:$24 sps:$4 sm:$0xff]  }
  0xa9   : > { %330 = vadd.xlane.f32.xlu1 %v329_v56  ;;  %v327_v57 = vmul.f32 %v2467_v54, %v2467_v54  ;;  %v328_v58 = vmul.f32 %v2470_v55, %v2470_v55  ;;  %1004 = vmatpush1.bf16.msra.mxu1 %v2054_v3  ;;  %v2090_v51 = vld [vmem:[%s3003_s2 + $0xa4] ss:$24 sps:$4 sm:$0xff]   ;;  %v2094_v56 = vld [vmem:[%s3003_s2 + $0x100] ss:$24 sps:$4 sm:$0xff]  }
  0xaa   : > { %962 = vmatprep.subr.bf16.mxu0 %v2055_v4  ;;  %1005 = vmatprep.subr.bf16.mxu1 %v2058_v6  ;;  %v2114_v3 = vld [vmem:[%s3003_s2 + $0x224] ss:$24 sps:$4 sm:$0xff]   ;;  %v2112_v4 = vld [vmem:[%s3003_s2 + $0x220] ss:$24 sps:$4 sm:$0xff]   ;;  %v2115_v6 = vld [vmem:[%s3003_s2 + $0x250] ss:$24 sps:$4 sm:$0xff]  }
  0xab   : > { %v332_v59 = vadd.f32 %v328_v58, %v327_v57  ;;  %963 = vmatpush1.bf16.msra.mxu0 %v2057_v5  ;;  %v2099_v57 = vld [vmem:[%s3003_s2 + $0x134] ss:$24 sps:$4 sm:$0xff]   ;;  %v2097_v58 = vld [vmem:[%s3003_s2 + $0x130] ss:$24 sps:$4 sm:$0xff]  }
  0xac   : > { %964 = vmatprep.subr.bf16.mxu0 %v2061_v8  ;;  %v2117_v5 = vld [vmem:[%s3003_s2 + $0x254] ss:$24 sps:$4 sm:$0xff]   ;;  %v2118_v8 = vld [vmem:[%s3003_s2 + $0x280] ss:$24 sps:$4 sm:$0xff]  }
  0xad   : > { %333 = vadd.xlane.f32.xlu1 %v332_v59  ;;  %1006 = vmatpush1.bf16.msra.mxu1 %v2060_v7  ;;  %v2102_v59 = vld [vmem:[%s3003_s2 + $0x164] ss:$24 sps:$4 sm:$0xff]  }
  0xae   : > { %1007 = vmatprep.subr.bf16.mxu1 %v2064_v9  ;;  %v2120_v7 = vld [vmem:[%s3003_s2 + $0x284] ss:$24 sps:$4 sm:$0xff]   ;;  %v2123_v9 = vld [vmem:[%s3003_s2 + $0x2b4] ss:$24 sps:$4 sm:$0xff]  }
  0xaf   : > { %965 = vmatpush1.bf16.msra.mxu0 %v2063_v10  ;;  %v2121_v10 = vld [vmem:[%s3003_s2 + $0x2b0] ss:$24 sps:$4 sm:$0xff]  }
  0xb0   : > { %966 = vmatprep.subr.bf16.mxu0 %v2067_v12  ;;  %v2124_v12 = vld [vmem:[%s3003_s2 + $0x2e0] ss:$24 sps:$4 sm:$0xff]  }
  0xb1   : > { %1008 = vmatpush1.bf16.msra.mxu1 %v2066_v11  ;;  %v2126_v11 = vld [vmem:[%s3003_s2 + $0x2e4] ss:$24 sps:$4 sm:$0xff]  }
  0xb2   : > { %1009 = vmatprep.subr.bf16.mxu1 %v2070_v13 }
  0xb3   : > { %967 = vmatpush1.bf16.msra.mxu0 %v2069_v14 }
  0xb4   : > { %968 = vmatprep.subr.bf16.mxu0 %v2073_v16 }
  0xb5   : > { %1010 = vmatpush1.bf16.msra.mxu1 %v2072_v15 }
  0xb6   : > { %1011 = vmatprep.subr.bf16.mxu1 %v2076_v17 }
  0xb7   : > { %969 = vmatpush1.bf16.msra.mxu0 %v2075_v18 }
  0xb8   : > { %1024 = vmatprep.subr.bf16.mxu0 %v2081_v20 }
  0xb9   : > { %1012 = vmatpush1.bf16.msra.mxu1 %v2078_v19 }
 0x136   : > { %v331_v21 = vpop.xlane.xlu1 %330 }
 0x137   : > { %v335_v22 = vmul.f32 0.00390625, %v331_v21 }
 0x139   : > { %v337_v23 = vadd.f32 1e-05, %v335_v22 }
 0x13a   : > { %v334_v24 = vpop.xlane.xlu1 %333 }
 0x13b   : > { %2175 = vrsqrt.f32 %v337_v23  ;;  %v336_v25 = vmul.f32 0.00390625, %v334_v24 }
 0x13d   : > { %v338_v27 = vadd.f32 1e-05, %v336_v25 }
 0x13f   : > { %2177 = vrsqrt.f32 %v338_v27 }
 0x145   : > { %v2176_v31 = vpop.eup %2175 }
 0x146   : > { %v342_v33 = vmul.f32 %v2176_v31, %v2460_v49  ;;  %v341_v35 = vmul.f32 %v2176_v31, %v2457_v48  ;;  %v2082_v48 = vld [vmem:[%s3003_s2 + $0x40] ss:$24 sps:$4 sm:$0xff]   ;;  %v2087_v49 = vld [vmem:[%s3003_s2 + $0x74] ss:$24 sps:$4 sm:$0xff]  }
 0x148   : > { %v357_v40 = vmul.f32 %v353_v34, %v342_v33  ;;  %v356_v42 = vmul.f32 %v349_v36, %v341_v35  ;;  %v1351_v33 = vsel %vm1350_vm0, %v1140_v28, 0.0  ;;  %v2255_v35 = vmov 0.0  }
 0x149   : > { %v2178_v37 = vpop.eup %2177  ;;  %1961 = vmatprep.subr.bf16.mxu1 %v2255_v35 }
 0x14a   : > { %v344_v38 = vmul.f32 %v2178_v37, %v2470_v55  ;;  %v343_v39 = vmul.f32 %v2178_v37, %v2467_v54  ;;  %v2091_v54 = vld [vmem:[%s3003_s2 + $0xd0] ss:$24 sps:$4 sm:$0xff]   ;;  %v2096_v55 = vld [vmem:[%s3003_s2 + $0x104] ss:$24 sps:$4 sm:$0xff]  }
 0x14c   : > { %v359_v41 = vmul.f32 %v353_v34, %v344_v38  ;;  %v358_v43 = vmul.f32 %v349_v36, %v343_v39  ;;  %v1142_v34 = vsel %vm1141_vm1, %v1140_v28, 0.0 }
 0x14e   : > { %v361_v44 = vpack.c.bf16 %v359_v41, %v357_v40  ;;  %v2567_v46 = vpack.c.bf16 %v358_v43, %v356_v42 }
 0x150   : > { %970 = vmatprep.mubr.bf16.mxu0 %v361_v44  ;;  %1013 = vmatprep.mubr.bf16.mxu1 %v361_v44 }
 0x151   : > { %971 = vmatmul.mubr.bf16.vlgmr.msra.gmra.mrb[0].mxu0 %v2567_v46  ;;  %1014 = vmatmul.mubr.bf16.vlgmr.msra.gmra.mrb[0].mxu1 %v2567_v46 }
 0x152   : > { %1025 = vmatpush1.bf16.msra.mxu0 %v2079_v45  ;;  %1056 = vmatprep.mubr.bf16.mxu0 %v361_v44 }
 0x153   : > { %1026 = vmatprep.subr.bf16.mxu0 %v2084_v47  ;;  %1963 = vmatprep.mubr.msk.bf16.mxu1 %vm2256_vm2, %v2255_v35  ;;  %v2724_v47 = vld [vmem:[%s3007_s6] sm:$0x1] }
 0x156   : > { %1027 = vmatpush1.bf16.msra.mxu0 %v2082_v48 }
 0x157   : > { %1028 = vmatprep.subr.bf16.mxu0 %v2087_v49 }
 0x15a   : > { %1029 = vmatpush1.bf16.msra.mxu0 %v2085_v50  ;;  %v2732_v50 = vrot.slane %v2724_v47, %v2551_v29 }
 0x15b   : > { %1030 = vmatprep.subr.bf16.mxu0 %v2090_v51 }
 0x15e   : > { %1031 = vmatpush1.bf16.msra.mxu0 %v2088_v52 }
 0x15f   : > { %1032 = vmatprep.subr.bf16.mxu0 %v2093_v53 }
 0x162   : > { %1033 = vmatpush1.bf16.msra.mxu0 %v2091_v54 }
 0x163   : > { %1034 = vmatprep.subr.bf16.mxu0 %v2096_v55 }
 0x166   : > { %1035 = vmatpush1.bf16.msra.mxu0 %v2094_v56 }
 0x167   : > { %1036 = vmatprep.subr.bf16.mxu0 %v2099_v57 }
 0x16a   : > { %1037 = vmatpush1.bf16.msra.mxu0 %v2097_v58 }
 0x16b   : > { %1038 = vmatprep.subr.bf16.mxu0 %v2102_v59 }
 0x16e   : > { %1039 = vmatpush1.bf16.msra.mxu0 %v2100_v60 }
 0x16f   : > { %1040 = vmatprep.subr.bf16.mxu0 %v2105_v61 }
 0x172   : > { %1041 = vmatpush1.bf16.msra.mxu0 %v2103_v62 }
 0x173   : > { %1042 = vmatprep.subr.bf16.mxu0 %v2108_v63 }
 0x176   : > { %1043 = vmatpush1.bf16.msra.mxu0 %v2106_v0 }
 0x177   : > { %1044 = vmatprep.subr.bf16.mxu0 %v2111_v1 }
 0x17a   : > { %1045 = vmatpush1.bf16.msra.mxu0 %v2109_v2 }
 0x17b   : > { %1046 = vmatprep.subr.bf16.mxu0 %v2114_v3 }
 0x17e   : > { %1047 = vmatpush1.bf16.msra.mxu0 %v2112_v4 }
 0x17f   : > { %1048 = vmatprep.subr.bf16.mxu0 %v2117_v5 }
 0x182   : > { %1049 = vmatpush1.bf16.msra.mxu0 %v2115_v6 }
 0x183   : > { %1050 = vmatprep.subr.bf16.mxu0 %v2120_v7 }
 0x186   : > { %1051 = vmatpush1.bf16.msra.mxu0 %v2118_v8 }
 0x187   : > { %1052 = vmatprep.subr.bf16.mxu0 %v2123_v9 }
 0x18a   : > { %1053 = vmatpush1.bf16.msra.mxu0 %v2121_v10 }
 0x18b   : > { %1054 = vmatprep.subr.bf16.mxu0 %v2126_v11 }
 0x18e   : > { %1055 = vmatpush1.bf16.msra.mxu0 %v2124_v12 }
 0x18f   : > { %1949 = vmatprep.subr.bf16.mxu0 %v2255_v35 }
 0x191   : > { %1057 = vmatmul.mubr.bf16.vlgmr.msra.gmra.mrb[4].mxu0 %v2567_v46 }
 0x192   : > { %1951 = vmatprep.mubr.msk.bf16.mxu0 %vm2256_vm2, %v2255_v35 }
 0x224   : > { %v2662_v13 = vpop.f32.mrb[0].mxu0  ;;  %v2664_v14 = vpop.f32.mrb[0].mxu1 }
 0x225   : > { %v2666_v15 = vpop.f32.mrb[1].mxu0  ;;  %v2668_v16 = vpop.f32.mrb[1].mxu1  ;;  %v1106_v17 = vmul.f32 %v2664_v14, %v2664_v14  ;;  %v1072_v31 = vmul.f32 %v2662_v13, %v2662_v13 }
 0x226   : > { %v2672_v18 = vpop.f32.mrb[2].mxu0  ;;  %v2674_v19 = vpop.f32.mrb[2].mxu1  ;;  %v1322_v23 = vmul.f32 %v2668_v16, %v2668_v16  ;;  %v1294_v25 = vmul.f32 %v2666_v15, %v2666_v15 }
 0x227   : > { %1108 = vadd.xlane.f32.xlu0 %v1106_v17  ;;  %v2676_v20 = vpop.f32.mrb[3].mxu0  ;;  %v2678_v21 = vpop.f32.mrb[3].mxu1  ;;  %v1107_v22 = vmul.f32 %v2674_v19, %v2674_v19  ;;  %v1073_v32 = vmul.f32 %v2672_v18, %v2672_v18 }
 0x228   : > { %v1323_v24 = vmul.f32 %v2678_v21, %v2678_v21  ;;  %v1295_v27 = vmul.f32 %v2676_v20, %v2676_v20 }
 0x229   : > { %1110 = vadd.xlane.f32.xlu1 %v1107_v22 }
 0x22b   : > { %1324 = vadd.xlane.f32.xlu0 %v1322_v23 }
 0x22d   : > { %1326 = vadd.xlane.f32.xlu1 %v1323_v24 }
 0x22f   : > { %1296 = vadd.xlane.f32.xlu0 %v1294_v25 }
 0x231   : > { %1298 = vadd.xlane.f32.xlu1 %v1295_v27 }
 0x233   : > { %1074 = vadd.xlane.f32.xlu0 %v1072_v31 }
 0x235   : > { %1076 = vadd.xlane.f32.xlu1 %v1073_v32 }
 0x237   : > { %1352 = vadd.xlane.f32.xlu0 %v1351_v33 }
 0x239   : > { %1143 = vadd.xlane.f32.xlu1 %v1142_v34 }
 0x264   : > { %v2707_v36 = vpop.f32.mrb[4].mxu0 }
 0x265   : > { %v2709_v37 = vpop.f32.mrb[5].mxu0 }
 0x266   : > { %v2711_v38 = vpop.f32.mrb[6].mxu0 }
 0x267   : > { %v1241_v39 = vpack.c.bf16 %v2711_v38, %v2707_v36  ;;  %v2715_v40 = vpop.f32.mrb[7].mxu0 }
 0x268   : > { %v1449_v41 = vpack.c.bf16 %v2715_v40, %v2709_v37 }
 0x2b4   : > { %v1109_v42 = vpop.xlane.xlu0 %1108 }
 0x2b5   : > { %2179 = vrsqrt.f32 %v1109_v42  ;;  %vm1114_vm3 = vcmp.eq.f32.partialorder %v1109_v42, inf  ;;  %vm1116_vm4 = vcmp.eq.f32.partialorder %v1109_v42, 0.0  ;;  %v1117_v52 = vand.u32 2147483648, %v1109_v42 }
 0x2b6   : > { %v1111_v43 = vpop.xlane.xlu1 %1110 }
 0x2b7   : > { %2181 = vrsqrt.f32 %v1111_v43  ;;  %vm1121_vm5 = vcmp.eq.f32.partialorder %v1111_v43, inf  ;;  %vm1123_vm6 = vcmp.eq.f32.partialorder %v1111_v43, 0.0  ;;  %v1124_v55 = vand.u32 2147483648, %v1111_v43 }
 0x2b8   : > { %v1325_v44 = vpop.xlane.xlu0 %1324 }
 0x2b9   : > { %2183 = vrsqrt.f32 %v1325_v44  ;;  %vm1330_vm7 = vcmp.eq.f32.partialorder %v1325_v44, inf  ;;  %vm1332_vm8 = vcmp.eq.f32.partialorder %v1325_v44, 0.0  ;;  %v1333_v58 = vand.u32 2147483648, %v1325_v44 }
 0x2ba   : > { %v1327_v45 = vpop.xlane.xlu1 %1326 }
 0x2bb   : > { %2185 = vrsqrt.f32 %v1327_v45  ;;  %vm1337_vm9 = vcmp.eq.f32.partialorder %v1327_v45, inf  ;;  %vm1339_vm10 = vcmp.eq.f32.partialorder %v1327_v45, 0.0  ;;  %v1340_v1 = vand.u32 2147483648, %v1327_v45 }
 0x2bc   : > { %v2719_v46 = vpop.xlane.xlu0 %1296 }
 0x2bd   : > { %2187 = vrsqrt.f32 %v2719_v46  ;;  %vm1302_vm11 = vcmp.eq.f32.partialorder %v2719_v46, inf  ;;  %vm1304_vm12 = vcmp.eq.f32.partialorder %v2719_v46, 0.0  ;;  %v1305_v11 = vand.u32 2147483648, %v2719_v46 }
 0x2be   : > { %v2727_v48 = vpop.xlane.xlu1 %1298 }
 0x2bf   : > { %v2180_v49 = vpop.eup %2179  ;;  %2189 = vrsqrt.f32 %v2727_v48  ;;  %vm1309_vm13 = vcmp.eq.f32.partialorder %v2727_v48, inf  ;;  %vm1311_vm14 = vcmp.eq.f32.partialorder %v2727_v48, 0.0  ;;  %v1312_v25 = vand.u32 2147483648, %v2727_v48 }
 0x2c0   : > { %v1113_v51 = vmul.f32 %v2180_v49, %v1109_v42  ;;  %v2734_v53 = vpop.xlane.xlu0 %1074 }
 0x2c1   : > { %v2182_v54 = vpop.eup %2181  ;;  %2191 = vrsqrt.f32 %v2734_v53  ;;  %vm1080_vm15 = vcmp.eq.f32.partialorder %v2734_v53, inf  ;;  %vm1082_vm0 = vcmp.eq.f32.partialorder %v2734_v53, 0.0  ;;  %v1083_v34 = vand.u32 2147483648, %v2734_v53 }
 0x2c2   : > { %v1115_v56 = vsel %vm1114_vm3, %v1109_v42, %v1113_v51  ;;  %v1120_v57 = vmul.f32 %v2182_v54, %v1111_v43  ;;  %v2737_v59 = vpop.xlane.xlu1 %1076 }
 0x2c3   : > { %v2184_v60 = vpop.eup %2183  ;;  %v1118_v61 = vsel %vm1116_vm4, %v1117_v52, %v1115_v56  ;;  %2193 = vrsqrt.f32 %v2737_v59  ;;  %vm1087_vm1 = vcmp.eq.f32.partialorder %v2737_v59, inf  ;;  %vm1089_vm3 = vcmp.eq.f32.partialorder %v2737_v59, 0.0 }
 0x2c4   : > { %v1126_v62 = vmax.f32 %v1118_v61, 1e-12  ;;  %v1122_v63 = vsel %vm1121_vm5, %v1111_v43, %v1120_v57  ;;  %v1329_v0 = vmul.f32 %v2184_v60, %v1325_v44  ;;  %v2741_v2 = vpop.xlane.xlu0 %1352 }
 0x2c5   : > { %v2186_v3 = vpop.eup %2185  ;;  %v1125_v4 = vsel %vm1123_vm6, %v1124_v55, %v1122_v63  ;;  %2195 = vrsqrt.f32 %v2741_v2  ;;  %vm1356_vm4 = vcmp.eq.f32.partialorder %v2741_v2, inf  ;;  %vm1358_vm5 = vcmp.eq.f32.partialorder %v2741_v2, 0.0 }
 0x2c6   : > { %2197 = vrcp.f32 %v1126_v62  ;;  %v1127_v5 = vmax.f32 %v1125_v4, 1e-12  ;;  %v1331_v6 = vsel %vm1330_vm7, %v1325_v44, %v1329_v0  ;;  %v1336_v7 = vmul.f32 %v2186_v3, %v1327_v45  ;;  %v2748_v8 = vpop.xlane.xlu1 %1143 }
 0x2c7   : > { %v2188_v9 = vpop.eup %2187  ;;  %v1334_v10 = vsel %vm1332_vm8, %v1333_v58, %v1331_v6  ;;  %2199 = vrsqrt.f32 %v2748_v8  ;;  %vm1147_vm6 = vcmp.eq.f32.partialorder %v2748_v8, inf  ;;  %vm1149_vm7 = vcmp.eq.f32.partialorder %v2748_v8, 0.0 }
 0x2c8   : > { %2201 = vrcp.f32 %v1127_v5  ;;  %v1342_v12 = vmax.f32 %v1334_v10, 1e-12  ;;  %v1338_v17 = vsel %vm1337_vm9, %v1327_v45, %v1336_v7  ;;  %v1301_v22 = vmul.f32 %v2188_v9, %v2719_v46 }
 0x2c9   : > { %v2190_v23 = vpop.eup %2189  ;;  %v1341_v24 = vsel %vm1339_vm10, %v1340_v1, %v1338_v17  ;;  %v1150_v63 = vand.u32 2147483648, %v2748_v8  ;;  %v1069_v1 = vld [vmem:[%s3006_s5] sm:$0x1]  ;;  %vm1209_vm8 = vcmask 130048  }
 0x2ca   : > { %2203 = vrcp.f32 %v1342_v12  ;;  %v1343_v27 = vmax.f32 %v1341_v24, 1e-12  ;;  %v1303_v28 = vsel %vm1302_vm11, %v2719_v46, %v1301_v22  ;;  %v1308_v31 = vmul.f32 %v2190_v23, %v2727_v48 }
 0x2cb   : > { %v2192_v32 = vpop.eup %2191  ;;  %v1306_v33 = vsel %vm1304_vm12, %v1305_v11, %v1303_v28  ;;  %v1090_v46 = vand.u32 2147483648, %v2737_v59  ;;  %v1071_v11 = vmul.f32 8.0, %v1069_v1 }
 0x2cc   : > { %2205 = vrcp.f32 %v1343_v27  ;;  %v1314_v42 = vmax.f32 %v1306_v33, 1e-12  ;;  %v1310_v43 = vsel %vm1309_vm13, %v2727_v48, %v1308_v31  ;;  %v1079_v44 = vmul.f32 %v2192_v32, %v2734_v53 }
 0x2cd   : > { %v2194_v45 = vpop.eup %2193  ;;  %v1313_v49 = vsel %vm1311_vm14, %v1312_v25, %v1310_v43  ;;  %v1359_v48 = vand.u32 2147483648, %v2741_v2  ;;  %v1102_v31 = vrot.slane %v1071_v11, %v2551_v29 }
 0x2ce   : > { %2207 = vrcp.f32 %v1314_v42  ;;  %v1315_v51 = vmax.f32 %v1313_v49, 1e-12  ;;  %v1081_v52 = vsel %vm1080_vm15, %v2734_v53, %v1079_v44  ;;  %v1086_v54 = vmul.f32 %v2194_v45, %v2737_v59 }
 0x2cf   : > { %v2196_v55 = vpop.eup %2195  ;;  %v1084_v56 = vsel %vm1082_vm0, %v1083_v34, %v1081_v52 }
 0x2d0   : > { %v2198_v57 = vpop.eup %2197  ;;  %2209 = vrcp.f32 %v1315_v51  ;;  %v1092_v58 = vmax.f32 %v1084_v56, 1e-12  ;;  %v1088_v60 = vsel %vm1087_vm1, %v2737_v59, %v1086_v54  ;;  %v1355_v61 = vmul.f32 %v2196_v55, %v2741_v2 }
 0x2d1   : > { %v2200_v62 = vpop.eup %2199  ;;  %v1091_v53 = vsel %vm1089_vm3, %v1090_v46, %v1088_v60  ;;  %v1129_v0 = vmul.f32 %v2198_v57, %v2664_v14 }
 0x2d2   : > { %v2202_v3 = vpop.eup %2201  ;;  %2211 = vrcp.f32 %v1092_v58  ;;  %v1093_v4 = vmax.f32 %v1091_v53, 1e-12  ;;  %v1357_v5 = vsel %vm1356_vm4, %v2741_v2, %v1355_v61  ;;  %v1146_v59 = vmul.f32 %v2200_v62, %v2748_v8 }
 0x2d3   : > { %v1360_v6 = vsel %vm1358_vm5, %v1359_v48, %v1357_v5  ;;  %v1131_v7 = vmul.f32 %v2202_v3, %v2674_v19  ;;  %v1138_v17 = vmul.f32 %v2732_v50, %v1129_v0 }
 0x2d4   : > { %v2204_v9 = vpop.eup %2203  ;;  %2213 = vrcp.f32 %v1093_v4  ;;  %v1361_v14 = vmax.f32 %v1360_v6, 1e-12  ;;  %v1148_v10 = vsel %vm1147_vm6, %v2748_v8, %v1146_v59 }
 0x2d5   : > { %v1151_v12 = vsel %vm1149_vm7, %v1150_v63, %v1148_v10  ;;  %v1139_v22 = vmul.f32 %v2732_v50, %v1131_v7  ;;  %v1345_v2 = vmul.f32 %v2204_v9, %v2668_v16 }
 0x2d6   : > { %v2206_v23 = vpop.eup %2205  ;;  %2215 = vrcp.f32 %v1361_v14  ;;  %v1152_v19 = vmax.f32 %v1151_v12, 1e-12 }
 0x2d7   : > { %v1157_v24 = vpack.c.bf16 %v1139_v22, %v1138_v17  ;;  %v1347_v25 = vmul.f32 %v2206_v23, %v2678_v21  ;;  %v1348_v28 = vmul.f32 %v1345_v2, %v2732_v50 }
 0x2d8   : > { %v2208_v27 = vpop.eup %2207  ;;  %2217 = vrcp.f32 %v1152_v19 }
 0x2d9   : > { %1950 = vmatpush3.bf16.xpose.msra.mxu0 %v1157_v24  ;;  %v1349_v8 = vmul.f32 %v1347_v25, %v2732_v50  ;;  %v1317_v32 = vmul.f32 %v2208_v27, %v2666_v15 }
 0x2da   : > { %v2210_v33 = vpop.eup %2209  ;;  %1955 = vmatprep.subr.bf16.mxu0 %v2255_v35 }
 0x2db   : > { %v1366_v16 = vpack.c.bf16 %v1349_v8, %v1348_v28  ;;  %v1319_v34 = vmul.f32 %v2210_v33, %v2676_v20  ;;  %v1320_v21 = vmul.f32 %v1317_v32, %v1102_v31 }
 0x2dc   : > { %v2212_v42 = vpop.eup %2211 }
 0x2dd   : > { %1962 = vmatpush3.bf16.xpose.msra.mxu1 %v1366_v16  ;;  %v1321_v43 = vmul.f32 %v1319_v34, %v1102_v31  ;;  %v1095_v44 = vmul.f32 %v2212_v42, %v2662_v13 }
 0x2de   : > { %v2214_v45 = vpop.eup %2213  ;;  %1967 = vmatprep.subr.bf16.mxu1 %v2255_v35 }
 0x2df   : > { %v1365_v49 = vpack.c.bf16 %v1321_v43, %v1320_v21  ;;  %v1097_v46 = vmul.f32 %v2214_v45, %v2672_v18  ;;  %v1104_v15 = vmul.f32 %v1102_v31, %v1095_v44  ;;  %v2127_v45 = vld [vmem:[%s3008_s7] ss:$8 sps:$4 sm:$0xff]  }
 0x2e0   : > { %v2216_v51 = vpop.eup %2215 }
 0x2e1   : > { %v1105_v52 = vmul.f32 %v1102_v31, %v1097_v46  ;;  %v1363_v54 = vmul.f32 %v2216_v51, %v2691_v26  ;;  %v2132_v46 = vld [vmem:[%s3008_s7 + $0x14] ss:$8 sps:$4 sm:$0xff]   ;;  %v2130_v51 = vld [vmem:[%s3008_s7 + $0x10] ss:$8 sps:$4 sm:$0xff]  }
 0x2e2   : > { %v2218_v55 = vpop.eup %2217 }
 0x2e3   : > { %v1156_v56 = vpack.c.bf16 %v1105_v52, %v1104_v15  ;;  %v1154_v20 = vmul.f32 %v2218_v55, %v2691_v26  ;;  %v1364_v48 = vmul.f32 %v1363_v54, %v2732_v50  ;;  %v2138_v54 = vld [vmem:[%s3008_s7 + $0x34] ss:$8 sps:$4 sm:$0xff]   ;;  %v2136_v55 = vld [vmem:[%s3008_s7 + $0x30] ss:$8 sps:$4 sm:$0xff]  }
 0x2e4   : > { %1964 = vmatmul.mubr.bf16.vlgmr.msra.gmra.mrb[4].mxu1 %v1365_v49  ;;  %v2129_v49 = vld [vmem:[%s3008_s7 + $0x4] ss:$8 sps:$4 sm:$0xff]  }
 0x2e5   : > { %1952 = vmatmul.mubr.bf16.vlgmr.msra.gmra.mrb[8].mxu0 %v1156_v56  ;;  %1968 = vmatpush3.bf16.msra.mxu1 %v1449_v41  ;;  %v1155_v13 = vmul.f32 %v1154_v20, %v2724_v47  ;;  %v1411_v37 = vrot.slane %v1364_v48, %v2553_v30  ;;  %v2141_v56 = vld [vmem:[%s3008_s7 + $0x44] ss:$8 sps:$4 sm:$0xff]   ;;  %v2139_v20 = vld [vmem:[%s3008_s7 + $0x40] ss:$8 sps:$4 sm:$0xff]   ;;  %v2142_v48 = vld [vmem:[%s3008_s7 + $0x50] ss:$8 sps:$4 sm:$0xff]  }
 0x2e6   : > { %1956 = vmatpush3.bf16.msra.mxu0 %v1241_v39  ;;  %1969 = vmatprep.mubr.msk.bf16.mxu1 %vm2256_vm2, %v2255_v35 }
 0x2e7   : > { %v1202_v18 = vrot.slane %v1155_v13, %v2551_v29  ;;  %1957 = vmatprep.mubr.msk.bf16.mxu0 %vm2256_vm2, %v2255_v35  ;;  %v1413_v40 = vmul.f32 %v1411_v37, %v1321_v43  ;;  %v1412_v41 = vmul.f32 %v1411_v37, %v1320_v21  ;;  %1696 = vmatprep.subr.bf16.mxu1 %v2129_v49  ;;  %v2144_v13 = vld [vmem:[%s3008_s7 + $0x54] ss:$8 sps:$4 sm:$0xff]   ;;  %v2148_v37 = vld [vmem:[%s3008_s7 + $0x70] ss:$8 sps:$4 sm:$0xff]  }
 0x2e9   : > { %v1204_v26 = vmul.f32 %v1202_v18, %v1105_v52  ;;  %v1203_v57 = vmul.f32 %v1202_v18, %v1104_v15  ;;  %v2135_v15 = vld [vmem:[%s3008_s7 + $0x24] ss:$8 sps:$4 sm:$0xff]   ;;  %v2133_v52 = vld [vmem:[%s3008_s7 + $0x20] ss:$8 sps:$4 sm:$0xff]  }
 0x2ea   : > { %v2147_v18 = vld [vmem:[%s3008_s7 + $0x64] ss:$8 sps:$4 sm:$0xff]  }
 0x2eb   : > { %1207 = vadd.xlane.f32.xlu1 %v1204_v26  ;;  %1205 = vadd.xlane.f32.xlu0 %v1203_v57  ;;  %v2145_v26 = vld [vmem:[%s3008_s7 + $0x60] ss:$8 sps:$4 sm:$0xff]   ;;  %v2150_v57 = vld [vmem:[%s3008_s7 + $0x74] ss:$8 sps:$4 sm:$0xff]  }
 0x2ef   : > { %1416 = vadd.xlane.f32.xlu1 %v1413_v40  ;;  %1414 = vadd.xlane.f32.xlu0 %v1412_v41  ;;  %v2153_v40 = vld [vmem:[%s3008_s7 + $0x84] ss:$8 sps:$4 sm:$0xff]   ;;  %v2151_v41 = vld [vmem:[%s3008_s7 + $0x80] ss:$8 sps:$4 sm:$0xff]  }
 0x378   : > { %v2844_v0 = vpop.xlane.xlu0 %1205  ;;  %v2846_v1 = vpop.xlane.xlu1 %1207 }
 0x37c   : > { %v2848_v3 = vpop.xlane.xlu0 %1414  ;;  %v2850_v4 = vpop.xlane.xlu1 %1416 }
 0x3b7   : > { %v1401_v36 = vpop.f32.mrb[4].mxu1 }
 0x3b8   : > { %v1192_v38 = vpop.f32.mrb[8].mxu0  ;;  %v1965_v39 = vpop.f32.mrb[5].mxu1  ;;  %v1418_v47 = vsel %vm1209_vm8, %v1401_v36, -inf }
 0x3b9   : > { %v1404_v50 = vpop.f32.mrb[6].mxu1  ;;  %1419 = vmax.xlane.f32.xlu0 %v1418_v47  ;;  %v1953_v58 = vpop.f32.mrb[9].mxu0  ;;  %v1210_v53 = vsel %vm1209_vm8, %v1192_v38, -inf  ;;  %v2159_v39 = vld [vmem:[%s3008_s7 + $0xa4] ss:$8 sps:$4 sm:$0xff]  }
 0x3ba   : > { %v1195_v35 = vpop.f32.mrb[10].mxu0  ;;  %v1966_v60 = vpop.f32.mrb[7].mxu1  ;;  %v1421_v61 = vsel %vm1209_vm8, %v1404_v50, -inf  ;;  %v2157_v47 = vld [vmem:[%s3008_s7 + $0xa0] ss:$8 sps:$4 sm:$0xff]  }
 0x3bb   : > { %1422 = vmax.xlane.f32.xlu1 %v1421_v61  ;;  %v1954_v62 = vpop.f32.mrb[11].mxu0  ;;  %v1213_v63 = vsel %vm1209_vm8, %v1195_v35, -inf  ;;  %v2160_v58 = vld [vmem:[%s3008_s7 + $0xb0] ss:$8 sps:$4 sm:$0xff]   ;;  %v2163_v60 = vld [vmem:[%s3008_s7 + $0xc0] ss:$8 sps:$4 sm:$0xff]  }
 0x3bc   : > { %v2168_v61 = vld [vmem:[%s3008_s7 + $0xd4] ss:$8 sps:$4 sm:$0xff]   ;;  %v2166_v62 = vld [vmem:[%s3008_s7 + $0xd0] ss:$8 sps:$4 sm:$0xff]  }
 0x3bd   : > { %1211 = vmax.xlane.f32.xlu0 %v1210_v53  ;;  %v2171_v53 = vld [vmem:[%s3008_s7 + $0xe4] ss:$8 sps:$4 sm:$0xff]  }
 0x3bf   : > { %1214 = vmax.xlane.f32.xlu1 %v1213_v63  ;;  %v2169_v63 = vld [vmem:[%s3008_s7 + $0xe0] ss:$8 sps:$4 sm:$0xff]  }
 0x446   : > { %v1420_v5 = vpop.xlane.xlu0 %1419 }
 0x447   : > { %v2853_v59 = vmax.f32 %v1420_v5, %v2848_v3  ;;  %v2174_v5 = vld [vmem:[%s3008_s7 + $0xf4] ss:$8 sps:$4 sm:$0xff]  }
 0x448   : > { %v1423_v6 = vpop.xlane.xlu1 %1422 }
 0x449   : > { %v1426_v7 = vsub.f32 %v1401_v36, %v2853_v59  ;;  %v1432_v9 = vsub.f32 %v2848_v3, %v2853_v59  ;;  %v2859_v14 = vmax.f32 %v1423_v6, %v2850_v4  ;;  %v2156_v36 = vld [vmem:[%s3008_s7 + $0x94] ss:$8 sps:$4 sm:$0xff]   ;;  %v2172_v6 = vld [vmem:[%s3008_s7 + $0xf0] ss:$8 sps:$4 sm:$0xff]  }
 0x44a   : > { %v1212_v10 = vpop.xlane.xlu0 %1211 }
 0x44b   : > { %v1428_v11 = vmul.f32 1.442695, %v1426_v7  ;;  %v1427_v12 = vsub.f32 %v1404_v50, %v2859_v14  ;;  %v1433_v17 = vsub.f32 %v2850_v4, %v2859_v14  ;;  %v2865_v22 = vmax.f32 %v1212_v10, %v2844_v0  ;;  %v2162_v50 = vld [vmem:[%s3008_s7 + $0xb4] ss:$8 sps:$4 sm:$0xff]  }
 0x44c   : > { %v1215_v2 = vpop.xlane.xlu1 %1214  ;;  %v1434_v7 = vmul.f32 1.442695, %v1432_v9 }
 0x44d   : > { %2219 = vpow2.f32 %v1428_v11  ;;  %v1430_v23 = vmul.f32 1.442695, %v1427_v12  ;;  %v2868_v19 = vmax.f32 %v1215_v2, %v2846_v1  ;;  %v1218_v24 = vsub.f32 %v1192_v38, %v2865_v22  ;;  %v2154_v38 = vld [vmem:[%s3008_s7 + $0x90] ss:$8 sps:$4 sm:$0xff]  }
 0x44e   : > { %v1224_v10 = vsub.f32 %v2844_v0, %v2865_v22  ;;  %v1436_v11 = vmul.f32 1.442695, %v1433_v17 }
 0x44f   : > { %2221 = vpow2.f32 %v1430_v23  ;;  %v1219_v25 = vsub.f32 %v1195_v35, %v2868_v19  ;;  %v1220_v27 = vmul.f32 1.442695, %v1218_v24  ;;  %v2165_v35 = vld [vmem:[%s3008_s7 + $0xc4] ss:$8 sps:$4 sm:$0xff]   ;;  %v1225_v12 = vsub.f32 %v2846_v1, %v2868_v19  ;;  %v1068_v1 = vld [vmem:[%s3005_s4] sm:$0x3] }
 0x450   : > { %v1226_v2 = vmul.f32 1.442695, %v1224_v10 }
 0x451   : > { %v1222_v28 = vmul.f32 1.442695, %v1219_v25  ;;  %2223 = vpow2.f32 %v1220_v27  ;;  %v1228_v23 = vmul.f32 1.442695, %v1225_v12 }
 0x453   : > { %2225 = vpow2.f32 %v1222_v28  ;;  %v1453_v28 = vrot.slane %v1068_v1, %v2553_v30 }
 0x454   : > { %2227 = vpow2.f32 %v1434_v7 }
 0x455   : > { %2229 = vpow2.f32 %v1436_v11 }
 0x456   : > { %2231 = vpow2.f32 %v1226_v2 }
 0x457   : > { %v2220_v8 = vpop.eup %2219  ;;  %2233 = vpow2.f32 %v1228_v23 }
 0x458   : > { %v1438_v31 = vsel %vm1209_vm8, %v2220_v8, 0.0 }
 0x459   : > { %v2222_v32 = vpop.eup %2221  ;;  %1439 = vadd.xlane.f32.xlu0 %v1438_v31 }
 0x45a   : > { %v1441_v33 = vsel %vm1209_vm8, %v2222_v32, 0.0  ;;  %v1448_v16 = vpack.c.bf16 %v2222_v32, %v2220_v8  ;;  %v1245_v32 = vrot.slane %v1068_v1, %v2551_v29 }
 0x45b   : > { %1442 = vadd.xlane.f32.xlu1 %v1441_v33  ;;  %v2224_v34 = vpop.eup %2223 }
 0x45c   : > { %1970 = vmatmul.mubr.msk.bf16.vlgmr.msra.gmra.mrb[8].mxu1 %vm1209_vm8, %v1448_v16  ;;  %v1230_v42 = vsel %vm1209_vm8, %v2224_v34, 0.0 }
 0x45d   : > { %v2226_v21 = vpop.eup %2225  ;;  %1231 = vadd.xlane.f32.xlu0 %v1230_v42  ;;  %1697 = vmatpush1.bf16.msra.mxu1 %v2127_v45 }
 0x45e   : > { %v1233_v43 = vsel %vm1209_vm8, %v2226_v21, 0.0  ;;  %v1240_v44 = vpack.c.bf16 %v2226_v21, %v2224_v34  ;;  %1698 = vmatprep.subr.bf16.mxu1 %v2132_v46  ;;  %v2228_v3 = vpop.eup %2227 }
 0x45f   : > { %1234 = vadd.xlane.f32.xlu1 %v1233_v43  ;;  %v2230_v9 = vpop.eup %2229  ;;  %v1454_v8 = vmul.f32 %v2228_v3, %v1453_v28 }
 0x460   : > { %1958 = vmatmul.mubr.msk.bf16.vlgmr.msra.gmra.mrb[12].mxu0 %vm1209_vm8, %v1240_v44  ;;  %v2232_v22 = vpop.eup %2231  ;;  %v1455_v34 = vmul.f32 %v2230_v9, %v1453_v28 }
 0x461   : > { %1699 = vmatpush1.bf16.msra.mxu1 %v2130_v51  ;;  %v2234_v17 = vpop.eup %2233  ;;  %v1246_v46 = vmul.f32 %v2232_v22, %v1245_v32 }
 0x462   : > { %1700 = vmatprep.subr.bf16.mxu1 %v2135_v15 }
 0x465   : > { %1701 = vmatpush1.bf16.msra.mxu1 %v2133_v52 }
 0x466   : > { %1702 = vmatprep.subr.bf16.mxu1 %v2138_v54  ;;  %v1247_v54 = vmul.f32 %v2234_v17, %v1245_v32 }
 0x469   : > { %1703 = vmatpush1.bf16.msra.mxu1 %v2136_v55 }
 0x46a   : > { %1704 = vmatprep.subr.bf16.mxu1 %v2141_v56 }
 0x46d   : > { %1705 = vmatpush1.bf16.msra.mxu1 %v2139_v20 }
 0x46e   : > { %1706 = vmatprep.subr.bf16.mxu1 %v2144_v13 }
 0x471   : > { %1707 = vmatpush1.bf16.msra.mxu1 %v2142_v48 }
 0x472   : > { %1708 = vmatprep.subr.bf16.mxu1 %v2147_v18 }
 0x475   : > { %1709 = vmatpush1.bf16.msra.mxu1 %v2145_v26 }
 0x476   : > { %1710 = vmatprep.subr.bf16.mxu1 %v2150_v57 }
 0x479   : > { %1711 = vmatpush1.bf16.msra.mxu1 %v2148_v37 }
 0x47a   : > { %1712 = vmatprep.subr.bf16.mxu1 %v2153_v40  ;;  %v2243_v40 = vld [vmem:[%s2318_s10] sm:$0xff] }
 0x47d   : > { %1713 = vmatpush1.bf16.msra.mxu1 %v2151_v41 }
 0x47e   : > { %1714 = vmatprep.subr.bf16.mxu1 %v2156_v36 }
 0x481   : > { %1715 = vmatpush1.bf16.msra.mxu1 %v2154_v38  ;;  %v2244_v38 = vld [vmem:[%s2318_s10 + $0x8] sm:$0xff] }
 0x482   : > { %1716 = vmatprep.subr.bf16.mxu1 %v2159_v39 }
 0x485   : > { %1717 = vmatpush1.bf16.msra.mxu1 %v2157_v47 }
 0x486   : > { %1718 = vmatprep.subr.bf16.mxu1 %v2162_v50  ;;  %v2245_v50 = vld [vmem:[%s2318_s10 + $0x10] sm:$0xff] }
 0x489   : > { %1719 = vmatpush1.bf16.msra.mxu1 %v2160_v58 }
 0x48a   : > { %1720 = vmatprep.subr.bf16.mxu1 %v2165_v35 }
 0x48d   : > { %1721 = vmatpush1.bf16.msra.mxu1 %v2163_v60  ;;  %v2246_v60 = vld [vmem:[%s2318_s10 + $0x18] sm:$0xff] }
 0x48e   : > { %1722 = vmatprep.subr.bf16.mxu1 %v2168_v61 }
 0x491   : > { %1723 = vmatpush1.bf16.msra.mxu1 %v2166_v62 }
 0x492   : > { %1724 = vmatprep.subr.bf16.mxu1 %v2171_v53 }
 0x495   : > { %1725 = vmatpush1.bf16.msra.mxu1 %v2169_v63 }
 0x496   : > { %1726 = vmatprep.subr.bf16.mxu1 %v2174_v5 }
 0x499   : > { %1727 = vmatpush1.bf16.msra.mxu1 %v2172_v6 }
 0x4e6   : > { %v1440_v24 = vpop.xlane.xlu0 %1439 }
 0x4e7   : > { %v1444_v59 = vadd.f32 %v2228_v3, %v1440_v24 }
 0x4e8   : > { %v1443_v25 = vpop.xlane.xlu1 %1442 }
 0x4e9   : > { %v1445_v27 = vadd.f32 %v2230_v9, %v1443_v25  ;;  %2235 = vrcp.f32 %v1444_v59 }
 0x4ea   : > { %v1232_v0 = vpop.xlane.xlu0 %1231 }
 0x4eb   : > { %v1236_v14 = vadd.f32 %v2232_v22, %v1232_v0  ;;  %2237 = vrcp.f32 %v1445_v27 }
 0x4ec   : > { %v1235_v4 = vpop.xlane.xlu1 %1234 }
 0x4ed   : > { %v1237_v19 = vadd.f32 %v2234_v17, %v1235_v4  ;;  %2239 = vrcp.f32 %v1236_v14 }
 0x4ef   : > { %2241 = vrcp.f32 %v1237_v19 }
 0x4f3   : > { %v2236_v42 = vpop.eup %2235 }
 0x4f5   : > { %v2238_v49 = vpop.eup %2237 }
 0x4f7   : > { %v2240_v55 = vpop.eup %2239 }
 0x4f9   : > { %v2242_v18 = vpop.eup %2241 }
 0x52f   : > { %v1493_v31 = vpop.f32.mrb[8].mxu1 }
 0x530   : > { %v1494_v33 = vadd.f32 %v1493_v31, %v1454_v8  ;;  %v1971_v16 = vpop.f32.mrb[9].mxu1 }
 0x531   : > { %v1496_v21 = vpop.f32.mrb[10].mxu1 }
 0x532   : > { %v1500_v43 = vmul.f32 %v2236_v42, %v1494_v33  ;;  %v1497_v44 = vadd.f32 %v1496_v21, %v1455_v34  ;;  %v1972_v45 = vpop.f32.mrb[11].mxu1 }
 0x533   : > { %v1285_v15 = vpop.f32.mrb[12].mxu0 }
 0x534   : > { %v1501_v51 = vmul.f32 %v2238_v49, %v1497_v44  ;;  %v1286_v30 = vadd.f32 %v1285_v15, %v1246_v46  ;;  %v1959_v52 = vpop.f32.mrb[13].mxu0 }
 0x535   : > { %v1288_v29 = vpop.f32.mrb[14].mxu0 }
 0x536   : > { %v1503_v56 = vpack.c.bf16 %v1501_v51, %v1500_v43  ;;  %v1292_v20 = vmul.f32 %v2240_v55, %v1286_v30  ;;  %v1289_v13 = vadd.f32 %v1288_v29, %v1247_v54  ;;  %v1960_v48 = vpop.f32.mrb[15].mxu0 }
 0x538   : > { %1728 = vmatprep.mubr.bf16.mxu1 %v1503_v56  ;;  %v1293_v26 = vmul.f32 %v2242_v18, %v1289_v13 }
 0x53a   : > { %v1502_v57 = vpack.c.bf16 %v1293_v26, %v1292_v20 }
 0x53c   : > { %1729 = vmatmul.mubr.bf16.vlgmr.msra.gmra.mrb[12].mxu1 %v1502_v57 }
 0x60f   : > { %v1730_v37 = vpop.f32.mrb[12].mxu1 }
 0x610   : > { %v1731_v41 = vadd.f32 %v2243_v40, %v1730_v37  ;;  %v1732_v36 = vpop.f32.mrb[13].mxu1 }
 0x611   : > { %v1733_v39 = vadd.f32 %v2244_v38, %v1732_v36  ;;  %v1734_v47 = vpop.f32.mrb[14].mxu1 }
 0x612   : > { %1739 = vst [vmem:[%s305_s30] sm:$0xff] %v1731_v41  ;;  %v1735_v58 = vadd.f32 %v2245_v50, %v1734_v47  ;;  %v1736_v35 = vpop.f32.mrb[15].mxu1 }
 0x613   : > { %1740 = vst [vmem:[%s305_s30 + $0x8] sm:$0xff] %v1733_v39  ;;  %v1737_v61 = vadd.f32 %v2246_v60, %v1736_v35 }
 0x614   : > { %1741 = vst [vmem:[%s305_s30 + $0x10] sm:$0xff] %v1735_v58 }
 0x615   : > { %1742 = vst [vmem:[%s305_s30 + $0x18] sm:$0xff] %v1737_v61 }
 0x616 PF: > { %s18_s27 = sadd.s32 1, %s2253_s27  }
 0x617   : > { %p15_p4 = scmp.ge.s32.totalorder %s18_s27, 4  }
 0x619   :  { %17 = sbr.rel (!%p15_p4) target bundleno = 1 (0x1), region = 82 }

// kernel: transformer_blocks_forward.13
= control target key start
LH: loop header
LB: loop body
LE: loop exit
PB: predicated region body
PF: predicated region fallthrough
CT: control target
= control target key end

     0   :  { %7 = vsyncpa [#allocation3], 0  ;;  %s531_s0 = inlined_call_operand.vmem [shape: f32[32,256], index: 0, kind: input, shape index: {}]   ;;  %s532_s1 = inlined_call_operand.vmem [shape: f32[1,256], index: 1, kind: input, shape index: {}]   ;;  %s533_s2 = inlined_call_operand.hbm [shape: f32[32,256], index: 2, kind: output, shape index: {}]  }
   0x1   :  { %9 = vsyncpa [#allocation3 + $0x1], 0  ;;  %s426_s9 = smov 0   ;;  %s428_s10 = smov 0  }
   0x2   :  { %s430_s11 = smov 0   ;;  %s432_s12 = smov 0  }
   0x3 LB: > { %s447_s13 = sadd.s32 4294967295, %s406_s12   ;;  %s282_s14 = sadd.s32 4294967294, %s406_s12   ;;  %s406_s12 = sphi %s432_s12, %s539_s12   ;;  %s402_s11 = sphi %s430_s11, %s538_s11   ;;  %s398_s10 = sphi %s428_s10, %s537_s10   ;;  %s394_s9 = sphi %s426_s9, %s536_s9  }
   0x4   : > { %s451_s15 = sadd.s32 1, %s406_s12   ;;  %s69_s16 = sadd.s32 1, %s402_s11 }
   0x5   : > { %s66_s17 = ssub.s32 %s406_s12, %s451_s15  ;;  %p79_p0 = scmp.ne.s32.totalorder %s402_s11, %s398_s10 }
   0x6   : > { %p67_p1 = scmp.eq.s32.totalorder %s66_s17, 0  ;;  %p80_p2 = scmp.eq.s32.totalorder %s447_s13, 1 }
   0x7   : > { %p85_p3 = scmp.ne.s32.totalorder %s398_s10, %s394_s9  ;;  %p86_p4 = scmp.eq.s32.totalorder %s282_s14, 1 }
   0x8   : > { %s462_s18 = scalar_select %p67_p1, %s402_s11, %s69_s16  }
   0x9   : > { %p464_p5 = por %p80_p2, %p79_p0  ;;  %p468_p6 = por %p86_p4, %p85_p3 }
   0xa   : > { %p285_p7 = scmp.ge.s32.totalorder %s406_s12, 1  ;;  %p117_p8 = scmp.lt.s32.totalorder %s406_s12, 3 }
   0xc   : > { %p118_p9 = pnand %p285_p7, %p117_p8 }
   0xd   : > { %s287_s21 = sshll.u32 (!%p118_p9), %s447_s13, 1  ;;  %v187_v22 = vlaneseq (!%p118_p9)  ;;  %v152_v30 = vld [vmem:[%s532_s1] sm:$0x3] (!%p118_p9)  ;;  %s137_s28 = sand.u32 (!%p118_p9), 1, %s398_s10  }
   0xe   : > { %121 = sbr.rel (%p118_p9) target bundleno = 357 (0x165), region = 28  ;;  %p141_p10 = scmp.lt.s32.totalorder (!%p118_p9), %s287_s21, 3 }
   0xf   : > { %v188_v26 = vshrl.u32 (!%p118_p9), %v187_v22, 7  ;;  %s286_s29 = sshll.u32 (!%p118_p9), %s137_s28, 5  ;;  %s298_s30 = sshll.u32 (!%p118_p9), %s447_s13, 9 }
  0x10   : > { %s139_s3 = scalar_lea.vmem (!%p118_p9), [#allocation2], %s286_s29  ;;  %s486_s7 = scalar_lea.hbm (!%p118_p9), %s533_s2, %s298_s30 }
  0x11   : > { %v189_v28 = vsub.s32 (!%p118_p9), 0, %v188_v26  ;;  %v193_v29 = vsub.s32 (!%p118_p9), 1, %v188_v26  ;;  %s220_s4 = sshll.u32 (!%p118_p9), %s139_s3, 4  ;;  %s490_s8 = scalar_lea.sflag (!%p118_p9), [#allocation3], %s137_s28  ;;  %s488_s4 = int_to_ptr.vmem [resolvable:$true] %s220_s4 }
  0x12   : > { %s344_s13 = scalar_lea.vmem (!%p118_p9), %s488_s4, 512  ;;  %s408_s14 = smov (!%p118_p9), [#allocation2]  }
  0x13   : > { %v190_v31 = vrot.slane (!%p118_p9), %v152_v30, %v189_v28  ;;  %v194_v32 = vrot.slane (!%p118_p9), %v152_v30, %v193_v29  ;;  %p345_p11 = scmp.ne.s32.totalorder (!%p118_p9), %s488_s4, %s344_s13  ;;  %s348_s16 = sshll.u32 (!%p118_p9), %s408_s14, 4  ;;  %s349_s16 = int_to_ptr.vmem [resolvable:$false] %s348_s16 }
  0x14   : > { %s350_s17 = scalar_lea.vmem (!%p118_p9), %s349_s16, 1024  ;;  %p351_p0 = scmp.lt.s32.totalorder (!%p118_p9), %s488_s4, %s349_s16 }
  0x15   : > { %s541_s21 = smov (!%p141_p10, %s287_s21), 3  ;;  %p346_p12 = pnand %p345_p11, %p464_p5 }
  0x16   : > { %s296_s22 = sshll.u32 %s541_s21, 4  ;;  %p352_p1 = scmp.lt.s32.totalorder %s350_s17, %s344_s13 }
  0x17   : > { %s145_s25 = scalar_lea.vmem %s531_s0, %s296_s22  ;;  %p347_p13 = pneg %p346_p12 }
  0x18   : > { %v148_v0 = vld [vmem:[%s145_s25] sm:$0xff]  ;;  %v149_v1 = vld [vmem:[%s145_s25 + $0x8] sm:$0xff]  ;;  %v150_v2 = vld [vmem:[%s145_s25 + $0x10] sm:$0xff]  ;;  %p353_p2 = por %p352_p1, %p351_p0 }
  0x19   : > { %v153_v3 = vadd.f32 %v149_v1, %v148_v0  ;;  %v151_v4 = vld [vmem:[%s145_s25 + $0x18] sm:$0xff] }
  0x1a   : > { %v156_v5 = vadd.f32 %v151_v4, %v150_v2  ;;  %p354_p3 = pnand %p353_p2, %p347_p13 }
  0x1b   : > { %154 = vadd.xlane.f32.xlu0 %v153_v3 }
  0x1f   : > { %157 = vadd.xlane.f32.xlu0 %v156_v5 }
  0xa8   : > { %v155_v6 = vpop.xlane.xlu0 %154 }
  0xa9   : > { %v160_v7 = vmul.f32 0.00390625, %v155_v6 }
  0xab   : > { %v162_v8 = vsub.f32 %v148_v0, %v160_v7  ;;  %v163_v9 = vsub.f32 %v149_v1, %v160_v7 }
  0xac   : > { %v158_v10 = vpop.xlane.xlu0 %157 }
  0xad   : > { %v161_v11 = vmul.f32 0.00390625, %v158_v10  ;;  %v166_v12 = vmul.f32 %v162_v8, %v162_v8  ;;  %v167_v13 = vmul.f32 %v163_v9, %v163_v9 }
  0xaf   : > { %v164_v14 = vsub.f32 %v150_v2, %v161_v11  ;;  %v165_v15 = vsub.f32 %v151_v4, %v161_v11  ;;  %v170_v16 = vadd.f32 %v167_v13, %v166_v12 }
  0xb1   : > { %171 = vadd.xlane.f32.xlu1 %v170_v16  ;;  %v168_v17 = vmul.f32 %v164_v14, %v164_v14  ;;  %v169_v18 = vmul.f32 %v165_v15, %v165_v15 }
  0xb3   : > { %v173_v19 = vadd.f32 %v169_v18, %v168_v17 }
  0xb5   : > { %174 = vadd.xlane.f32.xlu1 %v173_v19 }
 0x13e   : > { %v172_v20 = vpop.xlane.xlu1 %171 }
 0x13f   : > { %v176_v21 = vmul.f32 0.00390625, %v172_v20 }
 0x141   : > { %v178_v23 = vadd.f32 1e-05, %v176_v21 }
 0x142   : > { %v175_v24 = vpop.xlane.xlu1 %174 }
 0x143   : > { %340 = vrsqrt.f32 %v178_v23  ;;  %v177_v25 = vmul.f32 0.00390625, %v175_v24 }
 0x145   : > { %v179_v27 = vadd.f32 1e-05, %v177_v25 }
 0x147   : > { %342 = vrsqrt.f32 %v179_v27 }
 0x14d   : > { %v341_v33 = vpop.eup %340 }
 0x14e   : > { %v182_v34 = vmul.f32 %v341_v33, %v162_v8  ;;  %v183_v35 = vmul.f32 %v341_v33, %v163_v9 }
 0x150   : > { %v197_v36 = vmul.f32 %v190_v31, %v182_v34  ;;  %v198_v37 = vmul.f32 %v194_v32, %v183_v35 }
 0x151   : > { %v343_v38 = vpop.eup %342 }
 0x152   : > { %201 = vst [vmem:[%s139_s3] sm:$0xff] %v197_v36  ;;  %202 = vst [vmem:[%s139_s3 + $0x8] sm:$0xff] %v198_v37  ;;  %v184_v39 = vmul.f32 %v343_v38, %v164_v14  ;;  %v185_v40 = vmul.f32 %v343_v38, %v165_v15 }
 0x154   : > { %v199_v41 = vmul.f32 %v190_v31, %v184_v39  ;;  %v200_v42 = vmul.f32 %v194_v32, %v185_v40 }
 0x156   : > { %203 = vst [vmem:[%s139_s3 + $0x10] sm:$0xff] %v199_v41  ;;  %204 = vst [vmem:[%s139_s3 + $0x18] sm:$0xff] %v200_v42 }
 0x157   : > { %357 = shalt.err (!%p354_p3)
}
 0x158   : > { %s358_s21 = scalar_lea.hbm %s486_s7, 512  ;;  %s362_s24 = scalar_lea.hbm %s533_s2, 1024 }
 0x159   : > { %p359_p4 = scmp.ne.s32.totalorder %s486_s7, %s358_s21  ;;  %p363_p9 = scmp.lt.u32.totalorder %s486_s7, %s533_s2 }
 0x15a   : > { %p364_p10 = scmp.lt.u32.totalorder %s362_s24, %s358_s21  ;;  %p366_p12 = scmp.lt.u32.totalorder %s358_s21, %s486_s7 }
 0x15b   : > { %p360_p7 = pnand %p359_p4, %p464_p5 }
 0x15c   : > { %p365_p11 = por %p364_p10, %p363_p9 }
 0x15d   : > { %p361_p8 = pneg %p360_p7 }
 0x15e   : > { %p367_p13 = por %p366_p12, %p365_p11 }
 0x160   : > { %p368_p0 = pnand %p367_p13, %p361_p8 }
 0x162   : > { %371 = shalt.err (!%p368_p0)
}
 0x163   : > { %s409_s27 = smov 256   ;;  %s410_s28 = smov 16  }
 0x164   : > { %299 = dma.vmem_to_hbm [thread:$0]  (%p464_p5), %s488_s4, 512, %s486_s7, %s490_s8, %s409_s27, %s409_s27, %s410_s28  }
 0x165 PF: > { %p305_p1 = scmp.ge.s32.totalorder %s406_s12, 2  ;;  %s235_s29 = sand.u32 1, %s394_s9  }
 0x166   : > { %s236_s30 = scalar_lea.sflag [#allocation3], %s235_s29 }
 0x167   : > { %p302_p2 = pnand %p305_p1, %p468_p6 }
 0x169   : > { %389 = dma.done.wait (!%p302_p2), %s236_s30, 512  }
 0x16a   : > { %391 = vsyncadd (!%p302_p2), %s236_s30, 4294966784  ;;  %p12_p3 = scmp.ge.s32.totalorder %s451_s15, 4   ;;  %s536_s9 = smov %s398_s10 }
 0x16b   : > { %s537_s10 = smov %s402_s11  ;;  %s538_s11 = smov %s462_s18 }
 0x16c   : > { %s539_s12 = smov %s451_s15  ;;  %14 = sbr.rel (!%p12_p3) target bundleno = 3 (0x3), region = 63 }
 0x173   :  { %241 = vsyncpa [#allocation3], 1 }
 0x174   :  { %243 = vsyncpa [#allocation3 + $0x1], 1 }

// kernel: transformer_blocks_forward.11
= control target key start
LH: loop header
LB: loop body
LE: loop exit
PB: predicated region body
PF: predicated region fallthrough
CT: control target
= control target key end

     0   :  { %s2504_s13 = smov 0   ;;  %s3146_s0 = inlined_call_operand.vmem [shape: f32[2,16,256], index: 0, kind: input, shape index: {}]   ;;  %s3147_s1 = inlined_call_operand.vmem [shape: bf16[2,24,256], index: 1, kind: input, shape index: {}]   ;;  %s3148_s2 = inlined_call_operand.vmem [shape: f32[1,256], index: 2, kind: input, shape index: {}]   ;;  %s3149_s3 = inlined_call_operand.vmem [shape: bf16[256,256], index: 3, kind: input, shape index: {}]   ;;  %s3150_s4 = inlined_call_operand.vmem [shape: bf16[256,512], index: 4, kind: input, shape index: {}]   ;;  %s3151_s5 = inlined_call_operand.vmem [shape: f32[2,128], index: 5, kind: input, shape index: {}]   ;;  %s3152_s6 = inlined_call_operand.vmem [shape: f32[2,128], index: 6, kind: input, shape index: {}]   ;;  %s3153_s7 = inlined_call_operand.vmem [shape: f32[1,128], index: 7, kind: input, shape index: {}]   ;;  %s3154_s8 = inlined_call_operand.vmem [shape: f32[1,128], index: 8, kind: input, shape index: {}]   ;;  %s3155_s9 = inlined_call_operand.vmem [shape: bf16[256,256], index: 9, kind: input, shape index: {}]   ;;  %s3156_s10 = inlined_call_operand.vmem [shape: f32[2,16,256], index: 10, kind: output, shape index: {}]  }
   0x1 LB: > { %s1959_s14 = sadd.s32 4294967295, %s2445_s13   ;;  %p1963_p0 = scmp.ge.s32.totalorder %s2445_s13, 1  ;;  %s2445_s13 = sphi %s2504_s13, %s20_s13  }
   0x2   : > { %p322_p1 = scmp.lt.s32.totalorder %s2445_s13, 3 }
   0x4   : > { %p323_p2 = pnand %p1963_p0, %p322_p1 }
   0x5   : > { %p365_p3 = scmp.lt.s32.totalorder (!%p323_p2), %s1959_s14, 1  ;;  %v2162_v0 = vld [vmem:[%s3150_s4 + $0x4] ss:$16 sps:$4 sm:$0xff] (!%p323_p2)   ;;  %v2164_v1 = vld [vmem:[%s3150_s4] ss:$16 sps:$4 sm:$0xff] (!%p323_p2)   ;;  %vm1494_vm12 = vcmask (!%p323_p2), 1041409  }
   0x6   : > { %326 = sbr.rel (%p323_p2) target bundleno = 1548 (0x60c), region = 60  ;;  %1075 = vmatprep.subr.bf16.mxu1 (!%p323_p2), %v2162_v0  ;;  %v2165_v2 = vld [vmem:[%s3150_s4 + $0x24] ss:$16 sps:$4 sm:$0xff] (!%p323_p2)   ;;  %v2167_v3 = vld [vmem:[%s3150_s4 + $0x20] ss:$16 sps:$4 sm:$0xff] (!%p323_p2)   ;;  %vm1265_vm13 = vcmask (!%p323_p2), 1040384  }
   0x7   : > { %1076 = vmatpush1.bf16.msra.mxu1 (!%p323_p2), %v2164_v1  ;;  %v2168_v4 = vld [vmem:[%s3150_s4 + $0x44] ss:$16 sps:$4 sm:$0xff] (!%p323_p2)   ;;  %v2170_v10 = vld [vmem:[%s3150_s4 + $0x40] ss:$16 sps:$4 sm:$0xff] (!%p323_p2)   ;;  %vm2448_vm14 = vmmov (!%p323_p2), 0  }
   0x8   : > { %1077 = vmatprep.subr.bf16.mxu1 (!%p323_p2), %v2165_v2  ;;  %v2171_v11 = vld [vmem:[%s3150_s4 + $0x64] ss:$16 sps:$4 sm:$0xff] (!%p323_p2)   ;;  %v2173_v13 = vld [vmem:[%s3150_s4 + $0x60] ss:$16 sps:$4 sm:$0xff] (!%p323_p2)  }
   0x9   : > { %v2174_v14 = vld [vmem:[%s3150_s4 + $0x84] ss:$16 sps:$4 sm:$0xff] (!%p323_p2)   ;;  %v2176_v15 = vld [vmem:[%s3150_s4 + $0x80] ss:$16 sps:$4 sm:$0xff] (!%p323_p2)  }
   0xa   : > { %v2177_v16 = vld [vmem:[%s3150_s4 + $0xa4] ss:$16 sps:$4 sm:$0xff] (!%p323_p2)   ;;  %v2179_v17 = vld [vmem:[%s3150_s4 + $0xa0] ss:$16 sps:$4 sm:$0xff] (!%p323_p2)  }
   0xb   : > { %1078 = vmatpush1.bf16.msra.mxu1 (!%p323_p2), %v2167_v3  ;;  %v2180_v18 = vld [vmem:[%s3150_s4 + $0xc4] ss:$16 sps:$4 sm:$0xff] (!%p323_p2)   ;;  %v2182_v19 = vld [vmem:[%s3150_s4 + $0xc0] ss:$16 sps:$4 sm:$0xff] (!%p323_p2)  }
   0xc   : > { %1079 = vmatprep.subr.bf16.mxu1 (!%p323_p2), %v2168_v4  ;;  %v2183_v21 = vld [vmem:[%s3150_s4 + $0xe4] ss:$16 sps:$4 sm:$0xff] (!%p323_p2)   ;;  %v2185_v22 = vld [vmem:[%s3150_s4 + $0xe0] ss:$16 sps:$4 sm:$0xff] (!%p323_p2)  }
   0xd   : > { %s3158_s14 = smov (!%p365_p3, %s1959_s14), 1  ;;  %v2186_v23 = vld [vmem:[%s3150_s4 + $0x104] ss:$16 sps:$4 sm:$0xff]   ;;  %v2188_v24 = vld [vmem:[%s3150_s4 + $0x100] ss:$16 sps:$4 sm:$0xff]  }
   0xe   : > { %s2105_s23 = sshll.u32 %s3158_s14, 5  ;;  %s2151_s24 = smul.u32 24, %s3158_s14  ;;  %v2189_v25 = vld [vmem:[%s3150_s4 + $0x124] ss:$16 sps:$4 sm:$0xff]   ;;  %v2191_v26 = vld [vmem:[%s3150_s4 + $0x120] ss:$16 sps:$4 sm:$0xff]  }
   0xf   : > { %s2535_s28 = scalar_lea.vmem %s3146_s0, %s2105_s23  ;;  %1080 = vmatpush1.bf16.msra.mxu1 %v2170_v10  ;;  %v2215_v27 = vld [vmem:[%s3149_s3 + $0x4] ss:$8 sps:$4 sm:$0xff]   ;;  %v2217_v28 = vld [vmem:[%s3149_s3] ss:$8 sps:$4 sm:$0xff]   ;;  %v2218_v29 = vld [vmem:[%s3149_s3 + $0x14] ss:$8 sps:$4 sm:$0xff]   ;;  %s379_s21 = scalar_lea.vmem %s3156_s10, %s2105_s23 }
  0x10   : > { %v2538_v5 = vld [vmem:[%s2535_s28] sm:$0xff]  ;;  %v2541_v6 = vld [vmem:[%s2535_s28 + $0x8] sm:$0xff]  ;;  %v2544_v7 = vld [vmem:[%s2535_s28 + $0x10] sm:$0xff]  ;;  %1081 = vmatprep.subr.bf16.mxu1 %v2171_v11  ;;  %s2581_s12 = scalar_lea.vmem %s3147_s1, %s2151_s24  ;;  %628 = vmatprep.subr.bf16.mxu0 %v2215_v27 }
  0x11   : > { %v386_v8 = vadd.f32 %v2541_v6, %v2538_v5  ;;  %v2549_v9 = vld [vmem:[%s2535_s28 + $0x18] sm:$0xff]  ;;  %v2587_v20 = vld [vmem:[%s2581_s12 + $0x4] ss:$8 sps:$4 sm:$0xff]   ;;  %629 = vmatpush1.bf16.msra.mxu0 %v2217_v28  ;;  %v2194_v32 = vld [vmem:[%s3150_s4 + $0x140] ss:$16 sps:$4 sm:$0xff]  }
  0x12   : > { %v389_v12 = vadd.f32 %v2549_v9, %v2544_v7  ;;  %1107 = vmatprep.mubr.bf16.mxu1 %v2587_v20  ;;  %v2192_v30 = vld [vmem:[%s3150_s4 + $0x144] ss:$16 sps:$4 sm:$0xff]   ;;  %v2220_v31 = vld [vmem:[%s3149_s3 + $0x10] ss:$8 sps:$4 sm:$0xff]   ;;  %630 = vmatprep.subr.bf16.mxu0 %v2218_v29  ;;  %v2223_v36 = vld [vmem:[%s3149_s3 + $0x20] ss:$8 sps:$4 sm:$0xff]  }
  0x13   : > { %387 = vadd.xlane.f32.xlu0 %v386_v8  ;;  %1082 = vmatpush1.bf16.msra.mxu1 %v2173_v13  ;;  %v2221_v33 = vld [vmem:[%s3149_s3 + $0x24] ss:$8 sps:$4 sm:$0xff]   ;;  %v2197_v35 = vld [vmem:[%s3150_s4 + $0x160] ss:$16 sps:$4 sm:$0xff]   ;;  %v2224_v37 = vld [vmem:[%s3149_s3 + $0x34] ss:$8 sps:$4 sm:$0xff]  }
  0x14   : > { %1083 = vmatprep.subr.bf16.mxu1 %v2174_v14  ;;  %v2195_v34 = vld [vmem:[%s3150_s4 + $0x164] ss:$16 sps:$4 sm:$0xff]   ;;  %v2226_v39 = vld [vmem:[%s3149_s3 + $0x30] ss:$8 sps:$4 sm:$0xff]   ;;  %v2229_v43 = vld [vmem:[%s3149_s3 + $0x40] ss:$8 sps:$4 sm:$0xff]  }
  0x15   : > { %v2198_v38 = vld [vmem:[%s3150_s4 + $0x184] ss:$16 sps:$4 sm:$0xff]   ;;  %631 = vmatpush1.bf16.msra.mxu0 %v2220_v31  ;;  %v2200_v40 = vld [vmem:[%s3150_s4 + $0x180] ss:$16 sps:$4 sm:$0xff]  }
  0x16   : > { %632 = vmatprep.subr.bf16.mxu0 %v2221_v33  ;;  %v2227_v41 = vld [vmem:[%s3149_s3 + $0x44] ss:$8 sps:$4 sm:$0xff]   ;;  %v2203_v44 = vld [vmem:[%s3150_s4 + $0x1a0] ss:$16 sps:$4 sm:$0xff]   ;;  %v2230_v45 = vld [vmem:[%s3149_s3 + $0x54] ss:$8 sps:$4 sm:$0xff]  }
  0x17   : > { %390 = vadd.xlane.f32.xlu0 %v389_v12  ;;  %1084 = vmatpush1.bf16.msra.mxu1 %v2176_v15  ;;  %v2201_v42 = vld [vmem:[%s3150_s4 + $0x1a4] ss:$16 sps:$4 sm:$0xff]   ;;  %v2232_v47 = vld [vmem:[%s3149_s3 + $0x50] ss:$8 sps:$4 sm:$0xff]   ;;  %v2235_v51 = vld [vmem:[%s3149_s3 + $0x60] ss:$8 sps:$4 sm:$0xff]  }
  0x18   : > { %1085 = vmatprep.subr.bf16.mxu1 %v2177_v16  ;;  %v2204_v46 = vld [vmem:[%s3150_s4 + $0x1c4] ss:$16 sps:$4 sm:$0xff]   ;;  %v2206_v48 = vld [vmem:[%s3150_s4 + $0x1c0] ss:$16 sps:$4 sm:$0xff]  }
  0x19   : > { %633 = vmatpush1.bf16.msra.mxu0 %v2223_v36  ;;  %v2233_v49 = vld [vmem:[%s3149_s3 + $0x64] ss:$8 sps:$4 sm:$0xff]   ;;  %v2209_v52 = vld [vmem:[%s3150_s4 + $0x1e0] ss:$16 sps:$4 sm:$0xff]   ;;  %v2236_v53 = vld [vmem:[%s3149_s3 + $0x74] ss:$8 sps:$4 sm:$0xff]  }
  0x1a   : > { %634 = vmatprep.subr.bf16.mxu0 %v2224_v37  ;;  %v2207_v50 = vld [vmem:[%s3150_s4 + $0x1e4] ss:$16 sps:$4 sm:$0xff]   ;;  %v2691_v55 = vld [vmem:[%s2581_s12] ss:$8 sps:$4 sm:$0xff]   ;;  %v2238_v56 = vld [vmem:[%s3149_s3 + $0x70] ss:$8 sps:$4 sm:$0xff]  }
  0x1b   : > { %1086 = vmatpush1.bf16.msra.mxu1 %v2179_v17  ;;  %v673_v54 = vld [vmem:[%s2581_s12 + $0x10] sm:$0xff]  ;;  %v2239_v58 = vld [vmem:[%s3149_s3 + $0x84] ss:$8 sps:$4 sm:$0xff]   ;;  %v2241_v59 = vld [vmem:[%s3149_s3 + $0x80] ss:$8 sps:$4 sm:$0xff]  }
  0x1c   : > { %1087 = vmatprep.subr.bf16.mxu1 %v2180_v18  ;;  %v2696_v57 = vcombine.high %v673_v54, %v673_v54  ;;  %v2242_v60 = vld [vmem:[%s3149_s3 + $0x94] ss:$8 sps:$4 sm:$0xff]   ;;  %v2709_v61 = vcombine.low %v673_v54, %v673_v54  ;;  %v2244_v62 = vld [vmem:[%s3149_s3 + $0x90] ss:$8 sps:$4 sm:$0xff]   ;;  %v2245_v15 = vld [vmem:[%s3149_s3 + $0xa4] ss:$8 sps:$4 sm:$0xff]  }
  0x1d   : > { %635 = vmatpush1.bf16.msra.mxu0 %v2226_v39  ;;  %v2250_v16 = vld [vmem:[%s3149_s3 + $0xb0] ss:$8 sps:$4 sm:$0xff]   ;;  %v2251_v17 = vld [vmem:[%s3149_s3 + $0xc4] ss:$8 sps:$4 sm:$0xff]   ;;  %v2253_v18 = vld [vmem:[%s3149_s3 + $0xc0] ss:$8 sps:$4 sm:$0xff]  }
  0x1e   : > { %636 = vmatprep.subr.bf16.mxu0 %v2227_v41 }
  0x1f   : > { %1088 = vmatpush1.bf16.msra.mxu1 %v2182_v19  ;;  %v2254_v19 = vld [vmem:[%s3149_s3 + $0xd4] ss:$8 sps:$4 sm:$0xff]  }
  0x20   : > { %1089 = vmatprep.subr.bf16.mxu1 %v2183_v21  ;;  %v2256_v21 = vld [vmem:[%s3149_s3 + $0xd0] ss:$8 sps:$4 sm:$0xff]  }
  0x21   : > { %637 = vmatpush1.bf16.msra.mxu0 %v2229_v43 }
  0x22   : > { %638 = vmatprep.subr.bf16.mxu0 %v2230_v45 }
  0x23   : > { %1090 = vmatpush1.bf16.msra.mxu1 %v2185_v22  ;;  %v2257_v22 = vld [vmem:[%s3149_s3 + $0xe4] ss:$8 sps:$4 sm:$0xff]  }
  0x24   : > { %1091 = vmatprep.subr.bf16.mxu1 %v2186_v23  ;;  %v2259_v23 = vld [vmem:[%s3149_s3 + $0xe0] ss:$8 sps:$4 sm:$0xff]  }
  0x25   : > { %639 = vmatpush1.bf16.msra.mxu0 %v2232_v47 }
  0x26   : > { %640 = vmatprep.subr.bf16.mxu0 %v2233_v49 }
  0x27   : > { %1092 = vmatpush1.bf16.msra.mxu1 %v2188_v24  ;;  %v2260_v24 = vld [vmem:[%s3149_s3 + $0xf4] ss:$8 sps:$4 sm:$0xff]  }
  0x28   : > { %1093 = vmatprep.subr.bf16.mxu1 %v2189_v25  ;;  %v2262_v25 = vld [vmem:[%s3149_s3 + $0xf0] ss:$8 sps:$4 sm:$0xff]  }
  0x29   : > { %641 = vmatpush1.bf16.msra.mxu0 %v2235_v51 }
  0x2a   : > { %642 = vmatprep.subr.bf16.mxu0 %v2236_v53 }
  0x2b   : > { %1094 = vmatpush1.bf16.msra.mxu1 %v2191_v26  ;;  %v2265_v26 = vld [vmem:[%s3150_s4 + $0xc] ss:$16 sps:$4 sm:$0xff]  }
  0x2c   : > { %1095 = vmatprep.subr.bf16.mxu1 %v2192_v30 }
  0x2d   : > { %643 = vmatpush1.bf16.msra.mxu0 %v2238_v56 }
  0x2e   : > { %644 = vmatprep.subr.bf16.mxu0 %v2239_v58 }
  0x2f   : > { %1096 = vmatpush1.bf16.msra.mxu1 %v2194_v32 }
  0x30   : > { %1097 = vmatprep.subr.bf16.mxu1 %v2195_v34 }
  0x31   : > { %645 = vmatpush1.bf16.msra.mxu0 %v2241_v59 }
  0x32   : > { %646 = vmatprep.subr.bf16.mxu0 %v2242_v60 }
  0x33   : > { %1098 = vmatpush1.bf16.msra.mxu1 %v2197_v35 }
  0x34   : > { %1099 = vmatprep.subr.bf16.mxu1 %v2198_v38 }
  0x35   : > { %647 = vmatpush1.bf16.msra.mxu0 %v2244_v62 }
  0x36   : > { %648 = vmatprep.subr.bf16.mxu0 %v2245_v15  ;;  %v2275_v15 = vld [vmem:[%s3150_s4 + $0x88] ss:$16 sps:$4 sm:$0xff]  }
  0x37   : > { %1100 = vmatpush1.bf16.msra.mxu1 %v2200_v40 }
  0x38   : > { %1101 = vmatprep.subr.bf16.mxu1 %v2201_v42 }
  0x3b   : > { %1102 = vmatpush1.bf16.msra.mxu1 %v2203_v44 }
  0x3c   : > { %1103 = vmatprep.subr.bf16.mxu1 %v2204_v46  ;;  %v420_v46 = vlaneseq }
  0x3f   : > { %1104 = vmatpush1.bf16.msra.mxu1 %v2206_v48  ;;  %v421_v48 = vshrl.u32 %v420_v46, 7 }
  0x40   : > { %1105 = vmatprep.subr.bf16.mxu1 %v2207_v50 }
  0x41   : > { %v2798_v49 = vsub.s32 0, %v421_v48  ;;  %v2800_v50 = vsub.s32 1, %v421_v48 }
  0x43   : > { %1106 = vmatpush1.bf16.msra.mxu1 %v2209_v52  ;;  %v385_v52 = vld [vmem:[%s3148_s2] sm:$0x3] }
  0x44   : > { %v423_v54 = vrot.slane %v385_v52, %v2798_v49  ;;  %v427_v56 = vrot.slane %v385_v52, %v2800_v50 }
  0x46   : > { %1108 = vmatmul.mubr.bf16.vlgmr.msra.gmra.mrb[0].mxu1 %v2691_v55 }
  0x47   : > { %1117 = vmatprep.mubr.bf16.mxu1 %v2696_v57 }
  0x4e   : > { %1118 = vmatmul.mubr.bf16.gmra.mrb[4].mxu1 %v2709_v61 }
  0xa0   : > { %v388_v63 = vpop.xlane.xlu0 %387 }
  0xa1   : > { %v393_v0 = vmul.f32 0.00390625, %v388_v63 }
  0xa3   : > { %v2716_v1 = vsub.f32 %v2538_v5, %v393_v0  ;;  %v2719_v2 = vsub.f32 %v2541_v6, %v393_v0 }
  0xa4   : > { %v391_v3 = vpop.xlane.xlu0 %390 }
  0xa5   : > { %v394_v4 = vmul.f32 0.00390625, %v391_v3  ;;  %v399_v8 = vmul.f32 %v2716_v1, %v2716_v1  ;;  %v400_v10 = vmul.f32 %v2719_v2, %v2719_v2 }
  0xa7   : > { %v2726_v11 = vsub.f32 %v2544_v7, %v394_v4  ;;  %v2729_v12 = vsub.f32 %v2549_v9, %v394_v4  ;;  %v403_v13 = vadd.f32 %v400_v10, %v399_v8  ;;  %v2247_v7 = vld [vmem:[%s3149_s3 + $0xa0] ss:$8 sps:$4 sm:$0xff]   ;;  %v2248_v9 = vld [vmem:[%s3149_s3 + $0xb4] ss:$8 sps:$4 sm:$0xff]  }
  0xa8   : > { %649 = vmatpush1.bf16.msra.mxu0 %v2247_v7  ;;  %v2280_v7 = vld [vmem:[%s3150_s4 + $0xac] ss:$16 sps:$4 sm:$0xff]  }
  0xa9   : > { %404 = vadd.xlane.f32.xlu1 %v403_v13  ;;  %v401_v5 = vmul.f32 %v2726_v11, %v2726_v11  ;;  %v402_v6 = vmul.f32 %v2729_v12, %v2729_v12  ;;  %650 = vmatprep.subr.bf16.mxu0 %v2248_v9  ;;  %v2268_v13 = vld [vmem:[%s3150_s4 + $0x2c] ss:$16 sps:$4 sm:$0xff]   ;;  %v2278_v9 = vld [vmem:[%s3150_s4 + $0xa8] ss:$16 sps:$4 sm:$0xff]  }
  0xab   : > { %v406_v14 = vadd.f32 %v402_v6, %v401_v5  ;;  %v2269_v5 = vld [vmem:[%s3150_s4 + $0x48] ss:$16 sps:$4 sm:$0xff]   ;;  %v2274_v6 = vld [vmem:[%s3150_s4 + $0x6c] ss:$16 sps:$4 sm:$0xff]  }
  0xac   : > { %651 = vmatpush1.bf16.msra.mxu0 %v2250_v16  ;;  %v2283_v16 = vld [vmem:[%s3150_s4 + $0xcc] ss:$16 sps:$4 sm:$0xff]  }
  0xad   : > { %407 = vadd.xlane.f32.xlu1 %v406_v14  ;;  %652 = vmatprep.subr.bf16.mxu0 %v2251_v17  ;;  %v2277_v14 = vld [vmem:[%s3150_s4 + $0x8c] ss:$16 sps:$4 sm:$0xff]   ;;  %v2281_v17 = vld [vmem:[%s3150_s4 + $0xc8] ss:$16 sps:$4 sm:$0xff]  }
  0xb0   : > { %653 = vmatpush1.bf16.msra.mxu0 %v2253_v18  ;;  %v2286_v18 = vld [vmem:[%s3150_s4 + $0xec] ss:$16 sps:$4 sm:$0xff]  }
  0xb1   : > { %654 = vmatprep.subr.bf16.mxu0 %v2254_v19  ;;  %v2284_v19 = vld [vmem:[%s3150_s4 + $0xe8] ss:$16 sps:$4 sm:$0xff]  }
  0xb4   : > { %655 = vmatpush1.bf16.msra.mxu0 %v2256_v21  ;;  %v2289_v21 = vld [vmem:[%s3150_s4 + $0x10c] ss:$16 sps:$4 sm:$0xff]  }
  0xb5   : > { %656 = vmatprep.subr.bf16.mxu0 %v2257_v22  ;;  %v2287_v22 = vld [vmem:[%s3150_s4 + $0x108] ss:$16 sps:$4 sm:$0xff]  }
  0xb8   : > { %657 = vmatpush1.bf16.msra.mxu0 %v2259_v23  ;;  %v2292_v23 = vld [vmem:[%s3150_s4 + $0x12c] ss:$16 sps:$4 sm:$0xff]  }
  0xb9   : > { %658 = vmatprep.subr.bf16.mxu0 %v2260_v24  ;;  %v2290_v24 = vld [vmem:[%s3150_s4 + $0x128] ss:$16 sps:$4 sm:$0xff]  }
  0xbc   : > { %659 = vmatpush1.bf16.msra.mxu0 %v2262_v25  ;;  %v2295_v25 = vld [vmem:[%s3150_s4 + $0x14c] ss:$16 sps:$4 sm:$0xff]  }
  0xbd   : > { %1126 = vmatprep.subr.bf16.mxu0 %v2265_v26  ;;  %v2293_v26 = vld [vmem:[%s3150_s4 + $0x148] ss:$16 sps:$4 sm:$0xff]  }
 0x119   : > { %v2774_v27 = vpop.f32.mrb[0].mxu1 }
 0x11a   : > { %v2776_v28 = vpop.f32.mrb[1].mxu1  ;;  %v1216_v33 = vmul.f32 %v2774_v27, %v2774_v27 }
 0x11b   : > { %v2778_v29 = vpop.f32.mrb[2].mxu1  ;;  %v1452_v30 = vmul.f32 %v2776_v28, %v2776_v28 }
 0x11c   : > { %v2782_v31 = vpop.f32.mrb[3].mxu1  ;;  %v1217_v34 = vmul.f32 %v2778_v29, %v2778_v29 }
 0x11d   : > { %1455 = vadd.xlane.f32.xlu0 %v1452_v30  ;;  %v1453_v32 = vmul.f32 %v2782_v31, %v2782_v31  ;;  %v2298_v30 = vld [vmem:[%s3150_s4 + $0x16c] ss:$16 sps:$4 sm:$0xff]  }
 0x11f   : > { %1457 = vadd.xlane.f32.xlu1 %v1453_v32  ;;  %v2296_v32 = vld [vmem:[%s3150_s4 + $0x168] ss:$16 sps:$4 sm:$0xff]  }
 0x121   : > { %1219 = vadd.xlane.f32.xlu0 %v1216_v33  ;;  %v2790_v35 = vpop.f32.mrb[4].mxu1  ;;  %v2301_v33 = vld [vmem:[%s3150_s4 + $0x18c] ss:$16 sps:$4 sm:$0xff]  }
 0x122   : > { %v2792_v36 = vpop.f32.mrb[5].mxu1  ;;  %v1218_v38 = vmul.f32 %v2790_v35, %v2790_v35 }
 0x123   : > { %1221 = vadd.xlane.f32.xlu1 %v1217_v34  ;;  %v1454_v37 = vmul.f32 %v2792_v36, %v2792_v36  ;;  %v1123_v39 = vpop.f32.mrb[6].mxu1  ;;  %v2299_v34 = vld [vmem:[%s3150_s4 + $0x188] ss:$16 sps:$4 sm:$0xff]  }
 0x124   : > { %v1124_v40 = vpop.f32.mrb[7].mxu1  ;;  %v2307_v39 = vld [vmem:[%s3150_s4 + $0x1cc] ss:$16 sps:$4 sm:$0xff]  }
 0x125   : > { %1459 = vadd.xlane.f32.xlu0 %v1454_v37  ;;  %v2304_v37 = vld [vmem:[%s3150_s4 + $0x1ac] ss:$16 sps:$4 sm:$0xff]   ;;  %v2305_v40 = vld [vmem:[%s3150_s4 + $0x1c8] ss:$16 sps:$4 sm:$0xff]  }
 0x127   : > { %1223 = vadd.xlane.f32.xlu1 %v1218_v38  ;;  %v2302_v38 = vld [vmem:[%s3150_s4 + $0x1a8] ss:$16 sps:$4 sm:$0xff]  }
 0x136   : > { %v405_v41 = vpop.xlane.xlu1 %404 }
 0x137   : > { %v409_v42 = vmul.f32 0.00390625, %v405_v41  ;;  %v2310_v41 = vld [vmem:[%s3150_s4 + $0x1ec] ss:$16 sps:$4 sm:$0xff]  }
 0x139   : > { %v411_v43 = vadd.f32 1e-05, %v409_v42  ;;  %v2308_v42 = vld [vmem:[%s3150_s4 + $0x1e8] ss:$16 sps:$4 sm:$0xff]  }
 0x13a   : > { %v408_v44 = vpop.xlane.xlu1 %407 }
 0x13b   : > { %2359 = vrsqrt.f32 %v411_v43  ;;  %v410_v45 = vmul.f32 0.00390625, %v408_v44 }
 0x13d   : > { %v412_v47 = vadd.f32 1e-05, %v410_v45 }
 0x13f   : > { %2361 = vrsqrt.f32 %v412_v47 }
 0x145   : > { %v2360_v51 = vpop.eup %2359 }
 0x146   : > { %v416_v53 = vmul.f32 %v2360_v51, %v2719_v2  ;;  %v415_v58 = vmul.f32 %v2360_v51, %v2716_v1  ;;  %v2263_v2 = vld [vmem:[%s3150_s4 + $0x8] ss:$16 sps:$4 sm:$0xff]   ;;  %v2447_v1 = vmov 0.0  }
 0x147   : > { %2119 = vmatprep.subr.bf16.mxu1 %v2447_v1  ;;  %2123 = vmatprep.mubr.msk.bf16.mxu1 %vm2448_vm14, %v2447_v1 }
 0x148   : > { %v431_v63 = vmul.f32 %v427_v56, %v416_v53  ;;  %v430_v3 = vmul.f32 %v423_v54, %v415_v58 }
 0x149   : > { %v2362_v59 = vpop.eup %2361 }
 0x14a   : > { %v418_v60 = vmul.f32 %v2362_v59, %v2729_v12  ;;  %v417_v62 = vmul.f32 %v2362_v59, %v2726_v11  ;;  %v2266_v11 = vld [vmem:[%s3150_s4 + $0x28] ss:$16 sps:$4 sm:$0xff]   ;;  %v2271_v12 = vld [vmem:[%s3150_s4 + $0x4c] ss:$16 sps:$4 sm:$0xff]  }
 0x14c   : > { %v433_v0 = vmul.f32 %v427_v56, %v418_v60  ;;  %v432_v4 = vmul.f32 %v423_v54, %v417_v62 }
 0x14e   : > { %v435_v8 = vpack.c.bf16 %v433_v0, %v431_v63  ;;  %v434_v10 = vpack.c.bf16 %v432_v4, %v430_v3 }
 0x150   : > { %660 = vmatprep.mubr.bf16.mxu0 %v435_v8 }
 0x151   : > { %661 = vmatmul.mubr.bf16.vlgmr.msra.gmra.mrb[0].mxu0 %v434_v10 }
 0x152   : > { %1127 = vmatpush1.bf16.msra.mxu0 %v2263_v2  ;;  %1158 = vmatprep.mubr.bf16.mxu0 %v2587_v20  ;;  %v2272_v20 = vld [vmem:[%s3150_s4 + $0x68] ss:$16 sps:$4 sm:$0xff]  }
 0x153   : > { %1128 = vmatprep.subr.bf16.mxu0 %v2268_v13 }
 0x156   : > { %1129 = vmatpush1.bf16.msra.mxu0 %v2266_v11 }
 0x157   : > { %1130 = vmatprep.subr.bf16.mxu0 %v2271_v12 }
 0x15a   : > { %1131 = vmatpush1.bf16.msra.mxu0 %v2269_v5 }
 0x15b   : > { %1132 = vmatprep.subr.bf16.mxu0 %v2274_v6 }
 0x15e   : > { %1133 = vmatpush1.bf16.msra.mxu0 %v2272_v20 }
 0x15f   : > { %1134 = vmatprep.subr.bf16.mxu0 %v2277_v14 }
 0x162   : > { %1135 = vmatpush1.bf16.msra.mxu0 %v2275_v15 }
 0x163   : > { %1136 = vmatprep.subr.bf16.mxu0 %v2280_v7 }
 0x166   : > { %1137 = vmatpush1.bf16.msra.mxu0 %v2278_v9 }
 0x167   : > { %1138 = vmatprep.subr.bf16.mxu0 %v2283_v16 }
 0x16a   : > { %1139 = vmatpush1.bf16.msra.mxu0 %v2281_v17 }
 0x16b   : > { %1140 = vmatprep.subr.bf16.mxu0 %v2286_v18 }
 0x16e   : > { %1141 = vmatpush1.bf16.msra.mxu0 %v2284_v19  ;;  %v2914_v19 = vld [vmem:[%s3154_s8] sm:$0x1] }
 0x16f   : > { %1142 = vmatprep.subr.bf16.mxu0 %v2289_v21 }
 0x172   : > { %1143 = vmatpush1.bf16.msra.mxu0 %v2287_v22 }
 0x173   : > { %1144 = vmatprep.subr.bf16.mxu0 %v2292_v23 }
 0x176   : > { %1145 = vmatpush1.bf16.msra.mxu0 %v2290_v24 }
 0x177   : > { %1146 = vmatprep.subr.bf16.mxu0 %v2295_v25  ;;  %v2918_v25 = vrot.slane %v2914_v19, %v2798_v49 }
 0x17a   : > { %1147 = vmatpush1.bf16.msra.mxu0 %v2293_v26 }
 0x17b   : > { %1148 = vmatprep.subr.bf16.mxu0 %v2298_v30 }
 0x17e   : > { %1149 = vmatpush1.bf16.msra.mxu0 %v2296_v32 }
 0x17f   : > { %1150 = vmatprep.subr.bf16.mxu0 %v2301_v33 }
 0x182   : > { %1151 = vmatpush1.bf16.msra.mxu0 %v2299_v34 }
 0x183   : > { %1152 = vmatprep.subr.bf16.mxu0 %v2304_v37 }
 0x186   : > { %1153 = vmatpush1.bf16.msra.mxu0 %v2302_v38 }
 0x187   : > { %1154 = vmatprep.subr.bf16.mxu0 %v2307_v39 }
 0x18a   : > { %1155 = vmatpush1.bf16.msra.mxu0 %v2305_v40 }
 0x18b   : > { %1156 = vmatprep.subr.bf16.mxu0 %v2310_v41 }
 0x18e   : > { %1157 = vmatpush1.bf16.msra.mxu0 %v2308_v42 }
 0x18f   : > { %2135 = vmatprep.subr.bf16.mxu0 %v2447_v1 }
 0x191   : > { %1159 = vmatmul.mubr.bf16.vlgmr.msra.gmra.mrb[4].mxu0 %v2691_v55 }
 0x192   : > { %1168 = vmatprep.mubr.bf16.mxu0 %v2696_v57 }
 0x199   : > { %1169 = vmatmul.mubr.bf16.gmra.mrb[8].mxu0 %v2709_v61 }
 0x19a   : > { %2139 = vmatprep.mubr.msk.bf16.mxu0 %vm2448_vm14, %v2447_v1 }
 0x1aa   : > { %v1456_v43 = vpop.xlane.xlu0 %1455 }
 0x1ab   : > { %2363 = vrsqrt.f32 %v1456_v43  ;;  %vm1463_vm0 = vcmp.eq.f32.partialorder %v1456_v43, inf  ;;  %v1466_v52 = vand.u32 2147483648, %v1456_v43  ;;  %vm1465_vm1 = vcmp.eq.f32.partialorder %v1456_v43, 0.0 }
 0x1ac   : > { %v1458_v44 = vpop.xlane.xlu1 %1457 }
 0x1ad   : > { %2365 = vrsqrt.f32 %v1458_v44  ;;  %vm1470_vm2 = vcmp.eq.f32.partialorder %v1458_v44, inf  ;;  %v1473_v61 = vand.u32 2147483648, %v1458_v44  ;;  %vm1472_vm3 = vcmp.eq.f32.partialorder %v1458_v44, 0.0 }
 0x1ae   : > { %v1220_v45 = vpop.xlane.xlu0 %1219 }
 0x1af   : > { %2367 = vrsqrt.f32 %v1220_v45  ;;  %vm1227_vm4 = vcmp.eq.f32.partialorder %v1220_v45, inf  ;;  %v1230_v59 = vand.u32 2147483648, %v1220_v45  ;;  %vm1229_vm5 = vcmp.eq.f32.partialorder %v1220_v45, 0.0 }
 0x1b0   : > { %v1222_v46 = vpop.xlane.xlu1 %1221 }
 0x1b1   : > { %2369 = vrsqrt.f32 %v1222_v46  ;;  %vm1234_vm6 = vcmp.eq.f32.partialorder %v1222_v46, inf  ;;  %vm1236_vm7 = vcmp.eq.f32.partialorder %v1222_v46, 0.0  ;;  %v1237_v4 = vand.u32 2147483648, %v1222_v46 }
 0x1b2   : > { %v1460_v47 = vpop.xlane.xlu0 %1459 }
 0x1b3   : > { %2371 = vrsqrt.f32 %v1460_v47  ;;  %vm1477_vm8 = vcmp.eq.f32.partialorder %v1460_v47, inf  ;;  %vm1479_vm9 = vcmp.eq.f32.partialorder %v1460_v47, 0.0  ;;  %v1480_v12 = vand.u32 2147483648, %v1460_v47 }
 0x1b4   : > { %v1224_v48 = vpop.xlane.xlu1 %1223 }
 0x1b5   : > { %v2364_v51 = vpop.eup %2363  ;;  %2373 = vrsqrt.f32 %v1224_v48  ;;  %vm1241_vm10 = vcmp.eq.f32.partialorder %v1224_v48, inf  ;;  %vm1243_vm11 = vcmp.eq.f32.partialorder %v1224_v48, 0.0  ;;  %v1244_v7 = vand.u32 2147483648, %v1224_v48 }
 0x1b6   : > { %v1462_v55 = vmul.f32 %v2364_v51, %v1456_v43 }
 0x1b7   : > { %v2366_v57 = vpop.eup %2365 }
 0x1b8   : > { %v1469_v53 = vmul.f32 %v2366_v57, %v1458_v44  ;;  %v1464_v54 = vsel %vm1463_vm0, %v1456_v43, %v1462_v55  ;;  %v2947_v57 = vld [vmem:[%s3151_s5] sm:$0x3] }
 0x1b9   : > { %v2368_v56 = vpop.eup %2367  ;;  %v1467_v58 = vsel %vm1465_vm1, %v1466_v52, %v1464_v54  ;;  %v1264_v54 = vmul.f32 %v2947_v57, %v2947_v57 }
 0x1ba   : > { %v1471_v60 = vsel %vm1470_vm2, %v1458_v44, %v1469_v53  ;;  %v1482_v62 = vmax.f32 %v1467_v58, 1e-12  ;;  %v1226_v63 = vmul.f32 %v2368_v56, %v1220_v45 }
 0x1bb   : > { %v2370_v0 = vpop.eup %2369  ;;  %v1474_v3 = vsel %vm1472_vm3, %v1473_v61, %v1471_v60  ;;  %v1266_v60 = vsel %vm1265_vm13, %v1264_v54, 0.0 }
 0x1bc   : > { %v1483_v8 = vmax.f32 %v1474_v3, 1e-12  ;;  %2375 = vrcp.f32 %v1482_v62  ;;  %v1233_v10 = vmul.f32 %v2370_v0, %v1222_v46  ;;  %v1228_v2 = vsel %vm1227_vm4, %v1220_v45, %v1226_v63 }
 0x1bd   : > { %v2372_v13 = vpop.eup %2371  ;;  %v1231_v11 = vsel %vm1229_vm5, %v1230_v59, %v1228_v2  ;;  %v1495_v59 = vsel %vm1494_vm12, %v1264_v54, 0.0  ;;  %vm1334_vm12 = vcmask 195584  }
 0x1be   : > { %2377 = vrcp.f32 %v1483_v8  ;;  %v1235_v5 = vsel %vm1234_vm6, %v1222_v46, %v1233_v10  ;;  %v1246_v6 = vmax.f32 %v1231_v11, 1e-12  ;;  %v1476_v20 = vmul.f32 %v2372_v13, %v1460_v47 }
 0x1bf   : > { %v2374_v14 = vpop.eup %2373  ;;  %v1238_v15 = vsel %vm1236_vm7, %v1237_v4, %v1235_v5 }
 0x1c0   : > { %v1247_v9 = vmax.f32 %v1238_v15, 1e-12  ;;  %2379 = vrcp.f32 %v1246_v6  ;;  %v1240_v16 = vmul.f32 %v2374_v14, %v1224_v48  ;;  %v1478_v17 = vsel %vm1477_vm8, %v1460_v47, %v1476_v20 }
 0x1c1   : > { %v1481_v18 = vsel %vm1479_vm9, %v1480_v12, %v1478_v17 }
 0x1c2   : > { %2381 = vrcp.f32 %v1247_v9  ;;  %v1242_v21 = vsel %vm1241_vm10, %v1224_v48, %v1240_v16  ;;  %v1484_v22 = vmax.f32 %v1481_v18, 1e-12 }
 0x1c3   : > { %v1245_v23 = vsel %vm1243_vm11, %v1244_v7, %v1242_v21  ;;  %vm1377_vm11 = vcmask 1043456  }
 0x1c4   : > { %v1248_v24 = vmax.f32 %v1245_v23, 1e-12  ;;  %2383 = vrcp.f32 %v1484_v22 }
 0x1c6   : > { %v2376_v26 = vpop.eup %2375  ;;  %2385 = vrcp.f32 %v1248_v24 }
 0x1c7   : > { %v1486_v30 = vmul.f32 %v2376_v26, %v2776_v28 }
 0x1c8   : > { %v2378_v32 = vpop.eup %2377 }
 0x1c9   : > { %v1488_v33 = vmul.f32 %v2378_v32, %v2782_v31  ;;  %v1491_v34 = vmul.f32 %v1486_v30, %v2918_v25 }
 0x1ca   : > { %v2380_v37 = vpop.eup %2379 }
 0x1cb   : > { %v1250_v38 = vmul.f32 %v2380_v37, %v2774_v27  ;;  %v1492_v39 = vmul.f32 %v1488_v33, %v2918_v25 }
 0x1cc   : > { %v2382_v40 = vpop.eup %2381 }
 0x1cd   : > { %v1252_v41 = vmul.f32 %v2382_v40, %v2778_v29  ;;  %v1261_v42 = vmul.f32 %v2918_v25, %v1250_v38  ;;  %v1510_v43 = vpack.c.bf16 %v1492_v39, %v1491_v34 }
 0x1ce   : > { %v2384_v44 = vpop.eup %2383 }
 0x1cf   : > { %v1262_v45 = vmul.f32 %v2918_v25, %v1252_v41  ;;  %2136 = vmatpush3.bf16.xpose.msra.mxu0 %v1510_v43  ;;  %v1490_v28 = vmul.f32 %v2384_v44, %v2792_v36  ;;  %v1179_v44 = vld [vmem:[%s3153_s7] sm:$0x1] }
 0x1d0   : > { %v2386_v31 = vpop.eup %2385  ;;  %2137 = vmatprep.subr.bf16.mxu0 %v2447_v1 }
 0x1d1   : > { %v1281_v46 = vpack.c.bf16 %v1262_v45, %v1261_v42  ;;  %v1254_v27 = vmul.f32 %v2386_v31, %v2790_v35  ;;  %v1493_v47 = vmul.f32 %v1490_v28, %v2918_v25 }
 0x1d3   : > { %2120 = vmatpush3.bf16.xpose.msra.mxu1 %v1281_v46  ;;  %v1263_v29 = vmul.f32 %v2918_v25, %v1254_v27  ;;  %v1511_v48 = vpack.c.bf16 %v1493_v47, %v1493_v47  ;;  %v1181_v27 = vmul.f32 8.0, %v1179_v44 }
 0x1d4   : > { %2121 = vmatprep.subr.bf16.mxu1 %v2447_v1 }
 0x1d5   : > { %v1282_v51 = vpack.c.bf16 %v1263_v29, %v1263_v29 }
 0x1d7   : > { %2138 = vmatpush3.bf16.xpose.msra.mxu0 %v1511_v48  ;;  %v1212_v48 = vrot.slane %v1181_v27, %v2798_v49 }
 0x1d8   : > { %2143 = vmatprep.subr.bf16.mxu0 %v2447_v1 }
 0x1db   : > { %2122 = vmatpush3.bf16.xpose.msra.mxu1 %v1282_v51 }
 0x1dc   : > { %2127 = vmatprep.subr.bf16.mxu1 %v2447_v1 }
 0x224   : > { %v2936_v36 = vpop.f32.mrb[0].mxu0 }
 0x225   : > { %v2938_v52 = vpop.f32.mrb[1].mxu0  ;;  %v1182_v56 = vmul.f32 %v2936_v36, %v2936_v36 }
 0x226   : > { %v2940_v35 = vpop.f32.mrb[2].mxu0  ;;  %v1424_v55 = vmul.f32 %v2938_v52, %v2938_v52 }
 0x227   : > { %v2949_v61 = vpop.f32.mrb[3].mxu0  ;;  %v1183_v58 = vmul.f32 %v2940_v35, %v2940_v35 }
 0x228   : > { %1426 = vadd.xlane.f32.xlu0 %v1424_v55  ;;  %v1425_v53 = vmul.f32 %v2949_v61, %v2949_v61 }
 0x22a   : > { %1428 = vadd.xlane.f32.xlu1 %v1425_v53 }
 0x22c   : > { %1184 = vadd.xlane.f32.xlu0 %v1182_v56 }
 0x22e   : > { %1186 = vadd.xlane.f32.xlu1 %v1183_v58 }
 0x230   : > { %1496 = vadd.xlane.f32.xlu0 %v1495_v59 }
 0x232   : > { %1267 = vadd.xlane.f32.xlu1 %v1266_v60 }
 0x2b5   : > { %v1427_v62 = vpop.xlane.xlu0 %1426 }
 0x2b6   : > { %2387 = vrsqrt.f32 %v1427_v62  ;;  %vm1432_vm15 = vcmp.eq.f32.partialorder %v1427_v62, inf  ;;  %vm1434_vm0 = vcmp.eq.f32.partialorder %v1427_v62, 0.0  ;;  %v1435_v11 = vand.u32 2147483648, %v1427_v62 }
 0x2b7   : > { %v1429_v63 = vpop.xlane.xlu1 %1428 }
 0x2b8   : > { %2389 = vrsqrt.f32 %v1429_v63  ;;  %vm1439_vm1 = vcmp.eq.f32.partialorder %v1429_v63, inf  ;;  %vm1441_vm2 = vcmp.eq.f32.partialorder %v1429_v63, 0.0  ;;  %v1442_v14 = vand.u32 2147483648, %v1429_v63 }
 0x2b9   : > { %v1185_v0 = vpop.xlane.xlu0 %1184 }
 0x2ba   : > { %2391 = vrsqrt.f32 %v1185_v0  ;;  %vm1190_vm3 = vcmp.eq.f32.partialorder %v1185_v0, inf  ;;  %vm1192_vm4 = vcmp.eq.f32.partialorder %v1185_v0, 0.0  ;;  %v1193_v16 = vand.u32 2147483648, %v1185_v0 }
 0x2bb   : > { %v1187_v3 = vpop.xlane.xlu1 %1186 }
 0x2bc   : > { %2393 = vrsqrt.f32 %v1187_v3  ;;  %vm1197_vm5 = vcmp.eq.f32.partialorder %v1187_v3, inf  ;;  %vm1199_vm6 = vcmp.eq.f32.partialorder %v1187_v3, 0.0  ;;  %v1200_v21 = vand.u32 2147483648, %v1187_v3 }
 0x2bd   : > { %v1497_v4 = vpop.xlane.xlu0 %1496 }
 0x2be   : > { %2395 = vrsqrt.f32 %v1497_v4  ;;  %vm1500_vm7 = vcmp.eq.f32.partialorder %v1497_v4, inf  ;;  %vm1502_vm8 = vcmp.eq.f32.partialorder %v1497_v4, 0.0  ;;  %v1503_v32 = vand.u32 2147483648, %v1497_v4 }
 0x2bf   : > { %v1268_v8 = vpop.xlane.xlu1 %1267 }
 0x2c0   : > { %v2388_v10 = vpop.eup %2387  ;;  %2397 = vrsqrt.f32 %v1268_v8  ;;  %vm1271_vm9 = vcmp.eq.f32.partialorder %v1268_v8, inf  ;;  %vm1273_vm10 = vcmp.eq.f32.partialorder %v1268_v8, 0.0  ;;  %v1274_v40 = vand.u32 2147483648, %v1268_v8 }
 0x2c1   : > { %v1431_v2 = vmul.f32 %v2388_v10, %v1427_v62 }
 0x2c2   : > { %v2390_v13 = vpop.eup %2389 }
 0x2c3   : > { %v1433_v12 = vsel %vm1432_vm15, %v1427_v62, %v1431_v2  ;;  %v1438_v5 = vmul.f32 %v2390_v13, %v1429_v63 }
 0x2c4   : > { %v2392_v6 = vpop.eup %2391  ;;  %v1436_v20 = vsel %vm1434_vm0, %v1435_v11, %v1433_v12 }
 0x2c5   : > { %v1444_v15 = vmax.f32 %v1436_v20, 1e-12  ;;  %v1440_v7 = vsel %vm1439_vm1, %v1429_v63, %v1438_v5  ;;  %v1189_v9 = vmul.f32 %v2392_v6, %v1185_v0 }
 0x2c6   : > { %v2394_v17 = vpop.eup %2393  ;;  %v1443_v18 = vsel %vm1441_vm2, %v1442_v14, %v1440_v7 }
 0x2c7   : > { %2399 = vrcp.f32 %v1444_v15  ;;  %v1445_v22 = vmax.f32 %v1443_v18, 1e-12  ;;  %v1191_v23 = vsel %vm1190_vm3, %v1185_v0, %v1189_v9  ;;  %v1196_v24 = vmul.f32 %v2394_v17, %v1187_v3 }
 0x2c8   : > { %v2396_v26 = vpop.eup %2395  ;;  %v1194_v30 = vsel %vm1192_vm4, %v1193_v16, %v1191_v23 }
 0x2c9   : > { %2401 = vrcp.f32 %v1445_v22  ;;  %v1202_v33 = vmax.f32 %v1194_v30, 1e-12  ;;  %v1198_v34 = vsel %vm1197_vm5, %v1187_v3, %v1196_v24  ;;  %v1499_v37 = vmul.f32 %v2396_v26, %v1497_v4 }
 0x2ca   : > { %v2398_v38 = vpop.eup %2397  ;;  %v1201_v39 = vsel %vm1199_vm6, %v1200_v21, %v1198_v34 }
 0x2cb   : > { %2403 = vrcp.f32 %v1202_v33  ;;  %v1203_v41 = vmax.f32 %v1201_v39, 1e-12  ;;  %v1501_v42 = vsel %vm1500_vm7, %v1497_v4, %v1499_v37  ;;  %v1270_v43 = vmul.f32 %v2398_v38, %v1268_v8 }
 0x2cc   : > { %v1504_v45 = vsel %vm1502_vm8, %v1503_v32, %v1501_v42 }
 0x2cd   : > { %2405 = vrcp.f32 %v1203_v41  ;;  %v1505_v28 = vmax.f32 %v1504_v45, 1e-12  ;;  %v1272_v31 = vsel %vm1271_vm9, %v1268_v8, %v1270_v43 }
 0x2ce   : > { %v1275_v46 = vsel %vm1273_vm10, %v1274_v40, %v1272_v31 }
 0x2cf   : > { %2407 = vrcp.f32 %v1505_v28  ;;  %v1276_v47 = vmax.f32 %v1275_v46, 1e-12 }
 0x2d1   : > { %v2400_v29 = vpop.eup %2399  ;;  %2409 = vrcp.f32 %v1276_v47 }
 0x2d2   : > { %v1447_v51 = vmul.f32 %v2400_v29, %v2938_v52 }
 0x2d3   : > { %v2402_v55 = vpop.eup %2401 }
 0x2d4   : > { %v1449_v53 = vmul.f32 %v2402_v55, %v2949_v61  ;;  %v1450_v56 = vmul.f32 %v1447_v51, %v1212_v48 }
 0x2d5   : > { %v2404_v54 = vpop.eup %2403 }
 0x2d6   : > { %v1451_v58 = vmul.f32 %v1449_v53, %v1212_v48  ;;  %v1205_v59 = vmul.f32 %v2404_v54, %v2936_v36 }
 0x2d7   : > { %v2406_v60 = vpop.eup %2405 }
 0x2d8   : > { %v1509_v62 = vpack.c.bf16 %v1451_v58, %v1450_v56  ;;  %v1207_v63 = vmul.f32 %v2406_v60, %v2940_v35  ;;  %v1214_v3 = vmul.f32 %v1212_v48, %v1205_v59 }
 0x2d9   : > { %v2408_v0 = vpop.eup %2407 }
 0x2da   : > { %2140 = vmatmul.mubr.bf16.vlgmr.msra.gmra.mrb[12].mxu0 %v1509_v62  ;;  %v1215_v4 = vmul.f32 %v1212_v48, %v1207_v63  ;;  %v1507_v8 = vmul.f32 %v2408_v0, %v2947_v57 }
 0x2db   : > { %v2410_v10 = vpop.eup %2409  ;;  %2147 = vmatprep.mubr.msk.bf16.mxu0 %vm2448_vm14, %v2447_v1 }
 0x2dc   : > { %v1280_v52 = vpack.c.bf16 %v1215_v4, %v1214_v3  ;;  %v1278_v61 = vmul.f32 %v2410_v10, %v2947_v57  ;;  %v1508_v2 = vmul.f32 %v1507_v8, %v2918_v25  ;;  %v1160_v57 = vpop.f32.mrb[4].mxu0 }
 0x2dd   : > { %v1162_v20 = vpop.f32.mrb[5].mxu0 }
 0x2de   : > { %2124 = vmatmul.mubr.bf16.vlgmr.msra.gmra.mrb[8].mxu1 %v1280_v52  ;;  %v1279_v36 = vmul.f32 %v1278_v61, %v2914_v19  ;;  %v1556_v12 = vrot.slane %v1508_v2, %v2800_v50  ;;  %v1164_v19 = vpop.f32.mrb[6].mxu0 }
 0x2df   : > { %2131 = vmatprep.mubr.msk.bf16.mxu1 %vm2448_vm14, %v2447_v1  ;;  %v1366_v14 = vpack.c.bf16 %v1164_v19, %v1160_v57  ;;  %v1166_v25 = vpop.f32.mrb[7].mxu0  ;;  %v2319_v57 = vld [vmem:[%s3155_s9 + $0x24] ss:$8 sps:$4 sm:$0xff]   ;;  %v2322_v19 = vld [vmem:[%s3155_s9 + $0x34] ss:$8 sps:$4 sm:$0xff]  }
 0x2e0   : > { %v1327_v35 = vrot.slane %v1279_v36, %v2798_v49  ;;  %v1558_v5 = vmul.f32 %v1556_v12, %v1451_v58  ;;  %v1557_v6 = vmul.f32 %v1556_v12, %v1450_v56  ;;  %v1594_v15 = vpack.c.bf16 %v1166_v25, %v1162_v20  ;;  %v1170_v7 = vpop.f32.mrb[8].mxu0  ;;  %v2313_v12 = vld [vmem:[%s3155_s9 + $0x4] ss:$8 sps:$4 sm:$0xff]   ;;  %v2317_v20 = vld [vmem:[%s3155_s9 + $0x20] ss:$8 sps:$4 sm:$0xff]  }
 0x2e1   : > { %2128 = vmatpush3.bf16.msra.mxu1 %v1366_v14  ;;  %v1367_v9 = vpack.c.bf16 %v1170_v7, %v1170_v7  ;;  %v1172_v16 = vpop.f32.mrb[9].mxu0  ;;  %v2320_v14 = vld [vmem:[%s3155_s9 + $0x30] ss:$8 sps:$4 sm:$0xff]   ;;  %v2325_v25 = vld [vmem:[%s3155_s9 + $0x44] ss:$8 sps:$4 sm:$0xff]  }
 0x2e2   : > { %v1329_v13 = vmul.f32 %v1327_v35, %v1215_v4  ;;  %v1328_v11 = vmul.f32 %v1327_v35, %v1214_v3  ;;  %2144 = vmatpush3.bf16.msra.mxu0 %v1594_v15  ;;  %v1595_v17 = vpack.c.bf16 %v1172_v16, %v1172_v16  ;;  %v1174_v18 = vpop.f32.mrb[10].mxu0  ;;  %2129 = vmatprep.subr.bf16.mxu1 %v2447_v1  ;;  %v2323_v15 = vld [vmem:[%s3155_s9 + $0x40] ss:$8 sps:$4 sm:$0xff]   ;;  %v2328_v7 = vld [vmem:[%s3155_s9 + $0x54] ss:$8 sps:$4 sm:$0xff]  }
 0x2e3   : > { %v1379_v21 = vsel %vm1377_vm11, %v1367_v9, 0  ;;  %v1175_v22 = vpop.f32.mrb[11].mxu0  ;;  %2145 = vmatprep.subr.bf16.mxu0 %v2447_v1  ;;  %v2326_v9 = vld [vmem:[%s3155_s9 + $0x50] ss:$8 sps:$4 sm:$0xff]   ;;  %v2331_v16 = vld [vmem:[%s3155_s9 + $0x64] ss:$8 sps:$4 sm:$0xff]  }
 0x2e4   : > { %1332 = vadd.xlane.f32.xlu1 %v1329_v13  ;;  %1330 = vadd.xlane.f32.xlu0 %v1328_v11  ;;  %v1606_v23 = vsel %vm1377_vm11, %v1595_v17, 0  ;;  %v2311_v11 = vld [vmem:[%s3155_s9] ss:$8 sps:$4 sm:$0xff]   ;;  %v2334_v18 = vld [vmem:[%s3155_s9 + $0x74] ss:$8 sps:$4 sm:$0xff]  }
 0x2e5   : > { %2130 = vmatpush3.bf16.msra.mxu1 %v1379_v21  ;;  %v2329_v17 = vld [vmem:[%s3155_s9 + $0x60] ss:$8 sps:$4 sm:$0xff]   ;;  %v2332_v21 = vld [vmem:[%s3155_s9 + $0x70] ss:$8 sps:$4 sm:$0xff]   ;;  %v2337_v22 = vld [vmem:[%s3155_s9 + $0x84] ss:$8 sps:$4 sm:$0xff]  }
 0x2e6   : > { %2146 = vmatpush3.bf16.msra.mxu0 %v1606_v23  ;;  %1845 = vmatprep.subr.bf16.mxu1 %v2313_v12  ;;  %v2335_v23 = vld [vmem:[%s3155_s9 + $0x80] ss:$8 sps:$4 sm:$0xff]  }
 0x2e8   : > { %1561 = vadd.xlane.f32.xlu1 %v1558_v5  ;;  %1559 = vadd.xlane.f32.xlu0 %v1557_v6  ;;  %v2316_v5 = vld [vmem:[%s3155_s9 + $0x14] ss:$8 sps:$4 sm:$0xff]   ;;  %v2314_v6 = vld [vmem:[%s3155_s9 + $0x10] ss:$8 sps:$4 sm:$0xff]  }
 0x371   : > { %v2989_v42 = vpop.xlane.xlu0 %1330  ;;  %v2991_v43 = vpop.xlane.xlu1 %1332 }
 0x375   : > { %v2993_v44 = vpop.xlane.xlu0 %1559  ;;  %v2995_v45 = vpop.xlane.xlu1 %1561 }
 0x3ad   : > { %v1546_v24 = vpop.f32.mrb[12].mxu0 }
 0x3ae   : > { %v2141_v26 = vpop.f32.mrb[13].mxu0  ;;  %v1563_v30 = vsel %vm1334_vm12, %v1546_v24, -inf }
 0x3af   : > { %v1549_v32 = vpop.f32.mrb[14].mxu0  ;;  %1564 = vmax.xlane.f32.xlu0 %v1563_v30  ;;  %v2338_v26 = vld [vmem:[%s3155_s9 + $0x90] ss:$8 sps:$4 sm:$0xff]   ;;  %v2343_v30 = vld [vmem:[%s3155_s9 + $0xa4] ss:$8 sps:$4 sm:$0xff]  }
 0x3b0   : > { %v2142_v33 = vpop.f32.mrb[15].mxu0  ;;  %v1566_v34 = vsel %vm1334_vm12, %v1549_v32, -inf }
 0x3b1   : > { %v1317_v37 = vpop.f32.mrb[8].mxu1  ;;  %1567 = vmax.xlane.f32.xlu1 %v1566_v34  ;;  %v2346_v33 = vld [vmem:[%s3155_s9 + $0xb4] ss:$8 sps:$4 sm:$0xff]   ;;  %v2344_v34 = vld [vmem:[%s3155_s9 + $0xb0] ss:$8 sps:$4 sm:$0xff]  }
 0x3b2   : > { %v2125_v38 = vpop.f32.mrb[9].mxu1  ;;  %v1335_v39 = vsel %vm1334_vm12, %v1317_v37, -inf }
 0x3b3   : > { %v1320_v40 = vpop.f32.mrb[10].mxu1  ;;  %1336 = vmax.xlane.f32.xlu0 %v1335_v39  ;;  %v2347_v38 = vld [vmem:[%s3155_s9 + $0xc0] ss:$8 sps:$4 sm:$0xff]   ;;  %v2352_v39 = vld [vmem:[%s3155_s9 + $0xd4] ss:$8 sps:$4 sm:$0xff]  }
 0x3b4   : > { %v2126_v1 = vpop.f32.mrb[11].mxu1  ;;  %v1338_v41 = vsel %vm1334_vm12, %v1320_v40, -inf }
 0x3b5   : > { %1339 = vmax.xlane.f32.xlu1 %v1338_v41  ;;  %v2355_v1 = vld [vmem:[%s3155_s9 + $0xe4] ss:$8 sps:$4 sm:$0xff]   ;;  %v2353_v41 = vld [vmem:[%s3155_s9 + $0xe0] ss:$8 sps:$4 sm:$0xff]  }
 0x43c   : > { %v1565_v28 = vpop.xlane.xlu0 %1564 }
 0x43d   : > { %v2998_v31 = vmax.f32 %v1565_v28, %v2993_v44  ;;  %v2358_v28 = vld [vmem:[%s3155_s9 + $0xf4] ss:$8 sps:$4 sm:$0xff]  }
 0x43e   : > { %v1568_v46 = vpop.xlane.xlu1 %1567 }
 0x43f   : > { %v1571_v27 = vsub.f32 %v1546_v24, %v2998_v31  ;;  %v1577_v47 = vsub.f32 %v2993_v44, %v2998_v31  ;;  %v3004_v29 = vmax.f32 %v1568_v46, %v2995_v45  ;;  %v2340_v24 = vld [vmem:[%s3155_s9 + $0x94] ss:$8 sps:$4 sm:$0xff]   ;;  %v2356_v46 = vld [vmem:[%s3155_s9 + $0xf0] ss:$8 sps:$4 sm:$0xff]  }
 0x440   : > { %v1337_v48 = vpop.xlane.xlu0 %1336 }
 0x441   : > { %v1573_v51 = vmul.f32 1.442695, %v1571_v27  ;;  %v1572_v55 = vsub.f32 %v1549_v32, %v3004_v29  ;;  %v1578_v53 = vsub.f32 %v2995_v45, %v3004_v29  ;;  %v3010_v54 = vmax.f32 %v1337_v48, %v2989_v42  ;;  %v2341_v32 = vld [vmem:[%s3155_s9 + $0xa0] ss:$8 sps:$4 sm:$0xff]  }
 0x442   : > { %v1340_v56 = vpop.xlane.xlu1 %1339  ;;  %v1579_v27 = vmul.f32 1.442695, %v1577_v47 }
 0x443   : > { %2411 = vpow2.f32 %v1573_v51  ;;  %v1575_v58 = vmul.f32 1.442695, %v1572_v55  ;;  %v3013_v59 = vmax.f32 %v1340_v56, %v2991_v43  ;;  %v1343_v60 = vsub.f32 %v1317_v37, %v3010_v54  ;;  %v2349_v37 = vld [vmem:[%s3155_s9 + $0xc4] ss:$8 sps:$4 sm:$0xff]  }
 0x444   : > { %v1349_v48 = vsub.f32 %v2989_v42, %v3010_v54  ;;  %v1581_v51 = vmul.f32 1.442695, %v1578_v53 }
 0x445   : > { %2413 = vpow2.f32 %v1575_v58  ;;  %v1344_v62 = vsub.f32 %v1320_v40, %v3013_v59  ;;  %v1345_v63 = vmul.f32 1.442695, %v1343_v60  ;;  %v2350_v40 = vld [vmem:[%s3155_s9 + $0xd0] ss:$8 sps:$4 sm:$0xff]   ;;  %v1350_v55 = vsub.f32 %v2991_v43, %v3013_v59  ;;  %v1178_v43 = vld [vmem:[%s3152_s6] sm:$0x3] }
 0x446   : > { %v1351_v56 = vmul.f32 1.442695, %v1349_v48 }
 0x447   : > { %v1347_v0 = vmul.f32 1.442695, %v1344_v62  ;;  %2415 = vpow2.f32 %v1345_v63  ;;  %v1353_v58 = vmul.f32 1.442695, %v1350_v55 }
 0x449   : > { %2417 = vpow2.f32 %v1347_v0  ;;  %v1599_v0 = vrot.slane %v1178_v43, %v2800_v50 }
 0x44a   : > { %2419 = vpow2.f32 %v1579_v27 }
 0x44b   : > { %2421 = vpow2.f32 %v1581_v51 }
 0x44c   : > { %2423 = vpow2.f32 %v1351_v56 }
 0x44d   : > { %v2412_v3 = vpop.eup %2411  ;;  %2425 = vpow2.f32 %v1353_v58 }
 0x44e   : > { %v1583_v4 = vsel %vm1334_vm12, %v2412_v3, 0.0 }
 0x44f   : > { %v2414_v8 = vpop.eup %2413  ;;  %1584 = vadd.xlane.f32.xlu0 %v1583_v4 }
 0x450   : > { %v1586_v10 = vsel %vm1334_vm12, %v2414_v8, 0.0  ;;  %v1593_v52 = vpack.c.bf16 %v2414_v8, %v2412_v3  ;;  %v1371_v8 = vrot.slane %v1178_v43, %v2798_v49 }
 0x451   : > { %1587 = vadd.xlane.f32.xlu1 %v1586_v10  ;;  %v2416_v61 = vpop.eup %2415 }
 0x452   : > { %2148 = vmatmul.mubr.msk.bf16.vlgmr.msra.gmra.mrb[16].mxu0 %vm1334_vm12, %v1593_v52  ;;  %v1355_v36 = vsel %vm1334_vm12, %v2416_v61, 0.0 }
 0x453   : > { %v2418_v2 = vpop.eup %2417  ;;  %1356 = vadd.xlane.f32.xlu0 %v1355_v36 }
 0x454   : > { %v1358_v35 = vsel %vm1334_vm12, %v2418_v2, 0.0  ;;  %v1365_v13 = vpack.c.bf16 %v2418_v2, %v2416_v61  ;;  %v2420_v44 = vpop.eup %2419 }
 0x455   : > { %1359 = vadd.xlane.f32.xlu1 %v1358_v35  ;;  %v2422_v47 = vpop.eup %2421  ;;  %v1600_v3 = vmul.f32 %v2420_v44, %v1599_v0 }
 0x456   : > { %2132 = vmatmul.mubr.msk.bf16.vlgmr.msra.gmra.mrb[12].mxu1 %vm1334_vm12, %v1365_v13  ;;  %v2424_v54 = vpop.eup %2423  ;;  %v1601_v61 = vmul.f32 %v2422_v47, %v1599_v0 }
 0x457   : > { %1846 = vmatpush1.bf16.msra.mxu1 %v2311_v11  ;;  %v2426_v53 = vpop.eup %2425 }
 0x458   : > { %1847 = vmatprep.subr.bf16.mxu1 %v2316_v5  ;;  %v1372_v5 = vmul.f32 %v2424_v54, %v1371_v8 }
 0x45b   : > { %1848 = vmatpush1.bf16.msra.mxu1 %v2314_v6 }
 0x45c   : > { %1849 = vmatprep.subr.bf16.mxu1 %v2319_v57 }
 0x45f   : > { %1850 = vmatpush1.bf16.msra.mxu1 %v2317_v20 }
 0x460   : > { %1851 = vmatprep.subr.bf16.mxu1 %v2322_v19  ;;  %v1373_v19 = vmul.f32 %v2426_v53, %v1371_v8 }
 0x463   : > { %1852 = vmatpush1.bf16.msra.mxu1 %v2320_v14 }
 0x464   : > { %1853 = vmatprep.subr.bf16.mxu1 %v2325_v25 }
 0x467   : > { %1854 = vmatpush1.bf16.msra.mxu1 %v2323_v15 }
 0x468   : > { %1855 = vmatprep.subr.bf16.mxu1 %v2328_v7 }
 0x46b   : > { %1856 = vmatpush1.bf16.msra.mxu1 %v2326_v9 }
 0x46c   : > { %1857 = vmatprep.subr.bf16.mxu1 %v2331_v16 }
 0x46f   : > { %1858 = vmatpush1.bf16.msra.mxu1 %v2329_v17 }
 0x470   : > { %1859 = vmatprep.subr.bf16.mxu1 %v2334_v18 }
 0x473   : > { %1860 = vmatpush1.bf16.msra.mxu1 %v2332_v21 }
 0x474   : > { %1861 = vmatprep.subr.bf16.mxu1 %v2337_v22  ;;  %v2435_v22 = vld [vmem:[%s2535_s28] sm:$0xff] }
 0x477   : > { %1862 = vmatpush1.bf16.msra.mxu1 %v2335_v23 }
 0x478   : > { %1863 = vmatprep.subr.bf16.mxu1 %v2340_v24 }
 0x47b   : > { %1864 = vmatpush1.bf16.msra.mxu1 %v2338_v26  ;;  %v2436_v26 = vld [vmem:[%s2535_s28 + $0x8] sm:$0xff] }
 0x47c   : > { %1865 = vmatprep.subr.bf16.mxu1 %v2343_v30 }
 0x47f   : > { %1866 = vmatpush1.bf16.msra.mxu1 %v2341_v32 }
 0x480   : > { %1867 = vmatprep.subr.bf16.mxu1 %v2346_v33  ;;  %v2437_v33 = vld [vmem:[%s2535_s28 + $0x10] sm:$0xff] }
 0x483   : > { %1868 = vmatpush1.bf16.msra.mxu1 %v2344_v34 }
 0x484   : > { %1869 = vmatprep.subr.bf16.mxu1 %v2349_v37 }
 0x487   : > { %1870 = vmatpush1.bf16.msra.mxu1 %v2347_v38  ;;  %v2438_v38 = vld [vmem:[%s2535_s28 + $0x18] sm:$0xff] }
 0x488   : > { %1871 = vmatprep.subr.bf16.mxu1 %v2352_v39 }
 0x48b   : > { %1872 = vmatpush1.bf16.msra.mxu1 %v2350_v40 }
 0x48c   : > { %1873 = vmatprep.subr.bf16.mxu1 %v2355_v1 }
 0x48f   : > { %1874 = vmatpush1.bf16.msra.mxu1 %v2353_v41 }
 0x490   : > { %1875 = vmatprep.subr.bf16.mxu1 %v2358_v28 }
 0x493   : > { %1876 = vmatpush1.bf16.msra.mxu1 %v2356_v46 }
 0x4dc   : > { %v1585_v60 = vpop.xlane.xlu0 %1584 }
 0x4dd   : > { %v1589_v31 = vadd.f32 %v2420_v44, %v1585_v60 }
 0x4de   : > { %v1588_v62 = vpop.xlane.xlu1 %1587 }
 0x4df   : > { %v1590_v63 = vadd.f32 %v2422_v47, %v1588_v62  ;;  %2427 = vrcp.f32 %v1589_v31 }
 0x4e0   : > { %v1357_v42 = vpop.xlane.xlu0 %1356 }
 0x4e1   : > { %v1361_v29 = vadd.f32 %v2424_v54, %v1357_v42  ;;  %2429 = vrcp.f32 %v1590_v63 }
 0x4e2   : > { %v1360_v45 = vpop.xlane.xlu1 %1359 }
 0x4e3   : > { %v1362_v59 = vadd.f32 %v2426_v53, %v1360_v45  ;;  %2431 = vrcp.f32 %v1361_v29 }
 0x4e5   : > { %2433 = vrcp.f32 %v1362_v59 }
 0x4e9   : > { %v2428_v36 = vpop.eup %2427 }
 0x4eb   : > { %v2430_v12 = vpop.eup %2429 }
 0x4ed   : > { %v2432_v14 = vpop.eup %2431 }
 0x4ef   : > { %v2434_v16 = vpop.eup %2433 }
 0x525   : > { %v1642_v4 = vpop.f32.mrb[16].mxu0 }
 0x526   : > { %v1643_v10 = vadd.f32 %v1642_v4, %v1600_v3  ;;  %v2149_v52 = vpop.f32.mrb[17].mxu0 }
 0x527   : > { %v1645_v2 = vpop.f32.mrb[18].mxu0 }
 0x528   : > { %v1649_v35 = vmul.f32 %v2428_v36, %v1643_v10  ;;  %v1646_v13 = vadd.f32 %v1645_v2, %v1601_v61  ;;  %v2150_v11 = vpop.f32.mrb[19].mxu0 }
 0x529   : > { %v1415_v57 = vpop.f32.mrb[12].mxu1 }
 0x52a   : > { %v1650_v6 = vmul.f32 %v2430_v12, %v1646_v13  ;;  %v1416_v50 = vadd.f32 %v1415_v57, %v1372_v5  ;;  %v2133_v20 = vpop.f32.mrb[13].mxu1 }
 0x52b   : > { %v1418_v49 = vpop.f32.mrb[14].mxu1 }
 0x52c   : > { %v1652_v25 = vpack.c.bf16 %v1650_v6, %v1649_v35  ;;  %v1422_v15 = vmul.f32 %v2432_v14, %v1416_v50  ;;  %v1419_v7 = vadd.f32 %v1418_v49, %v1373_v19  ;;  %v2134_v9 = vpop.f32.mrb[15].mxu1 }
 0x52e   : > { %1877 = vmatprep.mubr.bf16.mxu1 %v1652_v25  ;;  %v1423_v17 = vmul.f32 %v2434_v16, %v1419_v7 }
 0x530   : > { %v1651_v18 = vpack.c.bf16 %v1423_v17, %v1422_v15 }
 0x532   : > { %1878 = vmatmul.mubr.bf16.vlgmr.msra.gmra.mrb[16].mxu1 %v1651_v18 }
 0x605   : > { %v1879_v21 = vpop.f32.mrb[16].mxu1 }
 0x606   : > { %v1880_v23 = vadd.f32 %v2435_v22, %v1879_v21  ;;  %v1881_v24 = vpop.f32.mrb[17].mxu1 }
 0x607   : > { %v1882_v30 = vadd.f32 %v2436_v26, %v1881_v24  ;;  %v1883_v32 = vpop.f32.mrb[18].mxu1 }
 0x608   : > { %1888 = vst [vmem:[%s379_s21] sm:$0xff] %v1880_v23  ;;  %v1884_v34 = vadd.f32 %v2437_v33, %v1883_v32  ;;  %v1885_v37 = vpop.f32.mrb[19].mxu1 }
 0x609   : > { %1889 = vst [vmem:[%s379_s21 + $0x8] sm:$0xff] %v1882_v30  ;;  %v1886_v39 = vadd.f32 %v2438_v38, %v1885_v37 }
 0x60a   : > { %1890 = vst [vmem:[%s379_s21 + $0x10] sm:$0xff] %v1884_v34 }
 0x60b   : > { %1891 = vst [vmem:[%s379_s21 + $0x18] sm:$0xff] %v1886_v39 }
 0x60c PF: > { %s20_s13 = sadd.s32 1, %s2445_s13  }
 0x60d   : > { %p17_p4 = scmp.ge.s32.totalorder %s20_s13, 4  }
 0x60f   :  { %19 = sbr.rel (!%p17_p4) target bundleno = 1 (0x1), region = 93 }

// kernel: transformer_blocks_forward.12
= control target key start
LH: loop header
LB: loop body
LE: loop exit
PB: predicated region body
PF: predicated region fallthrough
CT: control target
= control target key end

     0   :  { %s2504_s21 = smov 0   ;;  %s3228_s0 = inlined_call_operand.vmem [shape: f32[32,256], index: 0, kind: input, shape index: {}]   ;;  %s3229_s1 = inlined_call_operand.vmem [shape: f32[1,256], index: 1, kind: input, shape index: {}]   ;;  %s3230_s2 = inlined_call_operand.vmem [shape: bf16[256,512], index: 2, kind: input, shape index: {}]   ;;  %s3231_s3 = inlined_call_operand.vmem [shape: bf16[256,512], index: 3, kind: input, shape index: {}]   ;;  %s3232_s4 = inlined_call_operand.vmem [shape: f32[1,512], index: 4, kind: input, shape index: {}]   ;;  %s3233_s5 = inlined_call_operand.vmem [shape: bf16[512,256], index: 5, kind: input, shape index: {}]   ;;  %s3234_s6 = inlined_call_operand.vmem [shape: f32[32,256], index: 6, kind: output, shape index: {}]  }
   0x1 LB: > { %s1922_s22 = sadd.s32 4294967295, %s2467_s21   ;;  %p1926_p0 = scmp.ge.s32.totalorder %s2467_s21, 1  ;;  %s2467_s21 = sphi %s2504_s21, %s16_s21  }
   0x2   : > { %p214_p1 = scmp.lt.s32.totalorder %s2467_s21, 3 }
   0x4   : > { %p215_p2 = pnand %p1926_p0, %p214_p1 }
   0x5   : > { %s1927_s23 = sshll.u32 (!%p215_p2), %s1922_s22, 1  ;;  %v2145_v6 = vld [vmem:[%s3230_s2 + $0x4] ss:$16 sps:$4 sm:$0xff] (!%p215_p2)   ;;  %v2147_v7 = vld [vmem:[%s3230_s2] ss:$16 sps:$4 sm:$0xff] (!%p215_p2)  }
   0x6   : > { %218 = sbr.rel (%p215_p2) target bundleno = 1285 (0x505), region = 44  ;;  %p247_p3 = scmp.lt.s32.totalorder (!%p215_p2), %s1927_s23, 3  ;;  %v2148_v8 = vld [vmem:[%s3231_s3 + $0x4] ss:$16 sps:$4 sm:$0xff] (!%p215_p2)   ;;  %v2150_v9 = vld [vmem:[%s3231_s3] ss:$16 sps:$4 sm:$0xff] (!%p215_p2)   ;;  %699 = vmatprep.subr.bf16.mxu1 (!%p215_p2), %v2145_v6 }
   0x7   : > { %v2151_v10 = vld [vmem:[%s3230_s2 + $0x24] ss:$16 sps:$4 sm:$0xff] (!%p215_p2)   ;;  %1169 = vmatprep.subr.bf16.mxu0 (!%p215_p2), %v2148_v8  ;;  %700 = vmatpush1.bf16.msra.mxu1 (!%p215_p2), %v2147_v7  ;;  %v2153_v12 = vld [vmem:[%s3230_s2 + $0x20] ss:$16 sps:$4 sm:$0xff] (!%p215_p2)  }
   0x8   : > { %v2154_v11 = vld [vmem:[%s3231_s3 + $0x24] ss:$16 sps:$4 sm:$0xff] (!%p215_p2)   ;;  %1170 = vmatpush1.bf16.msra.mxu0 (!%p215_p2), %v2150_v9  ;;  %v2156_v13 = vld [vmem:[%s3231_s3 + $0x20] ss:$16 sps:$4 sm:$0xff] (!%p215_p2)   ;;  %701 = vmatprep.subr.bf16.mxu1 (!%p215_p2), %v2151_v10 }
   0x9   : > { %1171 = vmatprep.subr.bf16.mxu0 (!%p215_p2), %v2154_v11  ;;  %v2157_v14 = vld [vmem:[%s3230_s2 + $0x44] ss:$16 sps:$4 sm:$0xff] (!%p215_p2)   ;;  %v2159_v16 = vld [vmem:[%s3230_s2 + $0x40] ss:$16 sps:$4 sm:$0xff] (!%p215_p2)  }
   0xa   : > { %v2160_v15 = vld [vmem:[%s3231_s3 + $0x44] ss:$16 sps:$4 sm:$0xff] (!%p215_p2)   ;;  %v2162_v17 = vld [vmem:[%s3231_s3 + $0x40] ss:$16 sps:$4 sm:$0xff] (!%p215_p2)  }
   0xb   : > { %702 = vmatpush1.bf16.msra.mxu1 (!%p215_p2), %v2153_v12  ;;  %v2163_v18 = vld [vmem:[%s3230_s2 + $0x64] ss:$16 sps:$4 sm:$0xff] (!%p215_p2)   ;;  %v2165_v20 = vld [vmem:[%s3230_s2 + $0x60] ss:$16 sps:$4 sm:$0xff] (!%p215_p2)  }
   0xc   : > { %1172 = vmatpush1.bf16.msra.mxu0 (!%p215_p2), %v2156_v13  ;;  %703 = vmatprep.subr.bf16.mxu1 (!%p215_p2), %v2157_v14  ;;  %v2166_v19 = vld [vmem:[%s3231_s3 + $0x64] ss:$16 sps:$4 sm:$0xff] (!%p215_p2)   ;;  %v2168_v21 = vld [vmem:[%s3231_s3 + $0x60] ss:$16 sps:$4 sm:$0xff] (!%p215_p2)  }
   0xd   : > { %s3236_s23 = smov (!%p247_p3, %s1927_s23), 3  ;;  %1173 = vmatprep.subr.bf16.mxu0 %v2160_v15  ;;  %v2169_v22 = vld [vmem:[%s3230_s2 + $0x84] ss:$16 sps:$4 sm:$0xff]   ;;  %v2171_v24 = vld [vmem:[%s3230_s2 + $0x80] ss:$16 sps:$4 sm:$0xff]  }
   0xe   : > { %s2127_s24 = sshll.u32 %s3236_s23, 4  ;;  %v2172_v23 = vld [vmem:[%s3231_s3 + $0x84] ss:$16 sps:$4 sm:$0xff]   ;;  %v2174_v25 = vld [vmem:[%s3231_s3 + $0x80] ss:$16 sps:$4 sm:$0xff]  }
   0xf   : > { %s2520_s27 = scalar_lea.vmem %s3228_s0, %s2127_s24  ;;  %704 = vmatpush1.bf16.msra.mxu1 %v2159_v16  ;;  %v2175_v26 = vld [vmem:[%s3230_s2 + $0xa4] ss:$16 sps:$4 sm:$0xff]   ;;  %v2177_v28 = vld [vmem:[%s3230_s2 + $0xa0] ss:$16 sps:$4 sm:$0xff]   ;;  %s258_s14 = scalar_lea.vmem %s3234_s6, %s2127_s24 }
  0x10   : > { %v2523_v0 = vld [vmem:[%s2520_s27] sm:$0xff]  ;;  %v2526_v1 = vld [vmem:[%s2520_s27 + $0x8] sm:$0xff]  ;;  %v2529_v2 = vld [vmem:[%s2520_s27 + $0x10] sm:$0xff]  ;;  %1174 = vmatpush1.bf16.msra.mxu0 %v2162_v17  ;;  %705 = vmatprep.subr.bf16.mxu1 %v2163_v18 }
  0x11   : > { %v265_v3 = vadd.f32 %v2526_v1, %v2523_v0  ;;  %v2534_v4 = vld [vmem:[%s2520_s27 + $0x18] sm:$0xff]  ;;  %1175 = vmatprep.subr.bf16.mxu0 %v2166_v19  ;;  %v2178_v27 = vld [vmem:[%s3231_s3 + $0xa4] ss:$16 sps:$4 sm:$0xff]   ;;  %v2180_v29 = vld [vmem:[%s3231_s3 + $0xa0] ss:$16 sps:$4 sm:$0xff]  }
  0x12   : > { %v268_v5 = vadd.f32 %v2534_v4, %v2529_v2  ;;  %v2181_v30 = vld [vmem:[%s3230_s2 + $0xc4] ss:$16 sps:$4 sm:$0xff]   ;;  %v2183_v32 = vld [vmem:[%s3230_s2 + $0xc0] ss:$16 sps:$4 sm:$0xff]  }
  0x13   : > { %266 = vadd.xlane.f32.xlu0 %v265_v3  ;;  %706 = vmatpush1.bf16.msra.mxu1 %v2165_v20  ;;  %v2184_v31 = vld [vmem:[%s3231_s3 + $0xc4] ss:$16 sps:$4 sm:$0xff]   ;;  %v2186_v33 = vld [vmem:[%s3231_s3 + $0xc0] ss:$16 sps:$4 sm:$0xff]   ;;  %v2243_v20 = vld [vmem:[%s3230_s2 + $0xc] ss:$16 sps:$4 sm:$0xff]  }
  0x14   : > { %1176 = vmatpush1.bf16.msra.mxu0 %v2168_v21  ;;  %707 = vmatprep.subr.bf16.mxu1 %v2169_v22  ;;  %v2187_v34 = vld [vmem:[%s3230_s2 + $0xe4] ss:$16 sps:$4 sm:$0xff]   ;;  %v2189_v36 = vld [vmem:[%s3230_s2 + $0xe0] ss:$16 sps:$4 sm:$0xff]  }
  0x15   : > { %1177 = vmatprep.subr.bf16.mxu0 %v2172_v23  ;;  %v2190_v35 = vld [vmem:[%s3231_s3 + $0xe4] ss:$16 sps:$4 sm:$0xff]   ;;  %v2192_v37 = vld [vmem:[%s3231_s3 + $0xe0] ss:$16 sps:$4 sm:$0xff]  }
  0x16   : > { %v2193_v38 = vld [vmem:[%s3230_s2 + $0x104] ss:$16 sps:$4 sm:$0xff]   ;;  %v2195_v40 = vld [vmem:[%s3230_s2 + $0x100] ss:$16 sps:$4 sm:$0xff]  }
  0x17   : > { %269 = vadd.xlane.f32.xlu0 %v268_v5  ;;  %708 = vmatpush1.bf16.msra.mxu1 %v2171_v24  ;;  %v2196_v39 = vld [vmem:[%s3231_s3 + $0x104] ss:$16 sps:$4 sm:$0xff]   ;;  %v2198_v41 = vld [vmem:[%s3231_s3 + $0x100] ss:$16 sps:$4 sm:$0xff]  }
  0x18   : > { %1178 = vmatpush1.bf16.msra.mxu0 %v2174_v25  ;;  %709 = vmatprep.subr.bf16.mxu1 %v2175_v26  ;;  %v2199_v42 = vld [vmem:[%s3230_s2 + $0x124] ss:$16 sps:$4 sm:$0xff]   ;;  %v2201_v44 = vld [vmem:[%s3230_s2 + $0x120] ss:$16 sps:$4 sm:$0xff]   ;;  %v299_v26 = vlaneseq }
  0x19   : > { %1179 = vmatprep.subr.bf16.mxu0 %v2178_v27  ;;  %v2202_v43 = vld [vmem:[%s3231_s3 + $0x124] ss:$16 sps:$4 sm:$0xff]   ;;  %v2204_v45 = vld [vmem:[%s3231_s3 + $0x120] ss:$16 sps:$4 sm:$0xff]  }
  0x1a   : > { %v2205_v60 = vld [vmem:[%s3230_s2 + $0x144] ss:$16 sps:$4 sm:$0xff]   ;;  %v2207_v61 = vld [vmem:[%s3230_s2 + $0x140] ss:$16 sps:$4 sm:$0xff]  }
  0x1b   : > { %710 = vmatpush1.bf16.msra.mxu1 %v2177_v28  ;;  %v2208_v62 = vld [vmem:[%s3231_s3 + $0x144] ss:$16 sps:$4 sm:$0xff]   ;;  %v2210_v63 = vld [vmem:[%s3231_s3 + $0x140] ss:$16 sps:$4 sm:$0xff]   ;;  %v2753_v28 = vshrl.u32 %v299_v26, 7 }
  0x1c   : > { %1180 = vmatpush1.bf16.msra.mxu0 %v2180_v29  ;;  %711 = vmatprep.subr.bf16.mxu1 %v2181_v30  ;;  %v2216_v3 = vld [vmem:[%s3231_s3 + $0x160] ss:$16 sps:$4 sm:$0xff]   ;;  %v2220_v6 = vld [vmem:[%s3231_s3 + $0x184] ss:$16 sps:$4 sm:$0xff]   ;;  %v2307_v26 = vld [vmem:[%s3231_s3 + $0xc8] ss:$16 sps:$4 sm:$0xff]  }
  0x1d   : > { %1181 = vmatprep.subr.bf16.mxu0 %v2184_v31  ;;  %v2219_v5 = vld [vmem:[%s3230_s2 + $0x180] ss:$16 sps:$4 sm:$0xff]   ;;  %v2223_v8 = vld [vmem:[%s3230_s2 + $0x1a4] ss:$16 sps:$4 sm:$0xff]   ;;  %v305_v29 = vsub.s32 1, %v2753_v28  ;;  %v301_v30 = vsub.s32 0, %v2753_v28 }
  0x1e   : > { %v2222_v7 = vld [vmem:[%s3231_s3 + $0x180] ss:$16 sps:$4 sm:$0xff]   ;;  %v2226_v9 = vld [vmem:[%s3231_s3 + $0x1a4] ss:$16 sps:$4 sm:$0xff]  }
  0x1f   : > { %712 = vmatpush1.bf16.msra.mxu1 %v2183_v32  ;;  %v2225_v10 = vld [vmem:[%s3230_s2 + $0x1a0] ss:$16 sps:$4 sm:$0xff]   ;;  %v2229_v12 = vld [vmem:[%s3230_s2 + $0x1c4] ss:$16 sps:$4 sm:$0xff]  }
  0x20   : > { %1182 = vmatpush1.bf16.msra.mxu0 %v2186_v33  ;;  %713 = vmatprep.subr.bf16.mxu1 %v2187_v34  ;;  %v2228_v11 = vld [vmem:[%s3231_s3 + $0x1a0] ss:$16 sps:$4 sm:$0xff]   ;;  %v2232_v13 = vld [vmem:[%s3231_s3 + $0x1c4] ss:$16 sps:$4 sm:$0xff]  }
  0x21   : > { %1183 = vmatprep.subr.bf16.mxu0 %v2190_v35  ;;  %v2231_v14 = vld [vmem:[%s3230_s2 + $0x1c0] ss:$16 sps:$4 sm:$0xff]   ;;  %v2235_v16 = vld [vmem:[%s3230_s2 + $0x1e4] ss:$16 sps:$4 sm:$0xff]  }
  0x22   : > { %v2234_v15 = vld [vmem:[%s3231_s3 + $0x1c0] ss:$16 sps:$4 sm:$0xff]   ;;  %v2238_v17 = vld [vmem:[%s3231_s3 + $0x1e4] ss:$16 sps:$4 sm:$0xff]  }
  0x23   : > { %714 = vmatpush1.bf16.msra.mxu1 %v2189_v36  ;;  %v2237_v18 = vld [vmem:[%s3230_s2 + $0x1e0] ss:$16 sps:$4 sm:$0xff]  }
  0x24   : > { %1184 = vmatpush1.bf16.msra.mxu0 %v2192_v37  ;;  %715 = vmatprep.subr.bf16.mxu1 %v2193_v38  ;;  %v2240_v19 = vld [vmem:[%s3231_s3 + $0x1e0] ss:$16 sps:$4 sm:$0xff]  }
  0x25   : > { %1185 = vmatprep.subr.bf16.mxu0 %v2196_v39  ;;  %v264_v32 = vld [vmem:[%s3229_s1] sm:$0x3] }
  0x26   : > { %v306_v34 = vrot.slane %v264_v32, %v305_v29  ;;  %v302_v36 = vrot.slane %v264_v32, %v301_v30  ;;  %v2315_v32 = vld [vmem:[%s3231_s3 + $0x10c] ss:$16 sps:$4 sm:$0xff]  }
  0x27   : > { %716 = vmatpush1.bf16.msra.mxu1 %v2195_v40 }
  0x28   : > { %1186 = vmatpush1.bf16.msra.mxu0 %v2198_v41  ;;  %717 = vmatprep.subr.bf16.mxu1 %v2199_v42 }
  0x29   : > { %1187 = vmatprep.subr.bf16.mxu0 %v2202_v43 }
  0x2b   : > { %718 = vmatpush1.bf16.msra.mxu1 %v2201_v44 }
  0x2c   : > { %1188 = vmatpush1.bf16.msra.mxu0 %v2204_v45  ;;  %719 = vmatprep.subr.bf16.mxu1 %v2205_v60  ;;  %v2241_v45 = vld [vmem:[%s3230_s2 + $0x8] ss:$16 sps:$4 sm:$0xff]  }
  0x2d   : > { %1189 = vmatprep.subr.bf16.mxu0 %v2208_v62  ;;  %v2262_v60 = vld [vmem:[%s3230_s2 + $0xe8] ss:$16 sps:$4 sm:$0xff]  }
  0x2e   : > { %v2265_v62 = vld [vmem:[%s3230_s2 + $0x108] ss:$16 sps:$4 sm:$0xff]  }
  0x2f   : > { %720 = vmatpush1.bf16.msra.mxu1 %v2207_v61  ;;  %v2267_v61 = vld [vmem:[%s3230_s2 + $0x10c] ss:$16 sps:$4 sm:$0xff]  }
  0x30   : > { %1190 = vmatpush1.bf16.msra.mxu0 %v2210_v63  ;;  %v2270_v63 = vld [vmem:[%s3230_s2 + $0x12c] ss:$16 sps:$4 sm:$0xff]  }
  0xa0   : > { %v267_v46 = vpop.xlane.xlu0 %266 }
  0xa1   : > { %v272_v47 = vmul.f32 0.00390625, %v267_v46 }
  0xa3   : > { %v2659_v48 = vsub.f32 %v2523_v0, %v272_v47  ;;  %v2662_v49 = vsub.f32 %v2526_v1, %v272_v47  ;;  %v2211_v0 = vld [vmem:[%s3230_s2 + $0x164] ss:$16 sps:$4 sm:$0xff]   ;;  %v2213_v1 = vld [vmem:[%s3230_s2 + $0x160] ss:$16 sps:$4 sm:$0xff]   ;;  %v2246_v47 = vld [vmem:[%s3230_s2 + $0x2c] ss:$16 sps:$4 sm:$0xff]  }
  0xa4   : > { %v270_v50 = vpop.xlane.xlu0 %269  ;;  %721 = vmatprep.subr.bf16.mxu1 %v2211_v0  ;;  %v2268_v0 = vld [vmem:[%s3230_s2 + $0x128] ss:$16 sps:$4 sm:$0xff]  }
  0xa5   : > { %v273_v51 = vmul.f32 0.00390625, %v270_v50  ;;  %v278_v52 = vmul.f32 %v2659_v48, %v2659_v48  ;;  %v279_v53 = vmul.f32 %v2662_v49, %v2662_v49  ;;  %722 = vmatpush1.bf16.msra.mxu1 %v2213_v1  ;;  %v2247_v50 = vld [vmem:[%s3230_s2 + $0x48] ss:$16 sps:$4 sm:$0xff]   ;;  %v2273_v1 = vld [vmem:[%s3230_s2 + $0x14c] ss:$16 sps:$4 sm:$0xff]  }
  0xa7   : > { %v2669_v54 = vsub.f32 %v2529_v2, %v273_v51  ;;  %v2672_v55 = vsub.f32 %v2534_v4, %v273_v51  ;;  %v282_v56 = vadd.f32 %v279_v53, %v278_v52  ;;  %v2214_v2 = vld [vmem:[%s3231_s3 + $0x164] ss:$16 sps:$4 sm:$0xff]   ;;  %v2252_v51 = vld [vmem:[%s3230_s2 + $0x6c] ss:$16 sps:$4 sm:$0xff]   ;;  %v2250_v52 = vld [vmem:[%s3230_s2 + $0x68] ss:$16 sps:$4 sm:$0xff]  }
  0xa8   : > { %1191 = vmatprep.subr.bf16.mxu0 %v2214_v2  ;;  %v2217_v4 = vld [vmem:[%s3230_s2 + $0x184] ss:$16 sps:$4 sm:$0xff]   ;;  %v2255_v53 = vld [vmem:[%s3230_s2 + $0x8c] ss:$16 sps:$4 sm:$0xff]   ;;  %v2271_v2 = vld [vmem:[%s3230_s2 + $0x148] ss:$16 sps:$4 sm:$0xff]  }
  0xa9   : > { %283 = vadd.xlane.f32.xlu1 %v282_v56  ;;  %v280_v57 = vmul.f32 %v2669_v54, %v2669_v54  ;;  %v281_v58 = vmul.f32 %v2672_v55, %v2672_v55  ;;  %1192 = vmatpush1.bf16.msra.mxu0 %v2216_v3  ;;  %v2256_v56 = vld [vmem:[%s3230_s2 + $0xa8] ss:$16 sps:$4 sm:$0xff]   ;;  %v2276_v3 = vld [vmem:[%s3230_s2 + $0x16c] ss:$16 sps:$4 sm:$0xff]  }
  0xaa   : > { %723 = vmatprep.subr.bf16.mxu1 %v2217_v4  ;;  %1193 = vmatprep.subr.bf16.mxu0 %v2220_v6  ;;  %v2274_v4 = vld [vmem:[%s3230_s2 + $0x168] ss:$16 sps:$4 sm:$0xff]  }
  0xab   : > { %v285_v59 = vadd.f32 %v281_v58, %v280_v57  ;;  %724 = vmatpush1.bf16.msra.mxu1 %v2219_v5  ;;  %v2261_v57 = vld [vmem:[%s3230_s2 + $0xcc] ss:$16 sps:$4 sm:$0xff]   ;;  %v2259_v58 = vld [vmem:[%s3230_s2 + $0xc8] ss:$16 sps:$4 sm:$0xff]  }
  0xac   : > { %725 = vmatprep.subr.bf16.mxu1 %v2223_v8  ;;  %v2279_v5 = vld [vmem:[%s3230_s2 + $0x18c] ss:$16 sps:$4 sm:$0xff]   ;;  %v2277_v6 = vld [vmem:[%s3230_s2 + $0x188] ss:$16 sps:$4 sm:$0xff]  }
  0xad   : > { %286 = vadd.xlane.f32.xlu1 %v285_v59  ;;  %1194 = vmatpush1.bf16.msra.mxu0 %v2222_v7  ;;  %v2264_v59 = vld [vmem:[%s3230_s2 + $0xec] ss:$16 sps:$4 sm:$0xff]   ;;  %v2280_v8 = vld [vmem:[%s3230_s2 + $0x1a8] ss:$16 sps:$4 sm:$0xff]  }
  0xae   : > { %1195 = vmatprep.subr.bf16.mxu0 %v2226_v9  ;;  %v2282_v7 = vld [vmem:[%s3230_s2 + $0x1ac] ss:$16 sps:$4 sm:$0xff]  }
  0xaf   : > { %726 = vmatpush1.bf16.msra.mxu1 %v2225_v10  ;;  %v2285_v9 = vld [vmem:[%s3230_s2 + $0x1cc] ss:$16 sps:$4 sm:$0xff]   ;;  %v2283_v10 = vld [vmem:[%s3230_s2 + $0x1c8] ss:$16 sps:$4 sm:$0xff]  }
  0xb0   : > { %727 = vmatprep.subr.bf16.mxu1 %v2229_v12  ;;  %v2286_v12 = vld [vmem:[%s3230_s2 + $0x1e8] ss:$16 sps:$4 sm:$0xff]  }
  0xb1   : > { %1196 = vmatpush1.bf16.msra.mxu0 %v2228_v11  ;;  %v2288_v11 = vld [vmem:[%s3230_s2 + $0x1ec] ss:$16 sps:$4 sm:$0xff]  }
  0xb2   : > { %1197 = vmatprep.subr.bf16.mxu0 %v2232_v13  ;;  %v2291_v13 = vld [vmem:[%s3231_s3 + $0xc] ss:$16 sps:$4 sm:$0xff]  }
  0xb3   : > { %728 = vmatpush1.bf16.msra.mxu1 %v2231_v14  ;;  %v2289_v14 = vld [vmem:[%s3231_s3 + $0x8] ss:$16 sps:$4 sm:$0xff]  }
  0xb4   : > { %729 = vmatprep.subr.bf16.mxu1 %v2235_v16  ;;  %v2292_v16 = vld [vmem:[%s3231_s3 + $0x28] ss:$16 sps:$4 sm:$0xff]  }
  0xb5   : > { %1198 = vmatpush1.bf16.msra.mxu0 %v2234_v15  ;;  %v2294_v15 = vld [vmem:[%s3231_s3 + $0x2c] ss:$16 sps:$4 sm:$0xff]  }
  0xb6   : > { %1199 = vmatprep.subr.bf16.mxu0 %v2238_v17  ;;  %v2297_v17 = vld [vmem:[%s3231_s3 + $0x4c] ss:$16 sps:$4 sm:$0xff]  }
  0xb7   : > { %730 = vmatpush1.bf16.msra.mxu1 %v2237_v18  ;;  %v2295_v18 = vld [vmem:[%s3231_s3 + $0x48] ss:$16 sps:$4 sm:$0xff]  }
  0xb8   : > { %742 = vmatprep.subr.bf16.mxu1 %v2243_v20  ;;  %v2298_v20 = vld [vmem:[%s3231_s3 + $0x68] ss:$16 sps:$4 sm:$0xff]  }
  0xb9   : > { %1200 = vmatpush1.bf16.msra.mxu0 %v2240_v19  ;;  %v2300_v19 = vld [vmem:[%s3231_s3 + $0x6c] ss:$16 sps:$4 sm:$0xff]  }
 0x136   : > { %v284_v21 = vpop.xlane.xlu1 %283 }
 0x137   : > { %v288_v22 = vmul.f32 0.00390625, %v284_v21  ;;  %v2303_v21 = vld [vmem:[%s3231_s3 + $0x8c] ss:$16 sps:$4 sm:$0xff]  }
 0x139   : > { %v290_v23 = vadd.f32 1e-05, %v288_v22  ;;  %v2301_v22 = vld [vmem:[%s3231_s3 + $0x88] ss:$16 sps:$4 sm:$0xff]  }
 0x13a   : > { %v287_v24 = vpop.xlane.xlu1 %286 }
 0x13b   : > { %2433 = vrsqrt.f32 %v290_v23  ;;  %v289_v25 = vmul.f32 0.00390625, %v287_v24  ;;  %v2306_v23 = vld [vmem:[%s3231_s3 + $0xac] ss:$16 sps:$4 sm:$0xff]   ;;  %v2304_v24 = vld [vmem:[%s3231_s3 + $0xa8] ss:$16 sps:$4 sm:$0xff]  }
 0x13d   : > { %v291_v27 = vadd.f32 1e-05, %v289_v25  ;;  %v2309_v25 = vld [vmem:[%s3231_s3 + $0xcc] ss:$16 sps:$4 sm:$0xff]  }
 0x13f   : > { %2435 = vrsqrt.f32 %v291_v27  ;;  %v2312_v27 = vld [vmem:[%s3231_s3 + $0xec] ss:$16 sps:$4 sm:$0xff]  }
 0x145   : > { %v2434_v31 = vpop.eup %2433 }
 0x146   : > { %v295_v33 = vmul.f32 %v2434_v31, %v2662_v49  ;;  %v294_v35 = vmul.f32 %v2434_v31, %v2659_v48  ;;  %v2244_v48 = vld [vmem:[%s3230_s2 + $0x28] ss:$16 sps:$4 sm:$0xff]   ;;  %v2249_v49 = vld [vmem:[%s3230_s2 + $0x4c] ss:$16 sps:$4 sm:$0xff]  }
 0x147   : > { %v2310_v31 = vld [vmem:[%s3231_s3 + $0xe8] ss:$16 sps:$4 sm:$0xff]  }
 0x148   : > { %v310_v40 = vmul.f32 %v306_v34, %v295_v33  ;;  %v309_v42 = vmul.f32 %v302_v36, %v294_v35  ;;  %v2313_v33 = vld [vmem:[%s3231_s3 + $0x108] ss:$16 sps:$4 sm:$0xff]  }
 0x149   : > { %v2436_v37 = vpop.eup %2435  ;;  %v2316_v35 = vld [vmem:[%s3231_s3 + $0x128] ss:$16 sps:$4 sm:$0xff]  }
 0x14a   : > { %v297_v38 = vmul.f32 %v2436_v37, %v2672_v55  ;;  %v296_v39 = vmul.f32 %v2436_v37, %v2669_v54  ;;  %v2253_v54 = vld [vmem:[%s3230_s2 + $0x88] ss:$16 sps:$4 sm:$0xff]   ;;  %v2258_v55 = vld [vmem:[%s3230_s2 + $0xac] ss:$16 sps:$4 sm:$0xff]  }
 0x14b   : > { %v2319_v37 = vld [vmem:[%s3231_s3 + $0x148] ss:$16 sps:$4 sm:$0xff]  }
 0x14c   : > { %v312_v41 = vmul.f32 %v306_v34, %v297_v38  ;;  %v311_v43 = vmul.f32 %v302_v36, %v296_v39  ;;  %v2318_v34 = vld [vmem:[%s3231_s3 + $0x12c] ss:$16 sps:$4 sm:$0xff]   ;;  %v2322_v39 = vld [vmem:[%s3231_s3 + $0x168] ss:$16 sps:$4 sm:$0xff]  }
 0x14d   : > { %v2321_v36 = vld [vmem:[%s3231_s3 + $0x14c] ss:$16 sps:$4 sm:$0xff]  }
 0x14e   : > { %v2768_v44 = vpack.c.bf16 %v312_v41, %v310_v40  ;;  %v2773_v46 = vpack.c.bf16 %v311_v43, %v309_v42  ;;  %v2324_v38 = vld [vmem:[%s3231_s3 + $0x16c] ss:$16 sps:$4 sm:$0xff]   ;;  %v2325_v41 = vld [vmem:[%s3231_s3 + $0x188] ss:$16 sps:$4 sm:$0xff]  }
 0x14f   : > { %v2327_v40 = vld [vmem:[%s3231_s3 + $0x18c] ss:$16 sps:$4 sm:$0xff]   ;;  %v2328_v43 = vld [vmem:[%s3231_s3 + $0x1a8] ss:$16 sps:$4 sm:$0xff]  }
 0x150   : > { %731 = vmatprep.mubr.bf16.mxu1 %v2768_v44  ;;  %1201 = vmatprep.mubr.bf16.mxu0 %v2768_v44  ;;  %v2330_v42 = vld [vmem:[%s3231_s3 + $0x1ac] ss:$16 sps:$4 sm:$0xff]  }
 0x151   : > { %732 = vmatmul.mubr.bf16.vlgmr.msra.gmra.mrb[0].mxu1 %v2773_v46  ;;  %1202 = vmatmul.mubr.bf16.vlgmr.msra.gmra.mrb[0].mxu0 %v2773_v46 }
 0x152   : > { %743 = vmatpush1.bf16.msra.mxu1 %v2241_v45  ;;  %774 = vmatprep.mubr.bf16.mxu1 %v2768_v44  ;;  %v2331_v45 = vld [vmem:[%s3231_s3 + $0x1c8] ss:$16 sps:$4 sm:$0xff]  }
 0x153   : > { %744 = vmatprep.subr.bf16.mxu1 %v2246_v47  ;;  %v2336_v47 = vld [vmem:[%s3231_s3 + $0x1ec] ss:$16 sps:$4 sm:$0xff]  }
 0x156   : > { %745 = vmatpush1.bf16.msra.mxu1 %v2244_v48  ;;  %v2334_v48 = vld [vmem:[%s3231_s3 + $0x1e8] ss:$16 sps:$4 sm:$0xff]  }
 0x157   : > { %746 = vmatprep.subr.bf16.mxu1 %v2249_v49 }
 0x15a   : > { %747 = vmatpush1.bf16.msra.mxu1 %v2247_v50 }
 0x15b   : > { %748 = vmatprep.subr.bf16.mxu1 %v2252_v51 }
 0x15e   : > { %749 = vmatpush1.bf16.msra.mxu1 %v2250_v52 }
 0x15f   : > { %750 = vmatprep.subr.bf16.mxu1 %v2255_v53 }
 0x162   : > { %751 = vmatpush1.bf16.msra.mxu1 %v2253_v54 }
 0x163   : > { %752 = vmatprep.subr.bf16.mxu1 %v2258_v55 }
 0x166   : > { %753 = vmatpush1.bf16.msra.mxu1 %v2256_v56 }
 0x167   : > { %754 = vmatprep.subr.bf16.mxu1 %v2261_v57 }
 0x16a   : > { %755 = vmatpush1.bf16.msra.mxu1 %v2259_v58 }
 0x16b   : > { %756 = vmatprep.subr.bf16.mxu1 %v2264_v59 }
 0x16e   : > { %757 = vmatpush1.bf16.msra.mxu1 %v2262_v60 }
 0x16f   : > { %758 = vmatprep.subr.bf16.mxu1 %v2267_v61 }
 0x172   : > { %759 = vmatpush1.bf16.msra.mxu1 %v2265_v62 }
 0x173   : > { %760 = vmatprep.subr.bf16.mxu1 %v2270_v63 }
 0x176   : > { %761 = vmatpush1.bf16.msra.mxu1 %v2268_v0 }
 0x177   : > { %762 = vmatprep.subr.bf16.mxu1 %v2273_v1 }
 0x17a   : > { %763 = vmatpush1.bf16.msra.mxu1 %v2271_v2 }
 0x17b   : > { %764 = vmatprep.subr.bf16.mxu1 %v2276_v3 }
 0x17e   : > { %765 = vmatpush1.bf16.msra.mxu1 %v2274_v4 }
 0x17f   : > { %766 = vmatprep.subr.bf16.mxu1 %v2279_v5 }
 0x182   : > { %767 = vmatpush1.bf16.msra.mxu1 %v2277_v6 }
 0x183   : > { %768 = vmatprep.subr.bf16.mxu1 %v2282_v7 }
 0x186   : > { %769 = vmatpush1.bf16.msra.mxu1 %v2280_v8 }
 0x187   : > { %770 = vmatprep.subr.bf16.mxu1 %v2285_v9 }
 0x18a   : > { %771 = vmatpush1.bf16.msra.mxu1 %v2283_v10 }
 0x18b   : > { %772 = vmatprep.subr.bf16.mxu1 %v2288_v11 }
 0x18e   : > { %773 = vmatpush1.bf16.msra.mxu1 %v2286_v12 }
 0x18f   : > { %1212 = vmatprep.subr.bf16.mxu1 %v2291_v13 }
 0x191   : > { %775 = vmatmul.mubr.bf16.vlgmr.msra.gmra.mrb[4].mxu1 %v2773_v46 }
 0x192   : > { %1213 = vmatpush1.bf16.msra.mxu1 %v2289_v14  ;;  %1244 = vmatprep.mubr.bf16.mxu1 %v2768_v44  ;;  %v2333_v44 = vld [vmem:[%s3231_s3 + $0x1cc] ss:$16 sps:$4 sm:$0xff]  }
 0x193   : > { %1214 = vmatprep.subr.bf16.mxu1 %v2294_v15 }
 0x196   : > { %1215 = vmatpush1.bf16.msra.mxu1 %v2292_v16 }
 0x197   : > { %1216 = vmatprep.subr.bf16.mxu1 %v2297_v17 }
 0x19a   : > { %1217 = vmatpush1.bf16.msra.mxu1 %v2295_v18 }
 0x19b   : > { %1218 = vmatprep.subr.bf16.mxu1 %v2300_v19 }
 0x19e   : > { %1219 = vmatpush1.bf16.msra.mxu1 %v2298_v20 }
 0x19f   : > { %1220 = vmatprep.subr.bf16.mxu1 %v2303_v21 }
 0x1a2   : > { %1221 = vmatpush1.bf16.msra.mxu1 %v2301_v22 }
 0x1a3   : > { %1222 = vmatprep.subr.bf16.mxu1 %v2306_v23 }
 0x1a6   : > { %1223 = vmatpush1.bf16.msra.mxu1 %v2304_v24 }
 0x1a7   : > { %1224 = vmatprep.subr.bf16.mxu1 %v2309_v25 }
 0x1aa   : > { %1225 = vmatpush1.bf16.msra.mxu1 %v2307_v26 }
 0x1ab   : > { %1226 = vmatprep.subr.bf16.mxu1 %v2312_v27 }
 0x1ae   : > { %1227 = vmatpush1.bf16.msra.mxu1 %v2310_v31 }
 0x1af   : > { %1228 = vmatprep.subr.bf16.mxu1 %v2315_v32 }
 0x1b2   : > { %1229 = vmatpush1.bf16.msra.mxu1 %v2313_v33 }
 0x1b3   : > { %1230 = vmatprep.subr.bf16.mxu1 %v2318_v34 }
 0x1b6   : > { %1231 = vmatpush1.bf16.msra.mxu1 %v2316_v35 }
 0x1b7   : > { %1232 = vmatprep.subr.bf16.mxu1 %v2321_v36 }
 0x1ba   : > { %1233 = vmatpush1.bf16.msra.mxu1 %v2319_v37 }
 0x1bb   : > { %1234 = vmatprep.subr.bf16.mxu1 %v2324_v38 }
 0x1be   : > { %1235 = vmatpush1.bf16.msra.mxu1 %v2322_v39 }
 0x1bf   : > { %1236 = vmatprep.subr.bf16.mxu1 %v2327_v40 }
 0x1c2   : > { %1237 = vmatpush1.bf16.msra.mxu1 %v2325_v41 }
 0x1c3   : > { %1238 = vmatprep.subr.bf16.mxu1 %v2330_v42 }
 0x1c6   : > { %1239 = vmatpush1.bf16.msra.mxu1 %v2328_v43 }
 0x1c7   : > { %1240 = vmatprep.subr.bf16.mxu1 %v2333_v44 }
 0x1ca   : > { %1241 = vmatpush1.bf16.msra.mxu1 %v2331_v45 }
 0x1cb   : > { %1242 = vmatprep.subr.bf16.mxu1 %v2336_v47 }
 0x1ce   : > { %1243 = vmatpush1.bf16.msra.mxu1 %v2334_v48 }
 0x1d1   : > { %1245 = vmatmul.mubr.bf16.vlgmr.msra.gmra.mrb[8].mxu1 %v2773_v46 }
 0x224   : > { %v733_v49 = vpop.f32.mrb[0].mxu1  ;;  %v1203_v50 = vpop.f32.mrb[0].mxu0 }
 0x225   : > { %v1263_v51 = vmul.f32 0.70710677, %v733_v49  ;;  %v735_v52 = vpop.f32.mrb[1].mxu1  ;;  %v1205_v53 = vpop.f32.mrb[1].mxu0  ;;  %v1255_v63 = vmul.f32 0.5, %v733_v49 }
 0x226   : > { %v1264_v54 = vmul.f32 0.70710677, %v735_v52  ;;  %v737_v55 = vpop.f32.mrb[2].mxu1  ;;  %v1207_v56 = vpop.f32.mrb[2].mxu0  ;;  %v1256_v1 = vmul.f32 0.5, %v735_v52 }
 0x227   : > { %2437 = verf.f32 %v1263_v51  ;;  %v1267_v57 = vmul.f32 0.70710677, %v737_v55  ;;  %v739_v58 = vpop.f32.mrb[3].mxu1  ;;  %v1209_v59 = vpop.f32.mrb[3].mxu0  ;;  %v1259_v5 = vmul.f32 0.5, %v737_v55 }
 0x228   : > { %2439 = verf.f32 %v1264_v54  ;;  %v1268_v60 = vmul.f32 0.70710677, %v739_v58  ;;  %v1260_v8 = vmul.f32 0.5, %v739_v58  ;;  %v2337_v58 = vld [vmem:[%s3233_s5] ss:$8 sps:$4 sm:$0xff]  }
 0x229   : > { %2441 = verf.f32 %v1267_v57 }
 0x22a   : > { %2443 = verf.f32 %v1268_v60  ;;  %v2342_v60 = vld [vmem:[%s3233_s5 + $0x14] ss:$8 sps:$4 sm:$0xff]  }
 0x231   : > { %v2438_v61 = vpop.eup %2437 }
 0x232   : > { %v2440_v62 = vpop.eup %2439  ;;  %v1279_v46 = vadd.f32 1.0, %v2438_v61  ;;  %v2340_v61 = vld [vmem:[%s3233_s5 + $0x10] ss:$8 sps:$4 sm:$0xff]  }
 0x233   : > { %v2442_v0 = vpop.eup %2441  ;;  %v1280_v2 = vadd.f32 1.0, %v2440_v62  ;;  %v2345_v62 = vld [vmem:[%s3233_s5 + $0x24] ss:$8 sps:$4 sm:$0xff]  }
 0x234   : > { %v2444_v3 = vpop.eup %2443  ;;  %v1287_v4 = vmul.f32 %v1279_v46, %v1255_v63  ;;  %v1283_v6 = vadd.f32 1.0, %v2442_v0  ;;  %v2343_v63 = vld [vmem:[%s3233_s5 + $0x20] ss:$8 sps:$4 sm:$0xff]   ;;  %v2348_v46 = vld [vmem:[%s3233_s5 + $0x34] ss:$8 sps:$4 sm:$0xff]  }
 0x235   : > { %v1288_v7 = vmul.f32 %v1280_v2, %v1256_v1  ;;  %v1284_v9 = vadd.f32 1.0, %v2444_v3  ;;  %v2346_v0 = vld [vmem:[%s3233_s5 + $0x30] ss:$8 sps:$4 sm:$0xff]   ;;  %v2351_v1 = vld [vmem:[%s3233_s5 + $0x44] ss:$8 sps:$4 sm:$0xff]  }
 0x236   : > { %v2969_v10 = vmul.f32 %v1287_v4, %v1203_v50  ;;  %v1291_v11 = vmul.f32 %v1283_v6, %v1259_v5  ;;  %v2349_v2 = vld [vmem:[%s3233_s5 + $0x40] ss:$8 sps:$4 sm:$0xff]   ;;  %v2354_v3 = vld [vmem:[%s3233_s5 + $0x54] ss:$8 sps:$4 sm:$0xff]   ;;  %v2352_v4 = vld [vmem:[%s3233_s5 + $0x50] ss:$8 sps:$4 sm:$0xff]  }
 0x237   : > { %v2971_v12 = vmul.f32 %v1288_v7, %v1205_v53  ;;  %v1292_v13 = vmul.f32 %v1284_v9, %v1260_v8  ;;  %v2357_v5 = vld [vmem:[%s3233_s5 + $0x64] ss:$8 sps:$4 sm:$0xff]   ;;  %v2355_v6 = vld [vmem:[%s3233_s5 + $0x60] ss:$8 sps:$4 sm:$0xff]   ;;  %v2360_v7 = vld [vmem:[%s3233_s5 + $0x74] ss:$8 sps:$4 sm:$0xff]  }
 0x238   : > { %v2973_v14 = vmul.f32 %v1291_v11, %v1207_v56  ;;  %v2358_v8 = vld [vmem:[%s3233_s5 + $0x70] ss:$8 sps:$4 sm:$0xff]   ;;  %v2363_v9 = vld [vmem:[%s3233_s5 + $0x84] ss:$8 sps:$4 sm:$0xff]   ;;  %v2361_v11 = vld [vmem:[%s3233_s5 + $0x80] ss:$8 sps:$4 sm:$0xff]  }
 0x239   : > { %v2975_v15 = vmul.f32 %v1292_v13, %v1209_v59  ;;  %v1304_v42 = vadd.f32 %v2971_v12, %v2969_v10  ;;  %v2339_v59 = vld [vmem:[%s3233_s5 + $0x4] ss:$8 sps:$4 sm:$0xff]   ;;  %v2366_v13 = vld [vmem:[%s3233_s5 + $0x94] ss:$8 sps:$4 sm:$0xff]  }
 0x23a   : > { %1774 = vmatprep.subr.bf16.mxu0 %v2339_v59 }
 0x23b   : > { %v1309_v50 = vadd.f32 %v2975_v15, %v2973_v14  ;;  %1775 = vmatpush1.bf16.msra.mxu0 %v2337_v58 }
 0x23c   : > { %1776 = vmatprep.subr.bf16.mxu0 %v2342_v60 }
 0x23f   : > { %1777 = vmatpush1.bf16.msra.mxu0 %v2340_v61 }
 0x240   : > { %1778 = vmatprep.subr.bf16.mxu0 %v2345_v62  ;;  %v1368_v62 = vsub.s32 2, %v2753_v28 }
 0x243   : > { %1779 = vmatpush1.bf16.msra.mxu0 %v2343_v63  ;;  %v1303_v63 = vld [vmem:[%s3232_s4] sm:$0xf] }
 0x244   : > { %1780 = vmatprep.subr.bf16.mxu0 %v2348_v46  ;;  %v1372_v46 = vsub.s32 3, %v2753_v28 }
 0x247   : > { %1781 = vmatpush1.bf16.msra.mxu0 %v2346_v0 }
 0x248   : > { %1782 = vmatprep.subr.bf16.mxu0 %v2351_v1  ;;  %v1365_v1 = vrot.slane %v1303_v63, %v305_v29 }
 0x24b   : > { %1783 = vmatpush1.bf16.msra.mxu0 %v2349_v2  ;;  %v1369_v2 = vrot.slane %v1303_v63, %v1368_v62  ;;  %v2458_v62 = vld [vmem:[%s2520_s27 + $0x8] sm:$0xff] }
 0x24c   : > { %1784 = vmatprep.subr.bf16.mxu0 %v2354_v3 }
 0x24f   : > { %1785 = vmatpush1.bf16.msra.mxu0 %v2352_v4 }
 0x250   : > { %1786 = vmatprep.subr.bf16.mxu0 %v2357_v5  ;;  %v1361_v5 = vrot.slane %v1303_v63, %v301_v30  ;;  %v2385_v30 = vld [vmem:[%s3233_s5 + $0x100] ss:$8 sps:$4 sm:$0xff]  }
 0x253   : > { %1787 = vmatpush1.bf16.msra.mxu0 %v2355_v6 }
 0x254   : > { %1788 = vmatprep.subr.bf16.mxu0 %v2360_v7 }
 0x257   : > { %1789 = vmatpush1.bf16.msra.mxu0 %v2358_v8 }
 0x258   : > { %1790 = vmatprep.subr.bf16.mxu0 %v2363_v9 }
 0x25b   : > { %1791 = vmatpush1.bf16.msra.mxu0 %v2361_v11 }
 0x25c   : > { %1792 = vmatprep.subr.bf16.mxu0 %v2366_v13  ;;  %v1373_v13 = vrot.slane %v1303_v63, %v1372_v46 }
 0x264   : > { %v776_v16 = vpop.f32.mrb[4].mxu1 }
 0x265   : > { %v778_v17 = vpop.f32.mrb[5].mxu1  ;;  %v1265_v20 = vmul.f32 0.70710677, %v776_v16  ;;  %v1257_v33 = vmul.f32 0.5, %v776_v16  ;;  %v2364_v16 = vld [vmem:[%s3233_s5 + $0x90] ss:$8 sps:$4 sm:$0xff]  }
 0x266   : > { %v780_v18 = vpop.f32.mrb[6].mxu1  ;;  %v1266_v21 = vmul.f32 0.70710677, %v778_v17  ;;  %v1258_v35 = vmul.f32 0.5, %v778_v17  ;;  %v2369_v17 = vld [vmem:[%s3233_s5 + $0xa4] ss:$8 sps:$4 sm:$0xff]   ;;  %1793 = vmatpush1.bf16.msra.mxu0 %v2364_v16 }
 0x267   : > { %v782_v19 = vpop.f32.mrb[7].mxu1  ;;  %v1269_v22 = vmul.f32 0.70710677, %v780_v18  ;;  %2445 = verf.f32 %v1265_v20  ;;  %v1261_v37 = vmul.f32 0.5, %v780_v18  ;;  %v2367_v18 = vld [vmem:[%s3233_s5 + $0xa0] ss:$8 sps:$4 sm:$0xff]   ;;  %1794 = vmatprep.subr.bf16.mxu0 %v2369_v17 }
 0x268   : > { %v1270_v23 = vmul.f32 0.70710677, %v782_v19  ;;  %2447 = verf.f32 %v1266_v21  ;;  %v1262_v39 = vmul.f32 0.5, %v782_v19 }
 0x269   : > { %2449 = verf.f32 %v1269_v22 }
 0x26a   : > { %2451 = verf.f32 %v1270_v23  ;;  %1795 = vmatpush1.bf16.msra.mxu0 %v2367_v18 }
 0x271   : > { %v2446_v24 = vpop.eup %2445 }
 0x272   : > { %v2448_v25 = vpop.eup %2447  ;;  %v1281_v31 = vadd.f32 1.0, %v2446_v24 }
 0x273   : > { %v2450_v26 = vpop.eup %2449  ;;  %v1282_v32 = vadd.f32 1.0, %v2448_v25 }
 0x274   : > { %v2452_v27 = vpop.eup %2451  ;;  %v1285_v34 = vadd.f32 1.0, %v2450_v26  ;;  %v1289_v38 = vmul.f32 %v1281_v31, %v1257_v33 }
 0x275   : > { %v1286_v36 = vadd.f32 1.0, %v2452_v27  ;;  %v1290_v41 = vmul.f32 %v1282_v32, %v1258_v35 }
 0x276   : > { %v1293_v45 = vmul.f32 %v1285_v34, %v1261_v37 }
 0x277   : > { %v1294_v49 = vmul.f32 %v1286_v36, %v1262_v39 }
 0x2a4   : > { %v1246_v40 = vpop.f32.mrb[8].mxu1 }
 0x2a5   : > { %v2979_v43 = vmul.f32 %v1289_v38, %v1246_v40  ;;  %v1248_v44 = vpop.f32.mrb[9].mxu1 }
 0x2a6   : > { %v2981_v47 = vmul.f32 %v1290_v41, %v1248_v44  ;;  %v1250_v48 = vpop.f32.mrb[10].mxu1  ;;  %v2372_v44 = vld [vmem:[%s3233_s5 + $0xb4] ss:$8 sps:$4 sm:$0xff]  }
 0x2a7   : > { %v1305_v51 = vadd.f32 %v1304_v42, %v2979_v43  ;;  %v2986_v52 = vmul.f32 %v1293_v45, %v1250_v48  ;;  %v1252_v53 = vpop.f32.mrb[11].mxu1  ;;  %v2370_v45 = vld [vmem:[%s3233_s5 + $0xb0] ss:$8 sps:$4 sm:$0xff]   ;;  %1796 = vmatprep.subr.bf16.mxu0 %v2372_v44  ;;  %v2375_v48 = vld [vmem:[%s3233_s5 + $0xc4] ss:$8 sps:$4 sm:$0xff]  }
 0x2a8   : > { %v2988_v54 = vmul.f32 %v1294_v49, %v1252_v53  ;;  %1797 = vmatpush1.bf16.msra.mxu0 %v2370_v45  ;;  %v2378_v49 = vld [vmem:[%s3233_s5 + $0xd4] ss:$8 sps:$4 sm:$0xff]   ;;  %v2412_v44 = vld [vmem:[%s3233_s5 + $0x190] ss:$8 sps:$4 sm:$0xff]   ;;  %v2417_v45 = vld [vmem:[%s3233_s5 + $0x1a4] ss:$8 sps:$4 sm:$0xff]  }
 0x2a9   : > { %v1310_v55 = vadd.f32 %v1309_v50, %v2986_v52  ;;  %v1306_v56 = vadd.f32 %v1305_v51, %v2981_v47  ;;  %1798 = vmatprep.subr.bf16.mxu0 %v2375_v48  ;;  %v2376_v50 = vld [vmem:[%s3233_s5 + $0xd0] ss:$8 sps:$4 sm:$0xff]   ;;  %v2381_v51 = vld [vmem:[%s3233_s5 + $0xe4] ss:$8 sps:$4 sm:$0xff]   ;;  %v2384_v53 = vld [vmem:[%s3233_s5 + $0xf4] ss:$8 sps:$4 sm:$0xff]  }
 0x2aa   : > { %v2420_v48 = vld [vmem:[%s3233_s5 + $0x1b4] ss:$8 sps:$4 sm:$0xff]  }
 0x2ab   : > { %1307 = vadd.xlane.f32.xlu0 %v1306_v56  ;;  %v1311_v57 = vadd.f32 %v1310_v55, %v2988_v54  ;;  %v2387_v55 = vld [vmem:[%s3233_s5 + $0x104] ss:$8 sps:$4 sm:$0xff]  }
 0x2ad   : > { %1312 = vadd.xlane.f32.xlu1 %v1311_v57 }
 0x338   : > { %v1308_v19 = vpop.xlane.xlu0 %1307 }
 0x339   : > { %v1315_v20 = vmul.f32 0.001953125, %v1308_v19 }
 0x33a   : > { %v1313_v21 = vpop.xlane.xlu1 %1312 }
 0x33b   : > { %v1317_v22 = vsub.f32 %v2969_v10, %v1315_v20  ;;  %v1318_v23 = vsub.f32 %v2971_v12, %v1315_v20  ;;  %v1316_v24 = vmul.f32 0.001953125, %v1313_v21  ;;  %v1319_v25 = vsub.f32 %v2979_v43, %v1315_v20 }
 0x33c   : > { %v3063_v26 = vsub.f32 %v2981_v47, %v1315_v20  ;;  %v2373_v47 = vld [vmem:[%s3233_s5 + $0xc0] ss:$8 sps:$4 sm:$0xff]  }
 0x33d   : > { %v1321_v27 = vsub.f32 %v2973_v14, %v1316_v24  ;;  %v1322_v31 = vsub.f32 %v2975_v15, %v1316_v24  ;;  %v1325_v32 = vmul.f32 %v1317_v22, %v1317_v22  ;;  %v1326_v33 = vmul.f32 %v1318_v23, %v1318_v23  ;;  %1799 = vmatpush1.bf16.msra.mxu0 %v2373_v47  ;;  %v2415_v47 = vld [vmem:[%s3233_s5 + $0x1a0] ss:$8 sps:$4 sm:$0xff]  }
 0x33e   : > { %v1327_v34 = vmul.f32 %v1319_v25, %v1319_v25  ;;  %v1323_v35 = vsub.f32 %v2986_v52, %v1316_v24  ;;  %v1324_v10 = vsub.f32 %v2988_v54, %v1316_v24  ;;  %v1328_v38 = vmul.f32 %v3063_v26, %v3063_v26  ;;  %1800 = vmatprep.subr.bf16.mxu0 %v2378_v49  ;;  %v2379_v52 = vld [vmem:[%s3233_s5 + $0xe0] ss:$8 sps:$4 sm:$0xff]   ;;  %v2382_v54 = vld [vmem:[%s3233_s5 + $0xf0] ss:$8 sps:$4 sm:$0xff]  }
 0x33f   : > { %v1333_v36 = vadd.f32 %v1326_v33, %v1325_v32  ;;  %v1329_v37 = vmul.f32 %v1321_v27, %v1321_v27  ;;  %v1330_v12 = vmul.f32 %v1322_v31, %v1322_v31  ;;  %v2388_v32 = vld [vmem:[%s3233_s5 + $0x110] ss:$8 sps:$4 sm:$0xff]   ;;  %v2393_v33 = vld [vmem:[%s3233_s5 + $0x124] ss:$8 sps:$4 sm:$0xff]  }
 0x340   : > { %v1331_v40 = vmul.f32 %v1323_v35, %v1323_v35  ;;  %v1332_v14 = vmul.f32 %v1324_v10, %v1324_v10  ;;  %v2418_v49 = vld [vmem:[%s3233_s5 + $0x1b0] ss:$8 sps:$4 sm:$0xff]  }
 0x341   : > { %v1334_v39 = vadd.f32 %v1333_v36, %v1327_v34  ;;  %v1338_v41 = vadd.f32 %v1330_v12, %v1329_v37  ;;  %1801 = vmatpush1.bf16.msra.mxu0 %v2376_v50  ;;  %v2391_v34 = vld [vmem:[%s3233_s5 + $0x120] ss:$8 sps:$4 sm:$0xff]   ;;  %v2394_v36 = vld [vmem:[%s3233_s5 + $0x130] ss:$8 sps:$4 sm:$0xff]   ;;  %v2402_v12 = vld [vmem:[%s3233_s5 + $0x154] ss:$8 sps:$4 sm:$0xff]  }
 0x342   : > { %1802 = vmatprep.subr.bf16.mxu0 %v2381_v51  ;;  %v2397_v37 = vld [vmem:[%s3233_s5 + $0x140] ss:$8 sps:$4 sm:$0xff]   ;;  %v2423_v50 = vld [vmem:[%s3233_s5 + $0x1c4] ss:$8 sps:$4 sm:$0xff]  }
 0x343   : > { %v1335_v42 = vadd.f32 %v1334_v39, %v1328_v38  ;;  %v1339_v43 = vadd.f32 %v1338_v41, %v1331_v40  ;;  %v2400_v38 = vld [vmem:[%s3233_s5 + $0x150] ss:$8 sps:$4 sm:$0xff]   ;;  %v2405_v39 = vld [vmem:[%s3233_s5 + $0x164] ss:$8 sps:$4 sm:$0xff]   ;;  %v2403_v40 = vld [vmem:[%s3233_s5 + $0x160] ss:$8 sps:$4 sm:$0xff]  }
 0x344   : > { %v2408_v41 = vld [vmem:[%s3233_s5 + $0x174] ss:$8 sps:$4 sm:$0xff]   ;;  %v2421_v51 = vld [vmem:[%s3233_s5 + $0x1c0] ss:$8 sps:$4 sm:$0xff]  }
 0x345   : > { %1336 = vadd.xlane.f32.xlu0 %v1335_v42  ;;  %v1340_v15 = vadd.f32 %v1339_v43, %v1332_v14  ;;  %1803 = vmatpush1.bf16.msra.mxu0 %v2379_v52  ;;  %v2406_v42 = vld [vmem:[%s3233_s5 + $0x170] ss:$8 sps:$4 sm:$0xff]   ;;  %v2411_v14 = vld [vmem:[%s3233_s5 + $0x184] ss:$8 sps:$4 sm:$0xff]   ;;  %v2409_v43 = vld [vmem:[%s3233_s5 + $0x180] ss:$8 sps:$4 sm:$0xff]  }
 0x346   : > { %1804 = vmatprep.subr.bf16.mxu0 %v2384_v53  ;;  %v2426_v52 = vld [vmem:[%s3233_s5 + $0x1d4] ss:$8 sps:$4 sm:$0xff]   ;;  %v2424_v53 = vld [vmem:[%s3233_s5 + $0x1d0] ss:$8 sps:$4 sm:$0xff]  }
 0x347   : > { %1341 = vadd.xlane.f32.xlu1 %v1340_v15  ;;  %v2414_v15 = vld [vmem:[%s3233_s5 + $0x194] ss:$8 sps:$4 sm:$0xff]  }
 0x349   : > { %1805 = vmatpush1.bf16.msra.mxu0 %v2382_v54  ;;  %v2429_v54 = vld [vmem:[%s3233_s5 + $0x1e4] ss:$8 sps:$4 sm:$0xff]  }
 0x34a   : > { %1817 = vmatprep.subr.bf16.mxu0 %v2387_v55  ;;  %v2427_v55 = vld [vmem:[%s3233_s5 + $0x1e0] ss:$8 sps:$4 sm:$0xff]  }
 0x3d2   : > { %v1337_v56 = vpop.xlane.xlu0 %1336 }
 0x3d3   : > { %v1343_v57 = vmul.f32 0.001953125, %v1337_v56  ;;  %v2432_v56 = vld [vmem:[%s3233_s5 + $0x1f4] ss:$8 sps:$4 sm:$0xff]  }
 0x3d4   : > { %v1342_v58 = vpop.xlane.xlu1 %1341 }
 0x3d5   : > { %v1345_v59 = vadd.f32 1e-05, %v1343_v57  ;;  %v1344_v60 = vmul.f32 0.001953125, %v1342_v58  ;;  %v2430_v57 = vld [vmem:[%s3233_s5 + $0x1f0] ss:$8 sps:$4 sm:$0xff]  }
 0x3d7   : > { %2453 = vrsqrt.f32 %v1345_v59  ;;  %v1346_v61 = vadd.f32 1e-05, %v1344_v60  ;;  %v2457_v59 = vld [vmem:[%s2520_s27] sm:$0xff] }
 0x3d9   : > { %2455 = vrsqrt.f32 %v1346_v61 }
 0x3e1   : > { %v2454_v0 = vpop.eup %2453 }
 0x3e2   : > { %v1350_v3 = vmul.f32 %v2454_v0, %v1318_v23  ;;  %v1349_v4 = vmul.f32 %v2454_v0, %v1317_v22  ;;  %v1351_v6 = vmul.f32 %v2454_v0, %v1319_v25  ;;  %v1352_v11 = vmul.f32 %v2454_v0, %v3063_v26  ;;  %v2390_v26 = vld [vmem:[%s3233_s5 + $0x114] ss:$8 sps:$4 sm:$0xff]  }
 0x3e3   : > { %v2456_v7 = vpop.eup %2455  ;;  %v2459_v0 = vld [vmem:[%s2520_s27 + $0x10] sm:$0xff] }
 0x3e4   : > { %v1354_v8 = vmul.f32 %v2456_v7, %v1322_v31  ;;  %v1353_v9 = vmul.f32 %v2456_v7, %v1321_v27  ;;  %v1356_v16 = vmul.f32 %v2456_v7, %v1324_v10  ;;  %v1355_v17 = vmul.f32 %v2456_v7, %v1323_v35  ;;  %v2396_v35 = vld [vmem:[%s3233_s5 + $0x134] ss:$8 sps:$4 sm:$0xff]   ;;  %v2399_v10 = vld [vmem:[%s3233_s5 + $0x144] ss:$8 sps:$4 sm:$0xff]  }
 0x3e5   : > { %v3114_v18 = vmul.f32 %v1369_v2, %v1351_v6  ;;  %v1379_v19 = vmul.f32 %v1365_v1, %v1350_v3  ;;  %v1378_v29 = vmul.f32 %v1361_v5, %v1349_v4  ;;  %v1381_v25 = vmul.f32 %v1373_v13, %v1352_v11  ;;  %v2460_v3 = vld [vmem:[%s2520_s27 + $0x18] sm:$0xff] }
 0x3e6   : > { %v1383_v20 = vmul.f32 %v1365_v1, %v1354_v8  ;;  %v1382_v21 = vmul.f32 %v1361_v5, %v1353_v9  ;;  %v1385_v23 = vmul.f32 %v1373_v13, %v1356_v16  ;;  %v3116_v22 = vmul.f32 %v1369_v2, %v1355_v17 }
 0x3e8   : > { %v1387_v28 = vpack.c.bf16 %v1383_v20, %v1379_v19  ;;  %v1386_v24 = vpack.c.bf16 %v1382_v21, %v1378_v29  ;;  %v1388_v27 = vpack.c.bf16 %v3116_v22, %v3114_v18  ;;  %v1389_v31 = vpack.c.bf16 %v1385_v23, %v1381_v25 }
 0x3ea   : > { %1806 = vmatprep.mubr.bf16.mxu0 %v1387_v28 }
 0x3eb   : > { %1807 = vmatmul.mubr.bf16.vlgmr.msra.gmra.mrb[4].mxu0 %v1386_v24 }
 0x3ec   : > { %1818 = vmatpush1.bf16.msra.mxu0 %v2385_v30  ;;  %1849 = vmatprep.mubr.bf16.mxu0 %v1389_v31 }
 0x3ed   : > { %1819 = vmatprep.subr.bf16.mxu0 %v2390_v26 }
 0x3f0   : > { %1820 = vmatpush1.bf16.msra.mxu0 %v2388_v32 }
 0x3f1   : > { %1821 = vmatprep.subr.bf16.mxu0 %v2393_v33 }
 0x3f4   : > { %1822 = vmatpush1.bf16.msra.mxu0 %v2391_v34 }
 0x3f5   : > { %1823 = vmatprep.subr.bf16.mxu0 %v2396_v35 }
 0x3f8   : > { %1824 = vmatpush1.bf16.msra.mxu0 %v2394_v36 }
 0x3f9   : > { %1825 = vmatprep.subr.bf16.mxu0 %v2399_v10 }
 0x3fc   : > { %1826 = vmatpush1.bf16.msra.mxu0 %v2397_v37 }
 0x3fd   : > { %1827 = vmatprep.subr.bf16.mxu0 %v2402_v12 }
 0x400   : > { %1828 = vmatpush1.bf16.msra.mxu0 %v2400_v38 }
 0x401   : > { %1829 = vmatprep.subr.bf16.mxu0 %v2405_v39 }
 0x404   : > { %1830 = vmatpush1.bf16.msra.mxu0 %v2403_v40 }
 0x405   : > { %1831 = vmatprep.subr.bf16.mxu0 %v2408_v41 }
 0x408   : > { %1832 = vmatpush1.bf16.msra.mxu0 %v2406_v42 }
 0x409   : > { %1833 = vmatprep.subr.bf16.mxu0 %v2411_v14 }
 0x40c   : > { %1834 = vmatpush1.bf16.msra.mxu0 %v2409_v43 }
 0x40d   : > { %1835 = vmatprep.subr.bf16.mxu0 %v2414_v15 }
 0x410   : > { %1836 = vmatpush1.bf16.msra.mxu0 %v2412_v44 }
 0x411   : > { %1837 = vmatprep.subr.bf16.mxu0 %v2417_v45 }
 0x414   : > { %1838 = vmatpush1.bf16.msra.mxu0 %v2415_v47 }
 0x415   : > { %1839 = vmatprep.subr.bf16.mxu0 %v2420_v48 }
 0x418   : > { %1840 = vmatpush1.bf16.msra.mxu0 %v2418_v49 }
 0x419   : > { %1841 = vmatprep.subr.bf16.mxu0 %v2423_v50 }
 0x41c   : > { %1842 = vmatpush1.bf16.msra.mxu0 %v2421_v51 }
 0x41d   : > { %1843 = vmatprep.subr.bf16.mxu0 %v2426_v52 }
 0x420   : > { %1844 = vmatpush1.bf16.msra.mxu0 %v2424_v53 }
 0x421   : > { %1845 = vmatprep.subr.bf16.mxu0 %v2429_v54 }
 0x424   : > { %1846 = vmatpush1.bf16.msra.mxu0 %v2427_v55 }
 0x425   : > { %1847 = vmatprep.subr.bf16.mxu0 %v2432_v56 }
 0x428   : > { %1848 = vmatpush1.bf16.msra.mxu0 %v2430_v57 }
 0x42b   : > { %1850 = vmatmul.mubr.bf16.vlgmr.msra.gmra.mrb[4].mxu0 %v1388_v27 }
 0x4fe   : > { %v1851_v58 = vpop.f32.mrb[4].mxu0 }
 0x4ff   : > { %v2129_v60 = vadd.f32 %v2457_v59, %v1851_v58  ;;  %v1853_v61 = vpop.f32.mrb[5].mxu0 }
 0x500   : > { %v2130_v63 = vadd.f32 %v2458_v62, %v1853_v61  ;;  %v1855_v46 = vpop.f32.mrb[6].mxu0 }
 0x501   : > { %1860 = vst [vmem:[%s258_s14] sm:$0xff] %v2129_v60  ;;  %v2131_v1 = vadd.f32 %v2459_v0, %v1855_v46  ;;  %v1857_v2 = vpop.f32.mrb[7].mxu0 }
 0x502   : > { %1861 = vst [vmem:[%s258_s14 + $0x8] sm:$0xff] %v2130_v63  ;;  %v2132_v4 = vadd.f32 %v2460_v3, %v1857_v2 }
 0x503   : > { %1862 = vst [vmem:[%s258_s14 + $0x10] sm:$0xff] %v2131_v1 }
 0x504   : > { %1863 = vst [vmem:[%s258_s14 + $0x18] sm:$0xff] %v2132_v4 }
 0x505 PF: > { %s16_s21 = sadd.s32 1, %s2467_s21  }
 0x506   : > { %p13_p4 = scmp.ge.s32.totalorder %s16_s21, 4  }
 0x508   :  { %15 = sbr.rel (!%p13_p4) target bundleno = 1 (0x1), region = 74 }

</bundles_post_ra>
